<compile_context>
chip_gen: v7x
topology: tpu7x:2x2x1
jax: 0.10.0
libtpu: 0.0.40
codegen_flags: <defaults>
</compile_context>

<pallas_src>
import functools

import jax
import jax.numpy as jnp
from jax import lax
from jax.experimental import pallas as pl
from jax.experimental.pallas import tpu as pltpu


# ----------------------------------------------------------------------------- #
# small helpers
# ----------------------------------------------------------------------------- #
def _elu(x):
    # F.elu, alpha=1.0 (f32 math)
    return jnp.where(x > 0, x, jnp.exp(jnp.minimum(x, 0.0)) - 1.0)


def _sigmoid(x):
    return 1.0 / (1.0 + jnp.exp(-x))


def _proj_tile(m):
    # Largest tile <= 512 dividing M that still leaves >= 2 grid blocks (v7x has
    # 2 TensorCores); fall back to a single full-M block for tiny inputs.
    for t in (512, 256, 128, 64, 32, 16, 8):
        if t <= m and m % t == 0 and m // t >= 2:
            return t
    return m


# ----------------------------------------------------------------------------- #
# Pallas kernels
# ----------------------------------------------------------------------------- #
def _qkv_proj_kernel(x_ref, w1_ref, b1_ref, w2_ref, b2_ref, wn_ref, bn_ref, o_ref,
                     *, c_tot):
    """Fused q/k/v GatedResNet(k=1) + nin for one pixel tile.

    x_ref : (TM, Ctot)      f32   packed [xq | xk | xk]
    w1    : (Ctot, Ctot)    bf16  block-diag conv1 weights
    w2    : (Ctot, 2*Ctot)  bf16  [block-diag conv2 'a' | block-diag conv2 'gate']
    wn    : (Ctot, Nout)    bf16  block-diag nin weights (q-branch pre-scaled by 1/sqrt(dh))
    o_ref : (TM, Nout)      bf16  packed [q | k | v]  (lane-dense store)
    """
    x = x_ref[...]                                                   # (TM, Ctot) f32
    xe = _elu(x).astype(jnp.bfloat16)
    h = _elu(jnp.dot(xe, w1_ref[...], preferred_element_type=jnp.float32)
             + b1_ref[...]).astype(jnp.bfloat16)                     # (TM, Ctot)
    ag = jnp.dot(h, w2_ref[...], preferred_element_type=jnp.float32) + b2_ref[...]
    a = ag[:, :c_tot]                                                # static lane slices
    g = ag[:, c_tot:]
    r = (a * _sigmoid(g) + x).astype(jnp.bfloat16)                   # GLU + residual (f32)
    o_ref[...] = (jnp.dot(r, wn_ref[...], preferred_element_type=jnp.float32)
                  + bn_ref[...]).astype(o_ref.dtype)


def _attn_kernel(qkv_ref, o_ref, *, n_head, key_size, value_size):
    """Causal attention for one batch element; full sequence per block (TQ = S).

    qkv_ref: (1, S, 2*nh*dk + nh*dv) bf16, columns packed [q | k | v], heads innermost.
    o_ref  : (1, S, nh*dv)           bf16  (lane-dense store).
    Scale already folded into q; causal/start masks are compile-time iota patterns.
    """
    qkv = qkv_ref[0]                                                 # (S, F) bf16
    S = qkv.shape[0]
    dk, dv = key_size, value_size
    k_off = n_head * dk
    v_off = 2 * n_head * dk

    row = lax.broadcasted_iota(jnp.int32, (S, S), 0)
    col = lax.broadcasted_iota(jnp.int32, (S, S), 1)
    keep = col < row                       # strictly-previous positions (causal_mask)
    live = lax.broadcasted_iota(jnp.int32, (S, 1), 0) > 0            # start_mask: row 0 -> 0

    outs = []
    for h in range(n_head):
        q_h = qkv[:, h * dk:(h + 1) * dk]                            # (S, dk)
        k_h = qkv[:, k_off + h * dk:k_off + (h + 1) * dk]            # (S, dk)
        v_h = qkv[:, v_off + h * dv:v_off + (h + 1) * dv]            # (S, dv)
        logits = lax.dot_general(q_h, k_h, (((1,), (1,)), ((), ())),
                                 preferred_element_type=jnp.float32)  # (S, S) f32
        logits = jnp.where(keep, logits, jnp.float32(-10000.0))
        m = jnp.max(logits, axis=-1, keepdims=True)
        e = jnp.exp(logits - m)
        p = e * pl.reciprocal(jnp.sum(e, axis=-1, keepdims=True), approx=True)
        outs.append(jnp.dot(p.astype(jnp.bfloat16), v_h,
                            preferred_element_type=jnp.float32))      # (S, dv)
    out = jnp.concatenate(outs, axis=-1)                              # (S, nh*dv)
    o_ref[0] = jnp.where(live, out, 0.0).astype(o_ref.dtype)


# ----------------------------------------------------------------------------- #
# pallas_call wrappers
# ----------------------------------------------------------------------------- #
def _qkv_projection(x_cat, w1, b1, w2, b2, wn, bn):
    M, c_tot = x_cat.shape
    n_out = wn.shape[1]
    tm = _proj_tile(M)
    full = lambda m: (0, 0)
    kern = functools.partial(_qkv_proj_kernel, c_tot=c_tot)
    return pl.pallas_call(
        kern,
        out_shape=jax.ShapeDtypeStruct((M, n_out), jnp.bfloat16),
        grid=(M // tm,),
        in_specs=[pl.BlockSpec((tm, c_tot), lambda m: (m, 0)),
                  pl.BlockSpec((c_tot, c_tot), full), pl.BlockSpec((1, c_tot), full),
                  pl.BlockSpec((c_tot, 2 * c_tot), full), pl.BlockSpec((1, 2 * c_tot), full),
                  pl.BlockSpec((c_tot, n_out), full), pl.BlockSpec((1, n_out), full)],
        out_specs=pl.BlockSpec((tm, n_out), lambda m: (m, 0)),
        compiler_params=pltpu.CompilerParams(dimension_semantics=("parallel",)),
    )(x_cat, w1, b1, w2, b2, wn, bn)


def _pallas_attention(qkv, *, n_head, key_size, value_size):
    """qkv: (B, S, 2*nh*dk + nh*dv) bf16 -> (B, S, nh*dv) bf16."""
    B, S, F = qkv.shape
    n_out = n_head * value_size
    kern = functools.partial(_attn_kernel, n_head=n_head, key_size=key_size,
                             value_size=value_size)
    return pl.pallas_call(
        kern,
        out_shape=jax.ShapeDtypeStruct((B, S, n_out), jnp.bfloat16),
        grid=(B,),
        in_specs=[pl.BlockSpec((1, S, F), lambda b: (b, 0, 0))],
        out_specs=pl.BlockSpec((1, S, n_out), lambda b: (b, 0, 0)),
        compiler_params=pltpu.CompilerParams(dimension_semantics=("parallel",)),
    )(qkv)


# ----------------------------------------------------------------------------- #
# CausalAttention forward (NCHW in / NCHW out, matching the PyTorch module)
# ----------------------------------------------------------------------------- #
def causal_attention_forward(params, query_nchw, key_nchw, *,
                             key_size, value_size, n_head):
    B, Cq, H, W = query_nchw.shape
    Ck = key_nchw.shape[1]
    S = H * W
    M = B * S
    dim_head = key_size * n_head
    scale = 1.0 / float(dim_head) ** 0.5

    # NCHW -> per-pixel rows; q/k/v branch inputs packed side by side ([xq | xk | xk]).
    xq = jnp.transpose(query_nchw, (0, 2, 3, 1)).reshape(M, Cq)
    xk = jnp.transpose(key_nchw, (0, 2, 3, 1)).reshape(M, Ck)
    x_cat = jnp.concatenate([xq, xk, xk], axis=-1).astype(jnp.float32)   # (M, Cq+2Ck)

    qp, kp, vp = params["q"], params["k"], params["v"]
    blkdiag = jax.scipy.linalg.block_diag
    bf = lambda a: a.astype(jnp.bfloat16)
    cat = lambda *xs: jnp.concatenate(xs).reshape(1, -1).astype(jnp.float32)

    # Block-diagonal packing of the three per-pixel GatedResNet branches.
    w1 = bf(blkdiag(qp["res"]["w1"], kp["res"]["w1"], vp["res"]["w1"]))
    b1 = cat(qp["res"]["b1"], kp["res"]["b1"], vp["res"]["b1"])
    w2 = bf(jnp.concatenate(
        [blkdiag(qp["res"]["w2a"], kp["res"]["w2a"], vp["res"]["w2a"]),
         blkdiag(qp["res"]["w2b"], kp["res"]["w2b"], vp["res"]["w2b"])], axis=1))
    b2 = cat(qp["res"]["b2a"], kp["res"]["b2a"], vp["res"]["b2a"],
             qp["res"]["b2b"], kp["res"]["b2b"], vp["res"]["b2b"])
    # 1/sqrt(dim_head) folded into the q-branch nin weights.
    wn = bf(blkdiag(qp["nin"]["w"] * scale, kp["nin"]["w"], vp["nin"]["w"]))
    bn = cat(qp["nin"]["b"] * scale, kp["nin"]["b"], vp["nin"]["b"])

    qkv = _qkv_projection(x_cat, w1, b1, w2, b2, wn, bn).reshape(B, S, -1)  # (B,S,2*dh+nh*dv)
    out = _pallas_attention(qkv, n_head=n_head, key_size=key_size,
                            value_size=value_size)                          # (B,S,nh*dv) bf16
    out = out.astype(jnp.float32).reshape(B, H, W, n_head * value_size)
    return jnp.transpose(out, (0, 3, 1, 2))                                 # NHWC -> NCHW


# ----------------------------------------------------------------------------- #
# Parameter init (deterministic; effective weight_norm weights initialized directly)
# ----------------------------------------------------------------------------- #
class _KeyGen:
    def __init__(self, key):
        self.key = key

    def __call__(self):
        self.key, sub = jax.random.split(self.key)
        return sub


def _nrm(kg, shape, scale=0.05):
    return jax.random.normal(kg(), shape, jnp.float32) * scale


def init_gated_resnet_1x1(kg, c):
    # 1x1 convs are per-pixel linears; conv2 split into (a, gate) halves up front.
    return {"w1": _nrm(kg, (c, c)), "b1": jnp.zeros((c,), jnp.float32),
            "w2a": _nrm(kg, (c, c)), "b2a": jnp.zeros((c,), jnp.float32),
            "w2b": _nrm(kg, (c, c)), "b2b": jnp.zeros((c,), jnp.float32)}


def init_nin(kg, cin, cout):
    return {"w": _nrm(kg, (cin, cout)), "b": jnp.zeros((cout,), jnp.float32)}


def init_causal_attention(kg, q_in, k_in, key_size, value_size, n_head):
    dim_head = key_size * n_head
    return {
        "q": {"res": init_gated_resnet_1x1(kg, q_in), "nin": init_nin(kg, q_in, dim_head)},
        "k": {"res": init_gated_resnet_1x1(kg, k_in), "nin": init_nin(kg, k_in, dim_head)},
        "v": {"res": init_gated_resnet_1x1(kg, k_in),
              "nin": init_nin(kg, k_in, value_size * n_head)},
    }


# ----------------------------------------------------------------------------- #
# Pure-JAX f32 reference (same math, no Pallas) for a sanity check
# ----------------------------------------------------------------------------- #
def _reference_forward(params, query_nchw, key_nchw, *, key_size, value_size, n_head):
    B, Cq, H, W = query_nchw.shape
    S = H * W
    dim_head = key_size * n_head

    def resnet_nin(x2d, p):
        xe = jax.nn.elu(x2d)
        h = jax.nn.elu(xe @ p["res"]["w1"] + p["res"]["b1"])
        a = h @ p["res"]["w2a"] + p["res"]["b2a"]
        g = h @ p["res"]["w2b"] + p["res"]["b2b"]
        r = a * jax.nn.sigmoid(g) + x2d
        return r @ p["nin"]["w"] + p["nin"]["b"]

    xq = jnp.transpose(query_nchw, (0, 2, 3, 1)).reshape(B * S, Cq)
    xk = jnp.transpose(key_nchw, (0, 2, 3, 1)).reshape(B * S, -1)
    q = resnet_nin(xq, params["q"]).reshape(B, S, n_head, key_size).transpose(0, 2, 1, 3)
    k = resnet_nin(xk, params["k"]).reshape(B, S, n_head, key_size).transpose(0, 2, 1, 3)
    v = resnet_nin(xk, params["v"]).reshape(B, S, n_head, value_size).transpose(0, 2, 1, 3)
    logits = jnp.einsum("bhqd,bhkd->bhqk", q, k) / jnp.sqrt(jnp.float32(dim_head))
    r = jnp.arange(S)[:, None]
    c = jnp.arange(S)[None, :]
    logits = jnp.where(c < r, logits, -10000.0)
    p = jax.nn.softmax(logits, axis=-1) * (r > 0)
    out = jnp.einsum("bhqk,bhkd->bhqd", p, v)
    out = out.transpose(0, 2, 1, 3).reshape(B, H, W, n_head * value_size)
    return out.transpose(0, 3, 1, 2)


# ----------------------------------------------------------------------------- #
# main
# ----------------------------------------------------------------------------- #
if __name__ == "__main__":
    B, Cq, Ck = 2, 32, 32
    H = W = 16                        # shape=(16,16) -> S = 256 (matches the mask size)
    KEY_SIZE, VALUE_SIZE, N_HEAD = 16, 64, 2

    root = jax.random.PRNGKey(0)
    pkey, qkey, kkey = jax.random.split(root, 3)
    params = init_causal_attention(_KeyGen(pkey), Cq, Ck, KEY_SIZE, VALUE_SIZE, N_HEAD)
    query = jax.random.normal(qkey, (B, Cq, H, W), jnp.float32)
    key = jax.random.normal(kkey, (B, Ck, H, W), jnp.float32)

    fwd = jax.jit(functools.partial(causal_attention_forward,
                                    key_size=KEY_SIZE, value_size=VALUE_SIZE,
                                    n_head=N_HEAD))
    out = jax.block_until_ready(fwd(params, query, key))

    assert out.shape == (B, VALUE_SIZE * N_HEAD, H, W), out.shape
    assert bool(jnp.all(jnp.isfinite(out)))

    ref = _reference_forward(params, query, key, key_size=KEY_SIZE,
                             value_size=VALUE_SIZE, n_head=N_HEAD)
    max_err = float(jnp.max(jnp.abs(out - ref)))
    assert max_err < 5e-2, f"max abs err vs f32 reference: {max_err}"

    print("KERNEL_OK")
</pallas_src>

<mosaic_0001>
module attributes {stable_mosaic.version = 11 : i64} {
  func.func @_qkv_proj_kernel(%arg0: i32, %arg1: memref<256x96xf32, #tpu.memory_space<vmem>>, %arg2: memref<96x96xbf16, #tpu.memory_space<vmem>>, %arg3: memref<1x96xf32, #tpu.memory_space<vmem>>, %arg4: memref<96x192xbf16, #tpu.memory_space<vmem>>, %arg5: memref<1x192xf32, #tpu.memory_space<vmem>>, %arg6: memref<96x192xbf16, #tpu.memory_space<vmem>>, %arg7: memref<1x192xf32, #tpu.memory_space<vmem>>, %arg8: memref<256x192xbf16, #tpu.memory_space<vmem>>) attributes {dimension_semantics = [#tpu.dimension_semantics<parallel>], iteration_bounds = array<i64: 2>, scalar_prefetch = 0 : i64, scratch_operands = 0 : i64, tpu.core_type = #tpu.core_type<tc>, window_params = [{transform_indices = @transform_0, window_bounds = array<i64: 256, 96>}, {pipeline_mode = #tpu.pipeline_mode<synchronous>, transform_indices = @transform_1, window_bounds = array<i64: 96, 96>}, {pipeline_mode = #tpu.pipeline_mode<synchronous>, transform_indices = @transform_2, window_bounds = array<i64: 1, 96>}, {pipeline_mode = #tpu.pipeline_mode<synchronous>, transform_indices = @transform_3, window_bounds = array<i64: 96, 192>}, {pipeline_mode = #tpu.pipeline_mode<synchronous>, transform_indices = @transform_4, window_bounds = array<i64: 1, 192>}, {pipeline_mode = #tpu.pipeline_mode<synchronous>, transform_indices = @transform_5, window_bounds = array<i64: 96, 192>}, {pipeline_mode = #tpu.pipeline_mode<synchronous>, transform_indices = @transform_6, window_bounds = array<i64: 1, 192>}, {transform_indices = @transform_7, window_bounds = array<i64: 256, 192>}]} {
    %c0 = arith.constant 0 : index
    %c0_0 = arith.constant 0 : index
    %0 = vector.load %arg1[%c0, %c0_0] : memref<256x96xf32, #tpu.memory_space<vmem>>, vector<256x96xf32>
    %cst = arith.constant 0.000000e+00 : f32
    %1 = vector.broadcast %cst : f32 to vector<256x96xf32>
    %2 = arith.cmpf ogt, %0, %1 : vector<256x96xf32>
    %cst_1 = arith.constant 0.000000e+00 : f32
    %3 = vector.broadcast %cst_1 : f32 to vector<256x96xf32>
    %4 = arith.minimumf %0, %3 : vector<256x96xf32>
    %5 = math.exp %4 : vector<256x96xf32>
    %cst_2 = arith.constant 1.000000e+00 : f32
    %6 = vector.broadcast %cst_2 : f32 to vector<256x96xf32>
    %7 = arith.subf %5, %6 : vector<256x96xf32>
    %8 = arith.select %2, %0, %7 : vector<256x96xi1>, vector<256x96xf32>
    %9 = arith.truncf %8 : vector<256x96xf32> to vector<256x96xbf16>
    %c0_3 = arith.constant 0 : index
    %c0_4 = arith.constant 0 : index
    %10 = vector.load %arg2[%c0_3, %c0_4] : memref<96x96xbf16, #tpu.memory_space<vmem>>, vector<96x96xbf16>
    %cst_5 = arith.constant dense<0.000000e+00> : vector<256x96xf32>
    %11 = tpu.matmul %9, %10, %cst_5 {dimension_numbers = #tpu.dot_dimension_numbers<[1], [0], [0], [1], [0, 0, 1, 1], [], []>} : vector<256x96xbf16>, vector<96x96xbf16>, vector<256x96xf32> -> vector<256x96xf32>
    %c0_6 = arith.constant 0 : index
    %c0_7 = arith.constant 0 : index
    %12 = vector.load %arg3[%c0_6, %c0_7] : memref<1x96xf32, #tpu.memory_space<vmem>>, vector<1x96xf32>
    %13 = vector.broadcast %12 : vector<1x96xf32> to vector<256x96xf32>
    %14 = arith.addf %11, %13 : vector<256x96xf32>
    %cst_8 = arith.constant 0.000000e+00 : f32
    %15 = vector.broadcast %cst_8 : f32 to vector<256x96xf32>
    %16 = arith.cmpf ogt, %14, %15 : vector<256x96xf32>
    %cst_9 = arith.constant 0.000000e+00 : f32
    %17 = vector.broadcast %cst_9 : f32 to vector<256x96xf32>
    %18 = arith.minimumf %14, %17 : vector<256x96xf32>
    %19 = math.exp %18 : vector<256x96xf32>
    %cst_10 = arith.constant 1.000000e+00 : f32
    %20 = vector.broadcast %cst_10 : f32 to vector<256x96xf32>
    %21 = arith.subf %19, %20 : vector<256x96xf32>
    %22 = arith.select %16, %14, %21 : vector<256x96xi1>, vector<256x96xf32>
    %23 = arith.truncf %22 : vector<256x96xf32> to vector<256x96xbf16>
    %c0_11 = arith.constant 0 : index
    %c0_12 = arith.constant 0 : index
    %24 = vector.load %arg4[%c0_11, %c0_12] : memref<96x192xbf16, #tpu.memory_space<vmem>>, vector<96x192xbf16>
    %cst_13 = arith.constant dense<0.000000e+00> : vector<256x192xf32>
    %25 = tpu.matmul %23, %24, %cst_13 {dimension_numbers = #tpu.dot_dimension_numbers<[1], [0], [0], [1], [0, 0, 1, 1], [], []>} : vector<256x96xbf16>, vector<96x192xbf16>, vector<256x192xf32> -> vector<256x192xf32>
    %c0_14 = arith.constant 0 : index
    %c0_15 = arith.constant 0 : index
    %26 = vector.load %arg5[%c0_14, %c0_15] : memref<1x192xf32, #tpu.memory_space<vmem>>, vector<1x192xf32>
    %27 = vector.broadcast %26 : vector<1x192xf32> to vector<256x192xf32>
    %28 = arith.addf %25, %27 : vector<256x192xf32>
    %29 = vector.extract_strided_slice %28 {offsets = [0, 0], sizes = [256, 96], strides = [1, 1]} : vector<256x192xf32> to vector<256x96xf32>
    %30 = vector.extract_strided_slice %28 {offsets = [0, 96], sizes = [256, 96], strides = [1, 1]} : vector<256x192xf32> to vector<256x96xf32>
    %cst_16 = arith.constant 0.000000e+00 : f32
    %31 = vector.broadcast %cst_16 : f32 to vector<256x96xf32>
    %32 = arith.subf %31, %30 : vector<256x96xf32>
    %33 = math.exp %32 : vector<256x96xf32>
    %cst_17 = arith.constant 1.000000e+00 : f32
    %34 = vector.broadcast %cst_17 : f32 to vector<256x96xf32>
    %35 = arith.addf %34, %33 : vector<256x96xf32>
    %cst_18 = arith.constant 1.000000e+00 : f32
    %36 = vector.broadcast %cst_18 : f32 to vector<256x96xf32>
    %37 = arith.divf %36, %35 : vector<256x96xf32>
    %38 = arith.mulf %29, %37 : vector<256x96xf32>
    %39 = arith.addf %38, %0 : vector<256x96xf32>
    %40 = arith.truncf %39 : vector<256x96xf32> to vector<256x96xbf16>
    %c0_19 = arith.constant 0 : index
    %c0_20 = arith.constant 0 : index
    %41 = vector.load %arg6[%c0_19, %c0_20] : memref<96x192xbf16, #tpu.memory_space<vmem>>, vector<96x192xbf16>
    %cst_21 = arith.constant dense<0.000000e+00> : vector<256x192xf32>
    %42 = tpu.matmul %40, %41, %cst_21 {dimension_numbers = #tpu.dot_dimension_numbers<[1], [0], [0], [1], [0, 0, 1, 1], [], []>} : vector<256x96xbf16>, vector<96x192xbf16>, vector<256x192xf32> -> vector<256x192xf32>
    %c0_22 = arith.constant 0 : index
    %c0_23 = arith.constant 0 : index
    %43 = vector.load %arg7[%c0_22, %c0_23] : memref<1x192xf32, #tpu.memory_space<vmem>>, vector<1x192xf32>
    %44 = vector.broadcast %43 : vector<1x192xf32> to vector<256x192xf32>
    %45 = arith.addf %42, %44 : vector<256x192xf32>
    %46 = arith.truncf %45 : vector<256x192xf32> to vector<256x192xbf16>
    %c0_24 = arith.constant 0 : index
    %c0_25 = arith.constant 0 : index
    %47 = vector.load %arg8[%c0_24, %c0_25] : memref<256x192xbf16, #tpu.memory_space<vmem>>, vector<256x192xbf16>
    tpu.vector_store %arg8[%c0_24, %c0_25], %46 {strides = array<i32>} : memref<256x192xbf16, #tpu.memory_space<vmem>>, vector<256x192xbf16>,
    return
  }
  func.func @transform_0(%arg0: i32) -> (i32, i32) {
    %c0_i32 = arith.constant 0 : i32
    %c0_i32_0 = arith.constant 0 : i32
    return %arg0, %c0_i32 : i32, i32
  }
  func.func @transform_1(%arg0: i32) -> (i32, i32) {
    %c0_i32 = arith.constant 0 : i32
    %c0_i32_0 = arith.constant 0 : i32
    %c0_i32_1 = arith.constant 0 : i32
    return %c0_i32, %c0_i32_0 : i32, i32
  }
  func.func @transform_2(%arg0: i32) -> (i32, i32) {
    %c0_i32 = arith.constant 0 : i32
    %c0_i32_0 = arith.constant 0 : i32
    %c0_i32_1 = arith.constant 0 : i32
    return %c0_i32, %c0_i32_0 : i32, i32
  }
  func.func @transform_3(%arg0: i32) -> (i32, i32) {
    %c0_i32 = arith.constant 0 : i32
    %c0_i32_0 = arith.constant 0 : i32
    %c0_i32_1 = arith.constant 0 : i32
    return %c0_i32, %c0_i32_0 : i32, i32
  }
  func.func @transform_4(%arg0: i32) -> (i32, i32) {
    %c0_i32 = arith.constant 0 : i32
    %c0_i32_0 = arith.constant 0 : i32
    %c0_i32_1 = arith.constant 0 : i32
    return %c0_i32, %c0_i32_0 : i32, i32
  }
  func.func @transform_5(%arg0: i32) -> (i32, i32) {
    %c0_i32 = arith.constant 0 : i32
    %c0_i32_0 = arith.constant 0 : i32
    %c0_i32_1 = arith.constant 0 : i32
    return %c0_i32, %c0_i32_0 : i32, i32
  }
  func.func @transform_6(%arg0: i32) -> (i32, i32) {
    %c0_i32 = arith.constant 0 : i32
    %c0_i32_0 = arith.constant 0 : i32
    %c0_i32_1 = arith.constant 0 : i32
    return %c0_i32, %c0_i32_0 : i32, i32
  }
  func.func @transform_7(%arg0: i32) -> (i32, i32) {
    %c0_i32 = arith.constant 0 : i32
    %c0_i32_0 = arith.constant 0 : i32
    return %arg0, %c0_i32 : i32, i32
  }
}

module attributes {stable_mosaic.version = 11 : i64} {
  func.func @_attn_kernel(%arg0: i32, %arg1: memref<1x256x192xbf16, #tpu.memory_space<vmem>>, %arg2: memref<1x256x128xbf16, #tpu.memory_space<vmem>>) attributes {dimension_semantics = [#tpu.dimension_semantics<parallel>], iteration_bounds = array<i64: 2>, scalar_prefetch = 0 : i64, scratch_operands = 0 : i64, tpu.core_type = #tpu.core_type<tc>, window_params = [{transform_indices = @transform_0, window_bounds = array<i64: 1, 256, 192>}, {transform_indices = @transform_1, window_bounds = array<i64: 1, 256, 128>}]} {
    %c0 = arith.constant 0 : index
    %c0_0 = arith.constant 0 : index
    %c0_1 = arith.constant 0 : index
    %0 = vector.load %arg1[%c0, %c0_0, %c0_1] : memref<1x256x192xbf16, #tpu.memory_space<vmem>>, vector<1x256x192xbf16>
    %1 = vector.shape_cast %0 : vector<1x256x192xbf16> to vector<256x192xbf16>
    %2 = tpu.iota {dimensions = array<i32: 0>} : vector<256x256xi32>
    %3 = tpu.iota {dimensions = array<i32: 1>} : vector<256x256xi32>
    %4 = arith.cmpi slt, %3, %2 : vector<256x256xi32>
    %5 = tpu.iota {dimensions = array<i32: 0>} : vector<256x1xi32>
    %c0_i32 = arith.constant 0 : i32
    %6 = vector.broadcast %c0_i32 : i32 to vector<256x1xi32>
    %7 = arith.cmpi sgt, %5, %6 : vector<256x1xi32>
    %8 = vector.extract_strided_slice %1 {offsets = [0, 0], sizes = [256, 16], strides = [1, 1]} : vector<256x192xbf16> to vector<256x16xbf16>
    %9 = vector.extract_strided_slice %1 {offsets = [0, 32], sizes = [256, 16], strides = [1, 1]} : vector<256x192xbf16> to vector<256x16xbf16>
    %10 = vector.extract_strided_slice %1 {offsets = [0, 64], sizes = [256, 64], strides = [1, 1]} : vector<256x192xbf16> to vector<256x64xbf16>
    %cst = arith.constant dense<0.000000e+00> : vector<256x256xf32>
    %11 = tpu.matmul %8, %9, %cst {dimension_numbers = #tpu.dot_dimension_numbers<[1], [1], [0], [0], [0, 0, 1, 0], [], []>} : vector<256x16xbf16>, vector<256x16xbf16>, vector<256x256xf32> -> vector<256x256xf32>
    %cst_2 = arith.constant -1.000000e+04 : f32
    %12 = vector.broadcast %cst_2 : f32 to vector<256x256xf32>
    %13 = arith.select %4, %11, %12 : vector<256x256xi1>, vector<256x256xf32>
    %cst_3 = arith.constant dense<0xFF800000> : vector<256xf32>
    %14 = vector.multi_reduction <maximumf>, %13, %cst_3 [1] : vector<256x256xf32> to vector<256xf32>
    %15 = vector.shape_cast %14 : vector<256xf32> to vector<256x1xf32>
    %16 = vector.broadcast %15 : vector<256x1xf32> to vector<256x256xf32>
    %17 = arith.subf %13, %16 : vector<256x256xf32>
    %18 = math.exp %17 : vector<256x256xf32>
    %cst_4 = arith.constant dense<0.000000e+00> : vector<256xf32>
    %19 = vector.multi_reduction <add>, %18, %cst_4 [1] : vector<256x256xf32> to vector<256xf32>
    %20 = vector.shape_cast %19 : vector<256xf32> to vector<256x1xf32>
    %21 = tpu.reciprocal %20 {approx = true} : vector<256x1xf32> -> vector<256x1xf32>
    %22 = vector.broadcast %21 : vector<256x1xf32> to vector<256x256xf32>
    %23 = arith.mulf %18, %22 : vector<256x256xf32>
    %24 = arith.truncf %23 : vector<256x256xf32> to vector<256x256xbf16>
    %cst_5 = arith.constant dense<0.000000e+00> : vector<256x64xf32>
    %25 = tpu.matmul %24, %10, %cst_5 {dimension_numbers = #tpu.dot_dimension_numbers<[1], [0], [0], [1], [0, 0, 1, 1], [], []>} : vector<256x256xbf16>, vector<256x64xbf16>, vector<256x64xf32> -> vector<256x64xf32>
    %26 = vector.extract_strided_slice %1 {offsets = [0, 16], sizes = [256, 16], strides = [1, 1]} : vector<256x192xbf16> to vector<256x16xbf16>
    %27 = vector.extract_strided_slice %1 {offsets = [0, 48], sizes = [256, 16], strides = [1, 1]} : vector<256x192xbf16> to vector<256x16xbf16>
    %28 = vector.extract_strided_slice %1 {offsets = [0, 128], sizes = [256, 64], strides = [1, 1]} : vector<256x192xbf16> to vector<256x64xbf16>
    %cst_6 = arith.constant dense<0.000000e+00> : vector<256x256xf32>
    %29 = tpu.matmul %26, %27, %cst_6 {dimension_numbers = #tpu.dot_dimension_numbers<[1], [1], [0], [0], [0, 0, 1, 0], [], []>} : vector<256x16xbf16>, vector<256x16xbf16>, vector<256x256xf32> -> vector<256x256xf32>
    %cst_7 = arith.constant -1.000000e+04 : f32
    %30 = vector.broadcast %cst_7 : f32 to vector<256x256xf32>
    %31 = arith.select %4, %29, %30 : vector<256x256xi1>, vector<256x256xf32>
    %cst_8 = arith.constant dense<0xFF800000> : vector<256xf32>
    %32 = vector.multi_reduction <maximumf>, %31, %cst_8 [1] : vector<256x256xf32> to vector<256xf32>
    %33 = vector.shape_cast %32 : vector<256xf32> to vector<256x1xf32>
    %34 = vector.broadcast %33 : vector<256x1xf32> to vector<256x256xf32>
    %35 = arith.subf %31, %34 : vector<256x256xf32>
    %36 = math.exp %35 : vector<256x256xf32>
    %cst_9 = arith.constant dense<0.000000e+00> : vector<256xf32>
    %37 = vector.multi_reduction <add>, %36, %cst_9 [1] : vector<256x256xf32> to vector<256xf32>
    %38 = vector.shape_cast %37 : vector<256xf32> to vector<256x1xf32>
    %39 = tpu.reciprocal %38 {approx = true} : vector<256x1xf32> -> vector<256x1xf32>
    %40 = vector.broadcast %39 : vector<256x1xf32> to vector<256x256xf32>
    %41 = arith.mulf %36, %40 : vector<256x256xf32>
    %42 = arith.truncf %41 : vector<256x256xf32> to vector<256x256xbf16>
    %cst_10 = arith.constant dense<0.000000e+00> : vector<256x64xf32>
    %43 = tpu.matmul %42, %28, %cst_10 {dimension_numbers = #tpu.dot_dimension_numbers<[1], [0], [0], [1], [0, 0, 1, 1], [], []>} : vector<256x256xbf16>, vector<256x64xbf16>, vector<256x64xf32> -> vector<256x64xf32>
    %44 = tpu.concatenate %25, %43 in 1 : vector<256x64xf32>, vector<256x64xf32> -> vector<256x128xf32>
    %cst_11 = arith.constant 0.000000e+00 : f32
    %45 = vector.shape_cast %7 : vector<256x1xi1> to vector<256x1xi1>
    %46 = vector.broadcast %45 : vector<256x1xi1> to vector<256x128xi1>
    %47 = vector.broadcast %cst_11 : f32 to vector<256x128xf32>
    %48 = arith.select %46, %44, %47 : vector<256x128xi1>, vector<256x128xf32>
    %49 = arith.truncf %48 : vector<256x128xf32> to vector<256x128xbf16>
    %c0_12 = arith.constant 0 : index
    %c0_13 = arith.constant 0 : index
    %c0_14 = arith.constant 0 : index
    %50 = vector.load %arg2[%c0_12, %c0_13, %c0_14] : memref<1x256x128xbf16, #tpu.memory_space<vmem>>, vector<1x256x128xbf16>
    %51 = vector.shape_cast %50 : vector<1x256x128xbf16> to vector<256x128xbf16>
    %52 = vector.shape_cast %49 : vector<256x128xbf16> to vector<1x256x128xbf16>
    tpu.vector_store %arg2[%c0_12, %c0_13, %c0_14], %52 {strides = array<i32>} : memref<1x256x128xbf16, #tpu.memory_space<vmem>>, vector<1x256x128xbf16>,
    return
  }
  func.func @transform_0(%arg0: i32) -> (i32, i32, i32) {
    %c0_i32 = arith.constant 0 : i32
    %c0_i32_0 = arith.constant 0 : i32
    %c0_i32_1 = arith.constant 0 : i32
    return %arg0, %c0_i32, %c0_i32_0 : i32, i32, i32
  }
  func.func @transform_1(%arg0: i32) -> (i32, i32, i32) {
    %c0_i32 = arith.constant 0 : i32
    %c0_i32_0 = arith.constant 0 : i32
    %c0_i32_1 = arith.constant 0 : i32
    return %arg0, %c0_i32, %c0_i32_0 : i32, i32, i32
  }
}

</mosaic_0001>

<bundles_post_ra>
// kernel: causal_attention_forward.2
= control target key start
LH: loop header
LB: loop body
LE: loop exit
PB: predicated region body
PF: predicated region fallthrough
CT: control target
= control target key end

     0   :  { %s3470_s24 = smov 0   ;;  %s4708_s0 = inlined_call_operand.vmem [shape: f32[512,96], index: 0, kind: input, shape index: {}]   ;;  %s4709_s1 = inlined_call_operand.vmem [shape: bf16[96,96], index: 1, kind: input, shape index: {}]   ;;  %s4710_s2 = inlined_call_operand.vmem [shape: f32[1,96], index: 2, kind: input, shape index: {}]   ;;  %s4711_s3 = inlined_call_operand.vmem [shape: bf16[96,192], index: 3, kind: input, shape index: {}]   ;;  %s4712_s4 = inlined_call_operand.vmem [shape: f32[1,192], index: 4, kind: input, shape index: {}]   ;;  %s4713_s5 = inlined_call_operand.vmem [shape: bf16[96,192], index: 5, kind: input, shape index: {}]   ;;  %s4714_s6 = inlined_call_operand.vmem [shape: f32[1,192], index: 6, kind: input, shape index: {}]   ;;  %s4715_s7 = inlined_call_operand.vmem [shape: bf16[512,192], index: 7, kind: output, shape index: {}]  }
   0x1 LB: > { %s2654_s25 = sadd.s32 4294967295, %s3426_s24   ;;  %p2658_p0 = scmp.ge.s32.totalorder %s3426_s24, 1  ;;  %s3426_s24 = sphi %s3470_s24, %s17_s24  }
   0x2   : > { %p238_p1 = scmp.lt.s32.totalorder %s3426_s24, 3 }
   0x4   : > { %p239_p2 = pnand %p2658_p0, %p238_p1 }
   0x5   : > { %v2962_v0 = vld [vmem:[%s4709_s1] sm:$0xff] (!%p239_p2)   ;;  %s2659_s28 = sshll.u32 (!%p239_p2), %s2654_s25, 5  ;;  %v2963_v1 = vld [vmem:[%s4709_s1 + $0x8] sm:$0xff] (!%p239_p2)   ;;  %v2964_v2 = vld [vmem:[%s4709_s1 + $0x10] sm:$0xff] (!%p239_p2)   ;;  %vm580_vm2 = vcmask (!%p239_p2), 785408   ;;  %s3429_s15 = smov (!%p239_p2), 32  }
   0x6   : > { %242 = sbr.rel (%p239_p2) target bundleno = 991 (0x3df), region = 48  ;;  %p272_p3 = scmp.lt.s32.totalorder (!%p239_p2), %s2659_s28, 63  ;;  %2896 = vmatprep.subr.bf16.mxu0 (!%p239_p2), %v2962_v0  ;;  %2940 = vmatprep.subr.bf16.mxu1 (!%p239_p2), %v2962_v0  ;;  %v2965_v6 = vld [vmem:[%s4709_s1 + $0x18] sm:$0xff] (!%p239_p2)   ;;  %v2966_v15 = vld [vmem:[%s4709_s1 + $0x20] sm:$0xff] (!%p239_p2)   ;;  %v2967_v31 = vld [vmem:[%s4709_s1 + $0x28] sm:$0xff] (!%p239_p2)  }
   0x7   : > { %2897 = vmatpush3.bf16.msra.mxu0 (!%p239_p2), %v2962_v0  ;;  %2946 = vmatpush3.bf16.msra.mxu1 (!%p239_p2), %v2962_v0  ;;  %v2970_v63 = vld [vmem:[%s4711_s3 + $0x4] ss:$8 sps:$4 sm:$0xff] (!%p239_p2)  }
   0x8   : > { %2898 = vmatprep.subr.bf16.mxu0 (!%p239_p2), %v2963_v1  ;;  %2941 = vmatprep.subr.bf16.mxu1 (!%p239_p2), %v2963_v1 }
   0xb   : > { %2899 = vmatpush3.bf16.msra.mxu0 (!%p239_p2), %v2963_v1  ;;  %2947 = vmatpush3.bf16.msra.mxu1 (!%p239_p2), %v2963_v1 }
   0xc   : > { %2900 = vmatprep.subr.bf16.mxu0 (!%p239_p2), %v2964_v2  ;;  %2942 = vmatprep.subr.bf16.mxu1 (!%p239_p2), %v2964_v2 }
   0xd   : > { %s4719_s28 = smov (!%p272_p3, %s2659_s28), 63 }
   0xe   : > { %s2660_s10 = sshll.u32 %s4719_s28, 3 }
   0xf   : > { %s3495_s13 = scalar_lea.vmem %s4708_s0, %s2660_s10  ;;  %2901 = vmatpush3.bf16.msra.mxu0 %v2964_v2  ;;  %2948 = vmatpush3.bf16.msra.mxu1 %v2964_v2  ;;  %s4541_s19 = scalar_lea.vmem %s4715_s7, %s2660_s10 }
  0x10   : > { %v3498_v3 = vld [vmem:[%s3495_s13] sm:$0xff]  ;;  %v3501_v4 = vld [vmem:[%s3495_s13 + $0x8] sm:$0xff]  ;;  %v3504_v5 = vld [vmem:[%s3495_s13 + $0x10] sm:$0xff]  ;;  %2902 = vmatprep.subr.bf16.mxu0 %v2965_v6  ;;  %2943 = vmatprep.subr.bf16.mxu1 %v2965_v6 }
  0x11   : > { %v349_v7 = vmin.f32 %v3498_v3, 0.0  ;;  %v350_v8 = vmin.f32 %v3501_v4, 0.0  ;;  %v3512_v9 = vld [vmem:[%s3495_s13 + $0x18] sm:$0xff]  ;;  %v3515_v10 = vld [vmem:[%s3495_s13 + $0x20] sm:$0xff]  ;;  %v351_v11 = vmin.f32 %v3504_v5, 0.0  ;;  %v3520_v13 = vld [vmem:[%s3495_s13 + $0x28] sm:$0xff] }
  0x12   : > { %v352_v12 = vmin.f32 %v3512_v9, 0.0  ;;  %v3523_v14 = vld [vmem:[%s3495_s13 + $0x30] sm:$0xff]  ;;  %v353_v20 = vmin.f32 %v3515_v10, 0.0  ;;  %v354_v21 = vmin.f32 %v3520_v13, 0.0  ;;  %v3531_v22 = vld [vmem:[%s3495_s13 + $0x38] sm:$0xff]  ;;  %v3535_v24 = vld [vmem:[%s3495_s13 + $0x40] sm:$0xff] }
  0x13   : > { %v381_v16 = vmul.f32 1.442695, %v349_v7  ;;  %v383_v17 = vmul.f32 1.442695, %v350_v8  ;;  %v385_v18 = vmul.f32 1.442695, %v351_v11  ;;  %2903 = vmatpush3.bf16.msra.mxu0 %v2965_v6  ;;  %2949 = vmatpush3.bf16.msra.mxu1 %v2965_v6 }
  0x14   : > { %v387_v19 = vmul.f32 1.442695, %v352_v12  ;;  %v355_v23 = vmin.f32 %v3523_v14, 0.0  ;;  %v3538_v25 = vld [vmem:[%s3495_s13 + $0x48] sm:$0xff]  ;;  %v389_v26 = vmul.f32 1.442695, %v353_v20  ;;  %2904 = vmatprep.subr.bf16.mxu0 %v2966_v15  ;;  %2944 = vmatprep.subr.bf16.mxu1 %v2966_v15 }
  0x15   : > { %3004 = vpow2.f32 %v381_v16  ;;  %v391_v27 = vmul.f32 1.442695, %v354_v21  ;;  %v356_v28 = vmin.f32 %v3531_v22, 0.0  ;;  %v3542_v30 = vld [vmem:[%s3495_s13 + $0x50] sm:$0xff]  ;;  %v357_v32 = vmin.f32 %v3535_v24, 0.0  ;;  %v3550_v34 = vld [vmem:[%s3495_s13 + $0x58] sm:$0xff] }
  0x16   : > { %3006 = vpow2.f32 %v383_v17  ;;  %v393_v29 = vmul.f32 1.442695, %v355_v23  ;;  %v358_v33 = vmin.f32 %v3538_v25, 0.0  ;;  %vm317_vm0 = vcmp.gt.f32.partialorder %v3498_v3, 0.0  ;;  %v3555_v36 = vld [vmem:[%s3495_s13 + $0x60] sm:$0xff]  ;;  %v3558_v37 = vld [vmem:[%s3495_s13 + $0x68] sm:$0xff] }
  0x17   : > { %3008 = vpow2.f32 %v385_v18  ;;  %vm318_vm1 = vcmp.gt.f32.partialorder %v3501_v4, 0.0  ;;  %v395_v35 = vmul.f32 1.442695, %v356_v28  ;;  %v397_v38 = vmul.f32 1.442695, %v357_v32  ;;  %v3565_v42 = vld [vmem:[%s3495_s13 + $0x70] sm:$0xff]  ;;  %2905 = vmatpush3.bf16.msra.mxu0 %v2966_v15  ;;  %2950 = vmatpush3.bf16.msra.mxu1 %v2966_v15 }
  0x18   : > { %3010 = vpow2.f32 %v387_v19  ;;  %v399_v39 = vmul.f32 1.442695, %v358_v33  ;;  %v359_v40 = vmin.f32 %v3542_v30, 0.0  ;;  %vm319_vm3 = vcmp.gt.f32.partialorder %v3504_v5, 0.0  ;;  %v3570_v46 = vld [vmem:[%s3495_s13 + $0x78] sm:$0xff]  ;;  %2906 = vmatprep.subr.bf16.mxu0 %v2967_v31  ;;  %2945 = vmatprep.subr.bf16.mxu1 %v2967_v31  ;;  %v3575_v48 = vld [vmem:[%s3495_s13 + $0x80] sm:$0xff] }
  0x19   : > { %3012 = vpow2.f32 %v389_v26  ;;  %vm320_vm4 = vcmp.gt.f32.partialorder %v3512_v9, 0.0  ;;  %v360_v41 = vmin.f32 %v3550_v34, 0.0  ;;  %v361_v44 = vmin.f32 %v3555_v36, 0.0  ;;  %v3580_v52 = vld [vmem:[%s3495_s13 + $0x88] sm:$0xff]  ;;  %v3597_v15 = vld [vmem:[%s3495_s13 + $0x90] sm:$0xff]  ;;  %v3603_v19 = vld [vmem:[%s3495_s13 + $0x98] sm:$0xff] }
  0x1a   : > { %3014 = vpow2.f32 %v391_v27  ;;  %v401_v43 = vmul.f32 1.442695, %v359_v40  ;;  %v362_v45 = vmin.f32 %v3558_v37, 0.0  ;;  %vm321_vm5 = vcmp.gt.f32.partialorder %v3515_v10, 0.0 }
  0x1b   : > { %3016 = vpow2.f32 %v393_v29  ;;  %vm322_vm6 = vcmp.gt.f32.partialorder %v3520_v13, 0.0  ;;  %v403_v47 = vmul.f32 1.442695, %v360_v41  ;;  %vm323_vm7 = vcmp.gt.f32.partialorder %v3523_v14, 0.0  ;;  %2907 = vmatpush3.bf16.msra.mxu0 %v2967_v31  ;;  %2951 = vmatpush3.bf16.msra.mxu1 %v2967_v31 }
  0x1c   : > { %3018 = vpow2.f32 %v395_v35  ;;  %v405_v49 = vmul.f32 1.442695, %v361_v44  ;;  %v407_v50 = vmul.f32 1.442695, %v362_v45  ;;  %v363_v51 = vmin.f32 %v3565_v42, 0.0  ;;  %1130 = vmatprep.subr.bf16.mxu1 %v2970_v63 }
  0x1d   : > { %3020 = vpow2.f32 %v397_v38  ;;  %vm324_vm8 = vcmp.gt.f32.partialorder %v3531_v22, 0.0  ;;  %vm325_vm9 = vcmp.gt.f32.partialorder %v3535_v24, 0.0  ;;  %v364_v54 = vmin.f32 %v3570_v46, 0.0 }
  0x1e   : > { %3022 = vpow2.f32 %v399_v39  ;;  %v409_v57 = vmul.f32 1.442695, %v363_v51  ;;  %v365_v58 = vmin.f32 %v3575_v48, 0.0  ;;  %v366_v62 = vmin.f32 %v3580_v52, 0.0 }
  0x1f   : > { %v3005_v53 = vpop.eup %3004  ;;  %3024 = vpow2.f32 %v401_v43  ;;  %v411_v61 = vmul.f32 1.442695, %v364_v54  ;;  %vm326_vm10 = vcmp.gt.f32.partialorder %v3538_v25, 0.0  ;;  %vm327_vm11 = vcmp.gt.f32.partialorder %v3542_v30, 0.0  ;;  %v3628_v43 = vld [vmem:[%s3495_s13 + $0xa0] sm:$0xff] }
  0x20   : > { %v3007_v55 = vpop.eup %3006  ;;  %v2664_v56 = vadd.f32 -1.0, %v3005_v53  ;;  %3026 = vpow2.f32 %v403_v47  ;;  %v413_v6 = vmul.f32 1.442695, %v365_v58  ;;  %v415_v12 = vmul.f32 1.442695, %v366_v62  ;;  %v3657_v62 = vld [vmem:[%s3495_s13 + $0xb8] sm:$0xff] }
  0x21   : > { %v3009_v59 = vpop.eup %3008  ;;  %v2665_v60 = vadd.f32 -1.0, %v3007_v55  ;;  %3028 = vpow2.f32 %v405_v49  ;;  %v367_v31 = vmin.f32 %v3597_v15, 0.0  ;;  %vm328_vm12 = vcmp.gt.f32.partialorder %v3550_v34, 0.0 }
  0x22   : > { %v3011_v0 = vpop.eup %3010  ;;  %v477_v1 = vsel %vm317_vm0, %v3498_v3, %v2664_v56  ;;  %v2666_v2 = vadd.f32 -1.0, %v3009_v59  ;;  %3030 = vpow2.f32 %v407_v50  ;;  %v3635_v50 = vld [vmem:[%s3495_s13 + $0xa8] sm:$0xff]  ;;  %vm329_vm13 = vcmp.gt.f32.partialorder %v3555_v36, 0.0 }
  0x23   : > { %v3013_v7 = vpop.eup %3012  ;;  %v478_v8 = vsel %vm318_vm1, %v3501_v4, %v2665_v60  ;;  %v2667_v11 = vadd.f32 -1.0, %v3011_v0  ;;  %3032 = vpow2.f32 %v409_v57  ;;  %v417_v41 = vmul.f32 1.442695, %v367_v31  ;;  %v3697_v31 = vld [vmem:[%s3495_s13 + $0xe0] sm:$0xff] }
  0x24   : > { %v3015_v16 = vpop.eup %3014  ;;  %v509_v17 = vpack.c.bf16 %v478_v8, %v477_v1  ;;  %v479_v3 = vsel %vm319_vm3, %v3504_v5, %v2666_v2  ;;  %v2668_v18 = vadd.f32 -1.0, %v3013_v7  ;;  %3034 = vpow2.f32 %v411_v61 }
  0x25   : > { %v3017_v20 = vpop.eup %3016  ;;  %v480_v4 = vsel %vm320_vm4, %v3512_v9, %v2667_v11  ;;  %v2669_v21 = vadd.f32 -1.0, %v3015_v16  ;;  %3036 = vpow2.f32 %v413_v6  ;;  %v370_v59 = vmin.f32 %v3635_v50, 0.0  ;;  %v3674_v16 = vld [vmem:[%s3495_s13 + $0xc8] sm:$0xff] }
  0x26   : > { %v3019_v23 = vpop.eup %3018  ;;  %2908 = vmatprep.mubr.msk.bf16.mxu0 %vm580_vm2, %v509_v17  ;;  %v510_v26 = vpack.c.bf16 %v480_v4, %v479_v3  ;;  %v481_v5 = vsel %vm321_vm5, %v3515_v10, %v2668_v18  ;;  %v2670_v27 = vadd.f32 -1.0, %v3017_v20  ;;  %3038 = vpow2.f32 %v415_v12  ;;  %v3671_v12 = vld [vmem:[%s3495_s13 + $0xc0] sm:$0xff]  ;;  %v3684_v18 = vld [vmem:[%s3495_s13 + $0xd0] sm:$0xff] }
  0x27   : > { %v3021_v28 = vpop.eup %3020  ;;  %v482_v9 = vsel %vm322_vm6, %v3520_v13, %v2669_v21  ;;  %v2671_v29 = vadd.f32 -1.0, %v3019_v23  ;;  %v368_v10 = vmin.f32 %v3603_v19, 0.0  ;;  %3040 = vpow2.f32 %v417_v41 }
  0x28   : > { %v3023_v32 = vpop.eup %3022  ;;  %2909 = vmatmul.mubr.msk.bf16.vlgmr.msra.gmra.mrb[0].mxu0 %vm580_vm2, %v510_v26  ;;  %v511_v33 = vpack.c.bf16 %v482_v9, %v481_v5  ;;  %v2672_v35 = vadd.f32 -1.0, %v3021_v28  ;;  %v483_v13 = vsel %vm323_vm7, %v3523_v14, %v2670_v27  ;;  %vm330_vm14 = vcmp.gt.f32.partialorder %v3558_v37, 0.0  ;;  %v3692_v27 = vld [vmem:[%s3495_s13 + $0xd8] sm:$0xff] }
  0x29   : > { %v3025_v38 = vpop.eup %3024  ;;  %v484_v39 = vsel %vm324_vm8, %v3531_v22, %v2671_v29  ;;  %v2673_v40 = vadd.f32 -1.0, %v3023_v32  ;;  %v419_v49 = vmul.f32 1.442695, %v368_v10  ;;  %vm331_vm15 = vcmp.gt.f32.partialorder %v3565_v42, 0.0  ;;  %v3701_v10 = vld [vmem:[%s3495_s13 + $0xe8] sm:$0xff] }
  0x2a   : > { %v3027_v44 = vpop.eup %3026  ;;  %2912 = vmatprep.mubr.msk.bf16.mxu0 %vm580_vm2, %v511_v33  ;;  %v485_v45 = vsel %vm325_vm9, %v3535_v24, %v2672_v35  ;;  %v2674_v47 = vadd.f32 -1.0, %v3025_v38  ;;  %v512_v54 = vpack.c.bf16 %v484_v39, %v483_v13  ;;  %vm332_vm0 = vcmp.gt.f32.partialorder %v3570_v46, 0.0 }
  0x2b   : > { %v3029_v14 = vpop.eup %3028  ;;  %v486_v22 = vsel %vm326_vm10, %v3538_v25, %v2673_v40  ;;  %v2675_v51 = vadd.f32 -1.0, %v3027_v44  ;;  %3042 = vpow2.f32 %v419_v49  ;;  %v369_v25 = vmin.f32 %v3628_v43, 0.0 }
  0x2c   : > { %v3031_v53 = vpop.eup %3030  ;;  %v513_v55 = vpack.c.bf16 %v486_v22, %v485_v45  ;;  %v3643_v24 = vsel %vm327_vm11, %v3542_v30, %v2674_v47  ;;  %v2676_v58 = vadd.f32 -1.0, %v3029_v14  ;;  %v3654_v30 = vld [vmem:[%s3495_s13 + $0xb0] sm:$0xff]  ;;  %vm333_vm1 = vcmp.gt.f32.partialorder %v3575_v48, 0.0 }
  0x2d   : > { %v3033_v56 = vpop.eup %3032  ;;  %v488_v57 = vsel %vm328_vm12, %v3550_v34, %v2675_v51  ;;  %v2677_v61 = vadd.f32 -1.0, %v3031_v53  ;;  %v421_v34 = vmul.f32 1.442695, %v369_v25  ;;  %v423_v0 = vmul.f32 1.442695, %v370_v59  ;;  %v3716_v47 = vld [vmem:[%s3495_s13 + $0xf0] sm:$0xff] }
  0x2e   : > { %v3035_v60 = vpop.eup %3034  ;;  %v514_v2 = vpack.c.bf16 %v488_v57, %v3643_v24  ;;  %vm334_vm3 = vcmp.gt.f32.partialorder %v3580_v52, 0.0  ;;  %vm335_vm4 = vcmp.gt.f32.partialorder %v3597_v15, 0.0  ;;  %v489_v7 = vsel %vm329_vm13, %v3555_v36, %v2676_v58  ;;  %v2973_v53 = vld [vmem:[%s4711_s3 + $0x14] ss:$8 sps:$4 sm:$0xff]  }
  0x2f   : > { %v3037_v63 = vpop.eup %3036  ;;  %3044 = vpow2.f32 %v421_v34  ;;  %v371_v11 = vmin.f32 %v3654_v30, 0.0  ;;  %v490_v17 = vsel %vm330_vm14, %v3558_v37, %v2677_v61  ;;  %v372_v36 = vmin.f32 %v3657_v62, 0.0 }
  0x30   : > { %v3039_v1 = vpop.eup %3038  ;;  %2913 = vmatmul.mubr.msk.bf16.gmra.mrb[4].mxu0 %vm580_vm2, %v512_v54  ;;  %v2680_v6 = vadd.f32 -1.0, %v3037_v63  ;;  %3046 = vpow2.f32 %v423_v0  ;;  %v2678_v20 = vadd.f32 -1.0, %v3033_v56  ;;  %v2679_v4 = vadd.f32 -1.0, %v3035_v60  ;;  %v2971_v60 = vld [vmem:[%s4711_s3 + $0x10] ss:$8 sps:$4 sm:$0xff]  }
  0x31   : > { %2916 = vmatprep.mubr.msk.bf16.mxu0 %vm580_vm2, %v513_v55  ;;  %v2681_v8 = vadd.f32 -1.0, %v3039_v1  ;;  %v425_v23 = vmul.f32 1.442695, %v371_v11  ;;  %v427_v5 = vmul.f32 1.442695, %v372_v36  ;;  %v373_v37 = vmin.f32 %v3671_v12, 0.0  ;;  %v3041_v28 = vpop.eup %3040 }
  0x32   : > { %v493_v3 = vsel %vm333_vm1, %v3575_v48, %v2680_v6  ;;  %v374_v48 = vmin.f32 %v3674_v16, 0.0  ;;  %v515_v9 = vpack.c.bf16 %v490_v17, %v489_v7  ;;  %vm336_vm5 = vcmp.gt.f32.partialorder %v3603_v19, 0.0 }
  0x33   : > { %v494_v21 = vsel %vm334_vm3, %v3580_v52, %v2681_v8  ;;  %3048 = vpow2.f32 %v425_v23  ;;  %v375_v29 = vmin.f32 %v3684_v18, 0.0  ;;  %v2682_v32 = vadd.f32 -1.0, %v3041_v28 }
  0x34   : > { %v517_v26 = vpack.c.bf16 %v494_v21, %v493_v3  ;;  %3050 = vpow2.f32 %v427_v5  ;;  %v429_v33 = vmul.f32 1.442695, %v373_v37  ;;  %v431_v35 = vmul.f32 1.442695, %v374_v48 }
  0x35   : > { %v3043_v52 = vpop.eup %3042  ;;  %v491_v38 = vsel %vm331_vm15, %v3565_v42, %v2678_v20  ;;  %v376_v39 = vmin.f32 %v3692_v27, 0.0  ;;  %v433_v40 = vmul.f32 1.442695, %v375_v29  ;;  %v492_v41 = vsel %vm332_vm0, %v3570_v46, %v2679_v4  ;;  %v3724_v46 = vld [vmem:[%s3495_s13 + $0xf8] sm:$0xff] }
  0x36   : > { %2924 = vmatprep.mubr.msk.bf16.mxu1 %vm580_vm2, %v517_v26  ;;  %v2683_v13 = vadd.f32 -1.0, %v3043_v52  ;;  %v495_v44 = vsel %vm335_vm4, %v3597_v15, %v2682_v32  ;;  %3052 = vpow2.f32 %v429_v33  ;;  %v377_v45 = vmin.f32 %v3697_v31, 0.0  ;;  %v2968_v15 = vld [vmem:[%s4711_s3] ss:$8 sps:$4 sm:$0xff]  }
  0x37   : > { %3054 = vpow2.f32 %v431_v35  ;;  %v435_v49 = vmul.f32 1.442695, %v376_v39  ;;  %v378_v14 = vmin.f32 %v3701_v10, 0.0  ;;  %vm337_vm6 = vcmp.gt.f32.partialorder %v3628_v43, 0.0  ;;  %v2974_v39 = vld [vmem:[%s4711_s3 + $0x20] ss:$8 sps:$4 sm:$0xff]  }
  0x38   : > { %2917 = vmatmul.mubr.msk.bf16.gmra.mrb[8].mxu0 %vm580_vm2, %v514_v2  ;;  %v496_v42 = vsel %vm336_vm5, %v3603_v19, %v2683_v13  ;;  %3056 = vpow2.f32 %v433_v40  ;;  %v437_v51 = vmul.f32 1.442695, %v377_v45  ;;  %vm338_vm7 = vcmp.gt.f32.partialorder %v3635_v50, 0.0  ;;  %v2979_v40 = vld [vmem:[%s4711_s3 + $0x34] ss:$8 sps:$4 sm:$0xff]  }
  0x39   : > { %2920 = vmatprep.mubr.msk.bf16.mxu0 %vm580_vm2, %v515_v9  ;;  %v518_v22 = vpack.c.bf16 %v496_v42, %v495_v44  ;;  %v3045_v19 = vpop.eup %3044  ;;  %3058 = vpow2.f32 %v435_v49  ;;  %v439_v54 = vmul.f32 1.442695, %v378_v14  ;;  %v379_v55 = vmin.f32 %v3716_v47, 0.0  ;;  %v2982_v44 = vld [vmem:[%s4711_s3 + $0x44] ss:$8 sps:$4 sm:$0xff]  }
  0x3a   : > { %v3047_v24 = vpop.eup %3046  ;;  %v516_v56 = vpack.c.bf16 %v492_v41, %v491_v38  ;;  %v2684_v57 = vadd.f32 -1.0, %v3045_v19  ;;  %3060 = vpow2.f32 %v437_v51  ;;  %v380_v58 = vmin.f32 %v3724_v46, 0.0  ;;  %v2977_v41 = vld [vmem:[%s4711_s3 + $0x30] ss:$8 sps:$4 sm:$0xff]   ;;  %v2980_v45 = vld [vmem:[%s4711_s3 + $0x40] ss:$8 sps:$4 sm:$0xff]  }
  0x3b   : > { %2925 = vmatmul.mubr.msk.bf16.vlgmr.msra.gmra.mrb[0].mxu1 %vm580_vm2, %v518_v22  ;;  %v2685_v25 = vadd.f32 -1.0, %v3047_v24  ;;  %3062 = vpow2.f32 %v439_v54  ;;  %v441_v59 = vmul.f32 1.442695, %v379_v55  ;;  %vm339_vm8 = vcmp.gt.f32.partialorder %v3654_v30, 0.0  ;;  %v2983_v42 = vld [vmem:[%s4711_s3 + $0x50] ss:$8 sps:$4 sm:$0xff]  }
  0x3c   : > { %1131 = vmatpush1.bf16.msra.mxu1 %v2968_v15  ;;  %v497_v61 = vsel %vm337_vm6, %v3628_v43, %v2684_v57  ;;  %v443_v63 = vmul.f32 1.442695, %v380_v58  ;;  %vm340_vm9 = vcmp.gt.f32.partialorder %v3657_v62, 0.0  ;;  %vm341_vm10 = vcmp.gt.f32.partialorder %v3671_v12, 0.0  ;;  %v3802_v14 = vld [vmem:[%s4710_s2] ss:$0 sm:$0xff] }
  0x3d   : > { %1132 = vmatprep.subr.bf16.mxu1 %v2973_v53  ;;  %v3049_v34 = vpop.eup %3048  ;;  %v498_v0 = vsel %vm338_vm7, %v3635_v50, %v2685_v25  ;;  %3064 = vpow2.f32 %v441_v59  ;;  %vm342_vm11 = vcmp.gt.f32.partialorder %v3674_v16, 0.0  ;;  %vm343_vm12 = vcmp.gt.f32.partialorder %v3684_v18, 0.0 }
  0x3e   : > { %v3051_v1 = vpop.eup %3050  ;;  %v519_v2 = vpack.c.bf16 %v498_v0, %v497_v61  ;;  %v2686_v6 = vadd.f32 -1.0, %v3049_v34  ;;  %3066 = vpow2.f32 %v443_v63  ;;  %vm344_vm13 = vcmp.gt.f32.partialorder %v3692_v27, 0.0 }
  0x3f   : > { %v2687_v7 = vadd.f32 -1.0, %v3051_v1  ;;  %vm345_vm14 = vcmp.gt.f32.partialorder %v3697_v31, 0.0  ;;  %vm346_vm15 = vcmp.gt.f32.partialorder %v3701_v10, 0.0  ;;  %vm347_vm0 = vcmp.gt.f32.partialorder %v3716_v47, 0.0 }
  0x40   : > { %2921 = vmatmul.mubr.msk.bf16.gmra.mrb[12].mxu0 %vm580_vm2, %v516_v56  ;;  %1133 = vmatpush1.bf16.msra.mxu1 %v2971_v60  ;;  %v3053_v43 = vpop.eup %3052  ;;  %v499_v8 = vsel %vm339_vm8, %v3654_v30, %v2686_v6  ;;  %vm348_vm1 = vcmp.gt.f32.partialorder %v3724_v46, 0.0  ;;  %v3428_v49 = vmov 0  }
  0x41   : > { %2928 = vmatprep.mubr.msk.bf16.mxu1 %vm580_vm2, %v519_v2  ;;  %v3055_v50 = vpop.eup %3054  ;;  %v500_v11 = vsel %vm340_vm9, %v3657_v62, %v2687_v7  ;;  %v2688_v17 = vadd.f32 -1.0, %v3053_v43  ;;  %2208 = vmatprep.mubr.bf16.mxu0 %v3428_v49 }
  0x42   : > { %v3057_v3 = vpop.eup %3056  ;;  %v520_v36 = vpack.c.bf16 %v500_v11, %v499_v8  ;;  %v2689_v20 = vadd.f32 -1.0, %v3055_v50 }
  0x43   : > { %v3059_v4 = vpop.eup %3058  ;;  %v501_v21 = vsel %vm341_vm10, %v3671_v12, %v2688_v17  ;;  %v2690_v23 = vadd.f32 -1.0, %v3057_v3 }
  0x44   : > { %v3061_v30 = vpop.eup %3060  ;;  %2929 = vmatmul.mubr.msk.bf16.gmra.mrb[4].mxu1 %vm580_vm2, %v520_v36  ;;  %v502_v26 = vsel %vm342_vm11, %v3674_v16, %v2689_v20  ;;  %v2691_v62 = vadd.f32 -1.0, %v3059_v4 }
  0x45   : > { %v3063_v5 = vpop.eup %3062  ;;  %v521_v37 = vpack.c.bf16 %v502_v26, %v501_v21  ;;  %v503_v48 = vsel %vm343_vm12, %v3684_v18, %v2690_v23  ;;  %v2692_v28 = vadd.f32 -1.0, %v3061_v30 }
  0x46   : > { %v504_v12 = vsel %vm344_vm13, %v3692_v27, %v2691_v62  ;;  %v2693_v9 = vadd.f32 -1.0, %v3063_v5 }
  0x47   : > { %v3065_v29 = vpop.eup %3064  ;;  %2932 = vmatprep.mubr.msk.bf16.mxu1 %vm580_vm2, %v521_v37  ;;  %v505_v52 = vsel %vm345_vm14, %v3697_v31, %v2692_v28  ;;  %v522_v16 = vpack.c.bf16 %v504_v12, %v503_v48 }
  0x48   : > { %v3067_v32 = vpop.eup %3066  ;;  %v506_v33 = vsel %vm346_vm15, %v3701_v10, %v2693_v9  ;;  %v2694_v38 = vadd.f32 -1.0, %v3065_v29  ;;  %v2976_v10 = vld [vmem:[%s4711_s3 + $0x24] ss:$8 sps:$4 sm:$0xff]  }
  0x49   : > { %v523_v35 = vpack.c.bf16 %v506_v33, %v505_v52  ;;  %v2695_v13 = vadd.f32 -1.0, %v3067_v32  ;;  %1134 = vmatprep.subr.bf16.mxu1 %v2976_v10 }
  0x4a   : > { %v507_v18 = vsel %vm347_vm0, %v3716_v47, %v2694_v38  ;;  %1135 = vmatpush1.bf16.msra.mxu1 %v2974_v39  ;;  %v2985_v47 = vld [vmem:[%s4711_s3 + $0x54] ss:$8 sps:$4 sm:$0xff]  }
  0x4b   : > { %v508_v27 = vsel %vm348_vm1, %v3724_v46, %v2695_v13  ;;  %1136 = vmatprep.subr.bf16.mxu1 %v2979_v40 }
  0x4c   : > { %2933 = vmatmul.mubr.msk.bf16.gmra.mrb[8].mxu1 %vm580_vm2, %v522_v16  ;;  %v524_v31 = vpack.c.bf16 %v508_v27, %v507_v18 }
  0x4d   : > { %2936 = vmatprep.mubr.msk.bf16.mxu1 %vm580_vm2, %v523_v35 }
  0x4e   : > { %1137 = vmatpush1.bf16.msra.mxu1 %v2977_v41 }
  0x4f   : > { %1138 = vmatprep.subr.bf16.mxu1 %v2982_v44 }
  0x52   : > { %1139 = vmatpush1.bf16.msra.mxu1 %v2980_v45 }
  0x53   : > { %1140 = vmatprep.subr.bf16.mxu1 %v2985_v47 }
  0x54   : > { %2937 = vmatmul.mubr.msk.bf16.gmra.mrb[12].mxu1 %vm580_vm2, %v524_v31 }
  0x55   : > { %1162 = vmatprep.mubr.bf16.mxu1 %v3428_v49 }
  0x56   : > { %1141 = vmatpush1.bf16.msra.mxu1 %v2983_v42 }
  0xfb   : > { %v2910_v46 = vpop.f32.mrb[0].mxu0 }
  0xfc   : > { %v672_v15 = vadd.f32 %v2910_v46, %v3802_v14  ;;  %v663_v22 = vpop.f32.mrb[1].mxu0 }
  0xfd   : > { %v664_v51 = vadd.f32 %v3802_v14, %v663_v22  ;;  %v2911_v53 = vpop.f32.mrb[2].mxu0 }
  0xfe   : > { %v824_v19 = vmin.f32 %v672_v15, 0.0  ;;  %v675_v54 = vadd.f32 %v2911_v53, %v3802_v14  ;;  %v666_v55 = vpop.f32.mrb[3].mxu0  ;;  %vm792_vm3 = vcmp.gt.f32.partialorder %v672_v15, 0.0 }
  0xff   : > { %v822_v24 = vmin.f32 %v664_v51, 0.0  ;;  %v3808_v56 = vadd.f32 %v3802_v14, %v666_v55  ;;  %vm790_vm4 = vcmp.gt.f32.partialorder %v664_v51, 0.0 }
 0x100   : > { %v858_v57 = vmul.f32 1.442695, %v824_v19  ;;  %v825_v58 = vmin.f32 %v675_v54, 0.0  ;;  %vm793_vm5 = vcmp.gt.f32.partialorder %v675_v54, 0.0 }
 0x101   : > { %v854_v25 = vmul.f32 1.442695, %v822_v24  ;;  %v823_v59 = vmin.f32 %v3808_v56, 0.0  ;;  %vm791_vm6 = vcmp.gt.f32.partialorder %v3808_v56, 0.0 }
 0x102   : > { %3068 = vpow2.f32 %v858_v57  ;;  %v860_v60 = vmul.f32 1.442695, %v825_v58 }
 0x103   : > { %3070 = vpow2.f32 %v854_v25  ;;  %v856_v61 = vmul.f32 1.442695, %v823_v59  ;;  %v2914_v63 = vpop.f32.mrb[4].mxu0 }
 0x104   : > { %3072 = vpow2.f32 %v860_v60  ;;  %v3812_v34 = vadd.f32 %v2914_v63, %v3802_v14  ;;  %v679_v0 = vpop.f32.mrb[5].mxu0 }
 0x105   : > { %3074 = vpow2.f32 %v856_v61  ;;  %v3815_v1 = vadd.f32 %v3802_v14, %v679_v0  ;;  %v2915_v2 = vpop.f32.mrb[6].mxu0 }
 0x106   : > { %v828_v6 = vmin.f32 %v3812_v34, 0.0  ;;  %v3819_v7 = vadd.f32 %v2915_v2, %v3802_v14  ;;  %v682_v43 = vpop.f32.mrb[7].mxu0  ;;  %vm796_vm7 = vcmp.gt.f32.partialorder %v3812_v34, 0.0 }
 0x107   : > { %v826_v8 = vmin.f32 %v3815_v1, 0.0  ;;  %v3823_v50 = vadd.f32 %v3802_v14, %v682_v43  ;;  %vm794_vm8 = vcmp.gt.f32.partialorder %v3815_v1, 0.0 }
 0x108   : > { %v866_v11 = vmul.f32 1.442695, %v828_v6  ;;  %v829_v17 = vmin.f32 %v3819_v7, 0.0  ;;  %vm797_vm9 = vcmp.gt.f32.partialorder %v3819_v7, 0.0 }
 0x109   : > { %v862_v3 = vmul.f32 1.442695, %v826_v8  ;;  %v827_v36 = vmin.f32 %v3823_v50, 0.0  ;;  %vm795_vm10 = vcmp.gt.f32.partialorder %v3823_v50, 0.0 }
 0x10a   : > { %3076 = vpow2.f32 %v866_v11  ;;  %v868_v20 = vmul.f32 1.442695, %v829_v17 }
 0x10b   : > { %3078 = vpow2.f32 %v862_v3  ;;  %v864_v4 = vmul.f32 1.442695, %v827_v36  ;;  %v2918_v21 = vpop.f32.mrb[8].mxu0 }
 0x10c   : > { %v3069_v23 = vpop.eup %3068  ;;  %3080 = vpow2.f32 %v868_v20  ;;  %v3828_v30 = vadd.f32 %v2918_v21, %v3802_v14  ;;  %v695_v26 = vpop.f32.mrb[9].mxu0 }
 0x10d   : > { %v3071_v62 = vpop.eup %3070  ;;  %v2721_v5 = vadd.f32 -1.0, %v3069_v23  ;;  %3082 = vpow2.f32 %v864_v4  ;;  %v3831_v37 = vadd.f32 %v3802_v14, %v695_v26  ;;  %v2919_v48 = vpop.f32.mrb[10].mxu0 }
 0x10e   : > { %v3073_v28 = vpop.eup %3072  ;;  %v2719_v12 = vadd.f32 -1.0, %v3071_v62  ;;  %v832_v9 = vmin.f32 %v3828_v30, 0.0  ;;  %v3835_v29 = vadd.f32 %v2919_v48, %v3802_v14  ;;  %v698_v52 = vpop.f32.mrb[11].mxu0  ;;  %vm800_vm11 = vcmp.gt.f32.partialorder %v3828_v30, 0.0 }
 0x10f   : > { %v3075_v32 = vpop.eup %3074  ;;  %v2722_v16 = vadd.f32 -1.0, %v3073_v28  ;;  %v830_v33 = vmin.f32 %v3831_v37, 0.0  ;;  %v2926_v35 = vpop.f32.mrb[0].mxu1  ;;  %v3840_v38 = vsel %vm792_vm3, %v672_v15, %v2721_v5  ;;  %v3846_v41 = vadd.f32 %v3802_v14, %v698_v52 }
 0x110   : > { %v950_v13 = vsel %vm790_vm4, %v664_v51, %v2719_v12  ;;  %v2720_v18 = vadd.f32 -1.0, %v3075_v32  ;;  %v874_v27 = vmul.f32 1.442695, %v832_v9  ;;  %v727_v31 = vpop.f32.mrb[1].mxu1  ;;  %v833_v40 = vmin.f32 %v3835_v29, 0.0 }
 0x111   : > { %v3842_v10 = vsel %vm793_vm5, %v675_v54, %v2722_v16  ;;  %v870_v39 = vmul.f32 1.442695, %v830_v33  ;;  %v3848_v44 = vpop.f32.mrb[2].mxu1  ;;  %v3854_v42 = vadd.f32 %v2926_v35, %v3802_v14  ;;  %v831_v19 = vmin.f32 %v3846_v41, 0.0 }
 0x112   : > { %v983_v45 = vpack.c.bf16 %v3842_v10, %v3840_v38  ;;  %v951_v47 = vsel %vm791_vm6, %v3808_v56, %v2720_v18  ;;  %3084 = vpow2.f32 %v874_v27  ;;  %v3856_v46 = vpop.f32.mrb[3].mxu1  ;;  %v876_v22 = vmul.f32 1.442695, %v833_v40 }
 0x113   : > { %v982_v15 = vpack.c.bf16 %v951_v47, %v950_v13  ;;  %v2922_v51 = vpop.f32.mrb[12].mxu0  ;;  %3086 = vpow2.f32 %v870_v39  ;;  %v3870_v25 = vadd.f32 %v3802_v14, %v727_v31  ;;  %v872_v61 = vmul.f32 1.442695, %v831_v19 }
 0x114   : > { %v3077_v53 = vpop.eup %3076  ;;  %v3863_v54 = vadd.f32 %v2922_v51, %v3802_v14  ;;  %v711_v55 = vpop.f32.mrb[13].mxu0  ;;  %3088 = vpow2.f32 %v876_v22  ;;  %v840_v2 = vmin.f32 %v3854_v42, 0.0  ;;  %vm798_vm12 = vcmp.gt.f32.partialorder %v3831_v37, 0.0 }
 0x115   : > { %v3079_v24 = vpop.eup %3078  ;;  %v2725_v56 = vadd.f32 -1.0, %v3077_v53  ;;  %2763 = vmatmul.mubr.msk.bf16.vlgmr.msra.gmra.mrb[16].mxu1 %vm580_vm2, %v982_v15  ;;  %v3867_v57 = vadd.f32 %v3802_v14, %v711_v55  ;;  %v2923_v58 = vpop.f32.mrb[14].mxu0  ;;  %3090 = vpow2.f32 %v872_v61  ;;  %v838_v16 = vmin.f32 %v3870_v25, 0.0 }
 0x116   : > { %v3081_v59 = vpop.eup %3080  ;;  %v2723_v60 = vadd.f32 -1.0, %v3079_v24  ;;  %v836_v63 = vmin.f32 %v3863_v54, 0.0  ;;  %v714_v0 = vpop.f32.mrb[15].mxu0  ;;  %1172 = vmatprep.mubr.bf16.mxu1 %v3428_v49  ;;  %v3893_v4 = vadd.f32 %v2923_v58, %v3802_v14  ;;  %v890_v62 = vmul.f32 1.442695, %v840_v2 }
 0x117   : > { %v3083_v6 = vpop.eup %3082  ;;  %v3878_v43 = vsel %vm796_vm7, %v3812_v34, %v2725_v56  ;;  %v2726_v8 = vadd.f32 -1.0, %v3081_v59  ;;  %v834_v11 = vmin.f32 %v3867_v57, 0.0  ;;  %v3896_v21 = vadd.f32 %v3802_v14, %v714_v0  ;;  %v2930_v23 = vpop.f32.mrb[4].mxu1 }
 0x118   : > { %v3885_v17 = vsel %vm794_vm8, %v3815_v1, %v2723_v60  ;;  %v2724_v3 = vadd.f32 -1.0, %v3083_v6  ;;  %v882_v36 = vmul.f32 1.442695, %v836_v63  ;;  %v743_v5 = vpop.f32.mrb[5].mxu1  ;;  %v3910_v33 = vadd.f32 %v3848_v44, %v3802_v14 }
 0x119   : > { %v3890_v20 = vsel %vm797_vm9, %v3819_v7, %v2726_v8  ;;  %v878_v34 = vmul.f32 1.442695, %v834_v11  ;;  %v837_v7 = vmin.f32 %v3893_v4, 0.0  ;;  %v2931_v28 = vpop.f32.mrb[6].mxu1  ;;  %v835_v9 = vmin.f32 %v3896_v21, 0.0 }
 0x11a   : > { %v985_v1 = vpack.c.bf16 %v3890_v20, %v3878_v43  ;;  %v955_v26 = vsel %vm795_vm10, %v3823_v50, %v2724_v3  ;;  %3092 = vpow2.f32 %v882_v36  ;;  %v746_v52 = vpop.f32.mrb[7].mxu1  ;;  %vm801_vm13 = vcmp.gt.f32.partialorder %v3835_v29, 0.0 }
 0x11b   : > { %v984_v48 = vpack.c.bf16 %v955_v26, %v3885_v17  ;;  %3094 = vpow2.f32 %v878_v34  ;;  %v884_v50 = vmul.f32 1.442695, %v837_v7  ;;  %v880_v38 = vmul.f32 1.442695, %v835_v9 }
 0x11c   : > { %v3085_v12 = vpop.eup %3084  ;;  %3096 = vpow2.f32 %v890_v62  ;;  %v3916_v13 = vadd.f32 %v3802_v14, %v3856_v46  ;;  %v3919_v18 = vadd.f32 %v2930_v23, %v3802_v14  ;;  %vm799_vm14 = vcmp.gt.f32.partialorder %v3846_v41, 0.0 }
 0x11d   : > { %v2729_v32 = vadd.f32 -1.0, %v3085_v12  ;;  %2764 = vmatmul.mubr.msk.bf16.gmra.mrb[20].mxu1 %vm580_vm2, %v983_v45  ;;  %v3087_v35 = vpop.eup %3086  ;;  %vm804_vm15 = vcmp.gt.f32.partialorder %v3863_v54, 0.0  ;;  %3098 = vpow2.f32 %v884_v50  ;;  %v886_v31 = vmul.f32 1.442695, %v838_v16 }
 0x11e   : > { %1182 = vmatprep.mubr.bf16.mxu1 %v3428_v49  ;;  %v3089_v27 = vpop.eup %3088  ;;  %vm802_vm0 = vcmp.gt.f32.partialorder %v3867_v57, 0.0  ;;  %3100 = vpow2.f32 %v880_v38  ;;  %v841_v39 = vmin.f32 %v3910_v33, 0.0  ;;  %v2727_v44 = vadd.f32 -1.0, %v3087_v35 }
 0x11f   : > { %v2730_v10 = vadd.f32 -1.0, %v3089_v27  ;;  %v3928_v40 = vsel %vm800_vm11, %v3828_v30, %v2729_v32  ;;  %3102 = vpow2.f32 %v886_v31  ;;  %v839_v45 = vmin.f32 %v3916_v13, 0.0  ;;  %v2934_v47 = vpop.f32.mrb[8].mxu1  ;;  %v3091_v46 = vpop.eup %3090 }
 0x120   : > { %v892_v22 = vmul.f32 1.442695, %v841_v39  ;;  %v844_v51 = vmin.f32 %v3919_v18, 0.0  ;;  %v3938_v53 = vadd.f32 %v3802_v14, %v743_v5  ;;  %v759_v19 = vpop.f32.mrb[9].mxu1  ;;  %v2728_v55 = vadd.f32 -1.0, %v3091_v46 }
 0x121   : > { %v3934_v15 = vsel %vm801_vm13, %v3835_v29, %v2730_v10  ;;  %vm808_vm1 = vcmp.gt.f32.partialorder %v3854_v42, 0.0  ;;  %v888_v24 = vmul.f32 1.442695, %v839_v45  ;;  %v3944_v56 = vadd.f32 %v2931_v28, %v3802_v14  ;;  %v2935_v58 = vpop.f32.mrb[10].mxu1 }
 0x122   : > { %v987_v30 = vpack.c.bf16 %v3934_v15, %v3928_v40  ;;  %vm805_vm3 = vcmp.gt.f32.partialorder %v3893_v4, 0.0  ;;  %3104 = vpow2.f32 %v892_v22  ;;  %v898_v59 = vmul.f32 1.442695, %v844_v51  ;;  %v762_v61 = vpop.f32.mrb[11].mxu1 }
 0x123   : > { %v842_v60 = vmin.f32 %v3938_v53, 0.0  ;;  %v3951_v0 = vsel %vm798_vm12, %v3831_v37, %v2727_v44  ;;  %v3956_v2 = vsel %vm799_vm14, %v3846_v41, %v2728_v55  ;;  %3106 = vpow2.f32 %v888_v24 }
 0x124   : > { %v3093_v29 = vpop.eup %3092  ;;  %v986_v11 = vpack.c.bf16 %v3956_v2, %v3951_v0  ;;  %3108 = vpow2.f32 %v898_v59  ;;  %vm803_vm4 = vcmp.gt.f32.partialorder %v3896_v21, 0.0  ;;  %vm806_vm5 = vcmp.gt.f32.partialorder %v3870_v25, 0.0 }
 0x125   : > { %v3095_v63 = vpop.eup %3094  ;;  %v2733_v6 = vadd.f32 -1.0, %v3093_v29  ;;  %2765 = vmatmul.mubr.msk.bf16.gmra.mrb[24].mxu1 %vm580_vm2, %v984_v48  ;;  %v894_v3 = vmul.f32 1.442695, %v842_v60  ;;  %v845_v37 = vmin.f32 %v3944_v56, 0.0  ;;  %v3966_v41 = vadd.f32 %v3802_v14, %v746_v52 }
 0x126   : > { %v3097_v8 = vpop.eup %3096  ;;  %v2731_v17 = vadd.f32 -1.0, %v3095_v63  ;;  %1192 = vmatprep.mubr.bf16.mxu1 %v3428_v49  ;;  %vm809_vm6 = vcmp.gt.f32.partialorder %v3910_v33, 0.0  ;;  %v3970_v36 = vadd.f32 %v2934_v47, %v3802_v14  ;;  %v3973_v34 = vadd.f32 %v3802_v14, %v759_v19 }
 0x127   : > { %3110 = vpow2.f32 %v894_v3  ;;  %v3099_v23 = vpop.eup %3098  ;;  %v3978_v26 = vsel %vm804_vm15, %v3863_v54, %v2733_v6  ;;  %vm807_vm7 = vcmp.gt.f32.partialorder %v3916_v13, 0.0  ;;  %v900_v62 = vmul.f32 1.442695, %v845_v37  ;;  %v2938_v48 = vpop.f32.mrb[12].mxu1 }
 0x128   : > { %v843_v5 = vmin.f32 %v3966_v41, 0.0  ;;  %v3101_v7 = vpop.eup %3100  ;;  %v3985_v28 = vsel %vm802_vm0, %v3867_v57, %v2731_v17  ;;  %v2734_v12 = vadd.f32 -1.0, %v3099_v23  ;;  %v2737_v9 = vadd.f32 -1.0, %v3097_v8  ;;  %v775_v32 = vpop.f32.mrb[13].mxu1 }
 0x129   : > { %v848_v52 = vmin.f32 %v3970_v36, 0.0  ;;  %v3103_v50 = vpop.eup %3102  ;;  %v2732_v54 = vadd.f32 -1.0, %v3101_v7  ;;  %3112 = vpow2.f32 %v900_v62  ;;  %v846_v35 = vmin.f32 %v3973_v34, 0.0  ;;  %v2939_v38 = vpop.f32.mrb[14].mxu1 }
 0x12a   : > { %v896_v16 = vmul.f32 1.442695, %v843_v5  ;;  %v3992_v27 = vsel %vm805_vm3, %v3893_v4, %v2734_v12  ;;  %v2735_v31 = vadd.f32 -1.0, %v3103_v50  ;;  %v3995_v10 = vadd.f32 %v2935_v58, %v3802_v14  ;;  %v778_v39 = vpop.f32.mrb[15].mxu1 }
 0x12b   : > { %v906_v57 = vmul.f32 1.442695, %v848_v52  ;;  %v989_v44 = vpack.c.bf16 %v3992_v27, %v3978_v26  ;;  %v4002_v45 = vsel %vm803_vm4, %v3896_v21, %v2732_v54  ;;  %v902_v4 = vmul.f32 1.442695, %v846_v35 }
 0x12c   : > { %3114 = vpow2.f32 %v896_v16  ;;  %v3105_v47 = vpop.eup %3104  ;;  %v988_v46 = vpack.c.bf16 %v4002_v45, %v3985_v28  ;;  %v4013_v22 = vsel %vm808_vm1, %v3854_v42, %v2737_v9  ;;  %v4018_v21 = vsel %vm806_vm5, %v3870_v25, %v2735_v31 }
 0x12d   : > { %2766 = vmatmul.mubr.msk.bf16.gmra.mrb[28].mxu1 %vm580_vm2, %v985_v1  ;;  %3116 = vpow2.f32 %v906_v57  ;;  %v3107_v43 = vpop.eup %3106  ;;  %v2738_v20 = vadd.f32 -1.0, %v3105_v47  ;;  %v849_v1 = vmin.f32 %v3995_v10, 0.0  ;;  %v4023_v51 = vadd.f32 %v3802_v14, %v762_v61 }
 0x12e   : > { %1202 = vmatprep.mubr.bf16.mxu1 %v3428_v49  ;;  %3118 = vpow2.f32 %v902_v4  ;;  %v3109_v19 = vpop.eup %3108  ;;  %v2736_v55 = vadd.f32 -1.0, %v3107_v43  ;;  %v4026_v42 = vadd.f32 %v2938_v48, %v3802_v14  ;;  %v4029_v24 = vadd.f32 %v3802_v14, %v775_v32 }
 0x12f   : > { %v4032_v25 = vadd.f32 %v2939_v38, %v3802_v14  ;;  %v4037_v58 = vsel %vm809_vm6, %v3910_v33, %v2738_v20  ;;  %v2741_v29 = vadd.f32 -1.0, %v3109_v19  ;;  %v908_v59 = vmul.f32 1.442695, %v849_v1 }
 0x130   : > { %v991_v61 = vpack.c.bf16 %v4037_v58, %v4013_v22  ;;  %v4044_v63 = vsel %vm807_vm7, %v3916_v13, %v2736_v55  ;;  %vm812_vm8 = vcmp.gt.f32.partialorder %v3919_v18, 0.0  ;;  %v847_v6 = vmin.f32 %v4023_v51, 0.0 }
 0x131   : > { %v3111_v60 = vpop.eup %3110  ;;  %v990_v8 = vpack.c.bf16 %v4044_v63, %v4018_v21  ;;  %vm810_vm9 = vcmp.gt.f32.partialorder %v3938_v53, 0.0  ;;  %3120 = vpow2.f32 %v908_v59  ;;  %v852_v3 = vmin.f32 %v4026_v42, 0.0 }
 0x132   : > { %v2739_v33 = vadd.f32 -1.0, %v3111_v60  ;;  %v904_v17 = vmul.f32 1.442695, %v847_v6  ;;  %v850_v37 = vmin.f32 %v4029_v24, 0.0  ;;  %v4058_v13 = vsel %vm812_vm8, %v3919_v18, %v2741_v29 }
 0x133   : > { %v3113_v23 = vpop.eup %3112  ;;  %vm813_vm10 = vcmp.gt.f32.partialorder %v3944_v56, 0.0  ;;  %v853_v62 = vmin.f32 %v4032_v25, 0.0  ;;  %v779_v5 = vadd.f32 %v3802_v14, %v778_v39  ;;  %v914_v7 = vmul.f32 1.442695, %v852_v3 }
 0x134   : > { %v2742_v48 = vadd.f32 -1.0, %v3113_v23  ;;  %3122 = vpow2.f32 %v904_v17  ;;  %v910_v12 = vmul.f32 1.442695, %v850_v37  ;;  %vm811_vm11 = vcmp.gt.f32.partialorder %v3966_v41, 0.0 }
 0x135   : > { %2767 = vmatmul.mubr.msk.bf16.gmra.mrb[32].mxu1 %vm580_vm2, %v986_v11  ;;  %v916_v0 = vmul.f32 1.442695, %v853_v62  ;;  %v851_v2 = vmin.f32 %v779_v5, 0.0  ;;  %v970_v18 = vsel %vm810_vm9, %v3938_v53, %v2739_v33  ;;  %3124 = vpow2.f32 %v914_v7 }
 0x136   : > { %1212 = vmatprep.mubr.bf16.mxu1 %v3428_v49  ;;  %v3115_v9 = vpop.eup %3114  ;;  %v973_v52 = vsel %vm813_vm10, %v3944_v56, %v2742_v48  ;;  %3126 = vpow2.f32 %v910_v12  ;;  %vm816_vm12 = vcmp.gt.f32.partialorder %v3970_v36, 0.0  ;;  %vm817_vm13 = vcmp.gt.f32.partialorder %v3995_v10, 0.0 }
 0x137   : > { %v3117_v11 = vpop.eup %3116  ;;  %v2740_v32 = vadd.f32 -1.0, %v3115_v9  ;;  %v993_v50 = vpack.c.bf16 %v973_v52, %v4058_v13  ;;  %v912_v54 = vmul.f32 1.442695, %v851_v2  ;;  %3128 = vpow2.f32 %v916_v0 }
 0x138   : > { %v3119_v14 = vpop.eup %3118  ;;  %v2745_v35 = vadd.f32 -1.0, %v3117_v11  ;;  %vm814_vm14 = vcmp.gt.f32.partialorder %v3973_v34, 0.0  ;;  %vm815_vm15 = vcmp.gt.f32.partialorder %v4023_v51, 0.0  ;;  %vm820_vm0 = vcmp.gt.f32.partialorder %v4026_v42, 0.0 }
 0x139   : > { %v971_v16 = vsel %vm811_vm11, %v3966_v41, %v2740_v32  ;;  %3130 = vpow2.f32 %v912_v54  ;;  %v2743_v53 = vadd.f32 -1.0, %v3119_v14  ;;  %vm818_vm1 = vcmp.gt.f32.partialorder %v4029_v24, 0.0  ;;  %v2988_v32 = vld [vmem:[%s4713_s5 + $0x4] ss:$8 sps:$4 sm:$0xff]   ;;  %v2986_v54 = vld [vmem:[%s4713_s5] ss:$8 sps:$4 sm:$0xff]  }
 0x13a   : > { %v992_v38 = vpack.c.bf16 %v971_v16, %v970_v18  ;;  %v976_v56 = vsel %vm816_vm12, %v3970_v36, %v2745_v35  ;;  %vm821_vm3 = vcmp.gt.f32.partialorder %v4032_v25, 0.0  ;;  %vm819_vm4 = vcmp.gt.f32.partialorder %v779_v5, 0.0  ;;  %2176 = vmatprep.subr.bf16.mxu0 %v2988_v32 }
 0x13b   : > { %v3121_v31 = vpop.eup %3120  ;;  %v974_v4 = vsel %vm814_vm14, %v3973_v34, %v2743_v53  ;;  %v1012_v26 = vlaneseq  ;;  %2177 = vmatpush1.bf16.msra.mxu0 %v2986_v54  ;;  %vm1899_vm5 = vcmask 261120   ;;  %vm2561_vm6 = vcmask 1043456  }
 0x13c   : > { %v2746_v41 = vadd.f32 -1.0, %v3121_v31  ;;  %vm2562_vm7 = vcmask 523268  }
 0x13d   : > { %2768 = vmatmul.mubr.msk.bf16.gmra.mrb[36].mxu1 %vm580_vm2, %v987_v30  ;;  %v4121_v28 = vshrl.u32 %v1012_v26, 7 }
 0x13e   : > { %1222 = vmatprep.mubr.bf16.mxu1 %v3428_v49  ;;  %v3123_v57 = vpop.eup %3122  ;;  %v977_v39 = vsel %vm817_vm13, %v3995_v10, %v2746_v41 }
 0x13f   : > { %v995_v40 = vpack.c.bf16 %v977_v39, %v976_v56  ;;  %v2744_v15 = vadd.f32 -1.0, %v3123_v57  ;;  %v3125_v30 = vpop.eup %3124  ;;  %v1014_v27 = vsub.s32 0, %v4121_v28  ;;  %v1018_v45 = vsub.s32 1, %v4121_v28  ;;  %v2991_v56 = vld [vmem:[%s4713_s5 + $0x14] ss:$8 sps:$4 sm:$0xff]  }
 0x140   : > { %v3127_v47 = vpop.eup %3126  ;;  %v2749_v20 = vadd.f32 -1.0, %v3125_v30  ;;  %v2989_v39 = vld [vmem:[%s4713_s5 + $0x10] ss:$8 sps:$4 sm:$0xff]   ;;  %2178 = vmatprep.subr.bf16.mxu0 %v2991_v56 }
 0x141   : > { %v975_v43 = vsel %vm815_vm15, %v4023_v51, %v2744_v15  ;;  %v3129_v36 = vpop.eup %3128  ;;  %v2747_v19 = vadd.f32 -1.0, %v3127_v47  ;;  %2179 = vmatpush1.bf16.msra.mxu0 %v2989_v39  ;;  %v3003_v39 = vld [vmem:[%s4713_s5 + $0x54] ss:$8 sps:$4 sm:$0xff]  }
 0x142   : > { %v994_v1 = vpack.c.bf16 %v975_v43, %v974_v4  ;;  %v980_v34 = vsel %vm820_vm0, %v4026_v42, %v2749_v20  ;;  %v2750_v55 = vadd.f32 -1.0, %v3129_v36 }
 0x143   : > { %v3131_v10 = vpop.eup %3130  ;;  %v978_v51 = vsel %vm818_vm1, %v4029_v24, %v2747_v19 }
 0x144   : > { %v2748_v29 = vadd.f32 -1.0, %v3131_v10  ;;  %v981_v59 = vsel %vm821_vm3, %v4032_v25, %v2750_v55  ;;  %v2994_v55 = vld [vmem:[%s4713_s5 + $0x24] ss:$8 sps:$4 sm:$0xff]  }
 0x145   : > { %2769 = vmatmul.mubr.msk.bf16.gmra.mrb[40].mxu1 %vm580_vm2, %v988_v46  ;;  %v997_v60 = vpack.c.bf16 %v981_v59, %v980_v34  ;;  %2180 = vmatprep.subr.bf16.mxu0 %v2994_v55 }
 0x146   : > { %1232 = vmatprep.mubr.bf16.mxu1 %v3428_v49  ;;  %v979_v6 = vsel %vm819_vm4, %v779_v5, %v2748_v29 }
 0x147   : > { %v996_v33 = vpack.c.bf16 %v979_v6, %v978_v51  ;;  %v2992_v6 = vld [vmem:[%s4713_s5 + $0x20] ss:$8 sps:$4 sm:$0xff]  }
 0x148   : > { %2181 = vmatpush1.bf16.msra.mxu0 %v2992_v6 }
 0x14d   : > { %2770 = vmatmul.mubr.msk.bf16.gmra.mrb[44].mxu1 %vm580_vm2, %v989_v44  ;;  %v1010_v44 = vld [vmem:[%s4712_s4] sm:$0x3] }
 0x14e   : > { %1242 = vmatprep.mubr.bf16.mxu1 %v3428_v49  ;;  %v4130_v46 = vrot.slane %v1010_v44, %v1014_v27  ;;  %v4134_v22 = vrot.slane %v1010_v44, %v1018_v45 }
 0x155   : > { %2771 = vmatmul.mubr.msk.bf16.gmra.mrb[48].mxu1 %vm580_vm2, %v990_v8 }
 0x156   : > { %1252 = vmatprep.mubr.bf16.mxu1 %v3428_v49 }
 0x15d   : > { %2772 = vmatmul.mubr.msk.bf16.gmra.mrb[52].mxu1 %vm580_vm2, %v991_v61 }
 0x15e   : > { %1262 = vmatprep.mubr.bf16.mxu1 %v3428_v49 }
 0x165   : > { %2773 = vmatmul.mubr.msk.bf16.gmra.mrb[56].mxu1 %vm580_vm2, %v992_v38 }
 0x166   : > { %1272 = vmatprep.mubr.bf16.mxu1 %v3428_v49 }
 0x16d   : > { %2774 = vmatmul.mubr.msk.bf16.gmra.mrb[60].mxu1 %vm580_vm2, %v993_v50 }
 0x16e   : > { %1282 = vmatprep.mubr.bf16.mxu1 %v3428_v49 }
 0x175   : > { %2775 = vmatmul.mubr.msk.bf16.gmra.mrb[64].mxu1 %vm580_vm2, %v994_v1 }
 0x176   : > { %1292 = vmatprep.mubr.bf16.mxu1 %v3428_v49 }
 0x17d   : > { %2776 = vmatmul.mubr.msk.bf16.gmra.mrb[68].mxu1 %vm580_vm2, %v995_v40 }
 0x17e   : > { %1302 = vmatprep.mubr.bf16.mxu1 %v3428_v49 }
 0x185   : > { %2777 = vmatmul.mubr.msk.bf16.gmra.mrb[72].mxu1 %vm580_vm2, %v996_v33 }
 0x186   : > { %1312 = vmatprep.mubr.bf16.mxu1 %v3428_v49 }
 0x18d   : > { %2778 = vmatmul.mubr.msk.bf16.gmra.mrb[76].mxu1 %vm580_vm2, %v997_v60 }
 0x1e8   : > { %v1164_v21 = vpop.f32.mrb[16].mxu1 }
 0x1e9   : > { %v4137_v42 = vadd.f32 %v1164_v21, %v4130_v46  ;;  %v1166_v24 = vpop.f32.mrb[17].mxu1  ;;  %v2995_v21 = vld [vmem:[%s4713_s5 + $0x30] ss:$8 sps:$4 sm:$0xff]  }
 0x1ea   : > { %v1167_v25 = vadd.f32 %v1166_v24, %v4134_v22  ;;  %v1168_v58 = vpop.f32.mrb[18].mxu1 }
 0x1eb   : > { %v1323_v61 = vsub.f32 0.0, %v4137_v42  ;;  %v4142_v63 = vadd.f32 %v1168_v58, %v4130_v46  ;;  %v1170_v8 = vpop.f32.mrb[19].mxu1  ;;  %v2997_v58 = vld [vmem:[%s4713_s5 + $0x34] ss:$8 sps:$4 sm:$0xff]  }
 0x1ec   : > { %v1324_v17 = vsub.f32 0.0, %v1167_v25  ;;  %v1171_v3 = vadd.f32 %v1170_v8, %v4134_v22  ;;  %v3000_v8 = vld [vmem:[%s4713_s5 + $0x44] ss:$8 sps:$4 sm:$0xff]   ;;  %2182 = vmatprep.subr.bf16.mxu0 %v2997_v58 }
 0x1ed   : > { %v1387_v37 = vmul.f32 1.442695, %v1323_v61  ;;  %v1325_v23 = vsub.f32 0.0, %v4142_v63  ;;  %2183 = vmatpush1.bf16.msra.mxu0 %v2995_v21 }
 0x1ee   : > { %v1389_v13 = vmul.f32 1.442695, %v1324_v17  ;;  %v1326_v62 = vsub.f32 0.0, %v1171_v3  ;;  %2184 = vmatprep.subr.bf16.mxu0 %v3000_v8 }
 0x1ef   : > { %3132 = vpow2.f32 %v1387_v37  ;;  %v1391_v5 = vmul.f32 1.442695, %v1325_v23 }
 0x1f0   : > { %3134 = vpow2.f32 %v1389_v13  ;;  %v1393_v48 = vmul.f32 1.442695, %v1326_v62  ;;  %v1174_v7 = vpop.f32.mrb[20].mxu1 }
 0x1f1   : > { %3136 = vpow2.f32 %v1391_v5  ;;  %v4147_v12 = vadd.f32 %v1174_v7, %v4130_v46  ;;  %v1176_v9 = vpop.f32.mrb[21].mxu1 }
 0x1f2   : > { %3138 = vpow2.f32 %v1393_v48  ;;  %v1177_v0 = vadd.f32 %v1176_v9, %v4134_v22  ;;  %v1178_v2 = vpop.f32.mrb[22].mxu1  ;;  %v2998_v9 = vld [vmem:[%s4713_s5 + $0x40] ss:$8 sps:$4 sm:$0xff]  }
 0x1f3   : > { %v1327_v11 = vsub.f32 0.0, %v4147_v12  ;;  %v4152_v18 = vadd.f32 %v1178_v2, %v4130_v46  ;;  %v1180_v52 = vpop.f32.mrb[23].mxu1  ;;  %2185 = vmatpush1.bf16.msra.mxu0 %v2998_v9 }
 0x1f4   : > { %v1328_v14 = vsub.f32 0.0, %v1177_v0  ;;  %v1181_v50 = vadd.f32 %v1180_v52, %v4134_v22  ;;  %2186 = vmatprep.subr.bf16.mxu0 %v3003_v39 }
 0x1f5   : > { %v1395_v16 = vmul.f32 1.442695, %v1327_v11  ;;  %v1329_v35 = vsub.f32 0.0, %v4152_v18 }
 0x1f6   : > { %v1397_v38 = vmul.f32 1.442695, %v1328_v14  ;;  %v1330_v31 = vsub.f32 0.0, %v1181_v50 }
 0x1f7   : > { %3140 = vpow2.f32 %v1395_v16  ;;  %v1399_v53 = vmul.f32 1.442695, %v1329_v35 }
 0x1f8   : > { %3142 = vpow2.f32 %v1397_v38  ;;  %v1401_v41 = vmul.f32 1.442695, %v1330_v31  ;;  %v1184_v57 = vpop.f32.mrb[24].mxu1 }
 0x1f9   : > { %v3133_v4 = vpop.eup %3132  ;;  %3144 = vpow2.f32 %v1399_v53  ;;  %v4169_v40 = vadd.f32 %v1184_v57, %v4130_v46  ;;  %v1186_v15 = vpop.f32.mrb[25].mxu1  ;;  %v3001_v53 = vld [vmem:[%s4713_s5 + $0x50] ss:$8 sps:$4 sm:$0xff]  }
 0x1fa   : > { %v3135_v30 = vpop.eup %3134  ;;  %v1515_v47 = vadd.f32 1.0, %v3133_v4  ;;  %3146 = vpow2.f32 %v1401_v41  ;;  %v1187_v43 = vadd.f32 %v1186_v15, %v4134_v22  ;;  %v1188_v20 = vpop.f32.mrb[26].mxu1  ;;  %2187 = vmatpush1.bf16.msra.mxu0 %v3001_v53 }
 0x1fb   : > { %v3137_v36 = vpop.eup %3136  ;;  %v1516_v1 = vadd.f32 1.0, %v3135_v30  ;;  %v1331_v19 = vsub.f32 0.0, %v4169_v40  ;;  %v4174_v10 = vadd.f32 %v1188_v20, %v4130_v46  ;;  %v1190_v34 = vpop.f32.mrb[27].mxu1 }
 0x1fc   : > { %v3139_v51 = vpop.eup %3138  ;;  %3148 = vrcp.f32 %v1515_v47  ;;  %v1517_v29 = vadd.f32 1.0, %v3137_v36  ;;  %v1332_v59 = vsub.f32 0.0, %v1187_v43  ;;  %v1191_v60 = vadd.f32 %v1190_v34, %v4134_v22 }
 0x1fd   : > { %3150 = vrcp.f32 %v1516_v1  ;;  %v1518_v33 = vadd.f32 1.0, %v3139_v51  ;;  %v1403_v26 = vmul.f32 1.442695, %v1331_v19  ;;  %v1333_v44 = vsub.f32 0.0, %v4174_v10 }
 0x1fe   : > { %3152 = vrcp.f32 %v1517_v29  ;;  %v1405_v24 = vmul.f32 1.442695, %v1332_v59  ;;  %v1334_v25 = vsub.f32 0.0, %v1191_v60 }
 0x1ff   : > { %3154 = vrcp.f32 %v1518_v33  ;;  %v1407_v61 = vmul.f32 1.442695, %v1333_v44 }
 0x200   : > { %3156 = vpow2.f32 %v1403_v26  ;;  %v1409_v17 = vmul.f32 1.442695, %v1334_v25  ;;  %v1194_v3 = vpop.f32.mrb[28].mxu1 }
 0x201   : > { %v3141_v37 = vpop.eup %3140  ;;  %3158 = vpow2.f32 %v1405_v24  ;;  %v4194_v23 = vadd.f32 %v1194_v3, %v4130_v46  ;;  %v1196_v13 = vpop.f32.mrb[29].mxu1 }
 0x202   : > { %v3143_v62 = vpop.eup %3142  ;;  %v1519_v5 = vadd.f32 1.0, %v3141_v37  ;;  %3160 = vpow2.f32 %v1407_v61  ;;  %v1197_v48 = vadd.f32 %v1196_v13, %v4134_v22  ;;  %v1198_v7 = vpop.f32.mrb[30].mxu1 }
 0x203   : > { %v3145_v0 = vpop.eup %3144  ;;  %v1520_v2 = vadd.f32 1.0, %v3143_v62  ;;  %3162 = vpow2.f32 %v1409_v17  ;;  %v1335_v11 = vsub.f32 0.0, %v4194_v23  ;;  %v4202_v52 = vadd.f32 %v1198_v7, %v4130_v46  ;;  %v1200_v32 = vpop.f32.mrb[31].mxu1 }
 0x204   : > { %v3147_v14 = vpop.eup %3146  ;;  %3164 = vrcp.f32 %v1519_v5  ;;  %v1521_v50 = vadd.f32 1.0, %v3145_v0  ;;  %v1336_v54 = vsub.f32 0.0, %v1197_v48  ;;  %v1201_v16 = vadd.f32 %v1200_v32, %v4134_v22 }
 0x205   : > { %3166 = vrcp.f32 %v1520_v2  ;;  %v1522_v35 = vadd.f32 1.0, %v3147_v14  ;;  %v1411_v38 = vmul.f32 1.442695, %v1335_v11  ;;  %v1337_v31 = vsub.f32 0.0, %v4202_v52 }
 0x206   : > { %v3149_v56 = vpop.eup %3148  ;;  %3168 = vrcp.f32 %v1521_v50  ;;  %v1413_v41 = vmul.f32 1.442695, %v1336_v54  ;;  %v1338_v57 = vsub.f32 0.0, %v1201_v16 }
 0x207   : > { %v3151_v4 = vpop.eup %3150  ;;  %3170 = vrcp.f32 %v1522_v35  ;;  %v1415_v15 = vmul.f32 1.442695, %v1337_v31  ;;  %1771 = vrot.lane.b32.xlu0 %v3149_v56, %s3429_s15 }
 0x208   : > { %v3153_v30 = vpop.eup %3152  ;;  %3172 = vpow2.f32 %v1411_v38  ;;  %v1417_v47 = vmul.f32 1.442695, %v1338_v57  ;;  %v1204_v43 = vpop.f32.mrb[32].mxu1 }
 0x209   : > { %v3155_v20 = vpop.eup %3154  ;;  %3174 = vpow2.f32 %v1413_v41  ;;  %v4214_v36 = vadd.f32 %v1204_v43, %v4130_v46  ;;  %v1206_v1 = vpop.f32.mrb[33].mxu1  ;;  %1775 = vrot.lane.b32.xlu1 %v3153_v30, %s3429_s15 }
 0x20a   : > { %v3157_v19 = vpop.eup %3156  ;;  %3176 = vpow2.f32 %v1415_v15  ;;  %v1207_v34 = vadd.f32 %v1206_v1, %v4134_v22  ;;  %v1208_v55 = vpop.f32.mrb[34].mxu1 }
 0x20b   : > { %v3159_v51 = vpop.eup %3158  ;;  %v1523_v29 = vadd.f32 1.0, %v3157_v19  ;;  %3178 = vpow2.f32 %v1417_v47  ;;  %v1339_v59 = vsub.f32 0.0, %v4214_v36  ;;  %v4220_v60 = vadd.f32 %v1208_v55, %v4130_v46  ;;  %v1210_v6 = vpop.f32.mrb[35].mxu1  ;;  %1773 = vrot.lane.b32.xlu0 %v3151_v4, %s3429_s15 }
 0x20c   : > { %v3161_v33 = vpop.eup %3160  ;;  %v1524_v26 = vadd.f32 1.0, %v3159_v51  ;;  %v1340_v44 = vsub.f32 0.0, %v1207_v34  ;;  %v1211_v21 = vadd.f32 %v1210_v6, %v4134_v22 }
 0x20d   : > { %v3163_v24 = vpop.eup %3162  ;;  %3180 = vrcp.f32 %v1523_v29  ;;  %v1525_v25 = vadd.f32 1.0, %v3161_v33  ;;  %v1419_v58 = vmul.f32 1.442695, %v1339_v59  ;;  %v1341_v61 = vsub.f32 0.0, %v4220_v60  ;;  %1777 = vrot.lane.b32.xlu1 %v3155_v20, %s3429_s15 }
 0x20e   : > { %v3165_v8 = vpop.eup %3164  ;;  %3182 = vrcp.f32 %v1524_v26  ;;  %v1526_v17 = vadd.f32 1.0, %v3163_v24  ;;  %v1421_v3 = vmul.f32 1.442695, %v1340_v44  ;;  %v1342_v37 = vsub.f32 0.0, %v1211_v21 }
 0x20f   : > { %v3167_v13 = vpop.eup %3166  ;;  %3184 = vrcp.f32 %v1525_v25  ;;  %v1423_v62 = vmul.f32 1.442695, %v1341_v61  ;;  %1779 = vrot.lane.b32.xlu0 %v3165_v8, %s3429_s15 }
 0x210   : > { %v3169_v5 = vpop.eup %3168  ;;  %3186 = vrcp.f32 %v1526_v17  ;;  %v1425_v48 = vmul.f32 1.442695, %v1342_v37  ;;  %v1214_v7 = vpop.f32.mrb[36].mxu1 }
 0x211   : > { %v3171_v9 = vpop.eup %3170  ;;  %3188 = vpow2.f32 %v1419_v58  ;;  %v4228_v0 = vadd.f32 %v1214_v7, %v4130_v46  ;;  %v1216_v2 = vpop.f32.mrb[37].mxu1  ;;  %1781 = vrot.lane.b32.xlu1 %v3167_v13, %s3429_s15 }
 0x212   : > { %v3173_v11 = vpop.eup %3172  ;;  %3190 = vpow2.f32 %v1421_v3  ;;  %v1217_v32 = vadd.f32 %v1216_v2, %v4134_v22  ;;  %v1218_v14 = vpop.f32.mrb[38].mxu1 }
 0x213   : > { %v3175_v50 = vpop.eup %3174  ;;  %v1527_v54 = vadd.f32 1.0, %v3173_v11  ;;  %3192 = vpow2.f32 %v1423_v62  ;;  %v1343_v16 = vsub.f32 0.0, %v4228_v0  ;;  %v4234_v35 = vadd.f32 %v1218_v14, %v4130_v46  ;;  %v1220_v38 = vpop.f32.mrb[39].mxu1  ;;  %1783 = vrot.lane.b32.xlu0 %v3169_v5, %s3429_s15 }
 0x214   : > { %v3177_v31 = vpop.eup %3176  ;;  %v1528_v53 = vadd.f32 1.0, %v3175_v50  ;;  %3194 = vpow2.f32 %v1425_v48  ;;  %v1344_v56 = vsub.f32 0.0, %v1217_v32  ;;  %v1221_v41 = vadd.f32 %v1220_v38, %v4134_v22 }
 0x215   : > { %v3179_v57 = vpop.eup %3178  ;;  %3196 = vrcp.f32 %v1527_v54  ;;  %v1529_v39 = vadd.f32 1.0, %v3177_v31  ;;  %v1427_v4 = vmul.f32 1.442695, %v1343_v16  ;;  %v1345_v15 = vsub.f32 0.0, %v4234_v35  ;;  %1785 = vrot.lane.b32.xlu1 %v3171_v9, %s3429_s15 }
 0x216   : > { %3198 = vrcp.f32 %v1528_v53  ;;  %v1530_v30 = vadd.f32 1.0, %v3179_v57  ;;  %v1429_v47 = vmul.f32 1.442695, %v1344_v56  ;;  %v1346_v43 = vsub.f32 0.0, %v1221_v41 }
 0x217   : > { %v3181_v20 = vpop.eup %3180  ;;  %3200 = vrcp.f32 %v1529_v39  ;;  %v1431_v1 = vmul.f32 1.442695, %v1345_v15 }
 0x218   : > { %v3183_v19 = vpop.eup %3182  ;;  %3202 = vrcp.f32 %v1530_v30  ;;  %v1433_v34 = vmul.f32 1.442695, %v1346_v43  ;;  %1787 = vrot.lane.b32.xlu0 %v3181_v20, %s3429_s15  ;;  %v1224_v55 = vpop.f32.mrb[40].mxu1 }
 0x219   : > { %v3185_v51 = vpop.eup %3184  ;;  %3204 = vpow2.f32 %v1427_v4  ;;  %v4242_v29 = vadd.f32 %v1224_v55, %v4130_v46  ;;  %v1226_v59 = vpop.f32.mrb[41].mxu1  ;;  %1789 = vrot.lane.b32.xlu1 %v3183_v19, %s3429_s15 }
 0x21a   : > { %v3187_v6 = vpop.eup %3186  ;;  %3206 = vpow2.f32 %v1429_v47  ;;  %v1227_v33 = vadd.f32 %v1226_v59, %v4134_v22  ;;  %v1228_v26 = vpop.f32.mrb[42].mxu1 }
 0x21b   : > { %v3189_v44 = vpop.eup %3188  ;;  %3208 = vpow2.f32 %v1431_v1  ;;  %v1347_v21 = vsub.f32 0.0, %v4242_v29  ;;  %v4248_v24 = vadd.f32 %v1228_v26, %v4130_v46  ;;  %v1230_v25 = vpop.f32.mrb[43].mxu1 }
 0x21c   : > { %v3191_v58 = vpop.eup %3190  ;;  %v1531_v61 = vadd.f32 1.0, %v3189_v44  ;;  %3210 = vpow2.f32 %v1433_v34  ;;  %v1348_v8 = vsub.f32 0.0, %v1227_v33  ;;  %v1231_v17 = vadd.f32 %v1230_v25, %v4134_v22  ;;  %1791 = vrot.lane.b32.xlu0 %v3185_v51, %s3429_s15 }
 0x21d   : > { %v3193_v3 = vpop.eup %3192  ;;  %v1532_v37 = vadd.f32 1.0, %v3191_v58  ;;  %v1349_v13 = vsub.f32 0.0, %v4248_v24  ;;  %1793 = vrot.lane.b32.xlu1 %v3187_v6, %s3429_s15  ;;  %v1435_v48 = vmul.f32 1.442695, %v1347_v21 }
 0x21e   : > { %v3195_v62 = vpop.eup %3194  ;;  %3212 = vrcp.f32 %v1531_v61  ;;  %v1533_v5 = vadd.f32 1.0, %v3193_v3  ;;  %v1350_v7 = vsub.f32 0.0, %v1231_v17  ;;  %v1437_v11 = vmul.f32 1.442695, %v1348_v8 }
 0x21f   : > { %v3197_v9 = vpop.eup %3196  ;;  %3214 = vrcp.f32 %v1532_v37  ;;  %v1534_v2 = vadd.f32 1.0, %v3195_v62  ;;  %v1439_v14 = vmul.f32 1.442695, %v1349_v13 }
 0x220   : > { %v3199_v32 = vpop.eup %3198  ;;  %3216 = vrcp.f32 %v1533_v5  ;;  %1795 = vrot.lane.b32.xlu0 %v3197_v9, %s3429_s15  ;;  %v1234_v50 = vpop.f32.mrb[44].mxu1  ;;  %v1441_v16 = vmul.f32 1.442695, %v1350_v7 }
 0x221   : > { %v3201_v54 = vpop.eup %3200  ;;  %3218 = vrcp.f32 %v1534_v2  ;;  %v4256_v38 = vadd.f32 %v1234_v50, %v4130_v46  ;;  %v1236_v31 = vpop.f32.mrb[45].mxu1  ;;  %1797 = vrot.lane.b32.xlu1 %v3199_v32, %s3429_s15 }
 0x222   : > { %v3203_v53 = vpop.eup %3202  ;;  %3220 = vpow2.f32 %v1435_v48  ;;  %v1237_v56 = vadd.f32 %v1236_v31, %v4134_v22  ;;  %v1238_v41 = vpop.f32.mrb[46].mxu1 }
 0x223   : > { %v3205_v57 = vpop.eup %3204  ;;  %3222 = vpow2.f32 %v1437_v11  ;;  %v1351_v39 = vsub.f32 0.0, %v4256_v38  ;;  %v4262_v4 = vadd.f32 %v1238_v41, %v4130_v46  ;;  %v1240_v15 = vpop.f32.mrb[47].mxu1 }
 0x224   : > { %v3207_v30 = vpop.eup %3206  ;;  %v1535_v47 = vadd.f32 1.0, %v3205_v57  ;;  %3224 = vpow2.f32 %v1439_v14  ;;  %v1352_v43 = vsub.f32 0.0, %v1237_v56  ;;  %v1241_v20 = vadd.f32 %v1240_v15, %v4134_v22  ;;  %1799 = vrot.lane.b32.xlu0 %v3201_v54, %s3429_s15 }
 0x225   : > { %v3209_v1 = vpop.eup %3208  ;;  %v1536_v19 = vadd.f32 1.0, %v3207_v30  ;;  %3226 = vpow2.f32 %v1441_v16  ;;  %v1353_v34 = vsub.f32 0.0, %v4262_v4  ;;  %1801 = vrot.lane.b32.xlu1 %v3203_v53, %s3429_s15  ;;  %v1443_v59 = vmul.f32 1.442695, %v1351_v39 }
 0x226   : > { %v3211_v55 = vpop.eup %3210  ;;  %3228 = vrcp.f32 %v1535_v47  ;;  %v1537_v51 = vadd.f32 1.0, %v3209_v1  ;;  %v1354_v6 = vsub.f32 0.0, %v1241_v20  ;;  %v1445_v26 = vmul.f32 1.442695, %v1352_v43 }
 0x227   : > { %3230 = vrcp.f32 %v1536_v19  ;;  %v1538_v33 = vadd.f32 1.0, %v3211_v55  ;;  %v1447_v21 = vmul.f32 1.442695, %v1353_v34 }
 0x228   : > { %v3213_v44 = vpop.eup %3212  ;;  %3232 = vrcp.f32 %v1537_v51  ;;  %v1244_v25 = vpop.f32.mrb[48].mxu1  ;;  %v1449_v61 = vmul.f32 1.442695, %v1354_v6 }
 0x229   : > { %v3215_v58 = vpop.eup %3214  ;;  %3234 = vrcp.f32 %v1538_v33  ;;  %1803 = vrot.lane.b32.xlu0 %v3213_v44, %s3429_s15  ;;  %v4270_v8 = vadd.f32 %v1244_v25, %v4130_v46  ;;  %v1246_v17 = vpop.f32.mrb[49].mxu1 }
 0x22a   : > { %v3217_v3 = vpop.eup %3216  ;;  %3236 = vpow2.f32 %v1443_v59  ;;  %v1247_v37 = vadd.f32 %v1246_v17, %v4134_v22  ;;  %1805 = vrot.lane.b32.xlu1 %v3215_v58, %s3429_s15  ;;  %v1248_v13 = vpop.f32.mrb[50].mxu1 }
 0x22b   : > { %v3219_v62 = vpop.eup %3218  ;;  %3238 = vpow2.f32 %v1445_v26  ;;  %v1355_v5 = vsub.f32 0.0, %v4270_v8  ;;  %v4276_v48 = vadd.f32 %v1248_v13, %v4130_v46  ;;  %v1250_v7 = vpop.f32.mrb[51].mxu1 }
 0x22c   : > { %v3221_v9 = vpop.eup %3220  ;;  %3240 = vpow2.f32 %v1447_v21  ;;  %v1356_v2 = vsub.f32 0.0, %v1247_v37  ;;  %v1251_v11 = vadd.f32 %v1250_v7, %v4134_v22 }
 0x22d   : > { %v3223_v32 = vpop.eup %3222  ;;  %v1539_v14 = vadd.f32 1.0, %v3221_v9  ;;  %3242 = vpow2.f32 %v1449_v61  ;;  %v1357_v50 = vsub.f32 0.0, %v4276_v48  ;;  %1807 = vrot.lane.b32.xlu0 %v3217_v3, %s3429_s15  ;;  %v1451_v41 = vmul.f32 1.442695, %v1355_v5 }
 0x22e   : > { %v3225_v54 = vpop.eup %3224  ;;  %v1540_v16 = vadd.f32 1.0, %v3223_v32  ;;  %v1358_v31 = vsub.f32 0.0, %v1251_v11  ;;  %1809 = vrot.lane.b32.xlu1 %v3219_v62, %s3429_s15  ;;  %v1453_v15 = vmul.f32 1.442695, %v1356_v2 }
 0x22f   : > { %v3227_v53 = vpop.eup %3226  ;;  %3244 = vrcp.f32 %v1539_v14  ;;  %v1541_v56 = vadd.f32 1.0, %v3225_v54  ;;  %v1455_v43 = vmul.f32 1.442695, %v1357_v50 }
 0x230   : > { %v3229_v57 = vpop.eup %3228  ;;  %3246 = vrcp.f32 %v1540_v16  ;;  %v1542_v39 = vadd.f32 1.0, %v3227_v53  ;;  %v1254_v30 = vpop.f32.mrb[52].mxu1  ;;  %v1457_v34 = vmul.f32 1.442695, %v1358_v31 }
 0x231   : > { %v3231_v47 = vpop.eup %3230  ;;  %3248 = vrcp.f32 %v1541_v56  ;;  %1811 = vrot.lane.b32.xlu0 %v3229_v57, %s3429_s15  ;;  %v4284_v20 = vadd.f32 %v1254_v30, %v4130_v46  ;;  %v1256_v1 = vpop.f32.mrb[53].mxu1 }
 0x232   : > { %v3233_v19 = vpop.eup %3232  ;;  %3250 = vrcp.f32 %v1542_v39  ;;  %v1257_v55 = vadd.f32 %v1256_v1, %v4134_v22  ;;  %1813 = vrot.lane.b32.xlu1 %v3231_v47, %s3429_s15  ;;  %v1258_v51 = vpop.f32.mrb[54].mxu1 }
 0x233   : > { %v3235_v59 = vpop.eup %3234  ;;  %3252 = vpow2.f32 %v1451_v41  ;;  %v1359_v6 = vsub.f32 0.0, %v4284_v20  ;;  %v4290_v33 = vadd.f32 %v1258_v51, %v4130_v46  ;;  %v1260_v26 = vpop.f32.mrb[55].mxu1 }
 0x234   : > { %v3237_v44 = vpop.eup %3236  ;;  %3254 = vpow2.f32 %v1453_v15  ;;  %v1360_v21 = vsub.f32 0.0, %v1257_v55  ;;  %v1261_v25 = vadd.f32 %v1260_v26, %v4134_v22 }
 0x235   : > { %v3239_v58 = vpop.eup %3238  ;;  %v1543_v61 = vadd.f32 1.0, %v3237_v44  ;;  %3256 = vpow2.f32 %v1455_v43  ;;  %v1361_v17 = vsub.f32 0.0, %v4290_v33  ;;  %1815 = vrot.lane.b32.xlu0 %v3233_v19, %s3429_s15  ;;  %v1459_v7 = vmul.f32 1.442695, %v1359_v6 }
 0x236   : > { %v3241_v3 = vpop.eup %3240  ;;  %v1544_v37 = vadd.f32 1.0, %v3239_v58  ;;  %3258 = vpow2.f32 %v1457_v34  ;;  %v1362_v13 = vsub.f32 0.0, %v1261_v25  ;;  %1817 = vrot.lane.b32.xlu1 %v3235_v59, %s3429_s15  ;;  %v1461_v2 = vmul.f32 1.442695, %v1360_v21 }
 0x237   : > { %v3243_v62 = vpop.eup %3242  ;;  %3260 = vrcp.f32 %v1543_v61  ;;  %v1545_v5 = vadd.f32 1.0, %v3241_v3  ;;  %v1463_v14 = vmul.f32 1.442695, %v1361_v17 }
 0x238   : > { %3262 = vrcp.f32 %v1544_v37  ;;  %v1546_v9 = vadd.f32 1.0, %v3243_v62  ;;  %v1264_v11 = vpop.f32.mrb[56].mxu1  ;;  %v1465_v31 = vmul.f32 1.442695, %v1362_v13 }
 0x239   : > { %v3245_v32 = vpop.eup %3244  ;;  %3264 = vrcp.f32 %v1545_v5  ;;  %v4297_v50 = vadd.f32 %v1264_v11, %v4130_v46  ;;  %v1266_v54 = vpop.f32.mrb[57].mxu1 }
 0x23a   : > { %v3247_v16 = vpop.eup %3246  ;;  %3266 = vrcp.f32 %v1546_v9  ;;  %1819 = vrot.lane.b32.xlu0 %v3245_v32, %s3429_s15  ;;  %v1267_v53 = vadd.f32 %v1266_v54, %v4134_v22  ;;  %v1268_v56 = vpop.f32.mrb[58].mxu1 }
 0x23b   : > { %v3249_v41 = vpop.eup %3248  ;;  %3268 = vpow2.f32 %v1459_v7  ;;  %v1363_v57 = vsub.f32 0.0, %v4297_v50  ;;  %1821 = vrot.lane.b32.xlu1 %v3247_v16, %s3429_s15  ;;  %v4304_v39 = vadd.f32 %v1268_v56, %v4130_v46  ;;  %v1270_v15 = vpop.f32.mrb[59].mxu1 }
 0x23c   : > { %v3251_v30 = vpop.eup %3250  ;;  %3270 = vpow2.f32 %v1461_v2  ;;  %v1364_v47 = vsub.f32 0.0, %v1267_v53  ;;  %v1271_v43 = vadd.f32 %v1270_v15, %v4134_v22 }
 0x23d   : > { %v3253_v1 = vpop.eup %3252  ;;  %3272 = vpow2.f32 %v1463_v14  ;;  %v1467_v19 = vmul.f32 1.442695, %v1363_v57  ;;  %v1365_v34 = vsub.f32 0.0, %v4304_v39 }
 0x23e   : > { %v3255_v55 = vpop.eup %3254  ;;  %v1547_v51 = vadd.f32 1.0, %v3253_v1  ;;  %3274 = vpow2.f32 %v1465_v31  ;;  %v1366_v59 = vsub.f32 0.0, %v1271_v43  ;;  %1823 = vrot.lane.b32.xlu0 %v3249_v41, %s3429_s15  ;;  %v1469_v25 = vmul.f32 1.442695, %v1364_v47 }
 0x23f   : > { %v3257_v6 = vpop.eup %3256  ;;  %v1548_v26 = vadd.f32 1.0, %v3255_v55  ;;  %3276 = vpow2.f32 %v1467_v19  ;;  %1825 = vrot.lane.b32.xlu1 %v3251_v30, %s3429_s15  ;;  %v1471_v3 = vmul.f32 1.442695, %v1365_v34 }
 0x240   : > { %v3259_v44 = vpop.eup %3258  ;;  %3278 = vrcp.f32 %v1547_v51  ;;  %v1549_v21 = vadd.f32 1.0, %v3257_v6  ;;  %v1274_v58 = vpop.f32.mrb[60].mxu1  ;;  %v1473_v5 = vmul.f32 1.442695, %v1366_v59 }
 0x241   : > { %v3261_v61 = vpop.eup %3260  ;;  %3280 = vrcp.f32 %v1548_v26  ;;  %v1550_v17 = vadd.f32 1.0, %v3259_v44  ;;  %v4311_v37 = vadd.f32 %v1274_v58, %v4130_v46  ;;  %v1276_v13 = vpop.f32.mrb[61].mxu1 }
 0x242   : > { %v3263_v62 = vpop.eup %3262  ;;  %3282 = vrcp.f32 %v1549_v21  ;;  %1827 = vrot.lane.b32.xlu0 %v3261_v61, %s3429_s15  ;;  %v1277_v7 = vadd.f32 %v1276_v13, %v4134_v22  ;;  %v1278_v9 = vpop.f32.mrb[62].mxu1 }
 0x243   : > { %v3265_v2 = vpop.eup %3264  ;;  %3284 = vrcp.f32 %v1550_v17  ;;  %v1367_v11 = vsub.f32 0.0, %v4311_v37  ;;  %1829 = vrot.lane.b32.xlu1 %v3263_v62, %s3429_s15  ;;  %v4318_v32 = vadd.f32 %v1278_v9, %v4130_v46  ;;  %v1280_v14 = vpop.f32.mrb[63].mxu1 }
 0x244   : > { %v3267_v54 = vpop.eup %3266  ;;  %3286 = vpow2.f32 %v1469_v25  ;;  %v1281_v16 = vadd.f32 %v1280_v14, %v4134_v22  ;;  %v1368_v56 = vsub.f32 0.0, %v1277_v7 }
 0x245   : > { %v3269_v31 = vpop.eup %3268  ;;  %3288 = vpow2.f32 %v1471_v3  ;;  %v1475_v53 = vmul.f32 1.442695, %v1367_v11  ;;  %v1369_v15 = vsub.f32 0.0, %v4318_v32 }
 0x246   : > { %v3271_v41 = vpop.eup %3270  ;;  %v1551_v57 = vadd.f32 1.0, %v3269_v31  ;;  %3290 = vpow2.f32 %v1473_v5  ;;  %1831 = vrot.lane.b32.xlu0 %v3265_v2, %s3429_s15  ;;  %v1370_v43 = vsub.f32 0.0, %v1281_v16  ;;  %v1477_v59 = vmul.f32 1.442695, %v1368_v56 }
 0x247   : > { %v3273_v30 = vpop.eup %3272  ;;  %v1552_v47 = vadd.f32 1.0, %v3271_v41  ;;  %3292 = vpow2.f32 %v1475_v53  ;;  %1833 = vrot.lane.b32.xlu1 %v3267_v54, %s3429_s15  ;;  %v1479_v25 = vmul.f32 1.442695, %v1369_v15 }
 0x248   : > { %v3275_v1 = vpop.eup %3274  ;;  %3294 = vrcp.f32 %v1551_v57  ;;  %v1553_v19 = vadd.f32 1.0, %v3273_v30  ;;  %v1284_v34 = vpop.f32.mrb[64].mxu1  ;;  %v1481_v3 = vmul.f32 1.442695, %v1370_v43 }
 0x249   : > { %v3277_v55 = vpop.eup %3276  ;;  %3296 = vrcp.f32 %v1552_v47  ;;  %v1554_v51 = vadd.f32 1.0, %v3275_v1  ;;  %v4325_v6 = vadd.f32 %v1284_v34, %v4130_v46  ;;  %v1286_v26 = vpop.f32.mrb[65].mxu1 }
 0x24a   : > { %v3279_v44 = vpop.eup %3278  ;;  %3298 = vrcp.f32 %v1553_v19  ;;  %v1555_v21 = vadd.f32 1.0, %v3277_v55  ;;  %v1287_v58 = vadd.f32 %v1286_v26, %v4134_v22  ;;  %v1288_v61 = vpop.f32.mrb[66].mxu1 }
 0x24b   : > { %v3281_v17 = vpop.eup %3280  ;;  %3300 = vrcp.f32 %v1554_v51  ;;  %1835 = vrot.lane.b32.xlu0 %v3279_v44, %s3429_s15  ;;  %v1371_v13 = vsub.f32 0.0, %v4325_v6  ;;  %v4331_v62 = vadd.f32 %v1288_v61, %v4130_v46  ;;  %v1290_v5 = vpop.f32.mrb[67].mxu1 }
 0x24c   : > { %v3283_v7 = vpop.eup %3282  ;;  %3302 = vrcp.f32 %v1555_v21  ;;  %1837 = vrot.lane.b32.xlu1 %v3281_v17, %s3429_s15  ;;  %v1291_v9 = vadd.f32 %v1290_v5, %v4134_v22  ;;  %v1372_v14 = vsub.f32 0.0, %v1287_v58 }
 0x24d   : > { %v3285_v2 = vpop.eup %3284  ;;  %3304 = vpow2.f32 %v1477_v59  ;;  %v1483_v11 = vmul.f32 1.442695, %v1371_v13  ;;  %v1373_v16 = vsub.f32 0.0, %v4331_v62 }
 0x24e   : > { %v3287_v54 = vpop.eup %3286  ;;  %3306 = vpow2.f32 %v1479_v25  ;;  %v1374_v56 = vsub.f32 0.0, %v1291_v9  ;;  %v1485_v43 = vmul.f32 1.442695, %v1372_v14 }
 0x24f   : > { %v3289_v31 = vpop.eup %3288  ;;  %v1556_v53 = vadd.f32 1.0, %v3287_v54  ;;  %3308 = vpow2.f32 %v1481_v3  ;;  %1839 = vrot.lane.b32.xlu0 %v3283_v7, %s3429_s15  ;;  %v1487_v51 = vmul.f32 1.442695, %v1373_v16 }
 0x250   : > { %v3291_v41 = vpop.eup %3290  ;;  %v1557_v57 = vadd.f32 1.0, %v3289_v31  ;;  %3310 = vpow2.f32 %v1483_v11  ;;  %1841 = vrot.lane.b32.xlu1 %v3285_v2, %s3429_s15  ;;  %v1294_v15 = vpop.f32.mrb[68].mxu1  ;;  %v1489_v21 = vmul.f32 1.442695, %v1374_v56 }
 0x251   : > { %v3293_v30 = vpop.eup %3292  ;;  %3312 = vrcp.f32 %v1556_v53  ;;  %v1558_v47 = vadd.f32 1.0, %v3291_v41  ;;  %v4339_v1 = vadd.f32 %v1294_v15, %v4130_v46  ;;  %v1296_v19 = vpop.f32.mrb[69].mxu1 }
 0x252   : > { %v3295_v34 = vpop.eup %3294  ;;  %3314 = vrcp.f32 %v1557_v57  ;;  %v1559_v55 = vadd.f32 1.0, %v3293_v30  ;;  %v1297_v59 = vadd.f32 %v1296_v19, %v4134_v22  ;;  %v1298_v26 = vpop.f32.mrb[70].mxu1 }
 0x253   : > { %v3297_v44 = vpop.eup %3296  ;;  %3316 = vrcp.f32 %v1558_v47  ;;  %1843 = vrot.lane.b32.xlu0 %v3295_v34, %s3429_s15  ;;  %v1375_v25 = vsub.f32 0.0, %v4339_v1  ;;  %v4345_v58 = vadd.f32 %v1298_v26, %v4130_v46  ;;  %v1300_v61 = vpop.f32.mrb[71].mxu1 }
 0x254   : > { %v3299_v17 = vpop.eup %3298  ;;  %3318 = vrcp.f32 %v1559_v55  ;;  %v1376_v3 = vsub.f32 0.0, %v1297_v59  ;;  %1845 = vrot.lane.b32.xlu1 %v3297_v44, %s3429_s15  ;;  %v1301_v13 = vadd.f32 %v1300_v61, %v4134_v22 }
 0x255   : > { %v3301_v5 = vpop.eup %3300  ;;  %3320 = vpow2.f32 %v1485_v43  ;;  %v1491_v7 = vmul.f32 1.442695, %v1375_v25  ;;  %v1377_v9 = vsub.f32 0.0, %v4345_v58 }
 0x256   : > { %v3303_v2 = vpop.eup %3302  ;;  %3322 = vpow2.f32 %v1487_v51  ;;  %v1493_v11 = vmul.f32 1.442695, %v1376_v3  ;;  %v1378_v14 = vsub.f32 0.0, %v1301_v13 }
 0x257   : > { %v3305_v54 = vpop.eup %3304  ;;  %3324 = vpow2.f32 %v1489_v21  ;;  %1847 = vrot.lane.b32.xlu0 %v3299_v17, %s3429_s15  ;;  %v1495_v57 = vmul.f32 1.442695, %v1377_v9 }
 0x258   : > { %v3307_v16 = vpop.eup %3306  ;;  %v1560_v31 = vadd.f32 1.0, %v3305_v54  ;;  %3326 = vpow2.f32 %v1491_v7  ;;  %1849 = vrot.lane.b32.xlu1 %v3301_v5, %s3429_s15  ;;  %v1304_v53 = vpop.f32.mrb[72].mxu1  ;;  %v1497_v19 = vmul.f32 1.442695, %v1378_v14 }
 0x259   : > { %v3309_v56 = vpop.eup %3308  ;;  %v1561_v41 = vadd.f32 1.0, %v3307_v16  ;;  %3328 = vpow2.f32 %v1493_v11  ;;  %v4353_v15 = vadd.f32 %v1304_v53, %v4130_v46  ;;  %v1306_v30 = vpop.f32.mrb[73].mxu1 }
 0x25a   : > { %v3311_v47 = vpop.eup %3310  ;;  %3330 = vrcp.f32 %v1560_v31  ;;  %v1562_v43 = vadd.f32 1.0, %v3309_v56  ;;  %v1307_v34 = vadd.f32 %v1306_v30, %v4134_v22  ;;  %v1308_v55 = vpop.f32.mrb[74].mxu1 }
 0x25b   : > { %v3313_v51 = vpop.eup %3312  ;;  %3332 = vrcp.f32 %v1561_v41  ;;  %v1563_v59 = vadd.f32 1.0, %v3311_v47  ;;  %1851 = vrot.lane.b32.xlu0 %v3303_v2, %s3429_s15  ;;  %v1379_v26 = vsub.f32 0.0, %v4353_v15  ;;  %v4359_v44 = vadd.f32 %v1308_v55, %v4130_v46  ;;  %v1310_v21 = vpop.f32.mrb[75].mxu1 }
 0x25c   : > { %v3315_v25 = vpop.eup %3314  ;;  %3334 = vrcp.f32 %v1562_v43  ;;  %v1380_v61 = vsub.f32 0.0, %v1307_v34  ;;  %1853 = vrot.lane.b32.xlu1 %v3313_v51, %s3429_s15  ;;  %v1311_v17 = vadd.f32 %v1310_v21, %v4134_v22 }
 0x25d   : > { %v3317_v3 = vpop.eup %3316  ;;  %3336 = vrcp.f32 %v1563_v59  ;;  %v1499_v13 = vmul.f32 1.442695, %v1379_v26  ;;  %v1381_v5 = vsub.f32 0.0, %v4359_v44 }
 0x25e   : > { %v3319_v7 = vpop.eup %3318  ;;  %3338 = vpow2.f32 %v1495_v57  ;;  %v1501_v9 = vmul.f32 1.442695, %v1380_v61  ;;  %v1382_v2 = vsub.f32 0.0, %v1311_v17 }
 0x25f   : > { %v3321_v11 = vpop.eup %3320  ;;  %3340 = vpow2.f32 %v1497_v19  ;;  %1855 = vrot.lane.b32.xlu0 %v3315_v25, %s3429_s15  ;;  %v1503_v56 = vmul.f32 1.442695, %v1381_v5 }
 0x260   : > { %v3323_v14 = vpop.eup %3322  ;;  %v1564_v54 = vadd.f32 1.0, %v3321_v11  ;;  %3342 = vpow2.f32 %v1499_v13  ;;  %1857 = vrot.lane.b32.xlu1 %v3317_v3, %s3429_s15  ;;  %v1314_v16 = vpop.f32.mrb[76].mxu1  ;;  %v1505_v43 = vmul.f32 1.442695, %v1382_v2 }
 0x261   : > { %v3325_v31 = vpop.eup %3324  ;;  %v1565_v53 = vadd.f32 1.0, %v3323_v14  ;;  %3344 = vpow2.f32 %v1501_v9  ;;  %v4367_v41 = vadd.f32 %v1314_v16, %v4130_v46  ;;  %v1316_v57 = vpop.f32.mrb[77].mxu1 }
 0x262   : > { %v3327_v30 = vpop.eup %3326  ;;  %3346 = vrcp.f32 %v1564_v54  ;;  %v1566_v47 = vadd.f32 1.0, %v3325_v31  ;;  %v1317_v19 = vadd.f32 %v1316_v57, %v4134_v22  ;;  %v1318_v34 = vpop.f32.mrb[78].mxu1 }
 0x263   : > { %v3329_v55 = vpop.eup %3328  ;;  %3348 = vrcp.f32 %v1565_v53  ;;  %v1567_v51 = vadd.f32 1.0, %v3327_v30  ;;  %1859 = vrot.lane.b32.xlu0 %v3319_v7, %s3429_s15  ;;  %v1383_v59 = vsub.f32 0.0, %v4367_v41  ;;  %v4373_v26 = vadd.f32 %v1318_v34, %v4130_v46  ;;  %v1320_v21 = vpop.f32.mrb[79].mxu1 }
 0x264   : > { %v3331_v25 = vpop.eup %3330  ;;  %3350 = vrcp.f32 %v1566_v47  ;;  %v1568_v61 = vadd.f32 1.0, %v3329_v55  ;;  %v1384_v17 = vsub.f32 0.0, %v1317_v19  ;;  %v1321_v3 = vadd.f32 %v1320_v21, %v4134_v22 }
 0x265   : > { %v3333_v13 = vpop.eup %3332  ;;  %3352 = vrcp.f32 %v1567_v51  ;;  %v1507_v5 = vmul.f32 1.442695, %v1383_v59  ;;  %1861 = vrot.lane.b32.xlu1 %v3331_v25, %s3429_s15  ;;  %v1385_v46 = vsub.f32 0.0, %v4373_v26 }
 0x266   : > { %v3335_v9 = vpop.eup %3334  ;;  %3354 = vrcp.f32 %v1568_v61  ;;  %v1509_v7 = vmul.f32 1.442695, %v1384_v17  ;;  %v1386_v14 = vsub.f32 0.0, %v1321_v3 }
 0x267   : > { %v3337_v2 = vpop.eup %3336  ;;  %3356 = vpow2.f32 %v1503_v56  ;;  %1863 = vrot.lane.b32.xlu0 %v3333_v13, %s3429_s15  ;;  %v1511_v30 = vmul.f32 1.442695, %v1385_v46 }
 0x268   : > { %v3339_v11 = vpop.eup %3338  ;;  %3358 = vpow2.f32 %v1505_v43  ;;  %v1513_v19 = vmul.f32 1.442695, %v1386_v14 }
 0x269   : > { %v3341_v54 = vpop.eup %3340  ;;  %v1569_v16 = vadd.f32 1.0, %v3339_v11  ;;  %3360 = vpow2.f32 %v1507_v5  ;;  %1865 = vrot.lane.b32.xlu1 %v3335_v9, %s3429_s15 }
 0x26a   : > { %v3343_v22 = vpop.eup %3342  ;;  %v1570_v31 = vadd.f32 1.0, %v3341_v54  ;;  %3362 = vpow2.f32 %v1509_v7 }
 0x26b   : > { %v3345_v53 = vpop.eup %3344  ;;  %3364 = vrcp.f32 %v1569_v16  ;;  %v1571_v57 = vadd.f32 1.0, %v3343_v22  ;;  %1867 = vrot.lane.b32.xlu0 %v3337_v2, %s3429_s15 }
 0x26c   : > { %v3347_v56 = vpop.eup %3346  ;;  %3366 = vrcp.f32 %v1570_v31  ;;  %v1572_v47 = vadd.f32 1.0, %v3345_v53 }
 0x26d   : > { %v3349_v43 = vpop.eup %3348  ;;  %3368 = vrcp.f32 %v1571_v57  ;;  %1869 = vrot.lane.b32.xlu1 %v3347_v56, %s3429_s15 }
 0x26e   : > { %v3351_v34 = vpop.eup %3350  ;;  %3370 = vrcp.f32 %v1572_v47 }
 0x26f   : > { %v3353_v55 = vpop.eup %3352  ;;  %3372 = vpow2.f32 %v1511_v30  ;;  %1871 = vrot.lane.b32.xlu0 %v3349_v43, %s3429_s15 }
 0x270   : > { %v3355_v51 = vpop.eup %3354  ;;  %3374 = vpow2.f32 %v1513_v19 }
 0x271   : > { %v3357_v59 = vpop.eup %3356  ;;  %1873 = vrot.lane.b32.xlu1 %v3351_v34, %s3429_s15 }
 0x272   : > { %v3359_v21 = vpop.eup %3358  ;;  %v1573_v25 = vadd.f32 1.0, %v3357_v59 }
 0x273   : > { %v3361_v61 = vpop.eup %3360  ;;  %v1574_v17 = vadd.f32 1.0, %v3359_v21  ;;  %1875 = vrot.lane.b32.xlu0 %v3353_v55, %s3429_s15  ;;  %v3388_v21 = vld [vmem:[%s3495_s13] sm:$0xff] }
 0x274   : > { %v3363_v3 = vpop.eup %3362  ;;  %3376 = vrcp.f32 %v1573_v25  ;;  %v1575_v13 = vadd.f32 1.0, %v3361_v61  ;;  %v3389_v61 = vld [vmem:[%s3495_s13 + $0x8] sm:$0xff] }
 0x275   : > { %v3365_v5 = vpop.eup %3364  ;;  %3378 = vrcp.f32 %v1574_v17  ;;  %v1576_v9 = vadd.f32 1.0, %v3363_v3  ;;  %1877 = vrot.lane.b32.xlu1 %v3355_v51, %s3429_s15 }
 0x276   : > { %v3367_v7 = vpop.eup %3366  ;;  %3380 = vrcp.f32 %v1575_v13 }
 0x277   : > { %v3369_v2 = vpop.eup %3368  ;;  %1879 = vrot.lane.b32.xlu0 %v3365_v5, %s3429_s15  ;;  %3382 = vrcp.f32 %v1576_v9 }
 0x278   : > { %v3371_v46 = vpop.eup %3370 }
 0x279   : > { %v3373_v11 = vpop.eup %3372  ;;  %1881 = vrot.lane.b32.xlu1 %v3367_v7, %s3429_s15  ;;  %v1772_v14 = vpop.permute.xlu0 %1771 }
 0x27a   : > { %v3375_v54 = vpop.eup %3374  ;;  %v1577_v16 = vadd.f32 1.0, %v3373_v11 }
 0x27b   : > { %v1578_v22 = vadd.f32 1.0, %v3375_v54  ;;  %1883 = vrot.lane.b32.xlu0 %v3369_v2, %s3429_s15  ;;  %v1776_v31 = vpop.permute.xlu1 %1775  ;;  %v3390_v54 = vld [vmem:[%s3495_s13 + $0x10] sm:$0xff] }
 0x27c   : > { %3384 = vrcp.f32 %v1577_v16 }
 0x27d   : > { %1885 = vrot.lane.b32.xlu1 %v3371_v46, %s3429_s15  ;;  %v1774_v53 = vpop.permute.xlu0 %1773  ;;  %3386 = vrcp.f32 %v1578_v22 }
 0x27e   : > { %v3377_v57 = vpop.eup %3376  ;;  %v1900_v30 = vsel %vm1899_vm5, %v1772_v14, %v1774_v53 }
 0x27f   : > { %v3379_v56 = vpop.eup %3378  ;;  %1887 = vrot.lane.b32.xlu0 %v3377_v57, %s3429_s15  ;;  %v1964_v47 = vmul.f32 %v1900_v30, %v4137_v42  ;;  %v1778_v19 = vpop.permute.xlu1 %1777 }
 0x280   : > { %v3381_v43 = vpop.eup %3380  ;;  %v1901_v34 = vsel %vm1899_vm5, %v1776_v31, %v1778_v19 }
 0x281   : > { %1889 = vrot.lane.b32.xlu1 %v3379_v56, %s3429_s15  ;;  %v1965_v55 = vmul.f32 %v1901_v34, %v4142_v63  ;;  %v1780_v51 = vpop.permute.xlu0 %1779  ;;  %v3383_v59 = vpop.eup %3382  ;;  %v1996_v25 = vadd.f32 %v3388_v21, %v1964_v47  ;;  %v3392_v34 = vld [vmem:[%s3495_s13 + $0x20] sm:$0xff] }
 0x283   : > { %v1997_v17 = vadd.f32 %v3389_v61, %v1965_v55  ;;  %1891 = vrot.lane.b32.xlu0 %v3381_v43, %s3429_s15  ;;  %v1782_v3 = vpop.permute.xlu1 %1781 }
 0x284   : > { %v1902_v42 = vsel %vm1899_vm5, %v1780_v51, %v1782_v3  ;;  %v3393_v51 = vld [vmem:[%s3495_s13 + $0x28] sm:$0xff] }
 0x285   : > { %v2028_v13 = vpack.c.bf16 %v1997_v17, %v1996_v25  ;;  %1893 = vrot.lane.b32.xlu1 %v3383_v59, %s3429_s15  ;;  %v1784_v5 = vpop.permute.xlu0 %1783  ;;  %v1966_v63 = vmul.f32 %v1902_v42, %v4147_v12  ;;  %v3391_v12 = vld [vmem:[%s3495_s13 + $0x18] sm:$0xff] }
 0x286   : > { %v3385_v9 = vpop.eup %3384 }
 0x287   : > { %1895 = vrot.lane.b32.xlu0 %v3385_v9, %s3429_s15  ;;  %v1786_v7 = vpop.permute.xlu1 %1785  ;;  %2791 = vmatmul.mubr.msk.bf16.vlgmr.msra.gmra.mrb[16].mxu0 %vm580_vm2, %v2028_v13  ;;  %v3387_v2 = vpop.eup %3386  ;;  %v1998_v16 = vadd.f32 %v3390_v54, %v1966_v63  ;;  %v3394_v13 = vld [vmem:[%s3495_s13 + $0x30] sm:$0xff]  ;;  %v3395_v9 = vld [vmem:[%s3495_s13 + $0x38] sm:$0xff] }
 0x288   : > { %v1903_v46 = vsel %vm1899_vm5, %v1784_v5, %v1786_v7  ;;  %2218 = vmatprep.mubr.bf16.mxu0 %v3428_v49 }
 0x289   : > { %1897 = vrot.lane.b32.xlu1 %v3387_v2, %s3429_s15  ;;  %v1967_v11 = vmul.f32 %v1903_v46, %v4152_v18 }
 0x28a   : > { %v1788_v14 = vpop.permute.xlu0 %1787 }
 0x28b   : > { %v1999_v22 = vadd.f32 %v3391_v12, %v1967_v11  ;;  %v1790_v31 = vpop.permute.xlu1 %1789 }
 0x28c   : > { %v1904_v53 = vsel %vm1899_vm5, %v1788_v14, %v1790_v31 }
 0x28d   : > { %v2029_v57 = vpack.c.bf16 %v1999_v22, %v1998_v16  ;;  %v1968_v56 = vmul.f32 %v1904_v53, %v4169_v40  ;;  %v3396_v22 = vld [vmem:[%s3495_s13 + $0x40] sm:$0xff]  ;;  %v3397_v53 = vld [vmem:[%s3495_s13 + $0x48] sm:$0xff] }
 0x28e   : > { %v1792_v30 = vpop.permute.xlu0 %1791 }
 0x28f   : > { %v1794_v47 = vpop.permute.xlu1 %1793  ;;  %2792 = vmatmul.mubr.msk.bf16.gmra.mrb[20].mxu0 %vm580_vm2, %v2029_v57  ;;  %v2000_v55 = vadd.f32 %v3392_v34, %v1968_v56  ;;  %v3398_v34 = vld [vmem:[%s3495_s13 + $0x50] sm:$0xff] }
 0x290   : > { %v1905_v19 = vsel %vm1899_vm5, %v1792_v30, %v1794_v47  ;;  %2228 = vmatprep.mubr.bf16.mxu0 %v3428_v49 }
 0x291   : > { %v1969_v18 = vmul.f32 %v1905_v19, %v4174_v10 }
 0x292   : > { %v1796_v43 = vpop.permute.xlu0 %1795 }
 0x293   : > { %v2001_v59 = vadd.f32 %v3393_v51, %v1969_v18  ;;  %v1798_v21 = vpop.permute.xlu1 %1797  ;;  %v3399_v51 = vld [vmem:[%s3495_s13 + $0x58] sm:$0xff] }
 0x294   : > { %v1906_v25 = vsel %vm1899_vm5, %v1796_v43, %v1798_v21 }
 0x295   : > { %v2030_v40 = vpack.c.bf16 %v2001_v59, %v2000_v55  ;;  %v1970_v17 = vmul.f32 %v1906_v25, %v4194_v23 }
 0x296   : > { %v1800_v61 = vpop.permute.xlu0 %1799 }
 0x297   : > { %v1802_v3 = vpop.permute.xlu1 %1801  ;;  %2793 = vmatmul.mubr.msk.bf16.gmra.mrb[24].mxu0 %vm580_vm2, %v2030_v40  ;;  %v2002_v5 = vadd.f32 %v3394_v13, %v1970_v17  ;;  %v3400_v13 = vld [vmem:[%s3495_s13 + $0x60] sm:$0xff] }
 0x298   : > { %v1907_v42 = vsel %vm1899_vm5, %v1800_v61, %v1802_v3  ;;  %2238 = vmatprep.mubr.bf16.mxu0 %v3428_v49 }
 0x299   : > { %v1971_v10 = vmul.f32 %v1907_v42, %v4202_v52 }
 0x29b   : > { %v2003_v63 = vadd.f32 %v3395_v9, %v1971_v10  ;;  %v1804_v7 = vpop.permute.xlu0 %1803  ;;  %v3401_v9 = vld [vmem:[%s3495_s13 + $0x68] sm:$0xff] }
 0x29c   : > { %v1806_v2 = vpop.permute.xlu1 %1805 }
 0x29d   : > { %v2031_v46 = vpack.c.bf16 %v2003_v63, %v2002_v5  ;;  %v1908_v23 = vsel %vm1899_vm5, %v1804_v7, %v1806_v2 }
 0x29e   : > { %v1972_v14 = vmul.f32 %v1908_v23, %v4214_v36 }
 0x29f   : > { %v1808_v11 = vpop.permute.xlu0 %1807  ;;  %2794 = vmatmul.mubr.msk.bf16.gmra.mrb[28].mxu0 %vm580_vm2, %v2031_v46 }
 0x2a0   : > { %v1810_v54 = vpop.permute.xlu1 %1809  ;;  %2248 = vmatprep.mubr.bf16.mxu0 %v3428_v49  ;;  %v2004_v31 = vadd.f32 %v3396_v22, %v1972_v14 }
 0x2a1   : > { %v1909_v52 = vsel %vm1899_vm5, %v1808_v11, %v1810_v54  ;;  %v3402_v54 = vld [vmem:[%s3495_s13 + $0x70] sm:$0xff] }
 0x2a2   : > { %v1973_v16 = vmul.f32 %v1909_v52, %v4220_v60 }
 0x2a3   : > { %v1812_v12 = vpop.permute.xlu0 %1811 }
 0x2a4   : > { %v2005_v57 = vadd.f32 %v3397_v53, %v1973_v16  ;;  %v1814_v30 = vpop.permute.xlu1 %1813  ;;  %v3403_v16 = vld [vmem:[%s3495_s13 + $0x78] sm:$0xff] }
 0x2a5   : > { %v1910_v56 = vsel %vm1899_vm5, %v1812_v12, %v1814_v30 }
 0x2a6   : > { %v2032_v47 = vpack.c.bf16 %v2005_v57, %v2004_v31  ;;  %v1974_v36 = vmul.f32 %v1910_v56, %v4228_v0 }
 0x2a7   : > { %v1816_v19 = vpop.permute.xlu0 %1815 }
 0x2a8   : > { %v1818_v18 = vpop.permute.xlu1 %1817  ;;  %2795 = vmatmul.mubr.msk.bf16.gmra.mrb[32].mxu0 %vm580_vm2, %v2032_v47  ;;  %v2006_v55 = vadd.f32 %v3398_v34, %v1974_v36  ;;  %v3404_v36 = vld [vmem:[%s3495_s13 + $0x80] sm:$0xff] }
 0x2a9   : > { %v1911_v43 = vsel %vm1899_vm5, %v1816_v19, %v1818_v18  ;;  %2258 = vmatprep.mubr.bf16.mxu0 %v3428_v49 }
 0x2aa   : > { %v1975_v60 = vmul.f32 %v1911_v43, %v4234_v35  ;;  %v3405_v43 = vld [vmem:[%s3495_s13 + $0x88] sm:$0xff] }
 0x2ac   : > { %v2007_v59 = vadd.f32 %v3399_v51, %v1975_v60  ;;  %v1820_v21 = vpop.permute.xlu0 %1819 }
 0x2ad   : > { %v1822_v25 = vpop.permute.xlu1 %1821 }
 0x2ae   : > { %v2033_v40 = vpack.c.bf16 %v2007_v59, %v2006_v55  ;;  %v1912_v0 = vsel %vm1899_vm5, %v1820_v21, %v1822_v25 }
 0x2af   : > { %v1976_v17 = vmul.f32 %v1912_v0, %v4242_v29  ;;  %v3406_v0 = vld [vmem:[%s3495_s13 + $0x90] sm:$0xff] }
 0x2b0   : > { %v1824_v61 = vpop.permute.xlu0 %1823  ;;  %2796 = vmatmul.mubr.msk.bf16.gmra.mrb[36].mxu0 %vm580_vm2, %v2033_v40 }
 0x2b1   : > { %v1826_v3 = vpop.permute.xlu1 %1825  ;;  %2268 = vmatprep.mubr.bf16.mxu0 %v3428_v49  ;;  %v2008_v5 = vadd.f32 %v3400_v13, %v1976_v17  ;;  %v3407_v17 = vld [vmem:[%s3495_s13 + $0x98] sm:$0xff] }
 0x2b2   : > { %v1913_v35 = vsel %vm1899_vm5, %v1824_v61, %v1826_v3 }
 0x2b3   : > { %v1977_v42 = vmul.f32 %v1913_v35, %v4248_v24 }
 0x2b4   : > { %v1828_v10 = vpop.permute.xlu0 %1827 }
 0x2b5   : > { %v2009_v63 = vadd.f32 %v3401_v9, %v1977_v42  ;;  %v1830_v7 = vpop.permute.xlu1 %1829 }
 0x2b6   : > { %v1914_v2 = vsel %vm1899_vm5, %v1828_v10, %v1830_v7  ;;  %v3408_v7 = vld [vmem:[%s3495_s13 + $0xa0] sm:$0xff] }
 0x2b7   : > { %v2034_v46 = vpack.c.bf16 %v2009_v63, %v2008_v5  ;;  %v1978_v29 = vmul.f32 %v1914_v2, %v4256_v38 }
 0x2b8   : > { %v1832_v23 = vpop.permute.xlu0 %1831 }
 0x2b9   : > { %v1834_v11 = vpop.permute.xlu1 %1833  ;;  %2797 = vmatmul.mubr.msk.bf16.gmra.mrb[40].mxu0 %vm580_vm2, %v2034_v46  ;;  %v2010_v52 = vadd.f32 %v3402_v54, %v1978_v29  ;;  %v3409_v46 = vld [vmem:[%s3495_s13 + $0xa8] sm:$0xff] }
 0x2ba   : > { %v1915_v14 = vsel %vm1899_vm5, %v1832_v23, %v1834_v11  ;;  %2278 = vmatprep.mubr.bf16.mxu0 %v3428_v49 }
 0x2bb   : > { %v1979_v24 = vmul.f32 %v1915_v14, %v4262_v4 }
 0x2bd   : > { %v2011_v12 = vadd.f32 %v3403_v16, %v1979_v24  ;;  %v1836_v22 = vpop.permute.xlu0 %1835 }
 0x2be   : > { %v1838_v31 = vpop.permute.xlu1 %1837 }
 0x2bf   : > { %v2035_v53 = vpack.c.bf16 %v2011_v12, %v2010_v52  ;;  %v1916_v38 = vsel %vm1899_vm5, %v1836_v22, %v1838_v31  ;;  %v3410_v12 = vld [vmem:[%s3495_s13 + $0xb0] sm:$0xff]  ;;  %v3411_v31 = vld [vmem:[%s3495_s13 + $0xb8] sm:$0xff] }
 0x2c0   : > { %v1980_v30 = vmul.f32 %v1916_v38, %v4270_v8 }
 0x2c1   : > { %v1840_v57 = vpop.permute.xlu0 %1839  ;;  %2798 = vmatmul.mubr.msk.bf16.gmra.mrb[44].mxu0 %vm580_vm2, %v2035_v53 }
 0x2c2   : > { %v1842_v56 = vpop.permute.xlu1 %1841  ;;  %2288 = vmatprep.mubr.bf16.mxu0 %v3428_v49  ;;  %v2012_v18 = vadd.f32 %v3404_v36, %v1980_v30  ;;  %v3412_v36 = vld [vmem:[%s3495_s13 + $0xc0] sm:$0xff] }
 0x2c3   : > { %v1917_v4 = vsel %vm1899_vm5, %v1840_v57, %v1842_v56 }
 0x2c4   : > { %v1981_v47 = vmul.f32 %v1917_v4, %v4276_v48 }
 0x2c5   : > { %v1844_v19 = vpop.permute.xlu0 %1843 }
 0x2c6   : > { %v2013_v60 = vadd.f32 %v3405_v43, %v1981_v47  ;;  %v1846_v34 = vpop.permute.xlu1 %1845  ;;  %v3413_v43 = vld [vmem:[%s3495_s13 + $0xc8] sm:$0xff] }
 0x2c7   : > { %v1918_v55 = vsel %vm1899_vm5, %v1844_v19, %v1846_v34 }
 0x2c8   : > { %v2036_v51 = vpack.c.bf16 %v2013_v60, %v2012_v18  ;;  %v1982_v8 = vmul.f32 %v1918_v55, %v4284_v20 }
 0x2c9   : > { %v1848_v59 = vpop.permute.xlu0 %1847 }
 0x2ca   : > { %v1850_v21 = vpop.permute.xlu1 %1849  ;;  %2799 = vmatmul.mubr.msk.bf16.gmra.mrb[48].mxu0 %vm580_vm2, %v2036_v51  ;;  %v2014_v61 = vadd.f32 %v3406_v0, %v1982_v8  ;;  %v3415_v0 = vld [vmem:[%s3495_s13 + $0xd8] sm:$0xff] }
 0x2cb   : > { %v1919_v25 = vsel %vm1899_vm5, %v1848_v59, %v1850_v21  ;;  %2298 = vmatprep.mubr.bf16.mxu0 %v3428_v49 }
 0x2cc   : > { %v1983_v48 = vmul.f32 %v1919_v25, %v4290_v33 }
 0x2cd   : > { %v1852_v40 = vpop.permute.xlu0 %1851 }
 0x2ce   : > { %v2015_v3 = vadd.f32 %v3407_v17, %v1983_v48  ;;  %v1854_v35 = vpop.permute.xlu1 %1853  ;;  %v3414_v48 = vld [vmem:[%s3495_s13 + $0xd0] sm:$0xff] }
 0x2cf   : > { %v1920_v42 = vsel %vm1899_vm5, %v1852_v40, %v1854_v35 }
 0x2d0   : > { %v2037_v20 = vpack.c.bf16 %v2015_v3, %v2014_v61  ;;  %v1984_v13 = vmul.f32 %v1920_v42, %v4297_v50 }
 0x2d1   : > { %v1856_v10 = vpop.permute.xlu0 %1855 }
 0x2d2   : > { %v1858_v5 = vpop.permute.xlu1 %1857  ;;  %2800 = vmatmul.mubr.msk.bf16.gmra.mrb[52].mxu0 %vm580_vm2, %v2037_v20  ;;  %v2016_v2 = vadd.f32 %v3408_v7, %v1984_v13 }
 0x2d3   : > { %v1921_v9 = vsel %vm1899_vm5, %v1856_v10, %v1858_v5  ;;  %2308 = vmatprep.mubr.bf16.mxu0 %v3428_v49  ;;  %v3416_v5 = vld [vmem:[%s3495_s13 + $0xe0] sm:$0xff] }
 0x2d4   : > { %v1985_v33 = vmul.f32 %v1921_v9, %v4304_v39 }
 0x2d5   : > { %v1860_v63 = vpop.permute.xlu0 %1859 }
 0x2d6   : > { %v2017_v23 = vadd.f32 %v3409_v46, %v1985_v33  ;;  %v3417_v33 = vld [vmem:[%s3495_s13 + $0xe8] sm:$0xff] }
 0x2d7   : > { %v1862_v29 = vpop.permute.xlu1 %1861 }
 0x2d8   : > { %v2038_v11 = vpack.c.bf16 %v2017_v23, %v2016_v2  ;;  %v1922_v50 = vsel %vm1899_vm5, %v1860_v63, %v1862_v29 }
 0x2d9   : > { %v1864_v14 = vpop.permute.xlu0 %1863  ;;  %v1986_v24 = vmul.f32 %v1922_v50, %v4311_v37  ;;  %v3418_v50 = vld [vmem:[%s3495_s13 + $0xf0] sm:$0xff] }
 0x2da   : > { %2801 = vmatmul.mubr.msk.bf16.gmra.mrb[56].mxu0 %vm580_vm2, %v2038_v11 }
 0x2db   : > { %v1866_v54 = vpop.permute.xlu1 %1865  ;;  %2318 = vmatprep.mubr.bf16.mxu0 %v3428_v49  ;;  %v2018_v22 = vadd.f32 %v3410_v12, %v1986_v24  ;;  %v3419_v24 = vld [vmem:[%s3495_s13 + $0xf8] sm:$0xff] }
 0x2dc   : > { %v1923_v39 = vsel %vm1899_vm5, %v1864_v14, %v1866_v54 }
 0x2dd   : > { %v1987_v52 = vmul.f32 %v1923_v39, %v4318_v32  ;;  %v1868_v16 = vpop.permute.xlu0 %1867 }
 0x2df   : > { %v2019_v53 = vadd.f32 %v3411_v31, %v1987_v52  ;;  %v1870_v38 = vpop.permute.xlu1 %1869 }
 0x2e0   : > { %v1924_v57 = vsel %vm1899_vm5, %v1868_v16, %v1870_v38 }
 0x2e1   : > { %v2039_v30 = vpack.c.bf16 %v2019_v53, %v2018_v22  ;;  %v1872_v56 = vpop.permute.xlu0 %1871  ;;  %v1988_v37 = vmul.f32 %v1924_v57, %v4325_v6 }
 0x2e3   : > { %v1874_v4 = vpop.permute.xlu1 %1873  ;;  %2802 = vmatmul.mubr.msk.bf16.gmra.mrb[60].mxu0 %vm580_vm2, %v2039_v30  ;;  %v2020_v18 = vadd.f32 %v3412_v36, %v1988_v37 }
 0x2e4   : > { %v1925_v47 = vsel %vm1899_vm5, %v1872_v56, %v1874_v4  ;;  %2328 = vmatprep.mubr.bf16.mxu0 %v3428_v49 }
 0x2e5   : > { %v1989_v32 = vmul.f32 %v1925_v47, %v4331_v62  ;;  %v1876_v19 = vpop.permute.xlu0 %1875 }
 0x2e7   : > { %v2021_v60 = vadd.f32 %v3413_v43, %v1989_v32  ;;  %v1878_v34 = vpop.permute.xlu1 %1877 }
 0x2e8   : > { %v1926_v55 = vsel %vm1899_vm5, %v1876_v19, %v1878_v34 }
 0x2e9   : > { %v2040_v6 = vpack.c.bf16 %v2021_v60, %v2020_v18  ;;  %v1880_v51 = vpop.permute.xlu0 %1879  ;;  %v1990_v59 = vmul.f32 %v1926_v55, %v4339_v1 }
 0x2eb   : > { %v1882_v8 = vpop.permute.xlu1 %1881  ;;  %2803 = vmatmul.mubr.msk.bf16.gmra.mrb[64].mxu0 %vm580_vm2, %v2040_v6  ;;  %v2022_v40 = vadd.f32 %v3414_v48, %v1990_v59 }
 0x2ec   : > { %v1927_v21 = vsel %vm1899_vm5, %v1880_v51, %v1882_v8  ;;  %2338 = vmatprep.mubr.bf16.mxu0 %v3428_v49 }
 0x2ed   : > { %v1991_v62 = vmul.f32 %v1927_v21, %v4345_v58  ;;  %v1884_v25 = vpop.permute.xlu0 %1883 }
 0x2ef   : > { %v2023_v61 = vadd.f32 %v3415_v0, %v1991_v62  ;;  %v1886_v17 = vpop.permute.xlu1 %1885 }
 0x2f0   : > { %v1928_v3 = vsel %vm1899_vm5, %v1884_v25, %v1886_v17 }
 0x2f1   : > { %v2041_v1 = vpack.c.bf16 %v2023_v61, %v2022_v40  ;;  %v1888_v35 = vpop.permute.xlu0 %1887  ;;  %v1992_v42 = vmul.f32 %v1928_v3, %v4353_v15 }
 0x2f3   : > { %v1890_v20 = vpop.permute.xlu1 %1889  ;;  %2804 = vmatmul.mubr.msk.bf16.gmra.mrb[68].mxu0 %vm580_vm2, %v2041_v1  ;;  %v2024_v9 = vadd.f32 %v3416_v5, %v1992_v42 }
 0x2f4   : > { %v1929_v10 = vsel %vm1899_vm5, %v1888_v35, %v1890_v20  ;;  %2348 = vmatprep.mubr.bf16.mxu0 %v3428_v49 }
 0x2f5   : > { %v1993_v58 = vmul.f32 %v1929_v10, %v4359_v44  ;;  %v1892_v13 = vpop.permute.xlu0 %1891 }
 0x2f7   : > { %v2025_v63 = vadd.f32 %v3417_v33, %v1993_v58  ;;  %v1894_v7 = vpop.permute.xlu1 %1893 }
 0x2f8   : > { %v1930_v2 = vsel %vm1899_vm5, %v1892_v13, %v1894_v7 }
 0x2f9   : > { %v2042_v15 = vpack.c.bf16 %v2025_v63, %v2024_v9  ;;  %v1994_v46 = vmul.f32 %v1930_v2, %v4367_v41  ;;  %v1896_v23 = vpop.permute.xlu0 %1895  ;;  %v2056_v41 = vld [vmem:[%s4714_s6] sm:$0x3] }
 0x2fa   : > { %v4528_v52 = vrot.slane %v2056_v41, %v1014_v27 }
 0x2fb   : > { %v1898_v29 = vpop.permute.xlu1 %1897  ;;  %2805 = vmatmul.mubr.msk.bf16.gmra.mrb[72].mxu0 %vm580_vm2, %v2042_v15  ;;  %v2026_v14 = vadd.f32 %v3418_v50, %v1994_v46 }
 0x2fc   : > { %v1931_v11 = vsel %vm1899_vm5, %v1896_v23, %v1898_v29  ;;  %2358 = vmatprep.mubr.bf16.mxu0 %v3428_v49  ;;  %v4532_v49 = vrot.slane %v2056_v41, %v1018_v45 }
 0x2fd   : > { %v1995_v44 = vmul.f32 %v1931_v11, %v4373_v26 }
 0x2ff   : > { %v2027_v54 = vadd.f32 %v3419_v24, %v1995_v44 }
 0x301   : > { %v2043_v39 = vpack.c.bf16 %v2027_v54, %v2026_v14 }
 0x303   : > { %2806 = vmatmul.mubr.msk.bf16.gmra.mrb[76].mxu0 %vm580_vm2, %v2043_v39  ;;  %vm4543_vm2 = vmor %vm2562_vm7, %vm2561_vm6 }
 0x35a   : > { %v2210_v26 = vpop.f32.mrb[16].mxu0 }
 0x35b   : > { %v2211_v16 = vadd.f32 %v2210_v26, %v4528_v52  ;;  %v2212_v12 = vpop.f32.mrb[17].mxu0 }
 0x35c   : > { %v2213_v22 = vadd.f32 %v2212_v12, %v4532_v49  ;;  %v2214_v31 = vpop.f32.mrb[18].mxu0 }
 0x35d   : > { %v2215_v27 = vadd.f32 %v2214_v31, %v4528_v52  ;;  %v2216_v45 = vpop.f32.mrb[19].mxu0 }
 0x35e   : > { %v2842_v53 = vpack.c.bf16 %v2213_v22, %v2211_v16  ;;  %v2217_v38 = vadd.f32 %v2216_v45, %v4532_v49 }
 0x360   : > { %2564 = vst.msk [vmem:[%s4541_s19] sm:$0xff] %vm4543_vm2, %v2842_v53  ;;  %v2843_v57 = vpack.c.bf16 %v2217_v38, %v2215_v27 }
 0x362   : > { %2565 = vst.msk [vmem:[%s4541_s19 + $0x8] sm:$0xff] %vm4543_vm2, %v2843_v57  ;;  %v2220_v30 = vpop.f32.mrb[20].mxu0 }
 0x363   : > { %v2221_v56 = vadd.f32 %v2220_v30, %v4528_v52  ;;  %v2222_v37 = vpop.f32.mrb[21].mxu0 }
 0x364   : > { %v2223_v4 = vadd.f32 %v2222_v37, %v4532_v49  ;;  %v2224_v47 = vpop.f32.mrb[22].mxu0 }
 0x365   : > { %v2225_v32 = vadd.f32 %v2224_v47, %v4528_v52  ;;  %v2226_v19 = vpop.f32.mrb[23].mxu0 }
 0x366   : > { %v2844_v36 = vpack.c.bf16 %v2223_v4, %v2221_v56  ;;  %v2227_v18 = vadd.f32 %v2226_v19, %v4532_v49 }
 0x368   : > { %2566 = vst.msk [vmem:[%s4541_s19 + $0x10] sm:$0xff] %vm4543_vm2, %v2844_v36  ;;  %v2845_v43 = vpack.c.bf16 %v2227_v18, %v2225_v32 }
 0x36a   : > { %2567 = vst.msk [vmem:[%s4541_s19 + $0x18] sm:$0xff] %vm4543_vm2, %v2845_v43  ;;  %v2230_v60 = vpop.f32.mrb[24].mxu0 }
 0x36b   : > { %v2231_v34 = vadd.f32 %v2230_v60, %v4528_v52  ;;  %v2232_v55 = vpop.f32.mrb[25].mxu0 }
 0x36c   : > { %v2233_v6 = vadd.f32 %v2232_v55, %v4532_v49  ;;  %v2234_v51 = vpop.f32.mrb[26].mxu0 }
 0x36d   : > { %v2235_v59 = vadd.f32 %v2234_v51, %v4528_v52  ;;  %v2236_v8 = vpop.f32.mrb[27].mxu0 }
 0x36e   : > { %v2846_v21 = vpack.c.bf16 %v2233_v6, %v2231_v34  ;;  %v2237_v62 = vadd.f32 %v2236_v8, %v4532_v49 }
 0x370   : > { %2568 = vst.msk [vmem:[%s4541_s19 + $0x20] sm:$0xff] %vm4543_vm2, %v2846_v21  ;;  %v2847_v25 = vpack.c.bf16 %v2237_v62, %v2235_v59 }
 0x372   : > { %2569 = vst.msk [vmem:[%s4541_s19 + $0x28] sm:$0xff] %vm4543_vm2, %v2847_v25  ;;  %v2240_v48 = vpop.f32.mrb[28].mxu0 }
 0x373   : > { %v2241_v40 = vadd.f32 %v2240_v48, %v4528_v52  ;;  %v2242_v0 = vpop.f32.mrb[29].mxu0 }
 0x374   : > { %v2243_v61 = vadd.f32 %v2242_v0, %v4532_v49  ;;  %v2244_v17 = vpop.f32.mrb[30].mxu0 }
 0x375   : > { %v2245_v3 = vadd.f32 %v2244_v17, %v4528_v52  ;;  %v2246_v1 = vpop.f32.mrb[31].mxu0 }
 0x376   : > { %v2848_v35 = vpack.c.bf16 %v2243_v61, %v2241_v40  ;;  %v2247_v42 = vadd.f32 %v2246_v1, %v4532_v49 }
 0x378   : > { %2570 = vst.msk [vmem:[%s4541_s19 + $0x30] sm:$0xff] %vm4543_vm2, %v2848_v35  ;;  %v2849_v20 = vpack.c.bf16 %v2247_v42, %v2245_v3 }
 0x37a   : > { %2571 = vst.msk [vmem:[%s4541_s19 + $0x38] sm:$0xff] %vm4543_vm2, %v2849_v20 }
 0x37b   : > { %v2250_v10 = vpop.f32.mrb[32].mxu0 }
 0x37c   : > { %v2251_v58 = vadd.f32 %v2250_v10, %v4528_v52  ;;  %v2252_v13 = vpop.f32.mrb[33].mxu0 }
 0x37d   : > { %v2253_v5 = vadd.f32 %v2252_v13, %v4532_v49  ;;  %v2254_v9 = vpop.f32.mrb[34].mxu0 }
 0x37e   : > { %v2255_v33 = vadd.f32 %v2254_v9, %v4528_v52  ;;  %v2256_v63 = vpop.f32.mrb[35].mxu0 }
 0x37f   : > { %v2850_v7 = vpack.c.bf16 %v2253_v5, %v2251_v58  ;;  %v2257_v2 = vadd.f32 %v2256_v63, %v4532_v49 }
 0x381   : > { %2572 = vst.msk [vmem:[%s4541_s19 + $0x40] sm:$0xff] %vm4543_vm2, %v2850_v7  ;;  %v2851_v15 = vpack.c.bf16 %v2257_v2, %v2255_v33 }
 0x383   : > { %2573 = vst.msk [vmem:[%s4541_s19 + $0x48] sm:$0xff] %vm4543_vm2, %v2851_v15  ;;  %v2260_v46 = vpop.f32.mrb[36].mxu0 }
 0x384   : > { %v2261_v23 = vadd.f32 %v2260_v46, %v4528_v52  ;;  %v2262_v29 = vpop.f32.mrb[37].mxu0 }
 0x385   : > { %v2263_v11 = vadd.f32 %v2262_v29, %v4532_v49  ;;  %v2264_v44 = vpop.f32.mrb[38].mxu0 }
 0x386   : > { %v2265_v50 = vadd.f32 %v2264_v44, %v4528_v52  ;;  %v2266_v14 = vpop.f32.mrb[39].mxu0 }
 0x387   : > { %v2852_v24 = vpack.c.bf16 %v2263_v11, %v2261_v23  ;;  %v2267_v54 = vadd.f32 %v2266_v14, %v4532_v49 }
 0x389   : > { %2574 = vst.msk [vmem:[%s4541_s19 + $0x50] sm:$0xff] %vm4543_vm2, %v2852_v24  ;;  %v2853_v39 = vpack.c.bf16 %v2267_v54, %v2265_v50 }
 0x38b   : > { %2575 = vst.msk [vmem:[%s4541_s19 + $0x58] sm:$0xff] %vm4543_vm2, %v2853_v39 }
 0x38c   : > { %v2270_v41 = vpop.f32.mrb[40].mxu0 }
 0x38d   : > { %v2271_v26 = vadd.f32 %v2270_v41, %v4528_v52  ;;  %v2272_v16 = vpop.f32.mrb[41].mxu0 }
 0x38e   : > { %v2273_v12 = vadd.f32 %v2272_v16, %v4532_v49  ;;  %v2274_v22 = vpop.f32.mrb[42].mxu0 }
 0x38f   : > { %v2275_v31 = vadd.f32 %v2274_v22, %v4528_v52  ;;  %v2276_v27 = vpop.f32.mrb[43].mxu0 }
 0x390   : > { %v2854_v45 = vpack.c.bf16 %v2273_v12, %v2271_v26  ;;  %v2277_v53 = vadd.f32 %v2276_v27, %v4532_v49 }
 0x392   : > { %2576 = vst.msk [vmem:[%s4541_s19 + $0x60] sm:$0xff] %vm4543_vm2, %v2854_v45  ;;  %v2855_v38 = vpack.c.bf16 %v2277_v53, %v2275_v31 }
 0x394   : > { %2577 = vst.msk [vmem:[%s4541_s19 + $0x68] sm:$0xff] %vm4543_vm2, %v2855_v38  ;;  %v2280_v57 = vpop.f32.mrb[44].mxu0 }
 0x395   : > { %v2281_v30 = vadd.f32 %v2280_v57, %v4528_v52  ;;  %v2282_v56 = vpop.f32.mrb[45].mxu0 }
 0x396   : > { %v2283_v37 = vadd.f32 %v2282_v56, %v4532_v49  ;;  %v2284_v4 = vpop.f32.mrb[46].mxu0 }
 0x397   : > { %v2285_v47 = vadd.f32 %v2284_v4, %v4528_v52  ;;  %v2286_v32 = vpop.f32.mrb[47].mxu0 }
 0x398   : > { %v2856_v19 = vpack.c.bf16 %v2283_v37, %v2281_v30  ;;  %v2287_v36 = vadd.f32 %v2286_v32, %v4532_v49 }
 0x39a   : > { %2578 = vst.msk [vmem:[%s4541_s19 + $0x70] sm:$0xff] %vm4543_vm2, %v2856_v19  ;;  %v2857_v18 = vpack.c.bf16 %v2287_v36, %v2285_v47 }
 0x39c   : > { %2579 = vst.msk [vmem:[%s4541_s19 + $0x78] sm:$0xff] %vm4543_vm2, %v2857_v18 }
 0x39d   : > { %v2290_v43 = vpop.f32.mrb[48].mxu0 }
 0x39e   : > { %v2291_v60 = vadd.f32 %v2290_v43, %v4528_v52  ;;  %v2292_v34 = vpop.f32.mrb[49].mxu0 }
 0x39f   : > { %v2293_v55 = vadd.f32 %v2292_v34, %v4532_v49  ;;  %v2294_v6 = vpop.f32.mrb[50].mxu0 }
 0x3a0   : > { %v2295_v51 = vadd.f32 %v2294_v6, %v4528_v52  ;;  %v2296_v59 = vpop.f32.mrb[51].mxu0 }
 0x3a1   : > { %v2858_v8 = vpack.c.bf16 %v2293_v55, %v2291_v60  ;;  %v2297_v21 = vadd.f32 %v2296_v59, %v4532_v49 }
 0x3a3   : > { %2580 = vst.msk [vmem:[%s4541_s19 + $0x80] sm:$0xff] %vm4543_vm2, %v2858_v8  ;;  %v2859_v62 = vpack.c.bf16 %v2297_v21, %v2295_v51 }
 0x3a5   : > { %2581 = vst.msk [vmem:[%s4541_s19 + $0x88] sm:$0xff] %vm4543_vm2, %v2859_v62  ;;  %v2300_v25 = vpop.f32.mrb[52].mxu0 }
 0x3a6   : > { %v2301_v48 = vadd.f32 %v2300_v25, %v4528_v52  ;;  %v2302_v40 = vpop.f32.mrb[53].mxu0 }
 0x3a7   : > { %v2303_v0 = vadd.f32 %v2302_v40, %v4532_v49  ;;  %v2304_v61 = vpop.f32.mrb[54].mxu0 }
 0x3a8   : > { %v2305_v17 = vadd.f32 %v2304_v61, %v4528_v52  ;;  %v2306_v3 = vpop.f32.mrb[55].mxu0 }
 0x3a9   : > { %v2860_v1 = vpack.c.bf16 %v2303_v0, %v2301_v48  ;;  %v2307_v35 = vadd.f32 %v2306_v3, %v4532_v49 }
 0x3ab   : > { %2582 = vst.msk [vmem:[%s4541_s19 + $0x90] sm:$0xff] %vm4543_vm2, %v2860_v1  ;;  %v2861_v42 = vpack.c.bf16 %v2307_v35, %v2305_v17 }
 0x3ad   : > { %2583 = vst.msk [vmem:[%s4541_s19 + $0x98] sm:$0xff] %vm4543_vm2, %v2861_v42  ;;  %v2310_v20 = vpop.f32.mrb[56].mxu0 }
 0x3ae   : > { %v2311_v10 = vadd.f32 %v2310_v20, %v4528_v52  ;;  %v2312_v58 = vpop.f32.mrb[57].mxu0 }
 0x3af   : > { %v2313_v13 = vadd.f32 %v2312_v58, %v4532_v49  ;;  %v2314_v5 = vpop.f32.mrb[58].mxu0 }
 0x3b0   : > { %v2315_v9 = vadd.f32 %v2314_v5, %v4528_v52  ;;  %v2316_v33 = vpop.f32.mrb[59].mxu0 }
 0x3b1   : > { %v2862_v63 = vpack.c.bf16 %v2313_v13, %v2311_v10  ;;  %v2317_v7 = vadd.f32 %v2316_v33, %v4532_v49 }
 0x3b3   : > { %2584 = vst.msk [vmem:[%s4541_s19 + $0xa0] sm:$0xff] %vm4543_vm2, %v2862_v63  ;;  %v2863_v2 = vpack.c.bf16 %v2317_v7, %v2315_v9 }
 0x3b5   : > { %2585 = vst.msk [vmem:[%s4541_s19 + $0xa8] sm:$0xff] %vm4543_vm2, %v2863_v2 }
 0x3b6   : > { %v2320_v15 = vpop.f32.mrb[60].mxu0 }
 0x3b7   : > { %v2321_v46 = vadd.f32 %v2320_v15, %v4528_v52  ;;  %v2322_v23 = vpop.f32.mrb[61].mxu0 }
 0x3b8   : > { %v2323_v29 = vadd.f32 %v2322_v23, %v4532_v49  ;;  %v2324_v11 = vpop.f32.mrb[62].mxu0 }
 0x3b9   : > { %v2325_v44 = vadd.f32 %v2324_v11, %v4528_v52  ;;  %v2326_v50 = vpop.f32.mrb[63].mxu0 }
 0x3ba   : > { %v2864_v14 = vpack.c.bf16 %v2323_v29, %v2321_v46  ;;  %v2327_v24 = vadd.f32 %v2326_v50, %v4532_v49 }
 0x3bc   : > { %2586 = vst.msk [vmem:[%s4541_s19 + $0xb0] sm:$0xff] %vm4543_vm2, %v2864_v14  ;;  %v2865_v54 = vpack.c.bf16 %v2327_v24, %v2325_v44 }
 0x3be   : > { %2587 = vst.msk [vmem:[%s4541_s19 + $0xb8] sm:$0xff] %vm4543_vm2, %v2865_v54  ;;  %v2330_v39 = vpop.f32.mrb[64].mxu0 }
 0x3bf   : > { %v2331_v41 = vadd.f32 %v2330_v39, %v4528_v52  ;;  %v2332_v26 = vpop.f32.mrb[65].mxu0 }
 0x3c0   : > { %v2333_v16 = vadd.f32 %v2332_v26, %v4532_v49  ;;  %v2334_v12 = vpop.f32.mrb[66].mxu0 }
 0x3c1   : > { %v2335_v22 = vadd.f32 %v2334_v12, %v4528_v52  ;;  %v2336_v31 = vpop.f32.mrb[67].mxu0 }
 0x3c2   : > { %v2866_v27 = vpack.c.bf16 %v2333_v16, %v2331_v41  ;;  %v2337_v45 = vadd.f32 %v2336_v31, %v4532_v49 }
 0x3c4   : > { %2588 = vst.msk [vmem:[%s4541_s19 + $0xc0] sm:$0xff] %vm4543_vm2, %v2866_v27  ;;  %v2867_v53 = vpack.c.bf16 %v2337_v45, %v2335_v22 }
 0x3c6   : > { %2589 = vst.msk [vmem:[%s4541_s19 + $0xc8] sm:$0xff] %vm4543_vm2, %v2867_v53  ;;  %v2340_v38 = vpop.f32.mrb[68].mxu0 }
 0x3c7   : > { %v2341_v57 = vadd.f32 %v2340_v38, %v4528_v52  ;;  %v2342_v30 = vpop.f32.mrb[69].mxu0 }
 0x3c8   : > { %v2343_v56 = vadd.f32 %v2342_v30, %v4532_v49  ;;  %v2344_v37 = vpop.f32.mrb[70].mxu0 }
 0x3c9   : > { %v2345_v4 = vadd.f32 %v2344_v37, %v4528_v52  ;;  %v2346_v47 = vpop.f32.mrb[71].mxu0 }
 0x3ca   : > { %v2868_v32 = vpack.c.bf16 %v2343_v56, %v2341_v57  ;;  %v2347_v19 = vadd.f32 %v2346_v47, %v4532_v49 }
 0x3cc   : > { %2590 = vst.msk [vmem:[%s4541_s19 + $0xd0] sm:$0xff] %vm4543_vm2, %v2868_v32  ;;  %v2869_v36 = vpack.c.bf16 %v2347_v19, %v2345_v4 }
 0x3ce   : > { %2591 = vst.msk [vmem:[%s4541_s19 + $0xd8] sm:$0xff] %vm4543_vm2, %v2869_v36  ;;  %v2350_v18 = vpop.f32.mrb[72].mxu0 }
 0x3cf   : > { %v2351_v43 = vadd.f32 %v2350_v18, %v4528_v52  ;;  %v2352_v60 = vpop.f32.mrb[73].mxu0 }
 0x3d0   : > { %v2353_v34 = vadd.f32 %v2352_v60, %v4532_v49  ;;  %v2354_v55 = vpop.f32.mrb[74].mxu0 }
 0x3d1   : > { %v2355_v6 = vadd.f32 %v2354_v55, %v4528_v52  ;;  %v2356_v51 = vpop.f32.mrb[75].mxu0 }
 0x3d2   : > { %v2870_v59 = vpack.c.bf16 %v2353_v34, %v2351_v43  ;;  %v2357_v8 = vadd.f32 %v2356_v51, %v4532_v49 }
 0x3d4   : > { %2592 = vst.msk [vmem:[%s4541_s19 + $0xe0] sm:$0xff] %vm4543_vm2, %v2870_v59  ;;  %v2871_v21 = vpack.c.bf16 %v2357_v8, %v2355_v6 }
 0x3d6   : > { %2593 = vst.msk [vmem:[%s4541_s19 + $0xe8] sm:$0xff] %vm4543_vm2, %v2871_v21  ;;  %v2360_v62 = vpop.f32.mrb[76].mxu0 }
 0x3d7   : > { %v2361_v25 = vadd.f32 %v2360_v62, %v4528_v52  ;;  %v2362_v48 = vpop.f32.mrb[77].mxu0 }
 0x3d8   : > { %v2363_v40 = vadd.f32 %v2362_v48, %v4532_v49  ;;  %v2364_v0 = vpop.f32.mrb[78].mxu0 }
 0x3d9   : > { %v2365_v61 = vadd.f32 %v2364_v0, %v4528_v52  ;;  %v2366_v17 = vpop.f32.mrb[79].mxu0 }
 0x3da   : > { %v2872_v3 = vpack.c.bf16 %v2363_v40, %v2361_v25  ;;  %v2367_v1 = vadd.f32 %v2366_v17, %v4532_v49 }
 0x3dc   : > { %2594 = vst.msk [vmem:[%s4541_s19 + $0xf0] sm:$0xff] %vm4543_vm2, %v2872_v3  ;;  %v2873_v35 = vpack.c.bf16 %v2367_v1, %v2365_v61 }
 0x3de   : > { %2595 = vst.msk [vmem:[%s4541_s19 + $0xf8] sm:$0xff] %vm4543_vm2, %v2873_v35 }
 0x3df PF: > { %s17_s24 = sadd.s32 1, %s3426_s24  }
 0x3e0   : > { %p14_p4 = scmp.ge.s32.totalorder %s17_s24, 4  }
 0x3e2   :  { %16 = sbr.rel (!%p14_p4) target bundleno = 1 (0x1), region = 78 }

// kernel: causal_attention_forward.3
= control target key start
LH: loop header
LB: loop body
LE: loop exit
PB: predicated region body
PF: predicated region fallthrough
CT: control target
= control target key end

     0   :  { %s4245_s6 = smov 0   ;;  %s6043_s0 = inlined_call_operand.vmem [shape: bf16[2,256,192], index: 0, kind: input, shape index: {}]   ;;  %s6044_s1 = inlined_call_operand.vmem [shape: bf16[2,256,128], index: 1, kind: output, shape index: {}]  }
   0x1 LB: > { %s3095_s7 = sadd.s32 4294967295, %s4229_s6   ;;  %p3099_p0 = scmp.ge.s32.totalorder %s4229_s6, 1  ;;  %s4229_s6 = sphi %s4245_s6, %s11_s6  }
   0x2   : > { %p87_p1 = scmp.lt.s32.totalorder %s4229_s6, 3 }
   0x4   : > { %p88_p2 = pnand %p3099_p0, %p87_p1 }
   0x6   : > { %91 = sbr.rel (%p88_p2) target bundleno = 1962 (0x7aa), region = 24 }
   0xd   : > { %p107_p3 = scmp.lt.s32.totalorder %s3095_s7, 1  ;;  %vm394_vm0 = vcmask 130048   ;;  %s4231_s12 = smov 96   ;;  %v150_v57 = vlaneseq }
   0xe   : > { %s4232_s13 = smov 64   ;;  %s4233_s14 = smov 80  }
   0xf   : > { %s6362_s7 = smov (!%p107_p3, %s3095_s7), 1  ;;  %v4472_v58 = vshrl.u32 %v150_v57, 7  ;;  %v4474_v59 = vand.u32 127, %v150_v57  ;;  %s4234_s15 = smov 112  }
  0x10   : > { %s3202_s8 = sshll.u32 %s6362_s7, 8  ;;  %s3203_s16 = sshll.u32 %s6362_s7, 7 }
  0x11   : > { %s4259_s11 = scalar_lea.vmem %s6043_s0, %s3202_s8  ;;  %6131 = vst [vmem:[#allocation2_spill] sm:$0xff] %v4472_v58  ;;  %6132 = vst [vmem:[#allocation3_spill] sm:$0xff] %v4474_v59  ;;  %v4477_v60 = vadd.s32 8, %v4472_v58  ;;  %vm186_vm1 = vcmp.lt.s32.totalorder %v4474_v59, %v4472_v58  ;;  %s5960_s19 = scalar_lea.vmem %s6044_s1, %s3203_s16 }
  0x12   : > { %v4262_v0 = vld [vmem:[%s4259_s11] ss:$8 sps:$4 sm:$0xff]   ;;  %v4270_v2 = vld [vmem:[%s4259_s11 + $0x10] ss:$8 sps:$4 sm:$0xff]  }
  0x13   : > { %v4265_v1 = vld [vmem:[%s4259_s11 + $0x80] ss:$8 sps:$4 sm:$0xff]   ;;  %362 = vrot.lane.b32.xlu0 %v4262_v0, %s4231_s12  ;;  %3347 = vmatprep.mubr.msk.bf16.mxu0 %vm394_vm0, %v4262_v0  ;;  %v4277_v3 = vld [vmem:[%s4259_s11 + $0x90] ss:$8 sps:$4 sm:$0xff]   ;;  %6133 = vst [vmem:[#allocation4_spill] sm:$0xff] %v4477_v60  ;;  %vm188_vm2 = vcmp.lt.s32.totalorder %v4474_v59, %v4477_v60 }
  0x14   : > { %364 = vrot.lane.b32.xlu1 %v4270_v2, %s4231_s12  ;;  %v4282_v4 = vld [vmem:[%s4259_s11 + $0x20] ss:$8 sps:$4 sm:$0xff]   ;;  %v4292_v6 = vld [vmem:[%s4259_s11 + $0x30] ss:$8 sps:$4 sm:$0xff]  }
  0x15   : > { %v4287_v5 = vld [vmem:[%s4259_s11 + $0xa0] ss:$8 sps:$4 sm:$0xff]   ;;  %v4297_v7 = vld [vmem:[%s4259_s11 + $0xb0] ss:$8 sps:$4 sm:$0xff]  }
  0x16   : > { %v4302_v8 = vld [vmem:[%s4259_s11 + $0x40] ss:$8 sps:$4 sm:$0xff]   ;;  %v4312_v10 = vld [vmem:[%s4259_s11 + $0x50] ss:$8 sps:$4 sm:$0xff]  }
  0x17   : > { %378 = vrot.lane.b32.xlu0 %v4265_v1, %s4231_s12  ;;  %v4307_v9 = vld [vmem:[%s4259_s11 + $0xc0] ss:$8 sps:$4 sm:$0xff]   ;;  %v4317_v11 = vld [vmem:[%s4259_s11 + $0xd0] ss:$8 sps:$4 sm:$0xff]  }
  0x18   : > { %380 = vrot.lane.b32.xlu1 %v4277_v3, %s4231_s12  ;;  %v4322_v12 = vld [vmem:[%s4259_s11 + $0x60] ss:$8 sps:$4 sm:$0xff]   ;;  %v4332_v14 = vld [vmem:[%s4259_s11 + $0x70] ss:$8 sps:$4 sm:$0xff]  }
  0x19   : > { %v4327_v13 = vld [vmem:[%s4259_s11 + $0xe0] ss:$8 sps:$4 sm:$0xff]   ;;  %v4337_v15 = vld [vmem:[%s4259_s11 + $0xf0] ss:$8 sps:$4 sm:$0xff]  }
  0x1b   : > { %366 = vrot.lane.b32.xlu0 %v4282_v4, %s4231_s12 }
  0x1c   : > { %382 = vrot.lane.b32.xlu1 %v4287_v5, %s4231_s12 }
  0x1f   : > { %368 = vrot.lane.b32.xlu0 %v4292_v6, %s4231_s12 }
  0x20   : > { %384 = vrot.lane.b32.xlu1 %v4297_v7, %s4231_s12 }
  0x23   : > { %370 = vrot.lane.b32.xlu0 %v4302_v8, %s4231_s12 }
  0x24   : > { %386 = vrot.lane.b32.xlu1 %v4307_v9, %s4231_s12 }
  0x27   : > { %372 = vrot.lane.b32.xlu0 %v4312_v10, %s4231_s12 }
  0x28   : > { %388 = vrot.lane.b32.xlu1 %v4317_v11, %s4231_s12 }
  0x2b   : > { %374 = vrot.lane.b32.xlu0 %v4322_v12, %s4231_s12 }
  0x2c   : > { %390 = vrot.lane.b32.xlu1 %v4327_v13, %s4231_s12 }
  0x2f   : > { %376 = vrot.lane.b32.xlu0 %v4332_v14, %s4231_s12 }
  0x30   : > { %392 = vrot.lane.b32.xlu1 %v4337_v15, %s4231_s12 }
  0x33   : > { %1260 = vrot.lane.b32.xlu0 %v4262_v0, %s4232_s13 }
  0x34   : > { %1276 = vrot.lane.b32.xlu1 %v4265_v1, %s4232_s13 }
  0x37   : > { %1262 = vrot.lane.b32.xlu0 %v4270_v2, %s4232_s13 }
  0x38   : > { %1278 = vrot.lane.b32.xlu1 %v4277_v3, %s4232_s13 }
  0x3b   : > { %1282 = vrot.lane.b32.xlu0 %v4297_v7, %s4232_s13 }
  0x3c   : > { %1280 = vrot.lane.b32.xlu1 %v4287_v5, %s4232_s13 }
  0x3f   : > { %1286 = vrot.lane.b32.xlu0 %v4317_v11, %s4232_s13 }
  0x40   : > { %1264 = vrot.lane.b32.xlu1 %v4282_v4, %s4232_s13 }
  0x43   : > { %1290 = vrot.lane.b32.xlu0 %v4337_v15, %s4232_s13 }
  0x44   : > { %1266 = vrot.lane.b32.xlu1 %v4292_v6, %s4232_s13 }
  0x47   : > { %1517 = vrot.lane.b32.xlu0 %v4265_v1, %s4233_s14 }
  0x48   : > { %1284 = vrot.lane.b32.xlu1 %v4307_v9, %s4232_s13 }
  0x4b   : > { %1519 = vrot.lane.b32.xlu0 %v4277_v3, %s4233_s14 }
  0x4c   : > { %1268 = vrot.lane.b32.xlu1 %v4302_v8, %s4232_s13 }
  0x4f   : > { %1521 = vrot.lane.b32.xlu0 %v4287_v5, %s4233_s14 }
  0x50   : > { %1270 = vrot.lane.b32.xlu1 %v4312_v10, %s4232_s13 }
  0x53   : > { %1523 = vrot.lane.b32.xlu0 %v4297_v7, %s4233_s14 }
  0x54   : > { %1288 = vrot.lane.b32.xlu1 %v4327_v13, %s4232_s13 }
  0x58   : > { %1272 = vrot.lane.b32.xlu1 %v4322_v12, %s4232_s13 }
  0x5c   : > { %1274 = vrot.lane.b32.xlu1 %v4332_v14, %s4232_s13 }
  0x60   : > { %1501 = vrot.lane.b32.xlu1 %v4262_v0, %s4233_s14 }
  0x64   : > { %1503 = vrot.lane.b32.xlu1 %v4270_v2, %s4233_s14 }
  0x68   : > { %1505 = vrot.lane.b32.xlu1 %v4282_v4, %s4233_s14 }
  0x6c   : > { %1507 = vrot.lane.b32.xlu1 %v4292_v6, %s4233_s14 }
  0x70   : > { %1509 = vrot.lane.b32.xlu1 %v4302_v8, %s4233_s14 }
  0x85   : > { %v363_v16 = vpop.permute.xlu0 %362 }
  0x86   : > { %v365_v17 = vpop.permute.xlu1 %364  ;;  %v444_v19 = vsel %vm394_vm0, %v363_v16, 0 }
  0x87   : > { %v447_v22 = vsel %vm394_vm0, %v365_v17, 0 }
  0x89   : > { %v379_v18 = vpop.permute.xlu0 %378 }
  0x8a   : > { %3667 = vmatprep.subr.msk.bf16.mxu0 %vm394_vm0, %v379_v18  ;;  %v381_v20 = vpop.permute.xlu1 %380  ;;  %v4520_v18 = vadd.s32 40, %v4472_v58 }
  0x8b   : > { %3332 = vmatpush3.bf16.xpose.msra.mxu0 %v444_v19 }
  0x8c   : > { %3668 = vmatprep.subr.msk.bf16.mxu0 %vm394_vm0, %v381_v20  ;;  %6137 = vst [vmem:[#allocation8_spill] sm:$0xff] %v4520_v18  ;;  %vm196_vm6 = vcmp.lt.s32.totalorder %v4474_v59, %v4520_v18 }
  0x8d   : > { %v367_v23 = vpop.permute.xlu0 %366 }
  0x8e   : > { %v383_v21 = vpop.permute.xlu1 %382  ;;  %v450_v24 = vsel %vm394_vm0, %v367_v23, 0 }
  0x91   : > { %v369_v26 = vpop.permute.xlu0 %368 }
  0x92   : > { %v385_v25 = vpop.permute.xlu1 %384  ;;  %v453_v27 = vsel %vm394_vm0, %v369_v26, 0 }
  0x93   : > { %3334 = vmatpush3.bf16.xpose.msra.mxu0 %v447_v22 }
  0x94   : > { %3669 = vmatprep.subr.msk.bf16.mxu0 %vm394_vm0, %v383_v21 }
  0x95   : > { %v371_v29 = vpop.permute.xlu0 %370 }
  0x96   : > { %v387_v28 = vpop.permute.xlu1 %386  ;;  %v456_v30 = vsel %vm394_vm0, %v371_v29, 0  ;;  %v4543_v29 = vadd.s32 56, %v4472_v58 }
  0x98   : > { %6139 = vst [vmem:[#allocation10_spill] sm:$0xff] %v4543_v29  ;;  %vm200_vm8 = vcmp.lt.s32.totalorder %v4474_v59, %v4543_v29 }
  0x99   : > { %v373_v32 = vpop.permute.xlu0 %372 }
  0x9a   : > { %v389_v31 = vpop.permute.xlu1 %388  ;;  %v459_v33 = vsel %vm394_vm0, %v373_v32, 0 }
  0x9b   : > { %3336 = vmatpush3.bf16.xpose.msra.mxu0 %v450_v24 }
  0x9c   : > { %3670 = vmatprep.subr.msk.bf16.mxu0 %vm394_vm0, %v385_v25  ;;  %v4534_v25 = vadd.s32 48, %v4472_v58 }
  0x9d   : > { %v375_v35 = vpop.permute.xlu0 %374 }
  0x9e   : > { %v391_v34 = vpop.permute.xlu1 %390  ;;  %v462_v36 = vsel %vm394_vm0, %v375_v35, 0  ;;  %6138 = vst [vmem:[#allocation9_spill] sm:$0xff] %v4534_v25  ;;  %vm198_vm7 = vcmp.lt.s32.totalorder %v4474_v59, %v4534_v25  ;;  %v4556_v35 = vadd.s32 64, %v4472_v58 }
  0xa0   : > { %6140 = vst [vmem:[#allocation11_spill] sm:$0xff] %v4556_v35  ;;  %vm202_vm9 = vcmp.lt.s32.totalorder %v4474_v59, %v4556_v35 }
  0xa1   : > { %v377_v38 = vpop.permute.xlu0 %376 }
  0xa2   : > { %v393_v37 = vpop.permute.xlu1 %392  ;;  %v465_v39 = vsel %vm394_vm0, %v377_v38, 0 }
  0xa3   : > { %3338 = vmatpush3.bf16.xpose.msra.mxu0 %v453_v27 }
  0xa4   : > { %3671 = vmatprep.subr.msk.bf16.mxu0 %vm394_vm0, %v387_v28 }
  0xa5   : > { %v1261_v41 = vpop.permute.xlu0 %1260 }
  0xa6   : > { %v1277_v40 = vpop.permute.xlu1 %1276 }
  0xa7   : > { %3379 = vmatprep.subr.bf16.mxu1 %v1277_v40 }
  0xa8   : > { %3380 = vmatpush3.bf16.msra.mxu1 %v1261_v41 }
  0xa9   : > { %v1263_v43 = vpop.permute.xlu0 %1262 }
  0xaa   : > { %v1279_v42 = vpop.permute.xlu1 %1278 }
  0xab   : > { %3340 = vmatpush3.bf16.xpose.msra.mxu0 %v456_v30  ;;  %3381 = vmatprep.subr.bf16.mxu1 %v1279_v42 }
  0xac   : > { %3672 = vmatprep.subr.msk.bf16.mxu0 %vm394_vm0, %v389_v31  ;;  %3382 = vmatpush3.bf16.msra.mxu1 %v1263_v43 }
  0xad   : > { %v1283_v46 = vpop.permute.xlu0 %1282 }
  0xae   : > { %v1281_v44 = vpop.permute.xlu1 %1280 }
  0xaf   : > { %3383 = vmatprep.subr.bf16.mxu1 %v1281_v44 }
  0xb1   : > { %v1287_v50 = vpop.permute.xlu0 %1286 }
  0xb2   : > { %v1265_v45 = vpop.permute.xlu1 %1264 }
  0xb3   : > { %3342 = vmatpush3.bf16.xpose.msra.mxu0 %v459_v33  ;;  %3384 = vmatpush3.bf16.msra.mxu1 %v1265_v45  ;;  %v4578_v45 = vadd.s32 80, %v4472_v58 }
  0xb4   : > { %3673 = vmatprep.subr.msk.bf16.mxu0 %vm394_vm0, %v391_v34  ;;  %3385 = vmatprep.subr.bf16.mxu1 %v1283_v46 }
  0xb5   : > { %v1291_v54 = vpop.permute.xlu0 %1290  ;;  %6142 = vst [vmem:[#allocation13_spill] sm:$0xff] %v4578_v45  ;;  %vm206_vm11 = vcmp.lt.s32.totalorder %v4474_v59, %v4578_v45  ;;  %v4842_v45 = vadd.s32 240, %v4472_v58 }
  0xb6   : > { %v1267_v47 = vpop.permute.xlu1 %1266 }
  0xb7   : > { %3386 = vmatpush3.bf16.msra.mxu1 %v1267_v47  ;;  %6163 = vst [vmem:[#allocation34_spill] sm:$0xff] %v4842_v45 }
  0xb9   : > { %v1518_v56 = vpop.permute.xlu0 %1517 }
  0xba   : > { %v1285_v48 = vpop.permute.xlu1 %1284 }
  0xbb   : > { %3344 = vmatpush3.bf16.xpose.msra.mxu0 %v462_v36  ;;  %3387 = vmatprep.subr.bf16.mxu1 %v1285_v48 }
  0xbc   : > { %3674 = vmatprep.subr.msk.bf16.mxu0 %vm394_vm0, %v393_v37 }
  0xbe   : > { %v1269_v49 = vpop.permute.xlu1 %1268 }
  0xbf   : > { %3388 = vmatpush3.bf16.msra.mxu1 %v1269_v49  ;;  %v4587_v49 = vadd.s32 88, %v4472_v58 }
  0xc0   : > { %3389 = vmatprep.subr.bf16.mxu1 %v1287_v50 }
  0xc1   : > { %6143 = vst [vmem:[#allocation14_spill] sm:$0xff] %v4587_v49  ;;  %vm208_vm12 = vcmp.lt.s32.totalorder %v4474_v59, %v4587_v49 }
  0xc2   : > { %v1271_v51 = vpop.permute.xlu1 %1270 }
  0xc3   : > { %3346 = vmatpush3.bf16.xpose.msra.mxu0 %v465_v39  ;;  %3390 = vmatpush3.bf16.msra.mxu1 %v1271_v51  ;;  %v4565_v39 = vadd.s32 72, %v4472_v58 }
  0xc5   : > { %6141 = vst [vmem:[#allocation12_spill] sm:$0xff] %v4565_v39  ;;  %vm204_vm10 = vcmp.lt.s32.totalorder %v4474_v59, %v4565_v39 }
  0xc6   : > { %v1289_v52 = vpop.permute.xlu1 %1288 }
  0xc7   : > { %3391 = vmatprep.subr.bf16.mxu1 %v1289_v52 }
  0xca   : > { %3348 = vmatmul.mubr.msk.bf16.vlgmr.msra.gmra.mrb[0].mxu0 %vm394_vm0, %v4262_v0  ;;  %v1273_v53 = vpop.permute.xlu1 %1272 }
  0xcb   : > { %3349 = vmatprep.mubr.msk.bf16.mxu0 %vm394_vm0, %v4270_v2  ;;  %3392 = vmatpush3.bf16.msra.mxu1 %v1273_v53 }
  0xcc   : > { %3393 = vmatprep.subr.bf16.mxu1 %v1291_v54 }
  0xce   : > { %v1275_v55 = vpop.permute.xlu1 %1274 }
  0xcf   : > { %3394 = vmatpush3.bf16.msra.mxu1 %v1275_v55  ;;  %v4600_v55 = vadd.s32 96, %v4472_v58 }
  0xd0   : > { %3675 = vmatprep.subr.msk.bf16.mxu1 %vm394_vm0, %v1518_v56 }
  0xd1   : > { %6144 = vst [vmem:[#allocation15_spill] sm:$0xff] %v4600_v55  ;;  %vm6045_vm13 = vcmp.lt.s32.totalorder %v4474_v59, %v4600_v55 }
  0xd2   : > { %3350 = vmatmul.mubr.msk.bf16.gmra.mrb[4].mxu0 %vm394_vm0, %v4270_v2  ;;  %v4490_v2 = vadd.s32 16, %v4472_v58  ;;  %v4854_v35 = vpop.permute.xlu1 %1501 }
  0xd3   : > { %3351 = vmatprep.mubr.msk.bf16.mxu0 %vm394_vm0, %v4282_v4  ;;  %6165 = vst [vmem:[#allocation36_spill] sm:$0xff] %v4854_v35 }
  0xd4   : > { %6134 = vst [vmem:[#allocation5_spill] sm:$0xff] %v4490_v2  ;;  %vm190_vm3 = vcmp.lt.s32.totalorder %v4474_v59, %v4490_v2 }
  0xda   : > { %3352 = vmatmul.mubr.msk.bf16.gmra.mrb[8].mxu0 %vm394_vm0, %v4282_v4 }
  0xdb   : > { %3353 = vmatprep.mubr.msk.bf16.mxu0 %vm394_vm0, %v4292_v6 }
  0xe2   : > { %3354 = vmatmul.mubr.msk.bf16.gmra.mrb[12].mxu0 %vm394_vm0, %v4292_v6  ;;  %v4499_v6 = vadd.s32 24, %v4472_v58 }
  0xe3   : > { %3355 = vmatprep.mubr.msk.bf16.mxu0 %vm394_vm0, %v4302_v8 }
  0xe4   : > { %6135 = vst [vmem:[#allocation6_spill] sm:$0xff] %v4499_v6  ;;  %vm192_vm4 = vcmp.lt.s32.totalorder %v4474_v59, %v4499_v6 }
  0xea   : > { %3356 = vmatmul.mubr.msk.bf16.gmra.mrb[16].mxu0 %vm394_vm0, %v4302_v8 }
  0xeb   : > { %3357 = vmatprep.mubr.msk.bf16.mxu0 %vm394_vm0, %v4312_v10 }
  0xf2   : > { %3358 = vmatmul.mubr.msk.bf16.gmra.mrb[20].mxu0 %vm394_vm0, %v4312_v10 }
  0xf3   : > { %3359 = vmatprep.mubr.msk.bf16.mxu0 %vm394_vm0, %v4322_v12 }
  0xfa   : > { %3360 = vmatmul.mubr.msk.bf16.gmra.mrb[24].mxu0 %vm394_vm0, %v4322_v12 }
  0xfb   : > { %3361 = vmatprep.mubr.msk.bf16.mxu0 %vm394_vm0, %v4332_v14 }
 0x102   : > { %3362 = vmatmul.mubr.msk.bf16.gmra.mrb[28].mxu0 %vm394_vm0, %v4332_v14 }
 0x103   : > { %3363 = vmatprep.mubr.msk.bf16.mxu0 %vm394_vm0, %v4265_v1 }
 0x10a   : > { %3364 = vmatmul.mubr.msk.bf16.gmra.mrb[32].mxu0 %vm394_vm0, %v4265_v1 }
 0x10b   : > { %3365 = vmatprep.mubr.msk.bf16.mxu0 %vm394_vm0, %v4277_v3 }
 0x112   : > { %3366 = vmatmul.mubr.msk.bf16.gmra.mrb[36].mxu0 %vm394_vm0, %v4277_v3 }
 0x113   : > { %3367 = vmatprep.mubr.msk.bf16.mxu0 %vm394_vm0, %v4287_v5 }
 0x11a   : > { %3368 = vmatmul.mubr.msk.bf16.gmra.mrb[40].mxu0 %vm394_vm0, %v4287_v5 }
 0x11b   : > { %3369 = vmatprep.mubr.msk.bf16.mxu0 %vm394_vm0, %v4297_v7 }
 0x122   : > { %3370 = vmatmul.mubr.msk.bf16.gmra.mrb[44].mxu0 %vm394_vm0, %v4297_v7 }
 0x123   : > { %3371 = vmatprep.mubr.msk.bf16.mxu0 %vm394_vm0, %v4307_v9 }
 0x12a   : > { %3372 = vmatmul.mubr.msk.bf16.gmra.mrb[48].mxu0 %vm394_vm0, %v4307_v9 }
 0x12b   : > { %3373 = vmatprep.mubr.msk.bf16.mxu0 %vm394_vm0, %v4317_v11 }
 0x132   : > { %3374 = vmatmul.mubr.msk.bf16.gmra.mrb[52].mxu0 %vm394_vm0, %v4317_v11 }
 0x133   : > { %3375 = vmatprep.mubr.msk.bf16.mxu0 %vm394_vm0, %v4327_v13 }
 0x13a   : > { %3376 = vmatmul.mubr.msk.bf16.gmra.mrb[56].mxu0 %vm394_vm0, %v4327_v13 }
 0x13b   : > { %3377 = vmatprep.mubr.msk.bf16.mxu0 %vm394_vm0, %v4337_v15 }
 0x142   : > { %3378 = vmatmul.mubr.msk.bf16.gmra.mrb[60].mxu0 %vm394_vm0, %v4337_v15  ;;  %v4512_v15 = vadd.s32 32, %v4472_v58 }
 0x144   : > { %6136 = vst [vmem:[#allocation7_spill] sm:$0xff] %v4512_v15  ;;  %vm194_vm5 = vcmp.lt.s32.totalorder %v4474_v59, %v4512_v15  ;;  %v4876_v15 = vpop.permute.xlu1 %1503 }
 0x145   : > { %6168 = vst [vmem:[#allocation39_spill] sm:$0xff] %v4876_v15 }
 0x19d   : > { %v525_v61 = vpop.f32.mrb[0].mxu0 }
 0x19e   : > { %v4486_v62 = vsel %vm186_vm1, %v525_v61, -10000.0  ;;  %v527_v63 = vpop.f32.mrb[1].mxu0 }
 0x19f   : > { %v529_v0 = vpop.f32.mrb[2].mxu0  ;;  %v748_v1 = vmax.f32 %v4486_v62, -10000.0  ;;  %v4609_v63 = vadd.s32 104, %v4472_v58 }
 0x1a0   : > { %v4495_v3 = vsel %vm188_vm2, %v529_v0, -10000.0  ;;  %v531_v4 = vpop.f32.mrb[3].mxu0 }
 0x1a1   : > { %749 = vmax.xlane.f32.xlu0 %v748_v1  ;;  %v751_v5 = vmax.f32 %v4495_v3, -10000.0  ;;  %6145 = vst [vmem:[#allocation16_spill] sm:$0xff] %v4609_v63  ;;  %vm6049_vm14 = vcmp.lt.s32.totalorder %v4474_v59, %v4609_v63 }
 0x1a3   : > { %752 = vmax.xlane.f32.xlu1 %v751_v5 }
 0x1a5   : > { %v535_v7 = vpop.f32.mrb[4].mxu0 }
 0x1a6   : > { %v4508_v8 = vsel %vm190_vm3, %v535_v7, -10000.0  ;;  %v537_v12 = vpop.f32.mrb[5].mxu0 }
 0x1a7   : > { %v539_v13 = vpop.f32.mrb[6].mxu0  ;;  %v754_v14 = vmax.f32 %v4508_v8, -10000.0  ;;  %v4622_v12 = vadd.s32 112, %v4472_v58 }
 0x1a8   : > { %v4517_v16 = vsel %vm192_vm4, %v539_v13, -10000.0  ;;  %v541_v17 = vpop.f32.mrb[7].mxu0 }
 0x1a9   : > { %755 = vmax.xlane.f32.xlu0 %v754_v14  ;;  %v757_v19 = vmax.f32 %v4517_v16, -10000.0  ;;  %6146 = vst [vmem:[#allocation17_spill] sm:$0xff] %v4622_v12  ;;  %vm6046_vm15 = vcmp.lt.s32.totalorder %v4474_v59, %v4622_v12  ;;  %v4814_v12 = vadd.s32 224, %v4472_v58 }
 0x1ab   : > { %6161 = vst [vmem:[#allocation32_spill] sm:$0xff] %v4814_v12 }
 0x1ad   : > { %758 = vmax.xlane.f32.xlu0 %v757_v19  ;;  %v545_v20 = vpop.f32.mrb[8].mxu0  ;;  %v4631_v19 = vadd.s32 120, %v4472_v58 }
 0x1ae   : > { %v4530_v21 = vsel %vm194_vm5, %v545_v20, -10000.0  ;;  %v547_v22 = vpop.f32.mrb[9].mxu0 }
 0x1af   : > { %v549_v23 = vpop.f32.mrb[10].mxu0  ;;  %v760_v24 = vmax.f32 %v4530_v21, -10000.0  ;;  %6147 = vst [vmem:[#allocation18_spill] sm:$0xff] %v4631_v19 }
 0x1b0   : > { %v4539_v26 = vsel %vm196_vm6, %v549_v23, -10000.0  ;;  %v551_v27 = vpop.f32.mrb[11].mxu0 }
 0x1b1   : > { %761 = vmax.xlane.f32.xlu1 %v760_v24  ;;  %v763_v28 = vmax.f32 %v4539_v26, -10000.0 }
 0x1b3   : > { %764 = vmax.xlane.f32.xlu0 %v763_v28 }
 0x1b5   : > { %v555_v30 = vpop.f32.mrb[12].mxu0 }
 0x1b6   : > { %v4552_v31 = vsel %vm198_vm7, %v555_v30, -10000.0  ;;  %v557_v32 = vpop.f32.mrb[13].mxu0 }
 0x1b7   : > { %v559_v33 = vpop.f32.mrb[14].mxu0  ;;  %v766_v34 = vmax.f32 %v4552_v31, -10000.0  ;;  %v4649_v32 = vadd.s32 128, %v4472_v58 }
 0x1b8   : > { %v4561_v36 = vsel %vm200_vm8, %v559_v33, -10000.0  ;;  %v561_v37 = vpop.f32.mrb[15].mxu0  ;;  %v4652_v33 = vadd.s32 128, %v4474_v59 }
 0x1b9   : > { %767 = vmax.xlane.f32.xlu1 %v766_v34  ;;  %v769_v38 = vmax.f32 %v4561_v36, -10000.0  ;;  %6148 = vst [vmem:[#allocation19_spill] sm:$0xff] %v4649_v32  ;;  %v4656_v37 = vadd.s32 136, %v4472_v58 }
 0x1ba   : > { %6149 = vst [vmem:[#allocation20_spill] sm:$0xff] %v4652_v33 }
 0x1bb   : > { %770 = vmax.xlane.f32.xlu0 %v769_v38  ;;  %6150 = vst [vmem:[#allocation21_spill] sm:$0xff] %v4656_v37 }
 0x1bd   : > { %v565_v40 = vpop.f32.mrb[16].mxu0 }
 0x1be   : > { %v4574_v41 = vsel %vm202_vm9, %v565_v40, -10000.0  ;;  %v567_v42 = vpop.f32.mrb[17].mxu0 }
 0x1bf   : > { %v569_v43 = vpop.f32.mrb[18].mxu0  ;;  %v772_v44 = vmax.f32 %v4574_v41, -10000.0 }
 0x1c0   : > { %v4583_v46 = vsel %vm204_vm10, %v569_v43, -10000.0  ;;  %v571_v47 = vpop.f32.mrb[19].mxu0 }
 0x1c1   : > { %773 = vmax.xlane.f32.xlu1 %v772_v44  ;;  %v775_v48 = vmax.f32 %v4583_v46, -10000.0 }
 0x1c3   : > { %776 = vmax.xlane.f32.xlu0 %v775_v48  ;;  %v4674_v48 = vadd.s32 144, %v4472_v58 }
 0x1c5   : > { %v575_v50 = vpop.f32.mrb[20].mxu0  ;;  %6151 = vst [vmem:[#allocation22_spill] sm:$0xff] %v4674_v48 }
 0x1c6   : > { %v4596_v51 = vsel %vm206_vm11, %v575_v50, -10000.0  ;;  %v577_v52 = vpop.f32.mrb[21].mxu0 }
 0x1c7   : > { %v579_v53 = vpop.f32.mrb[22].mxu0  ;;  %v778_v54 = vmax.f32 %v4596_v51, -10000.0 }
 0x1c8   : > { %v4605_v56 = vsel %vm208_vm12, %v579_v53, -10000.0  ;;  %v581_v57 = vpop.f32.mrb[23].mxu0  ;;  %v4684_v53 = vadd.s32 152, %v4472_v58 }
 0x1c9   : > { %779 = vmax.xlane.f32.xlu1 %v778_v54  ;;  %v781_v61 = vmax.f32 %v4605_v56, -10000.0 }
 0x1ca   : > { %6152 = vst [vmem:[#allocation23_spill] sm:$0xff] %v4684_v53 }
 0x1cb   : > { %782 = vmax.xlane.f32.xlu0 %v781_v61 }
 0x1cd   : > { %v585_v0 = vpop.f32.mrb[24].mxu0 }
 0x1ce   : > { %v4618_v1 = vsel %vm6045_vm13, %v585_v0, -10000.0  ;;  %v587_v4 = vpop.f32.mrb[25].mxu0  ;;  %vm6047_vm13 = vcmp.lt.s32.totalorder %v4474_v59, %v4631_v19 }
 0x1cf   : > { %v589_v5 = vpop.f32.mrb[26].mxu0  ;;  %v784_v7 = vmax.f32 %v4618_v1, -10000.0 }
 0x1d0   : > { %v4627_v13 = vsel %vm6049_vm14, %v589_v5, -10000.0  ;;  %v591_v14 = vpop.f32.mrb[27].mxu0  ;;  %vm6053_vm14 = vcmp.lt.s32.totalorder %v4652_v33, %v4684_v53 }
 0x1d1   : > { %785 = vmax.xlane.f32.xlu1 %v784_v7  ;;  %v787_v17 = vmax.f32 %v4627_v13, -10000.0  ;;  %v4702_v7 = vadd.s32 160, %v4472_v58 }
 0x1d3   : > { %788 = vmax.xlane.f32.xlu0 %v787_v17  ;;  %6153 = vst [vmem:[#allocation24_spill] sm:$0xff] %v4702_v7 }
 0x1d5   : > { %v595_v20 = vpop.f32.mrb[28].mxu0 }
 0x1d6   : > { %v4640_v22 = vsel %vm6046_vm15, %v595_v20, -10000.0  ;;  %v597_v23 = vpop.f32.mrb[29].mxu0  ;;  %vm6048_vm15 = vcmp.lt.s32.totalorder %v4652_v33, %v4649_v32  ;;  %v4712_v20 = vadd.s32 168, %v4472_v58 }
 0x1d7   : > { %v599_v24 = vpop.f32.mrb[30].mxu0  ;;  %v790_v27 = vmax.f32 %v4640_v22, -10000.0 }
 0x1d8   : > { %v4646_v28 = vsel %vm6047_vm13, %v599_v24, -10000.0  ;;  %v601_v30 = vpop.f32.mrb[31].mxu0  ;;  %vm6051_vm13 = vcmp.lt.s32.totalorder %v4652_v33, %v4656_v37  ;;  %6154 = vst [vmem:[#allocation25_spill] sm:$0xff] %v4712_v20  ;;  %v4786_v37 = vadd.s32 208, %v4472_v58 }
 0x1d9   : > { %791 = vmax.xlane.f32.xlu1 %v790_v27  ;;  %v793_v34 = vmax.f32 %v4646_v28, -10000.0 }
 0x1da   : > { %6159 = vst [vmem:[#allocation30_spill] sm:$0xff] %v4786_v37 }
 0x1db   : > { %794 = vmax.xlane.f32.xlu0 %v793_v34 }
 0x1dd   : > { %v4660_v38 = vpop.f32.mrb[32].mxu0 }
 0x1de   : > { %v607_v40 = vpop.f32.mrb[33].mxu0 }
 0x1df   : > { %v4667_v42 = vsel %vm6048_vm15, %v607_v40, -10000.0  ;;  %v4669_v43 = vpop.f32.mrb[34].mxu0  ;;  %vm6050_vm15 = vcmp.lt.s32.totalorder %v4652_v33, %v4674_v48 }
 0x1e0   : > { %v611_v44 = vpop.f32.mrb[35].mxu0  ;;  %v796_v47 = vmax.f32 %v4660_v38, %v4667_v42 }
 0x1e1   : > { %v4679_v50 = vsel %vm6051_vm13, %v611_v44, -10000.0  ;;  %vm6059_vm13 = vcmp.lt.s32.totalorder %v4652_v33, %v4712_v20  ;;  %v4730_v44 = vadd.s32 176, %v4472_v58 }
 0x1e2   : > { %797 = vmax.xlane.f32.xlu1 %v796_v47  ;;  %v799_v52 = vmax.f32 %v4669_v43, %v4679_v50 }
 0x1e3   : > { %6155 = vst [vmem:[#allocation26_spill] sm:$0xff] %v4730_v44 }
 0x1e4   : > { %800 = vmax.xlane.f32.xlu0 %v799_v52 }
 0x1e5   : > { %v4688_v54 = vpop.f32.mrb[36].mxu0 }
 0x1e6   : > { %v617_v57 = vpop.f32.mrb[37].mxu0 }
 0x1e7   : > { %v4695_v61 = vsel %vm6050_vm15, %v617_v57, -10000.0  ;;  %v4697_v0 = vpop.f32.mrb[38].mxu0  ;;  %vm6052_vm15 = vcmp.lt.s32.totalorder %v4652_v33, %v4702_v7  ;;  %v4740_v57 = vadd.s32 184, %v4472_v58  ;;  %v4766_v7 = vadd.s32 200, %v4472_v58 }
 0x1e8   : > { %v621_v4 = vpop.f32.mrb[39].mxu0  ;;  %v802_v5 = vmax.f32 %v4688_v54, %v4695_v61 }
 0x1e9   : > { %v4707_v14 = vsel %vm6053_vm14, %v621_v4, -10000.0  ;;  %6156 = vst [vmem:[#allocation27_spill] sm:$0xff] %v4740_v57  ;;  %vm6067_vm14 = vcmp.lt.s32.totalorder %v4652_v33, %v4740_v57  ;;  %6158 = vst [vmem:[#allocation29_spill] sm:$0xff] %v4766_v7 }
 0x1ea   : > { %803 = vmax.xlane.f32.xlu1 %v802_v5  ;;  %v805_v17 = vmax.f32 %v4697_v0, %v4707_v14 }
 0x1ec   : > { %806 = vmax.xlane.f32.xlu0 %v805_v17 }
 0x1ed   : > { %v4716_v23 = vpop.f32.mrb[40].mxu0 }
 0x1ee   : > { %v627_v24 = vpop.f32.mrb[41].mxu0 }
 0x1ef   : > { %v4723_v27 = vsel %vm6052_vm15, %v627_v24, -10000.0  ;;  %v4725_v30 = vpop.f32.mrb[42].mxu0  ;;  %vm6056_vm15 = vcmp.lt.s32.totalorder %v4652_v33, %v4730_v44 }
 0x1f0   : > { %v631_v34 = vpop.f32.mrb[43].mxu0  ;;  %v808_v40 = vmax.f32 %v4716_v23, %v4723_v27 }
 0x1f1   : > { %v4735_v47 = vsel %vm6059_vm13, %v631_v34, -10000.0  ;;  %vm6075_vm13 = vcmp.lt.s32.totalorder %v4652_v33, %v4766_v7 }
 0x1f2   : > { %809 = vmax.xlane.f32.xlu1 %v808_v40  ;;  %v811_v52 = vmax.f32 %v4725_v30, %v4735_v47 }
 0x1f4   : > { %812 = vmax.xlane.f32.xlu0 %v811_v52  ;;  %v4758_v52 = vadd.s32 192, %v4472_v58 }
 0x1f5   : > { %v4744_v4 = vpop.f32.mrb[44].mxu0 }
 0x1f6   : > { %v637_v5 = vpop.f32.mrb[45].mxu0  ;;  %6157 = vst [vmem:[#allocation28_spill] sm:$0xff] %v4758_v52 }
 0x1f7   : > { %v4751_v17 = vsel %vm6056_vm15, %v637_v5, -10000.0  ;;  %v4753_v24 = vpop.f32.mrb[46].mxu0  ;;  %vm6064_vm15 = vcmp.lt.s32.totalorder %v4652_v33, %v4758_v52 }
 0x1f8   : > { %v641_v34 = vpop.f32.mrb[47].mxu0  ;;  %v814_v40 = vmax.f32 %v4744_v4, %v4751_v17 }
 0x1f9   : > { %v4763_v20 = vsel %vm6067_vm14, %v641_v34, -10000.0 }
 0x1fa   : > { %815 = vmax.xlane.f32.xlu0 %v814_v40  ;;  %v817_v5 = vmax.f32 %v4753_v24, %v4763_v20 }
 0x1fd   : > { %v4772_v44 = vpop.f32.mrb[48].mxu0 }
 0x1fe   : > { %818 = vmax.xlane.f32.xlu0 %v817_v5  ;;  %v647_v53 = vpop.f32.mrb[49].mxu0 }
 0x1ff   : > { %v4779_v34 = vsel %vm6064_vm15, %v647_v53, -10000.0  ;;  %v4781_v40 = vpop.f32.mrb[50].mxu0  ;;  %v4796_v53 = vadd.s32 216, %v4472_v58  ;;  %vm6072_vm15 = vcmp.lt.s32.totalorder %v4652_v33, %v4786_v37 }
 0x200   : > { %v651_v57 = vpop.f32.mrb[51].mxu0  ;;  %v820_v48 = vmax.f32 %v4772_v44, %v4779_v34 }
 0x201   : > { %v4791_v5 = vsel %vm6075_vm13, %v651_v57, -10000.0  ;;  %6160 = vst [vmem:[#allocation31_spill] sm:$0xff] %v4796_v53  ;;  %vm6081_vm14 = vcmp.lt.s32.totalorder %v4652_v33, %v4796_v53 }
 0x202   : > { %821 = vmax.xlane.f32.xlu1 %v820_v48  ;;  %v823_v52 = vmax.f32 %v4781_v40, %v4791_v5 }
 0x204   : > { %824 = vmax.xlane.f32.xlu0 %v823_v52 }
 0x205   : > { %v4800_v32 = vpop.f32.mrb[52].mxu0 }
 0x206   : > { %v657_v19 = vpop.f32.mrb[53].mxu0 }
 0x207   : > { %v4807_v48 = vsel %vm6072_vm15, %v657_v19, -10000.0  ;;  %v4809_v57 = vpop.f32.mrb[54].mxu0  ;;  %v4824_v19 = vadd.s32 232, %v4472_v58  ;;  %vm243_vm15 = vcmp.lt.s32.totalorder %v4652_v33, %v4814_v12 }
 0x208   : > { %v661_v7 = vpop.f32.mrb[55].mxu0  ;;  %v826_v52 = vmax.f32 %v4800_v32, %v4807_v48 }
 0x209   : > { %v4819_v63 = vsel %vm6081_vm14, %v661_v7, -10000.0  ;;  %6162 = vst [vmem:[#allocation33_spill] sm:$0xff] %v4824_v19  ;;  %vm6084_vm13 = vcmp.lt.s32.totalorder %v4652_v33, %v4824_v19  ;;  %vm247_vm14 = vcmp.lt.s32.totalorder %v4652_v33, %v4842_v45  ;;  %v4882_v45 = vpop.permute.xlu1 %1505 }
 0x20a   : > { %827 = vmax.xlane.f32.xlu1 %v826_v52  ;;  %v829_v37 = vmax.f32 %v4809_v57, %v4819_v63  ;;  %6170 = vst [vmem:[#allocation41_spill] sm:$0xff] %v4882_v45 }
 0x20c   : > { %830 = vmax.xlane.f32.xlu0 %v829_v37 }
 0x20d   : > { %v4828_v55 = vpop.f32.mrb[56].mxu0  ;;  %v4886_v60 = vpop.permute.xlu1 %1507 }
 0x20e   : > { %v667_v49 = vpop.f32.mrb[57].mxu0  ;;  %6172 = vst [vmem:[#allocation43_spill] sm:$0xff] %v4886_v60 }
 0x20f   : > { %v4835_v7 = vsel %vm243_vm15, %v667_v49, -10000.0  ;;  %v4837_v52 = vpop.f32.mrb[58].mxu0  ;;  %v4852_v49 = vadd.s32 248, %v4472_v58 }
 0x210   : > { %v671_v53 = vpop.f32.mrb[59].mxu0  ;;  %v832_v37 = vmax.f32 %v4828_v55, %v4835_v7 }
 0x211   : > { %v4847_v39 = vsel %vm6084_vm13, %v671_v53, -10000.0  ;;  %6164 = vst [vmem:[#allocation35_spill] sm:$0xff] %v4852_v49  ;;  %vm249_vm13 = vcmp.lt.s32.totalorder %v4652_v33, %v4852_v49  ;;  %v4890_v49 = vpop.permute.xlu1 %1509 }
 0x212   : > { %833 = vmax.xlane.f32.xlu1 %v832_v37  ;;  %v835_v12 = vmax.f32 %v4837_v52, %v4847_v39  ;;  %6174 = vst [vmem:[#allocation45_spill] sm:$0xff] %v4890_v49 }
 0x214   : > { %836 = vmax.xlane.f32.xlu0 %v835_v12 }
 0x215   : > { %v4858_v29 = vpop.f32.mrb[60].mxu0 }
 0x216   : > { %v677_v25 = vpop.f32.mrb[61].mxu0 }
 0x217   : > { %v4865_v53 = vsel %vm247_vm14, %v677_v25, -10000.0  ;;  %v4867_v37 = vpop.f32.mrb[62].mxu0  ;;  %v4880_v25 = vpop.permute.xlu0 %1519 }
 0x218   : > { %6166 = vst [vmem:[#allocation37_spill] sm:$0xff] %v4867_v37  ;;  %v681_v19 = vpop.f32.mrb[63].mxu0  ;;  %v838_v12 = vmax.f32 %v4858_v29, %v4865_v53  ;;  %6169 = vst [vmem:[#allocation40_spill] sm:$0xff] %v4880_v25 }
 0x219   : > { %v4874_v18 = vsel %vm249_vm13, %v681_v19, -10000.0 }
 0x21a   : > { %6167 = vst [vmem:[#allocation38_spill] sm:$0xff] %v4874_v18  ;;  %839 = vmax.xlane.f32.xlu1 %v838_v12  ;;  %v841_v6 = vmax.f32 %v4867_v37, %v4874_v18 }
 0x21b   : > { %v4884_v2 = vpop.permute.xlu0 %1521 }
 0x21c   : > { %842 = vmax.xlane.f32.xlu0 %v841_v6  ;;  %6171 = vst [vmem:[#allocation42_spill] sm:$0xff] %v4884_v2 }
 0x21f   : > { %v4888_v58 = vpop.permute.xlu0 %1523 }
 0x220   : > { %6173 = vst [vmem:[#allocation44_spill] sm:$0xff] %v4888_v58 }
 0x22e   : > { %v750_v19 = vpop.xlane.xlu0 %749 }
 0x22f   : > { %v844_v33 = vsub.f32 %v4486_v62, %v750_v19  ;;  %v845_v12 = vsub.f32 -10000.0, %v750_v19 }
 0x230   : > { %v753_v59 = vpop.xlane.xlu1 %752 }
 0x231   : > { %v908_v15 = vmul.f32 1.442695, %v844_v33  ;;  %v910_v35 = vmul.f32 1.442695, %v845_v12  ;;  %v846_v6 = vsub.f32 %v4495_v3, %v753_v59  ;;  %v847_v25 = vsub.f32 -10000.0, %v753_v59 }
 0x233   : > { %3823 = vpow2.f32 %v908_v15  ;;  %v912_v45 = vmul.f32 1.442695, %v846_v6  ;;  %v914_v18 = vmul.f32 1.442695, %v847_v25 }
 0x234   : > { %3825 = vpow2.f32 %v910_v35 }
 0x235   : > { %3827 = vpow2.f32 %v912_v45 }
 0x236   : > { %3829 = vpow2.f32 %v914_v18  ;;  %v756_v60 = vpop.xlane.xlu0 %755 }
 0x237   : > { %v848_v58 = vsub.f32 %v4508_v8, %v756_v60  ;;  %v849_v49 = vsub.f32 -10000.0, %v756_v60 }
 0x239   : > { %v916_v2 = vmul.f32 1.442695, %v848_v58  ;;  %v918_v37 = vmul.f32 1.442695, %v849_v49 }
 0x23a   : > { %v759_v62 = vpop.xlane.xlu0 %758 }
 0x23b   : > { %3831 = vpow2.f32 %v916_v2  ;;  %v850_v33 = vsub.f32 %v4517_v16, %v759_v62  ;;  %v851_v19 = vsub.f32 -10000.0, %v759_v62 }
 0x23c   : > { %3833 = vpow2.f32 %v918_v37 }
 0x23d   : > { %v4896_v3 = vpop.eup %3823  ;;  %v920_v59 = vmul.f32 1.442695, %v850_v33  ;;  %v922_v15 = vmul.f32 1.442695, %v851_v19 }
 0x23e   : > { %v4898_v25 = vpop.eup %3825  ;;  %v762_v35 = vpop.xlane.xlu1 %761 }
 0x23f   : > { %v4900_v18 = vpop.eup %3827  ;;  %3835 = vpow2.f32 %v920_v59  ;;  %v852_v60 = vsub.f32 %v4530_v21, %v762_v35  ;;  %v853_v58 = vsub.f32 -10000.0, %v762_v35  ;;  %v1036_v2 = vadd.f32 %v4898_v25, %v4896_v3 }
 0x240   : > { %v4905_v8 = vpop.eup %3829  ;;  %3837 = vpow2.f32 %v922_v15  ;;  %v765_v16 = vpop.xlane.xlu0 %764 }
 0x241   : > { %v924_v45 = vmul.f32 1.442695, %v852_v60  ;;  %v926_v49 = vmul.f32 1.442695, %v853_v58  ;;  %v854_v37 = vsub.f32 %v4539_v26, %v765_v16  ;;  %v855_v12 = vsub.f32 -10000.0, %v765_v16  ;;  %1037 = vadd.xlane.f32.xlu1 %v1036_v2 }
 0x242   : > { %v1039_v6 = vadd.f32 %v4905_v8, %v4900_v18 }
 0x243   : > { %3839 = vpow2.f32 %v924_v45  ;;  %v928_v62 = vmul.f32 1.442695, %v854_v37  ;;  %v930_v21 = vmul.f32 1.442695, %v855_v12 }
 0x244   : > { %3841 = vpow2.f32 %v926_v49  ;;  %1040 = vadd.xlane.f32.xlu0 %v1039_v6 }
 0x245   : > { %v4910_v33 = vpop.eup %3831  ;;  %3843 = vpow2.f32 %v928_v62 }
 0x246   : > { %v4912_v19 = vpop.eup %3833  ;;  %3845 = vpow2.f32 %v930_v21  ;;  %v768_v59 = vpop.xlane.xlu1 %767 }
 0x247   : > { %v856_v15 = vsub.f32 %v4552_v31, %v768_v59  ;;  %v857_v26 = vsub.f32 -10000.0, %v768_v59  ;;  %v1042_v35 = vadd.f32 %v4912_v19, %v4910_v33 }
 0x248   : > { %v771_v60 = vpop.xlane.xlu0 %770 }
 0x249   : > { %v4917_v58 = vpop.eup %3835  ;;  %v932_v2 = vmul.f32 1.442695, %v856_v15  ;;  %v934_v16 = vmul.f32 1.442695, %v857_v26  ;;  %v858_v45 = vsub.f32 %v4561_v36, %v771_v60  ;;  %v859_v49 = vsub.f32 -10000.0, %v771_v60  ;;  %1043 = vadd.xlane.f32.xlu0 %v1042_v35 }
 0x24a   : > { %v4920_v37 = vpop.eup %3837 }
 0x24b   : > { %3847 = vpow2.f32 %v932_v2  ;;  %v936_v12 = vmul.f32 1.442695, %v858_v45  ;;  %v938_v6 = vmul.f32 1.442695, %v859_v49  ;;  %v1045_v31 = vadd.f32 %v4920_v37, %v4917_v58 }
 0x24c   : > { %3849 = vpow2.f32 %v934_v16 }
 0x24d   : > { %v4924_v62 = vpop.eup %3839  ;;  %3851 = vpow2.f32 %v936_v12  ;;  %1046 = vadd.xlane.f32.xlu0 %v1045_v31 }
 0x24e   : > { %6175 = vst [vmem:[#allocation46_spill] sm:$0xff] %v4924_v62  ;;  %v4926_v21 = vpop.eup %3841  ;;  %3853 = vpow2.f32 %v938_v6  ;;  %v774_v49 = vpop.xlane.xlu1 %773 }
 0x24f   : > { %v4928_v59 = vpop.eup %3843  ;;  %v1048_v36 = vadd.f32 %v4926_v21, %v4924_v62  ;;  %v860_v12 = vsub.f32 %v4574_v41, %v774_v49  ;;  %v861_v6 = vsub.f32 -10000.0, %v774_v49 }
 0x250   : > { %6176 = vst [vmem:[#allocation47_spill] sm:$0xff] %v4928_v59  ;;  %v4932_v15 = vpop.eup %3845  ;;  %v777_v31 = vpop.xlane.xlu0 %776 }
 0x251   : > { %6177 = vst [vmem:[#allocation48_spill] sm:$0xff] %v4932_v15  ;;  %1049 = vadd.xlane.f32.xlu0 %v1048_v36  ;;  %v1051_v26 = vadd.f32 %v4932_v15, %v4928_v59  ;;  %v940_v36 = vmul.f32 1.442695, %v860_v12  ;;  %v863_v59 = vsub.f32 -10000.0, %v777_v31 }
 0x252   : > { %1511 = vrot.lane.b32.xlu1 %v4312_v10, %s4233_s14 }
 0x253   : > { %3855 = vpow2.f32 %v940_v36 }
 0x255   : > { %v4938_v35 = vpop.eup %3847  ;;  %1052 = vadd.xlane.f32.xlu0 %v1051_v26  ;;  %v942_v26 = vmul.f32 1.442695, %v861_v6 }
 0x256   : > { %6178 = vst [vmem:[#allocation49_spill] sm:$0xff] %v4938_v35  ;;  %v4940_v60 = vpop.eup %3849  ;;  %1527 = vrot.lane.b32.xlu1 %v4317_v11, %s4233_s14  ;;  %v862_v11 = vsub.f32 %v4583_v46, %v777_v31  ;;  %v780_v62 = vpop.xlane.xlu1 %779 }
 0x257   : > { %6179 = vst [vmem:[#allocation50_spill] sm:$0xff] %v4940_v60  ;;  %v4944_v2 = vpop.eup %3851  ;;  %v1054_v16 = vadd.f32 %v4940_v60, %v4938_v35  ;;  %v864_v60 = vsub.f32 %v4596_v51, %v780_v62  ;;  %3857 = vpow2.f32 %v942_v26  ;;  %v865_v15 = vsub.f32 -10000.0, %v780_v62 }
 0x258   : > { %6180 = vst [vmem:[#allocation51_spill] sm:$0xff] %v4944_v2  ;;  %v4948_v45 = vpop.eup %3853  ;;  %v944_v35 = vmul.f32 1.442695, %v862_v11  ;;  %v783_v12 = vpop.xlane.xlu0 %782 }
 0x259   : > { %6181 = vst [vmem:[#allocation52_spill] sm:$0xff] %v4948_v45  ;;  %1055 = vadd.xlane.f32.xlu0 %v1054_v16  ;;  %v1057_v10 = vadd.f32 %v4948_v45, %v4944_v2  ;;  %v946_v16 = vmul.f32 1.442695, %v863_v59  ;;  %v950_v49 = vmul.f32 1.442695, %v865_v15  ;;  %v866_v15 = vsub.f32 %v4605_v56, %v783_v12 }
 0x25a   : > { %3859 = vpow2.f32 %v944_v35 }
 0x25b   : > { %3861 = vpow2.f32 %v946_v16 }
 0x25d   : > { %1058 = vadd.xlane.f32.xlu0 %v1057_v10  ;;  %v948_v10 = vmul.f32 1.442695, %v864_v60  ;;  %v4959_v62 = vpop.eup %3855 }
 0x25e   : > { %v786_v2 = vpop.xlane.xlu1 %785 }
 0x25f   : > { %v868_v41 = vsub.f32 %v4618_v1, %v786_v2  ;;  %v869_v45 = vsub.f32 -10000.0, %v786_v2  ;;  %3863 = vpow2.f32 %v948_v10 }
 0x260   : > { %3865 = vpow2.f32 %v950_v49  ;;  %v789_v51 = vpop.xlane.xlu0 %788  ;;  %v952_v49 = vmul.f32 1.442695, %v866_v15 }
 0x261   : > { %v956_v6 = vmul.f32 1.442695, %v868_v41  ;;  %v958_v36 = vmul.f32 1.442695, %v869_v45  ;;  %v4961_v1 = vpop.eup %3857  ;;  %v867_v41 = vsub.f32 -10000.0, %v783_v12  ;;  %v871_v15 = vsub.f32 -10000.0, %v789_v51 }
 0x263   : > { %3867 = vpow2.f32 %v956_v6  ;;  %v954_v12 = vmul.f32 1.442695, %v867_v41 }
 0x264   : > { %3869 = vpow2.f32 %v958_v36  ;;  %v4966_v16 = vpop.eup %3859  ;;  %v870_v36 = vsub.f32 %v4627_v13, %v789_v51  ;;  %v962_v51 = vmul.f32 1.442695, %v871_v15 }
 0x265   : > { %v4970_v10 = vpop.eup %3861 }
 0x266   : > { %v792_v46 = vpop.xlane.xlu1 %791 }
 0x267   : > { %v872_v31 = vsub.f32 %v4640_v22, %v792_v46  ;;  %v873_v11 = vsub.f32 -10000.0, %v792_v46 }
 0x268   : > { %v795_v2 = vpop.xlane.xlu0 %794 }
 0x269   : > { %v964_v35 = vmul.f32 1.442695, %v872_v31  ;;  %v966_v22 = vmul.f32 1.442695, %v873_v11  ;;  %v4974_v31 = vpop.eup %3863  ;;  %v1063_v11 = vadd.f32 %v4970_v10, %v4966_v16  ;;  %v874_v41 = vsub.f32 %v4646_v28, %v795_v2 }
 0x26b   : > { %3871 = vpow2.f32 %v964_v35 }
 0x26c   : > { %3873 = vpow2.f32 %v966_v22 }
 0x26d   : > { %3875 = vpow2.f32 %v952_v49 }
 0x26f   : > { %v798_v59 = vpop.xlane.xlu1 %797 }
 0x270   : > { %v876_v60 = vsub.f32 %v4660_v38, %v798_v59  ;;  %v877_v45 = vsub.f32 %v4667_v42, %v798_v59  ;;  %v4979_v59 = vpop.eup %3865 }
 0x271   : > { %v801_v6 = vpop.xlane.xlu0 %800 }
 0x272   : > { %v972_v56 = vmul.f32 1.442695, %v876_v60  ;;  %v974_v38 = vmul.f32 1.442695, %v877_v45  ;;  %v960_v45 = vmul.f32 1.442695, %v870_v36  ;;  %v879_v15 = vsub.f32 %v4679_v50, %v801_v6 }
 0x273   : > { %1525 = vrot.lane.b32.xlu0 %v4307_v9, %s4233_s14  ;;  %v1060_v9 = vadd.f32 %v4961_v1, %v4959_v62 }
 0x274   : > { %3877 = vpow2.f32 %v972_v56 }
 0x275   : > { %3879 = vpow2.f32 %v974_v38 }
 0x276   : > { %3881 = vpow2.f32 %v954_v12  ;;  %v878_v12 = vsub.f32 %v4669_v43, %v801_v6  ;;  %v978_v6 = vmul.f32 1.442695, %v879_v15 }
 0x277   : > { %v804_v26 = vpop.xlane.xlu1 %803 }
 0x278   : > { %v880_v46 = vsub.f32 %v4688_v54, %v804_v26  ;;  %v881_v42 = vsub.f32 %v4695_v61, %v804_v26  ;;  %v4981_v61 = vpop.eup %3867  ;;  %v976_v43 = vmul.f32 1.442695, %v878_v12 }
 0x279   : > { %v807_v60 = vpop.xlane.xlu0 %806  ;;  %v4987_v49 = vpop.eup %3869 }
 0x27a   : > { %1061 = vadd.xlane.f32.xlu1 %v1060_v9  ;;  %v980_v54 = vmul.f32 1.442695, %v880_v46  ;;  %v982_v35 = vmul.f32 1.442695, %v881_v42  ;;  %v1066_v9 = vadd.f32 %v4979_v59, %v4974_v31  ;;  %v875_v46 = vsub.f32 -10000.0, %v795_v2  ;;  %v4990_v36 = vpop.eup %3871 }
 0x27c   : > { %3883 = vpow2.f32 %v980_v54  ;;  %v970_v2 = vmul.f32 1.442695, %v875_v46 }
 0x27d   : > { %3885 = vpow2.f32 %v982_v35 }
 0x27e   : > { %1064 = vadd.xlane.f32.xlu1 %v1063_v11  ;;  %3887 = vpow2.f32 %v960_v45  ;;  %v968_v11 = vmul.f32 1.442695, %v874_v41 }
 0x27f   : > { %v810_v22 = vpop.xlane.xlu1 %809  ;;  %3889 = vpow2.f32 %v962_v51 }
 0x280   : > { %v884_v13 = vsub.f32 %v4716_v23, %v810_v22  ;;  %v885_v26 = vsub.f32 %v4723_v27, %v810_v22  ;;  %v1072_v23 = vadd.f32 %v4987_v49, %v4981_v61  ;;  %v4994_v27 = vpop.eup %3873 }
 0x281   : > { %v813_v42 = vpop.xlane.xlu0 %812  ;;  %v4997_v28 = vpop.eup %3875 }
 0x282   : > { %v988_v56 = vmul.f32 1.442695, %v884_v13  ;;  %1067 = vadd.xlane.f32.xlu1 %v1066_v9  ;;  %v990_v38 = vmul.f32 1.442695, %v885_v26  ;;  %v5000_v35 = vpop.eup %3877  ;;  %v1078_v13 = vadd.f32 %v4994_v27, %v4990_v36  ;;  %v882_v9 = vsub.f32 %v4697_v0, %v807_v60 }
 0x283   : > { %v5006_v26 = vpop.eup %3879 }
 0x284   : > { %3891 = vpow2.f32 %v988_v56  ;;  %v5009_v50 = vpop.eup %3881  ;;  %v984_v0 = vmul.f32 1.442695, %v882_v9 }
 0x285   : > { %3893 = vpow2.f32 %v990_v38 }
 0x286   : > { %1073 = vadd.xlane.f32.xlu1 %v1072_v23  ;;  %3895 = vpow2.f32 %v968_v11  ;;  %v5012_v56 = vpop.eup %3883  ;;  %v886_v23 = vsub.f32 %v4725_v30, %v813_v42  ;;  %v1069_v30 = vadd.f32 %v5009_v50, %v4997_v28 }
 0x287   : > { %v816_v54 = vpop.xlane.xlu0 %815  ;;  %3897 = vpow2.f32 %v970_v2  ;;  %v5016_v46 = vpop.eup %3885 }
 0x288   : > { %v888_v22 = vsub.f32 %v4744_v4, %v816_v54  ;;  %v889_v45 = vsub.f32 %v4751_v17, %v816_v54  ;;  %v883_v4 = vsub.f32 %v4707_v14, %v807_v60  ;;  %v1084_v17 = vadd.f32 %v5006_v26, %v5000_v35  ;;  %v5018_v38 = vpop.eup %3887 }
 0x289   : > { %v5021_v12 = vpop.eup %3889  ;;  %v887_v60 = vsub.f32 %v4735_v47, %v813_v42  ;;  %v992_v9 = vmul.f32 1.442695, %v886_v23 }
 0x28a   : > { %v996_v51 = vmul.f32 1.442695, %v888_v22  ;;  %v998_v41 = vmul.f32 1.442695, %v889_v45  ;;  %1079 = vadd.xlane.f32.xlu1 %v1078_v13  ;;  %v986_v14 = vmul.f32 1.442695, %v883_v4  ;;  %v1090_v45 = vadd.f32 %v5016_v46, %v5012_v56 }
 0x28b   : > { %v819_v11 = vpop.xlane.xlu0 %818 }
 0x28c   : > { %3899 = vpow2.f32 %v996_v51 }
 0x28d   : > { %3901 = vpow2.f32 %v998_v41 }
 0x28e   : > { %3903 = vpow2.f32 %v976_v43  ;;  %1085 = vadd.xlane.f32.xlu1 %v1084_v17  ;;  %v5024_v15 = vpop.eup %3891  ;;  %v890_v43 = vsub.f32 %v4753_v24, %v819_v11  ;;  %v1075_v24 = vadd.f32 %v5021_v12, %v5018_v38 }
 0x28f   : > { %3905 = vpow2.f32 %v978_v6  ;;  %v822_v2 = vpop.xlane.xlu1 %821  ;;  %v5032_v13 = vpop.eup %3893 }
 0x290   : > { %v892_v54 = vsub.f32 %v4772_v44, %v822_v2  ;;  %v893_v22 = vsub.f32 %v4779_v34, %v822_v2  ;;  %3907 = vpow2.f32 %v984_v0  ;;  %v5035_v51 = vpop.eup %3895  ;;  %v994_v44 = vmul.f32 1.442695, %v887_v60 }
 0x291   : > { %3909 = vpow2.f32 %v986_v14  ;;  %v891_v34 = vsub.f32 %v4763_v20, %v819_v11  ;;  %v825_v41 = vpop.xlane.xlu0 %824  ;;  %v1096_v6 = vadd.f32 %v5032_v13, %v5024_v15  ;;  %v5042_v4 = vpop.eup %3897  ;;  %v1000_v17 = vmul.f32 1.442695, %v890_v43 }
 0x292   : > { %v1004_v47 = vmul.f32 1.442695, %v892_v54  ;;  %v1006_v42 = vmul.f32 1.442695, %v893_v22  ;;  %1091 = vadd.xlane.f32.xlu1 %v1090_v45  ;;  %1070 = vadd.xlane.f32.xlu0 %v1069_v30  ;;  %v894_v23 = vsub.f32 %v4781_v40, %v825_v41  ;;  %v895_v14 = vsub.f32 %v4791_v5, %v825_v41 }
 0x293   : > { %v1002_v11 = vmul.f32 1.442695, %v891_v34  ;;  %v1081_v40 = vadd.f32 %v5042_v4, %v5035_v51 }
 0x294   : > { %3911 = vpow2.f32 %v1004_v47 }
 0x295   : > { %3913 = vpow2.f32 %v1006_v42 }
 0x296   : > { %v5044_v0 = vpop.eup %3899  ;;  %3915 = vpow2.f32 %v992_v9  ;;  %1097 = vadd.xlane.f32.xlu1 %v1096_v6  ;;  %1076 = vadd.xlane.f32.xlu0 %v1075_v24  ;;  %v1008_v9 = vmul.f32 1.442695, %v894_v23 }
 0x297   : > { %v5047_v20 = vpop.eup %3901  ;;  %3917 = vpow2.f32 %v994_v44  ;;  %v828_v60 = vpop.xlane.xlu1 %827 }
 0x298   : > { %v5050_v2 = vpop.eup %3903  ;;  %v896_v54 = vsub.f32 %v4800_v32, %v828_v60  ;;  %v897_v22 = vsub.f32 %v4807_v48, %v828_v60  ;;  %v1102_v45 = vadd.f32 %v5047_v20, %v5044_v0  ;;  %3919 = vpow2.f32 %v1000_v17 }
 0x299   : > { %v5058_v30 = vpop.eup %3905  ;;  %v831_v43 = vpop.xlane.xlu0 %830  ;;  %3921 = vpow2.f32 %v1002_v11  ;;  %v1010_v32 = vmul.f32 1.442695, %v895_v14 }
 0x29a   : > { %v1012_v47 = vmul.f32 1.442695, %v896_v54  ;;  %v1014_v5 = vmul.f32 1.442695, %v897_v22  ;;  %v898_v42 = vsub.f32 %v4809_v57, %v831_v43  ;;  %1103 = vadd.xlane.f32.xlu1 %v1102_v45  ;;  %1082 = vadd.xlane.f32.xlu0 %v1081_v40  ;;  %v899_v48 = vsub.f32 %v4819_v63, %v831_v43  ;;  %v5062_v44 = vpop.eup %3907 }
 0x29b   : > { %v1087_v34 = vadd.f32 %v5058_v30, %v5050_v2  ;;  %v5066_v41 = vpop.eup %3909 }
 0x29c   : > { %3923 = vpow2.f32 %v1012_v47  ;;  %v1016_v6 = vmul.f32 1.442695, %v898_v42  ;;  %v1018_v17 = vmul.f32 1.442695, %v899_v48  ;;  %v1093_v54 = vadd.f32 %v5066_v41, %v5062_v44 }
 0x29d   : > { %3925 = vpow2.f32 %v1014_v5 }
 0x29e   : > { %v5068_v24 = vpop.eup %3911  ;;  %3927 = vpow2.f32 %v1008_v9  ;;  %1088 = vadd.xlane.f32.xlu0 %v1087_v34 }
 0x29f   : > { %6182 = vst [vmem:[#allocation53_spill] sm:$0xff] %v5068_v24  ;;  %v5070_v57 = vpop.eup %3913  ;;  %3929 = vpow2.f32 %v1010_v32  ;;  %v834_v23 = vpop.xlane.xlu1 %833 }
 0x2a0   : > { %v5072_v63 = vpop.eup %3915  ;;  %v900_v11 = vsub.f32 %v4828_v55, %v834_v23  ;;  %v901_v14 = vsub.f32 %v4835_v7, %v834_v23  ;;  %v1108_v60 = vadd.f32 %v5070_v57, %v5068_v24  ;;  %3931 = vpow2.f32 %v1016_v6 }
 0x2a1   : > { %v5080_v22 = vpop.eup %3917  ;;  %v837_v45 = vpop.xlane.xlu0 %836  ;;  %3933 = vpow2.f32 %v1018_v17 }
 0x2a2   : > { %v1020_v40 = vmul.f32 1.442695, %v900_v11  ;;  %v1022_v43 = vmul.f32 1.442695, %v901_v14  ;;  %v902_v9 = vsub.f32 %v4837_v52, %v837_v45  ;;  %v903_v47 = vsub.f32 %v4847_v39, %v837_v45  ;;  %1109 = vadd.xlane.f32.xlu1 %v1108_v60  ;;  %1094 = vadd.xlane.f32.xlu0 %v1093_v54  ;;  %v5084_v55 = vpop.eup %3919 }
 0x2a3   : > { %v1099_v42 = vadd.f32 %v5080_v22, %v5072_v63  ;;  %v5088_v32 = vpop.eup %3921 }
 0x2a4   : > { %3935 = vpow2.f32 %v1020_v40  ;;  %v1024_v7 = vmul.f32 1.442695, %v902_v9  ;;  %v1026_v5 = vmul.f32 1.442695, %v903_v47  ;;  %v1105_v6 = vadd.f32 %v5088_v32, %v5084_v55 }
 0x2a5   : > { %3937 = vpow2.f32 %v1022_v43 }
 0x2a6   : > { %v5090_v48 = vpop.eup %3923  ;;  %3939 = vpow2.f32 %v1024_v7  ;;  %1100 = vadd.xlane.f32.xlu0 %v1099_v42  ;;  %v5123_v7 = vld [vmem:[%s4259_s11 + $0xe0] ss:$8 sps:$4 sm:$0xff]  }
 0x2a7   : > { %6183 = vst [vmem:[#allocation54_spill] sm:$0xff] %v5090_v48  ;;  %v5092_v52 = vpop.eup %3925  ;;  %3941 = vpow2.f32 %v1026_v5  ;;  %v840_v5 = vpop.xlane.xlu1 %839  ;;  %v5128_v42 = vld [vmem:[%s4259_s11 + $0x60] ss:$8 sps:$4 sm:$0xff]  }
 0x2a8   : > { %6184 = vst [vmem:[#allocation55_spill] sm:$0xff] %v5092_v52  ;;  %v5094_v39 = vpop.eup %3927  ;;  %v1114_v34 = vadd.f32 %v5092_v52, %v5090_v48  ;;  %v6192_v48 = vld [vmem:[#allocation38_spill] sm:$0xff] }
 0x2a9   : > { %v5100_v17 = vpop.eup %3929 }
 0x2aa   : > { %1115 = vadd.xlane.f32.xlu1 %v1114_v34  ;;  %1106 = vadd.xlane.f32.xlu0 %v1105_v6  ;;  %v5102_v23 = vpop.eup %3931  ;;  %v1111_v11 = vadd.f32 %v5100_v17, %v5094_v39  ;;  %v843_v34 = vpop.xlane.xlu0 %842 }
 0x2ab   : > { %6185 = vst [vmem:[#allocation56_spill] sm:$0xff] %v5102_v23  ;;  %v5106_v14 = vpop.eup %3933 }
 0x2ac   : > { %6186 = vst [vmem:[#allocation57_spill] sm:$0xff] %v5106_v14  ;;  %v1117_v43 = vadd.f32 %v5106_v14, %v5102_v23 }
 0x2ae   : > { %v5108_v60 = vpop.eup %3935  ;;  %1112 = vadd.xlane.f32.xlu0 %v1111_v11  ;;  %v904_v11 = vsub.f32 %v4858_v29, %v840_v5 }
 0x2af   : > { %6187 = vst [vmem:[#allocation58_spill] sm:$0xff] %v5108_v60  ;;  %v5110_v54 = vpop.eup %3937 }
 0x2b0   : > { %6188 = vst [vmem:[#allocation59_spill] sm:$0xff] %v5110_v54  ;;  %v5112_v45 = vpop.eup %3939  ;;  %v1120_v40 = vadd.f32 %v5110_v54, %v5108_v60 }
 0x2b1   : > { %6189 = vst [vmem:[#allocation60_spill] sm:$0xff] %v5112_v45  ;;  %v5118_v9 = vpop.eup %3941 }
 0x2b2   : > { %6190 = vst [vmem:[#allocation61_spill] sm:$0xff] %v5118_v9  ;;  %1121 = vadd.xlane.f32.xlu1 %v1120_v40  ;;  %1118 = vadd.xlane.f32.xlu0 %v1117_v43  ;;  %v1123_v47 = vadd.f32 %v5118_v9, %v5112_v45  ;;  %v905_v40 = vsub.f32 %v4865_v53, %v840_v5  ;;  %v1028_v45 = vmul.f32 1.442695, %v904_v11 }
 0x2b3   : > { %v907_v9 = vsub.f32 %v6192_v48, %v843_v34 }
 0x2b4   : > { %v1030_v54 = vmul.f32 1.442695, %v905_v40 }
 0x2b5   : > { %v1034_v24 = vmul.f32 1.442695, %v907_v9 }
 0x2b6   : > { %1124 = vadd.xlane.f32.xlu0 %v1123_v47  ;;  %v6191_v47 = vld [vmem:[#allocation37_spill] sm:$0xff] }
 0x2b7   : > { %v906_v60 = vsub.f32 %v6191_v47, %v843_v34 }
 0x2b9   : > { %v1032_v23 = vmul.f32 1.442695, %v906_v60 }
 0x2c3   : > { %1529 = vrot.lane.b32.xlu1 %v5123_v7, %s4233_s14 }
 0x2cc   : > { %1513 = vrot.lane.b32.xlu0 %v5128_v42, %s4233_s14 }
 0x2ce   : > { %v1038_v6 = vpop.xlane.xlu1 %1037 }
 0x2cf   : > { %3943 = vrcp.f32 %v1038_v6 }
 0x2d1   : > { %v1041_v43 = vpop.xlane.xlu0 %1040 }
 0x2d2   : > { %3945 = vrcp.f32 %v1041_v43 }
 0x2d3   : > { %3947 = vpow2.f32 %v1028_v45 }
 0x2d4   : > { %3949 = vpow2.f32 %v1030_v54 }
 0x2d6   : > { %v1044_v52 = vpop.xlane.xlu0 %1043 }
 0x2d7   : > { %3951 = vrcp.f32 %v1044_v52 }
 0x2d8   : > { %3953 = vpow2.f32 %v1032_v23  ;;  %v6193_v23 = vld [vmem:[#allocation36_spill] sm:$0xff] }
 0x2d9   : > { %v3944_v14 = vpop.eup %3943 }
 0x2da   : > { %v1047_v29 = vpop.xlane.xlu0 %1046  ;;  %v1165_v5 = vmul.f32 %v3944_v14, %v4898_v25  ;;  %v1164_v11 = vmul.f32 %v3944_v14, %v4896_v3 }
 0x2db   : > { %3955 = vrcp.f32 %v1047_v29 }
 0x2dc   : > { %v3946_v53 = vpop.eup %3945  ;;  %3957 = vpow2.f32 %v1034_v24  ;;  %v1582_v24 = vsel %vm394_vm0, %v6193_v23, 0 }
 0x2dd   : > { %v1167_v6 = vmul.f32 %v3946_v53, %v4905_v8  ;;  %v1166_v48 = vmul.f32 %v3946_v53, %v4900_v18  ;;  %v5140_v54 = vpop.eup %3947  ;;  %v6194_v18 = vld [vmem:[#allocation40_spill] sm:$0xff] }
 0x2de   : > { %v1050_v60 = vpop.xlane.xlu0 %1049  ;;  %v5142_v52 = vpop.eup %3949 }
 0x2df   : > { %v1229_v34 = vpack.c.bf16 %v1167_v6, %v1165_v5  ;;  %v1228_v45 = vpack.c.bf16 %v1166_v48, %v1164_v11  ;;  %3959 = vrcp.f32 %v1050_v60  ;;  %v1126_v14 = vadd.f32 %v5142_v52, %v5140_v54  ;;  %v6195_v60 = vld [vmem:[#allocation39_spill] sm:$0xff] }
 0x2e1   : > { %1340 = vmatprep.mubr.bf16.mxu1 %v1229_v34  ;;  %v3952_v9 = vpop.eup %3951  ;;  %v1585_v34 = vsel %vm394_vm0, %v6195_v60, 0 }
 0x2e2   : > { %1341 = vmatmul.mubr.bf16.vlgmr.msra.gmra.mrb[0].mxu1 %v1228_v45  ;;  %v1053_v25 = vpop.xlane.xlu0 %1052  ;;  %v5146_v3 = vpop.eup %3953  ;;  %v1169_v47 = vmul.f32 %v3952_v9, %v4912_v19  ;;  %v1168_v53 = vmul.f32 %v3952_v9, %v4910_v33  ;;  %v6196_v19 = vld [vmem:[#allocation42_spill] sm:$0xff] }
 0x2e3   : > { %3492 = vmatpush3.bf16.xpose.msra.mxu1 %v1582_v24  ;;  %3961 = vrcp.f32 %v1053_v25  ;;  %v6198_v25 = vld [vmem:[#allocation46_spill] sm:$0xff] }
 0x2e4   : > { %3676 = vmatprep.subr.msk.bf16.mxu1 %vm394_vm0, %v6194_v18  ;;  %v6199_v18 = vld [vmem:[#allocation47_spill] sm:$0xff] }
 0x2e5   : > { %v3956_v8 = vpop.eup %3955 }
 0x2e6   : > { %v5152_v40 = vpop.eup %3957  ;;  %v1056_v43 = vpop.xlane.xlu0 %1055  ;;  %v1171_v29 = vmul.f32 %v3956_v8, %v4920_v37  ;;  %v1170_v5 = vmul.f32 %v3956_v8, %v4917_v58  ;;  %v6197_v37 = vld [vmem:[#allocation48_spill] sm:$0xff] }
 0x2e7   : > { %1127 = vadd.xlane.f32.xlu1 %v1126_v14  ;;  %3963 = vrcp.f32 %v1056_v43  ;;  %v1129_v48 = vadd.f32 %v5152_v40, %v5146_v3 }
 0x2e8   : > { %v1231_v6 = vpack.c.bf16 %v1171_v29, %v1169_v47  ;;  %v1230_v11 = vpack.c.bf16 %v1170_v5, %v1168_v53  ;;  %v6200_v47 = vld [vmem:[#allocation41_spill] sm:$0xff]  ;;  %v6201_v5 = vld [vmem:[#allocation44_spill] sm:$0xff] }
 0x2e9   : > { %v3960_v23 = vpop.eup %3959  ;;  %v1588_v29 = vsel %vm394_vm0, %v6200_v47, 0  ;;  %v6207_v47 = vld [vmem:[#allocation45_spill] sm:$0xff] }
 0x2ea   : > { %1348 = vmatprep.mubr.bf16.mxu1 %v1231_v6  ;;  %v1059_v45 = vpop.xlane.xlu0 %1058  ;;  %v1173_v58 = vmul.f32 %v3960_v23, %v4926_v21  ;;  %v1172_v9 = vmul.f32 %v3960_v23, %v6198_v25  ;;  %v6202_v6 = vld [vmem:[#allocation50_spill] sm:$0xff]  ;;  %v6205_v23 = vld [vmem:[#allocation51_spill] sm:$0xff] }
 0x2eb   : > { %3494 = vmatpush3.bf16.xpose.msra.mxu1 %v1585_v34  ;;  %3965 = vrcp.f32 %v1059_v45  ;;  %1130 = vadd.xlane.f32.xlu0 %v1129_v48  ;;  %v6203_v48 = vld [vmem:[#allocation52_spill] sm:$0xff]  ;;  %v6204_v34 = vld [vmem:[#allocation49_spill] sm:$0xff] }
 0x2ec   : > { %3677 = vmatprep.subr.msk.bf16.mxu1 %vm394_vm0, %v6196_v19  ;;  %1349 = vmatmul.mubr.bf16.gmra.mrb[4].mxu1 %v1230_v11 }
 0x2ed   : > { %v3962_v33 = vpop.eup %3961 }
 0x2ee   : > { %v1175_v24 = vmul.f32 %v3962_v33, %v6197_v37  ;;  %v1174_v8 = vmul.f32 %v3962_v33, %v6199_v18  ;;  %v4209_v37 = vld [vmem:[%s4259_s11 + $0xf0] ss:$8 sps:$4 sm:$0xff]   ;;  %v1512_v18 = vpop.permute.xlu1 %1511 }
 0x2f0   : > { %v1233_v14 = vpack.c.bf16 %v1175_v24, %v1173_v58  ;;  %v1232_v43 = vpack.c.bf16 %v1174_v8, %v1172_v9  ;;  %v6206_v24 = vld [vmem:[#allocation43_spill] sm:$0xff]  ;;  %v1526_v9 = vpop.permute.xlu0 %1525  ;;  %v4210_v8 = vld [vmem:[%s4259_s11 + $0x10] ss:$8 sps:$4 sm:$0xff]  }
 0x2f1   : > { %v3964_v53 = vpop.eup %3963  ;;  %v1591_v25 = vsel %vm394_vm0, %v6206_v24, 0  ;;  %v4219_v24 = vld [vmem:[%s4259_s11 + $0x80] ss:$8 sps:$4 sm:$0xff]  }
 0x2f2   : > { %1356 = vmatprep.mubr.bf16.mxu1 %v1233_v14  ;;  %v1177_v11 = vmul.f32 %v3964_v53, %v6202_v6  ;;  %v1176_v45 = vmul.f32 %v3964_v53, %v6204_v34  ;;  %v4211_v14 = vld [vmem:[%s4259_s11 + $0x70] ss:$8 sps:$4 sm:$0xff]   ;;  %v1528_v53 = vpop.permute.xlu1 %1527  ;;  %v4216_v34 = vld [vmem:[%s4259_s11 + $0x40] ss:$8 sps:$4 sm:$0xff]  }
 0x2f3   : > { %3496 = vmatpush3.bf16.xpose.msra.mxu1 %v1588_v29  ;;  %v1594_v29 = vsel %vm394_vm0, %v6207_v47, 0 }
 0x2f4   : > { %3678 = vmatprep.subr.msk.bf16.mxu1 %vm394_vm0, %v6201_v5  ;;  %1357 = vmatmul.mubr.bf16.gmra.mrb[8].mxu1 %v1232_v43  ;;  %v4212_v43 = vld [vmem:[%s4259_s11 + $0x30] ss:$8 sps:$4 sm:$0xff]   ;;  %v4213_v5 = vld [vmem:[%s4259_s11] ss:$8 sps:$4 sm:$0xff]  }
 0x2f5   : > { %v3966_v21 = vpop.eup %3965 }
 0x2f6   : > { %v1179_v60 = vmul.f32 %v3966_v21, %v6203_v48  ;;  %v1178_v19 = vmul.f32 %v3966_v21, %v6205_v23  ;;  %v4214_v21 = vld [vmem:[%s4259_s11 + $0x50] ss:$8 sps:$4 sm:$0xff]   ;;  %v1597_v48 = vsel %vm394_vm0, %v1512_v18, 0 }
 0x2f8   : > { %v1235_v33 = vpack.c.bf16 %v1179_v60, %v1177_v11  ;;  %v1234_v58 = vpack.c.bf16 %v1178_v19, %v1176_v45  ;;  %1531 = vrot.lane.b32.xlu1 %v4209_v37, %s4233_s14  ;;  %v4215_v11 = vld [vmem:[%s4259_s11 + $0x20] ss:$8 sps:$4 sm:$0xff]   ;;  %v4217_v45 = vld [vmem:[%s4259_s11 + $0x90] ss:$8 sps:$4 sm:$0xff]  }
 0x2f9   : > { %v4218_v19 = vld [vmem:[%s4259_s11 + $0xb0] ss:$8 sps:$4 sm:$0xff]  }
 0x2fa   : > { %1364 = vmatprep.mubr.bf16.mxu1 %v1235_v33 }
 0x2fb   : > { %3498 = vmatpush3.bf16.xpose.msra.mxu1 %v1591_v25  ;;  %v4220_v25 = vld [vmem:[%s4259_s11 + $0xd0] ss:$8 sps:$4 sm:$0xff]  }
 0x2fc   : > { %3679 = vmatprep.subr.msk.bf16.mxu1 %vm394_vm0, %v1526_v9  ;;  %1365 = vmatmul.mubr.bf16.gmra.mrb[12].mxu1 %v1234_v58 }
 0x2fd   : > { %1471 = vrot.lane.b32.xlu1 %v4210_v8, %s4234_s15 }
 0x301   : > { %1515 = vrot.lane.b32.xlu0 %v4211_v14, %s4233_s14  ;;  %1475 = vrot.lane.b32.xlu1 %v4212_v43, %s4234_s15 }
 0x303   : > { %3500 = vmatpush3.bf16.xpose.msra.mxu1 %v1594_v29  ;;  %v4221_v29 = vld [vmem:[%s4259_s11 + $0xa0] ss:$8 sps:$4 sm:$0xff]  }
 0x304   : > { %3680 = vmatprep.subr.msk.bf16.mxu1 %vm394_vm0, %v1528_v53 }
 0x305   : > { %1469 = vrot.lane.b32.xlu0 %v4213_v5, %s4234_s15  ;;  %1479 = vrot.lane.b32.xlu1 %v4214_v21, %s4234_s15  ;;  %v4222_v5 = vld [vmem:[%s4259_s11 + $0xc0] ss:$8 sps:$4 sm:$0xff]  }
 0x307   : > { %v1062_v6 = vpop.xlane.xlu1 %1061 }
 0x308   : > { %3967 = vrcp.f32 %v1062_v6 }
 0x309   : > { %1473 = vrot.lane.b32.xlu0 %v4215_v11, %s4234_s15  ;;  %1483 = vrot.lane.b32.xlu1 %v4211_v14, %s4234_s15 }
 0x30b   : > { %3502 = vmatpush3.bf16.xpose.msra.mxu1 %v1597_v48  ;;  %v1065_v60 = vpop.xlane.xlu1 %1064 }
 0x30c   : > { %3969 = vrcp.f32 %v1065_v60 }
 0x30d   : > { %1477 = vrot.lane.b32.xlu0 %v4216_v34, %s4234_s15  ;;  %1487 = vrot.lane.b32.xlu1 %v4217_v45, %s4234_s15 }
 0x30f   : > { %v1068_v23 = vpop.xlane.xlu1 %1067 }
 0x310   : > { %3971 = vrcp.f32 %v1068_v23 }
 0x311   : > { %1481 = vrot.lane.b32.xlu0 %v5128_v42, %s4234_s15  ;;  %1491 = vrot.lane.b32.xlu1 %v4218_v19, %s4234_s15 }
 0x312   : > { %v3968_v33 = vpop.eup %3967 }
 0x313   : > { %v1074_v58 = vpop.xlane.xlu1 %1073  ;;  %v1181_v18 = vmul.f32 %v3968_v33, %v4961_v1  ;;  %v1180_v42 = vmul.f32 %v3968_v33, %v4959_v62 }
 0x315   : > { %1485 = vrot.lane.b32.xlu0 %v4219_v24, %s4234_s15  ;;  %1495 = vrot.lane.b32.xlu1 %v4220_v25, %s4234_s15 }
 0x316   : > { %v3970_v9 = vpop.eup %3969 }
 0x317   : > { %v1183_v8 = vmul.f32 %v3970_v9, %v4970_v10  ;;  %v1182_v14 = vmul.f32 %v3970_v9, %v4966_v16  ;;  %v1080_v53 = vpop.xlane.xlu1 %1079 }
 0x319   : > { %v1237_v43 = vpack.c.bf16 %v1183_v8, %v1181_v18  ;;  %v1236_v47 = vpack.c.bf16 %v1182_v14, %v1180_v42  ;;  %1489 = vrot.lane.b32.xlu0 %v4221_v29, %s4234_s15  ;;  %1499 = vrot.lane.b32.xlu1 %v4209_v37, %s4234_s15 }
 0x31a   : > { %v3972_v37 = vpop.eup %3971 }
 0x31b   : > { %1372 = vmatprep.mubr.bf16.mxu1 %v1237_v43  ;;  %v1086_v10 = vpop.xlane.xlu1 %1085  ;;  %v1185_v48 = vmul.f32 %v3972_v37, %v4979_v59  ;;  %v1184_v34 = vmul.f32 %v3972_v37, %v4974_v31 }
 0x31c   : > { %1373 = vmatmul.mubr.bf16.gmra.mrb[16].mxu1 %v1236_v47 }
 0x31d   : > { %1493 = vrot.lane.b32.xlu0 %v4222_v5, %s4234_s15 }
 0x31f   : > { %v1071_v1 = vpop.xlane.xlu0 %1070  ;;  %v1092_v16 = vpop.xlane.xlu1 %1091 }
 0x320   : > { %3973 = vrcp.f32 %v1071_v1 }
 0x321   : > { %1497 = vrot.lane.b32.xlu0 %v5123_v7, %s4234_s15  ;;  %3975 = vrcp.f32 %v1074_v58 }
 0x323   : > { %v1077_v62 = vpop.xlane.xlu0 %1076  ;;  %v1098_v7 = vpop.xlane.xlu1 %1097 }
 0x324   : > { %3977 = vrcp.f32 %v1077_v62 }
 0x325   : > { %3979 = vrcp.f32 %v1080_v53 }
 0x327   : > { %v1083_v21 = vpop.xlane.xlu0 %1082  ;;  %v1104_v31 = vpop.xlane.xlu1 %1103 }
 0x328   : > { %3981 = vrcp.f32 %v1083_v21 }
 0x32a   : > { %v3974_v6 = vpop.eup %3973 }
 0x32b   : > { %v1089_v11 = vpop.xlane.xlu0 %1088  ;;  %v1187_v60 = vmul.f32 %v3974_v6, %v5009_v50  ;;  %v1186_v45 = vmul.f32 %v3974_v6, %v4997_v28  ;;  %v3976_v23 = vpop.eup %3975 }
 0x32c   : > { %3983 = vrcp.f32 %v1089_v11  ;;  %v1189_v25 = vmul.f32 %v3976_v23, %v4987_v49  ;;  %v1188_v14 = vmul.f32 %v3976_v23, %v4981_v61 }
 0x32d   : > { %v1239_v19 = vpack.c.bf16 %v1187_v60, %v1185_v48  ;;  %v1238_v33 = vpack.c.bf16 %v1186_v45, %v1184_v34  ;;  %3985 = vrcp.f32 %v1086_v10 }
 0x32e   : > { %v3978_v58 = vpop.eup %3977 }
 0x32f   : > { %v1095_v24 = vpop.xlane.xlu0 %1094  ;;  %1380 = vmatprep.mubr.bf16.mxu1 %v1239_v19  ;;  %v1191_v9 = vmul.f32 %v3978_v58, %v5021_v12  ;;  %v3980_v59 = vpop.eup %3979  ;;  %v1190_v28 = vmul.f32 %v3978_v58, %v5018_v38 }
 0x330   : > { %1381 = vmatmul.mubr.bf16.gmra.mrb[20].mxu1 %v1238_v33  ;;  %v1193_v43 = vmul.f32 %v3980_v59, %v4994_v27  ;;  %v1110_v47 = vpop.xlane.xlu1 %1109  ;;  %3987 = vrcp.f32 %v1095_v24  ;;  %v1192_v61 = vmul.f32 %v3980_v59, %v4990_v36 }
 0x331   : > { %v1241_v50 = vpack.c.bf16 %v1191_v9, %v1189_v25  ;;  %v1240_v12 = vpack.c.bf16 %v1190_v28, %v1188_v14  ;;  %3989 = vrcp.f32 %v1092_v16 }
 0x332   : > { %v3982_v18 = vpop.eup %3981 }
 0x333   : > { %v1101_v8 = vpop.xlane.xlu0 %1100  ;;  %1388 = vmatprep.mubr.bf16.mxu1 %v1241_v50  ;;  %v1195_v42 = vmul.f32 %v3982_v18, %v5042_v4  ;;  %v1194_v38 = vmul.f32 %v3982_v18, %v5035_v51 }
 0x334   : > { %3991 = vrcp.f32 %v1101_v8 }
 0x335   : > { %v1243_v29 = vpack.c.bf16 %v1195_v42, %v1193_v43  ;;  %v1242_v37 = vpack.c.bf16 %v1194_v38, %v1192_v61  ;;  %3993 = vrcp.f32 %v1098_v7  ;;  %v6212_v38 = vld [vmem:[#allocation61_spill] sm:$0xff]  ;;  %v6213_v61 = vld [vmem:[#allocation54_spill] sm:$0xff] }
 0x336   : > { %v3984_v53 = vpop.eup %3983 }
 0x337   : > { %v1107_v49 = vpop.xlane.xlu0 %1106  ;;  %v3986_v5 = vpop.eup %3985  ;;  %v1199_v4 = vmul.f32 %v3984_v53, %v5058_v30  ;;  %v1198_v51 = vmul.f32 %v3984_v53, %v5050_v2 }
 0x338   : > { %1389 = vmatmul.mubr.bf16.gmra.mrb[24].mxu1 %v1240_v12  ;;  %v1116_v1 = vpop.xlane.xlu1 %1115  ;;  %v1197_v27 = vmul.f32 %v3986_v5, %v5006_v26  ;;  %v1196_v26 = vmul.f32 %v3986_v5, %v5000_v35  ;;  %3995 = vrcp.f32 %v1107_v49  ;;  %v6209_v12 = vld [vmem:[#allocation53_spill] sm:$0xff] }
 0x339   : > { %1396 = vmatprep.mubr.bf16.mxu1 %v1243_v29  ;;  %3997 = vrcp.f32 %v1104_v31  ;;  %v6210_v29 = vld [vmem:[#allocation55_spill] sm:$0xff] }
 0x33a   : > { %v1245_v6 = vpack.c.bf16 %v1199_v4, %v1197_v27  ;;  %v3988_v11 = vpop.eup %3987  ;;  %v1244_v45 = vpack.c.bf16 %v1198_v51, %v1196_v26 }
 0x33b   : > { %v1113_v10 = vpop.xlane.xlu0 %1112  ;;  %v3990_v16 = vpop.eup %3989  ;;  %v1203_v36 = vmul.f32 %v3988_v11, %v5066_v41  ;;  %v1202_v33 = vmul.f32 %v3988_v11, %v5062_v44 }
 0x33c   : > { %v1201_v30 = vmul.f32 %v3990_v16, %v5016_v46  ;;  %v1200_v35 = vmul.f32 %v3990_v16, %v5012_v56  ;;  %3999 = vrcp.f32 %v1113_v10 }
 0x33d   : > { %4001 = vrcp.f32 %v1110_v47  ;;  %v6208_v47 = vld [vmem:[#allocation57_spill] sm:$0xff] }
 0x33e   : > { %v1247_v7 = vpack.c.bf16 %v1203_v36, %v1201_v30  ;;  %v3992_v19 = vpop.eup %3991  ;;  %v1246_v58 = vpack.c.bf16 %v1202_v33, %v1200_v35 }
 0x33f   : > { %v1122_v62 = vpop.xlane.xlu1 %1121  ;;  %v1119_v21 = vpop.xlane.xlu0 %1118  ;;  %v1207_v41 = vmul.f32 %v3992_v19, %v5080_v22  ;;  %v1206_v59 = vmul.f32 %v3992_v19, %v5072_v63 }
 0x340   : > { %1397 = vmatmul.mubr.bf16.gmra.mrb[28].mxu1 %v1242_v37  ;;  %v3994_v2 = vpop.eup %3993  ;;  %4003 = vrcp.f32 %v1119_v21 }
 0x341   : > { %1404 = vmatprep.mubr.bf16.mxu1 %v1245_v6  ;;  %v1205_v46 = vmul.f32 %v3994_v2, %v5032_v13  ;;  %v1204_v44 = vmul.f32 %v3994_v2, %v5024_v15  ;;  %4005 = vrcp.f32 %v1116_v1  ;;  %v6211_v1 = vld [vmem:[#allocation56_spill] sm:$0xff] }
 0x342   : > { %v3996_v25 = vpop.eup %3995  ;;  %v6215_v6 = vld [vmem:[#allocation60_spill] sm:$0xff] }
 0x343   : > { %v1530_v48 = vpop.permute.xlu1 %1529  ;;  %v1125_v60 = vpop.xlane.xlu0 %1124  ;;  %v1249_v24 = vpack.c.bf16 %v1207_v41, %v1205_v46  ;;  %v1211_v50 = vmul.f32 %v3996_v25, %v5088_v32  ;;  %v1248_v56 = vpack.c.bf16 %v1206_v59, %v1204_v44  ;;  %v1210_v8 = vmul.f32 %v3996_v25, %v5084_v55 }
 0x344   : > { %3681 = vmatprep.subr.msk.bf16.mxu1 %vm394_vm0, %v1530_v48  ;;  %v3998_v9 = vpop.eup %3997  ;;  %4007 = vrcp.f32 %v1125_v60  ;;  %v6216_v48 = vld [vmem:[#allocation58_spill] sm:$0xff] }
 0x345   : > { %v1209_v22 = vmul.f32 %v3998_v9, %v5047_v20  ;;  %v1208_v63 = vmul.f32 %v3998_v9, %v5044_v0  ;;  %4009 = vrcp.f32 %v1122_v62  ;;  %v6214_v62 = vld [vmem:[#allocation59_spill] sm:$0xff] }
 0x346   : > { %v4000_v13 = vpop.eup %3999 }
 0x347   : > { %v1514_v34 = vpop.permute.xlu0 %1513  ;;  %v1251_v18 = vpack.c.bf16 %v1211_v50, %v1209_v22  ;;  %v4002_v31 = vpop.eup %4001  ;;  %v1215_v28 = vmul.f32 %v4000_v13, %v5100_v17  ;;  %v1250_v15 = vpack.c.bf16 %v1210_v8, %v1208_v63  ;;  %v1214_v43 = vmul.f32 %v4000_v13, %v5094_v39 }
 0x348   : > { %v1600_v23 = vsel %vm394_vm0, %v1514_v34, 0  ;;  %1405 = vmatmul.mubr.bf16.gmra.mrb[32].mxu1 %v1244_v45  ;;  %v1213_v32 = vmul.f32 %v4002_v31, %v5070_v57  ;;  %v1212_v55 = vmul.f32 %v4002_v31, %v6209_v12 }
 0x349   : > { %1412 = vmatprep.mubr.bf16.mxu1 %v1247_v7  ;;  %3504 = vmatpush3.bf16.xpose.msra.mxu1 %v1600_v23 }
 0x34a   : > { %v1253_v42 = vpack.c.bf16 %v1215_v28, %v1213_v32  ;;  %v4004_v20 = vpop.eup %4003  ;;  %v1252_v53 = vpack.c.bf16 %v1214_v43, %v1212_v55 }
 0x34b   : > { %v4006_v14 = vpop.eup %4005  ;;  %v1219_v49 = vmul.f32 %v4004_v20, %v6208_v47  ;;  %v1218_v10 = vmul.f32 %v4004_v20, %v6211_v1 }
 0x34c   : > { %v1217_v17 = vmul.f32 %v4006_v14, %v6210_v29  ;;  %v1216_v27 = vmul.f32 %v4006_v14, %v6213_v61 }
 0x34e   : > { %v1255_v0 = vpack.c.bf16 %v1219_v49, %v1217_v17  ;;  %v4008_v5 = vpop.eup %4007  ;;  %v1254_v21 = vpack.c.bf16 %v1218_v10, %v1216_v27 }
 0x34f   : > { %v4010_v57 = vpop.eup %4009  ;;  %v1223_v4 = vmul.f32 %v4008_v5, %v6212_v38  ;;  %v1222_v11 = vmul.f32 %v4008_v5, %v6215_v6 }
 0x350   : > { %1413 = vmatmul.mubr.bf16.gmra.mrb[36].mxu1 %v1246_v58  ;;  %v1221_v39 = vmul.f32 %v4010_v57, %v6214_v62  ;;  %v1220_v60 = vmul.f32 %v4010_v57, %v6216_v48 }
 0x351   : > { %1420 = vmatprep.mubr.bf16.mxu1 %v1249_v24 }
 0x352   : > { %v1257_v37 = vpack.c.bf16 %v1223_v4, %v1221_v39  ;;  %v1256_v51 = vpack.c.bf16 %v1222_v11, %v1220_v60 }
 0x358   : > { %1421 = vmatmul.mubr.bf16.gmra.mrb[40].mxu1 %v1248_v56 }
 0x359   : > { %1428 = vmatprep.mubr.bf16.mxu1 %v1251_v18 }
 0x360   : > { %1429 = vmatmul.mubr.bf16.gmra.mrb[44].mxu1 %v1250_v15 }
 0x361   : > { %1436 = vmatprep.mubr.bf16.mxu1 %v1253_v42 }
 0x368   : > { %1437 = vmatmul.mubr.bf16.gmra.mrb[48].mxu1 %v1252_v53 }
 0x369   : > { %1444 = vmatprep.mubr.bf16.mxu1 %v1255_v0 }
 0x370   : > { %1445 = vmatmul.mubr.bf16.gmra.mrb[52].mxu1 %v1254_v21 }
 0x371   : > { %1452 = vmatprep.mubr.bf16.mxu1 %v1257_v37 }
 0x374   : > { %v1128_v16 = vpop.xlane.xlu1 %1127 }
 0x375   : > { %4011 = vrcp.f32 %v1128_v16 }
 0x378   : > { %v1131_v36 = vpop.xlane.xlu0 %1130  ;;  %v1532_v26 = vpop.permute.xlu1 %1531  ;;  %1453 = vmatmul.mubr.bf16.gmra.mrb[56].mxu1 %v1256_v51 }
 0x379   : > { %4013 = vrcp.f32 %v1131_v36  ;;  %3682 = vmatprep.subr.msk.bf16.mxu1 %vm394_vm0, %v1532_v26 }
 0x37c   : > { %v1516_v30 = vpop.permute.xlu0 %1515  ;;  %v1472_v58 = vpop.permute.xlu1 %1471 }
 0x37d   : > { %v1603_v34 = vsel %vm394_vm0, %v1516_v30, 0 }
 0x37e   : > { %3506 = vmatpush3.bf16.xpose.msra.mxu1 %v1603_v34 }
 0x37f   : > { %v4012_v45 = vpop.eup %4011 }
 0x380   : > { %v1225_v7 = vmul.f32 %v4012_v45, %v5142_v52  ;;  %v1224_v2 = vmul.f32 %v4012_v45, %v5140_v54  ;;  %v1470_v46 = vpop.permute.xlu0 %1469  ;;  %v1476_v54 = vpop.permute.xlu1 %1475 }
 0x383   : > { %v4014_v23 = vpop.eup %4013 }
 0x384   : > { %v1227_v19 = vmul.f32 %v4014_v23, %v5152_v40  ;;  %v1226_v33 = vmul.f32 %v4014_v23, %v5146_v3  ;;  %v1474_v24 = vpop.permute.xlu0 %1473  ;;  %v1480_v3 = vpop.permute.xlu1 %1479 }
 0x386   : > { %v1259_v41 = vpack.c.bf16 %v1227_v19, %v1225_v7  ;;  %v1258_v35 = vpack.c.bf16 %v1226_v33, %v1224_v2 }
 0x388   : > { %1460 = vmatprep.mubr.bf16.mxu1 %v1259_v41  ;;  %v1478_v52 = vpop.permute.xlu0 %1477  ;;  %v1484_v18 = vpop.permute.xlu1 %1483 }
 0x389   : > { %1461 = vmatmul.mubr.bf16.gmra.mrb[60].mxu1 %v1258_v35 }
 0x38a   : > { %3507 = vmatprep.mubr.msk.bf16.mxu1 %vm394_vm0, %v1470_v46 }
 0x38c   : > { %v1482_v50 = vpop.permute.xlu0 %1481  ;;  %v1488_v12 = vpop.permute.xlu1 %1487 }
 0x390   : > { %v1486_v15 = vpop.permute.xlu0 %1485  ;;  %v1492_v57 = vpop.permute.xlu1 %1491 }
 0x391   : > { %3508 = vmatmul.mubr.msk.bf16.vlgmr.msra.gmra.mrb[64].mxu1 %vm394_vm0, %v1470_v46 }
 0x392   : > { %3509 = vmatprep.mubr.msk.bf16.mxu1 %vm394_vm0, %v1472_v58 }
 0x394   : > { %v1490_v5 = vpop.permute.xlu0 %1489  ;;  %v1496_v38 = vpop.permute.xlu1 %1495 }
 0x398   : > { %v1494_v1 = vpop.permute.xlu0 %1493  ;;  %v1500_v37 = vpop.permute.xlu1 %1499 }
 0x399   : > { %3510 = vmatmul.mubr.msk.bf16.gmra.mrb[68].mxu1 %vm394_vm0, %v1472_v58 }
 0x39a   : > { %3511 = vmatprep.mubr.msk.bf16.mxu1 %vm394_vm0, %v1474_v24 }
 0x39c   : > { %v1498_v21 = vpop.permute.xlu0 %1497 }
 0x3a1   : > { %3512 = vmatmul.mubr.msk.bf16.gmra.mrb[72].mxu1 %vm394_vm0, %v1474_v24 }
 0x3a2   : > { %3513 = vmatprep.mubr.msk.bf16.mxu1 %vm394_vm0, %v1476_v54 }
 0x3a9   : > { %3514 = vmatmul.mubr.msk.bf16.gmra.mrb[76].mxu1 %vm394_vm0, %v1476_v54 }
 0x3aa   : > { %3515 = vmatprep.mubr.msk.bf16.mxu1 %vm394_vm0, %v1478_v52 }
 0x3b1   : > { %3516 = vmatmul.mubr.msk.bf16.gmra.mrb[80].mxu1 %vm394_vm0, %v1478_v52 }
 0x3b2   : > { %3517 = vmatprep.mubr.msk.bf16.mxu1 %vm394_vm0, %v1480_v3 }
 0x3b5   : > { %v3395_v40 = vpop.f32.mrb[0].mxu1 }
 0x3b6   : > { %v3396_v25 = vpop.f32.mrb[1].mxu1 }
 0x3b7   : > { %v5280_v9 = vadd.f32 %v3396_v25, %v3395_v40  ;;  %v3398_v59 = vpop.f32.mrb[2].mxu1 }
 0x3b8   : > { %v3399_v44 = vpop.f32.mrb[3].mxu1 }
 0x3b9   : > { %6217 = vst [vmem:[#allocation37_spill] sm:$0xff] %v5280_v9  ;;  %v5282_v22 = vadd.f32 %v3399_v44, %v3398_v59  ;;  %3518 = vmatmul.mubr.msk.bf16.gmra.mrb[84].mxu1 %vm394_vm0, %v1480_v3  ;;  %v3812_v9 = vld [vmem:[%s4259_s11 + $0x24] ss:$8 sps:$4 sm:$0xff]  }
 0x3ba   : > { %3519 = vmatprep.mubr.msk.bf16.mxu1 %vm394_vm0, %v1482_v50 }
 0x3bb   : > { %6218 = vst [vmem:[#allocation38_spill] sm:$0xff] %v5282_v22  ;;  %v3813_v22 = vld [vmem:[%s4259_s11 + $0xb4] ss:$8 sps:$4 sm:$0xff]  }
 0x3bf   : > { %v3401_v56 = vpop.f32.mrb[4].mxu1 }
 0x3c0   : > { %v3402_v13 = vpop.f32.mrb[5].mxu1 }
 0x3c1   : > { %v5286_v31 = vadd.f32 %v3402_v13, %v3401_v56  ;;  %v3404_v8 = vpop.f32.mrb[6].mxu1  ;;  %3520 = vmatmul.mubr.msk.bf16.gmra.mrb[88].mxu1 %vm394_vm0, %v1482_v50 }
 0x3c2   : > { %v3405_v28 = vpop.f32.mrb[7].mxu1  ;;  %3521 = vmatprep.mubr.msk.bf16.mxu1 %vm394_vm0, %v1484_v18 }
 0x3c3   : > { %6219 = vst [vmem:[#allocation36_spill] sm:$0xff] %v5286_v31  ;;  %v5290_v63 = vadd.f32 %v3405_v28, %v3404_v8 }
 0x3c5   : > { %6220 = vst [vmem:[#allocation40_spill] sm:$0xff] %v5290_v63 }
 0x3c7   : > { %v3407_v32 = vpop.f32.mrb[8].mxu1 }
 0x3c8   : > { %v3408_v42 = vpop.f32.mrb[9].mxu1 }
 0x3c9   : > { %v5292_v20 = vadd.f32 %v3408_v42, %v3407_v32  ;;  %v3410_v14 = vpop.f32.mrb[10].mxu1  ;;  %3522 = vmatmul.mubr.msk.bf16.gmra.mrb[92].mxu1 %vm394_vm0, %v1484_v18 }
 0x3ca   : > { %v3411_v43 = vpop.f32.mrb[11].mxu1  ;;  %3523 = vmatprep.mubr.msk.bf16.mxu1 %vm394_vm0, %v1486_v15 }
 0x3cb   : > { %6221 = vst [vmem:[#allocation39_spill] sm:$0xff] %v5292_v20  ;;  %v5296_v47 = vadd.f32 %v3411_v43, %v3410_v14 }
 0x3cd   : > { %6222 = vst [vmem:[#allocation42_spill] sm:$0xff] %v5296_v47 }
 0x3cf   : > { %v3413_v49 = vpop.f32.mrb[12].mxu1 }
 0x3d0   : > { %v3414_v55 = vpop.f32.mrb[13].mxu1 }
 0x3d1   : > { %v5298_v29 = vadd.f32 %v3414_v55, %v3413_v49  ;;  %v3416_v17 = vpop.f32.mrb[14].mxu1  ;;  %3524 = vmatmul.mubr.msk.bf16.gmra.mrb[96].mxu1 %vm394_vm0, %v1486_v15 }
 0x3d2   : > { %v3417_v53 = vpop.f32.mrb[15].mxu1  ;;  %3525 = vmatprep.mubr.msk.bf16.mxu1 %vm394_vm0, %v1488_v12 }
 0x3d3   : > { %6223 = vst [vmem:[#allocation48_spill] sm:$0xff] %v5298_v29  ;;  %v5302_v0 = vadd.f32 %v3417_v53, %v3416_v17  ;;  %v3809_v29 = vld [vmem:[%s4259_s11 + $0x94] ss:$8 sps:$4 sm:$0xff]  }
 0x3d5   : > { %6224 = vst [vmem:[#allocation46_spill] sm:$0xff] %v5302_v0 }
 0x3d9   : > { %3526 = vmatmul.mubr.msk.bf16.gmra.mrb[100].mxu1 %vm394_vm0, %v1488_v12 }
 0x3da   : > { %3527 = vmatprep.mubr.msk.bf16.mxu1 %vm394_vm0, %v1490_v5 }
 0x3e1   : > { %3528 = vmatmul.mubr.msk.bf16.gmra.mrb[104].mxu1 %vm394_vm0, %v1490_v5 }
 0x3e2   : > { %3529 = vmatprep.mubr.msk.bf16.mxu1 %vm394_vm0, %v1492_v57 }
 0x3e9   : > { %3530 = vmatmul.mubr.msk.bf16.gmra.mrb[108].mxu1 %vm394_vm0, %v1492_v57 }
 0x3ea   : > { %3531 = vmatprep.mubr.msk.bf16.mxu1 %vm394_vm0, %v1494_v1 }
 0x3ef   : > { %v3419_v10 = vpop.f32.mrb[16].mxu1 }
 0x3f0   : > { %v3420_v4 = vpop.f32.mrb[17].mxu1 }
 0x3f1   : > { %v5310_v61 = vadd.f32 %v3420_v4, %v3419_v10  ;;  %v3422_v27 = vpop.f32.mrb[18].mxu1  ;;  %3532 = vmatmul.mubr.msk.bf16.gmra.mrb[112].mxu1 %vm394_vm0, %v1494_v1 }
 0x3f2   : > { %v3423_v62 = vpop.f32.mrb[19].mxu1  ;;  %3533 = vmatprep.mubr.msk.bf16.mxu1 %vm394_vm0, %v1496_v38 }
 0x3f3   : > { %6225 = vst [vmem:[#allocation47_spill] sm:$0xff] %v5310_v61  ;;  %v5314_v39 = vadd.f32 %v3423_v62, %v3422_v27  ;;  %v3807_v61 = vld [vmem:[%s4259_s11 + $0x84] ss:$8 sps:$4 sm:$0xff]  }
 0x3f4   : > { %3539 = vmatprep.subr.bf16.mxu0 %v3807_v61  ;;  %3651 = vmatprep.subr.bf16.mxu1 %v3807_v61 }
 0x3f5   : > { %6226 = vst [vmem:[#allocation41_spill] sm:$0xff] %v5314_v39  ;;  %v3808_v39 = vld [vmem:[%s4259_s11 + $0x4] ss:$8 sps:$4 sm:$0xff]  }
 0x3f6   : > { %3540 = vmatpush3.bf16.msra.mxu0 %v3808_v39  ;;  %3659 = vmatpush3.bf16.msra.mxu1 %v3808_v39 }
 0x3f7   : > { %3541 = vmatprep.subr.bf16.mxu0 %v3809_v29  ;;  %3652 = vmatprep.subr.bf16.mxu1 %v3809_v29  ;;  %v3811_v29 = vld [vmem:[%s4259_s11 + $0xa4] ss:$8 sps:$4 sm:$0xff]  }
 0x3f9   : > { %3534 = vmatmul.mubr.msk.bf16.gmra.mrb[116].mxu1 %vm394_vm0, %v1496_v38 }
 0x3fa   : > { %3535 = vmatprep.mubr.msk.bf16.mxu1 %vm394_vm0, %v1498_v21 }
 0x401   : > { %3536 = vmatmul.mubr.msk.bf16.gmra.mrb[120].mxu1 %vm394_vm0, %v1498_v21 }
 0x402   : > { %3537 = vmatprep.mubr.msk.bf16.mxu1 %vm394_vm0, %v1500_v37 }
 0x403   : > { %v3425_v6 = vpop.f32.mrb[20].mxu1 }
 0x404   : > { %v3426_v11 = vpop.f32.mrb[21].mxu1 }
 0x405   : > { %v5320_v16 = vadd.f32 %v3426_v11, %v3425_v6  ;;  %v3428_v48 = vpop.f32.mrb[22].mxu1 }
 0x406   : > { %v3429_v60 = vpop.f32.mrb[23].mxu1 }
 0x407   : > { %6227 = vst [vmem:[#allocation44_spill] sm:$0xff] %v5320_v16  ;;  %v5322_v51 = vadd.f32 %v3429_v60, %v3428_v48 }
 0x409   : > { %6228 = vst [vmem:[#allocation50_spill] sm:$0xff] %v5322_v51  ;;  %3538 = vmatmul.mubr.msk.bf16.gmra.mrb[124].mxu1 %vm394_vm0, %v1500_v37 }
 0x40b   : > { %v3431_v36 = vpop.f32.mrb[24].mxu1 }
 0x40c   : > { %v3432_v26 = vpop.f32.mrb[25].mxu1 }
 0x40d   : > { %v5325_v30 = vadd.f32 %v3432_v26, %v3431_v36  ;;  %v3434_v34 = vpop.f32.mrb[26].mxu1 }
 0x40e   : > { %v3435_v45 = vpop.f32.mrb[27].mxu1 }
 0x40f   : > { %6229 = vst [vmem:[#allocation52_spill] sm:$0xff] %v5325_v30  ;;  %v5327_v23 = vadd.f32 %v3435_v45, %v3434_v34 }
 0x411   : > { %6230 = vst [vmem:[#allocation49_spill] sm:$0xff] %v5327_v23 }
 0x413   : > { %v3437_v7 = vpop.f32.mrb[28].mxu1 }
 0x414   : > { %v3438_v19 = vpop.f32.mrb[29].mxu1 }
 0x415   : > { %v5329_v2 = vadd.f32 %v3438_v19, %v3437_v7  ;;  %v3440_v33 = vpop.f32.mrb[30].mxu1 }
 0x416   : > { %v3441_v41 = vpop.f32.mrb[31].mxu1 }
 0x417   : > { %6231 = vst [vmem:[#allocation51_spill] sm:$0xff] %v5329_v2  ;;  %v5331_v35 = vadd.f32 %v3441_v41, %v3440_v33 }
 0x419   : > { %6232 = vst [vmem:[#allocation43_spill] sm:$0xff] %v5331_v35  ;;  %v6292_v35 = vld [vmem:[#allocation33_spill] sm:$0xff] }
 0x41b   : > { %v3443_v46 = vpop.f32.mrb[32].mxu1 }
 0x41c   : > { %v3444_v58 = vpop.f32.mrb[33].mxu1 }
 0x41d   : > { %v5333_v24 = vadd.f32 %v3444_v58, %v3443_v46  ;;  %v3446_v54 = vpop.f32.mrb[34].mxu1  ;;  %v6249_v58 = vld [vmem:[#allocation3_spill] sm:$0xff] }
 0x41e   : > { %v3447_v52 = vpop.f32.mrb[35].mxu1 }
 0x41f   : > { %6233 = vst [vmem:[#allocation45_spill] sm:$0xff] %v5333_v24  ;;  %v5335_v3 = vadd.f32 %v3447_v52, %v3446_v54  ;;  %v3816_v54 = vld [vmem:[%s4259_s11 + $0x44] ss:$8 sps:$4 sm:$0xff]  }
 0x421   : > { %6234 = vst [vmem:[#allocation57_spill] sm:$0xff] %v5335_v3 }
 0x423   : > { %v3449_v40 = vpop.f32.mrb[36].mxu1 }
 0x424   : > { %v3450_v25 = vpop.f32.mrb[37].mxu1 }
 0x425   : > { %v5337_v59 = vadd.f32 %v3450_v25, %v3449_v40  ;;  %v3452_v50 = vpop.f32.mrb[38].mxu1 }
 0x426   : > { %v3453_v44 = vpop.f32.mrb[39].mxu1 }
 0x427   : > { %6235 = vst [vmem:[#allocation53_spill] sm:$0xff] %v5337_v59  ;;  %v5339_v56 = vadd.f32 %v3453_v44, %v3452_v50 }
 0x429   : > { %6236 = vst [vmem:[#allocation55_spill] sm:$0xff] %v5339_v56 }
 0x42b   : > { %v3455_v18 = vpop.f32.mrb[40].mxu1 }
 0x42c   : > { %v3456_v13 = vpop.f32.mrb[41].mxu1 }
 0x42d   : > { %v5341_v8 = vadd.f32 %v3456_v13, %v3455_v18  ;;  %v3458_v28 = vpop.f32.mrb[42].mxu1 }
 0x42e   : > { %v3459_v32 = vpop.f32.mrb[43].mxu1 }
 0x42f   : > { %6237 = vst [vmem:[#allocation56_spill] sm:$0xff] %v5341_v8  ;;  %v5343_v15 = vadd.f32 %v3459_v32, %v3458_v28 }
 0x431   : > { %6238 = vst [vmem:[#allocation61_spill] sm:$0xff] %v5343_v15  ;;  %v6289_v15 = vld [vmem:[#allocation29_spill] sm:$0xff] }
 0x433   : > { %v3461_v42 = vpop.f32.mrb[44].mxu1 }
 0x434   : > { %v3462_v14 = vpop.f32.mrb[45].mxu1 }
 0x435   : > { %v5345_v43 = vadd.f32 %v3462_v14, %v3461_v42  ;;  %v3464_v49 = vpop.f32.mrb[46].mxu1 }
 0x436   : > { %v3465_v12 = vpop.f32.mrb[47].mxu1 }
 0x437   : > { %6239 = vst [vmem:[#allocation54_spill] sm:$0xff] %v5345_v43  ;;  %v5347_v55 = vadd.f32 %v3465_v12, %v3464_v49 }
 0x439   : > { %6240 = vst [vmem:[#allocation59_spill] sm:$0xff] %v5347_v55 }
 0x43b   : > { %v3467_v17 = vpop.f32.mrb[48].mxu1 }
 0x43c   : > { %v3468_v53 = vpop.f32.mrb[49].mxu1 }
 0x43d   : > { %v5349_v5 = vadd.f32 %v3468_v53, %v3467_v17  ;;  %v3470_v57 = vpop.f32.mrb[50].mxu1 }
 0x43e   : > { %v3471_v1 = vpop.f32.mrb[51].mxu1 }
 0x43f   : > { %6241 = vst [vmem:[#allocation60_spill] sm:$0xff] %v5349_v5  ;;  %v5351_v10 = vadd.f32 %v3471_v1, %v3470_v57 }
 0x441   : > { %6242 = vst [vmem:[#allocation58_spill] sm:$0xff] %v5351_v10  ;;  %v6285_v10 = vld [vmem:[#allocation27_spill] sm:$0xff] }
 0x443   : > { %v3473_v38 = vpop.f32.mrb[52].mxu1 }
 0x444   : > { %v3474_v4 = vpop.f32.mrb[53].mxu1 }
 0x445   : > { %v5353_v27 = vadd.f32 %v3474_v4, %v3473_v38  ;;  %v3476_v62 = vpop.f32.mrb[54].mxu1 }
 0x446   : > { %v3477_v21 = vpop.f32.mrb[55].mxu1 }
 0x447   : > { %6243 = vst [vmem:[#allocation62_spill] sm:$0xff] %v5353_v27  ;;  %v5355_v37 = vadd.f32 %v3477_v21, %v3476_v62 }
 0x449   : > { %6244 = vst [vmem:[#allocation63_spill] sm:$0xff] %v5355_v37  ;;  %v6281_v37 = vld [vmem:[#allocation25_spill] sm:$0xff] }
 0x44b   : > { %v3479_v6 = vpop.f32.mrb[56].mxu1 }
 0x44c   : > { %v3480_v11 = vpop.f32.mrb[57].mxu1 }
 0x44d   : > { %v5357_v48 = vadd.f32 %v3480_v11, %v3479_v6  ;;  %v3482_v60 = vpop.f32.mrb[58].mxu1 }
 0x44e   : > { %v3483_v36 = vpop.f32.mrb[59].mxu1 }
 0x44f   : > { %6245 = vst [vmem:[#allocation64_spill] sm:$0xff] %v5357_v48  ;;  %v5359_v26 = vadd.f32 %v3483_v36, %v3482_v60  ;;  %v6266_v36 = vld [vmem:[#allocation17_spill] sm:$0xff] }
 0x451   : > { %6246 = vst [vmem:[#allocation65_spill] sm:$0xff] %v5359_v26 }
 0x45c   : > { %v3485_v34 = vpop.f32.mrb[60].mxu1 }
 0x45d   : > { %v3486_v45 = vpop.f32.mrb[61].mxu1 }
 0x45e   : > { %v5361_v7 = vadd.f32 %v3486_v45, %v3485_v34  ;;  %v3488_v19 = vpop.f32.mrb[62].mxu1 }
 0x45f   : > { %v3489_v33 = vpop.f32.mrb[63].mxu1 }
 0x460   : > { %6247 = vst [vmem:[#allocation66_spill] sm:$0xff] %v5361_v7  ;;  %v5363_v41 = vadd.f32 %v3489_v33, %v3488_v19 }
 0x462   : > { %6248 = vst [vmem:[#allocation67_spill] sm:$0xff] %v5363_v41 }
 0x464   : > { %v1663_v46 = vpop.f32.mrb[64].mxu1 }
 0x465   : > { %v5368_v52 = vsel %vm186_vm1, %v1663_v46, -10000.0  ;;  %v1665_v40 = vpop.f32.mrb[65].mxu1 }
 0x466   : > { %v1886_v25 = vmax.f32 %v5368_v52, -10000.0  ;;  %v1667_v50 = vpop.f32.mrb[66].mxu1 }
 0x467   : > { %v5374_v18 = vsel %vm188_vm2, %v1667_v50, -10000.0  ;;  %v1669_v13 = vpop.f32.mrb[67].mxu1  ;;  %vm6267_vm2 = vcmp.lt.s32.totalorder %v6249_v58, %v6266_v36  ;;  %v6273_v36 = vld [vmem:[#allocation21_spill] sm:$0xff] }
 0x468   : > { %v1889_v28 = vmax.f32 %v5374_v18, -10000.0  ;;  %1887 = vmax.xlane.f32.xlu0 %v1886_v25 }
 0x46a   : > { %1890 = vmax.xlane.f32.xlu1 %v1889_v28 }
 0x46c   : > { %v1673_v32 = vpop.f32.mrb[68].mxu1 }
 0x46d   : > { %v5380_v14 = vsel %vm190_vm3, %v1673_v32, -10000.0  ;;  %v1675_v49 = vpop.f32.mrb[69].mxu1 }
 0x46e   : > { %v1892_v12 = vmax.f32 %v5380_v14, -10000.0  ;;  %v1677_v17 = vpop.f32.mrb[70].mxu1 }
 0x46f   : > { %v5386_v57 = vsel %vm192_vm4, %v1677_v17, -10000.0  ;;  %v1679_v1 = vpop.f32.mrb[71].mxu1 }
 0x470   : > { %1893 = vmax.xlane.f32.xlu0 %v1892_v12  ;;  %v1895_v38 = vmax.f32 %v5386_v57, -10000.0 }
 0x474   : > { %1896 = vmax.xlane.f32.xlu0 %v1895_v38  ;;  %v1683_v4 = vpop.f32.mrb[72].mxu1 }
 0x475   : > { %v5392_v21 = vsel %vm194_vm5, %v1683_v4, -10000.0  ;;  %v1685_v6 = vpop.f32.mrb[73].mxu1 }
 0x476   : > { %v1898_v11 = vmax.f32 %v5392_v21, -10000.0  ;;  %v1687_v60 = vpop.f32.mrb[74].mxu1 }
 0x477   : > { %v5398_v34 = vsel %vm196_vm6, %v1687_v60, -10000.0  ;;  %v1689_v45 = vpop.f32.mrb[75].mxu1 }
 0x478   : > { %v1901_v19 = vmax.f32 %v5398_v34, -10000.0  ;;  %1899 = vmax.xlane.f32.xlu1 %v1898_v11 }
 0x47a   : > { %1902 = vmax.xlane.f32.xlu0 %v1901_v19 }
 0x47c   : > { %v1693_v33 = vpop.f32.mrb[76].mxu1 }
 0x47d   : > { %v5404_v40 = vsel %vm198_vm7, %v1693_v33, -10000.0  ;;  %v1695_v25 = vpop.f32.mrb[77].mxu1 }
 0x47e   : > { %v1904_v50 = vmax.f32 %v5404_v40, -10000.0  ;;  %v1697_v44 = vpop.f32.mrb[78].mxu1 }
 0x47f   : > { %v5410_v28 = vsel %vm200_vm8, %v1697_v44, -10000.0  ;;  %v1699_v32 = vpop.f32.mrb[79].mxu1 }
 0x480   : > { %v1907_v42 = vmax.f32 %v5410_v28, -10000.0  ;;  %1905 = vmax.xlane.f32.xlu1 %v1904_v50 }
 0x482   : > { %1908 = vmax.xlane.f32.xlu0 %v1907_v42  ;;  %v6262_v42 = vld [vmem:[#allocation15_spill] sm:$0xff] }
 0x483   : > { %vm6263_vm0 = vcmp.lt.s32.totalorder %v6249_v58, %v6262_v42 }
 0x484   : > { %v1703_v49 = vpop.f32.mrb[80].mxu1 }
 0x485   : > { %v5416_v17 = vsel %vm202_vm9, %v1703_v49, -10000.0  ;;  %v1705_v53 = vpop.f32.mrb[81].mxu1 }
 0x486   : > { %v1910_v1 = vmax.f32 %v5416_v17, -10000.0  ;;  %v1707_v38 = vpop.f32.mrb[82].mxu1 }
 0x487   : > { %v5422_v62 = vsel %vm204_vm10, %v1707_v38, -10000.0  ;;  %v1709_v6 = vpop.f32.mrb[83].mxu1  ;;  %v6264_v38 = vld [vmem:[#allocation16_spill] sm:$0xff] }
 0x488   : > { %v1913_v11 = vmax.f32 %v5422_v62, -10000.0  ;;  %1911 = vmax.xlane.f32.xlu1 %v1910_v1  ;;  %vm6265_vm1 = vcmp.lt.s32.totalorder %v6249_v58, %v6264_v38  ;;  %v6271_v38 = vld [vmem:[#allocation19_spill] sm:$0xff] }
 0x48a   : > { %1914 = vmax.xlane.f32.xlu0 %v1913_v11 }
 0x48c   : > { %v1713_v60 = vpop.f32.mrb[84].mxu1 }
 0x48d   : > { %v5428_v45 = vsel %vm206_vm11, %v1713_v60, -10000.0  ;;  %v1715_v19 = vpop.f32.mrb[85].mxu1 }
 0x48e   : > { %v1916_v33 = vmax.f32 %v5428_v45, -10000.0  ;;  %v1717_v46 = vpop.f32.mrb[86].mxu1 }
 0x48f   : > { %v5434_v50 = vsel %vm208_vm12, %v1717_v46, -10000.0  ;;  %v1719_v44 = vpop.f32.mrb[87].mxu1 }
 0x490   : > { %v1919_v13 = vmax.f32 %v5434_v50, -10000.0  ;;  %1917 = vmax.xlane.f32.xlu1 %v1916_v33  ;;  %v6268_v44 = vld [vmem:[#allocation18_spill] sm:$0xff] }
 0x491   : > { %vm6269_vm3 = vcmp.lt.s32.totalorder %v6249_v58, %v6268_v44 }
 0x492   : > { %1920 = vmax.xlane.f32.xlu0 %v1919_v13 }
 0x494   : > { %v1723_v32 = vpop.f32.mrb[88].mxu1 }
 0x495   : > { %v5440_v49 = vsel %vm6263_vm0, %v1723_v32, -10000.0  ;;  %v1725_v12 = vpop.f32.mrb[89].mxu1 }
 0x496   : > { %v1922_v53 = vmax.f32 %v5440_v49, -10000.0  ;;  %v1727_v1 = vpop.f32.mrb[90].mxu1 }
 0x497   : > { %v5446_v4 = vsel %vm6265_vm1, %v1727_v1, -10000.0  ;;  %v1729_v6 = vpop.f32.mrb[91].mxu1  ;;  %v6270_v1 = vld [vmem:[#allocation20_spill] sm:$0xff] }
 0x498   : > { %v1925_v11 = vmax.f32 %v5446_v4, -10000.0  ;;  %1923 = vmax.xlane.f32.xlu1 %v1922_v53  ;;  %vm6272_vm4 = vcmp.lt.s32.totalorder %v6270_v1, %v6271_v38  ;;  %vm6274_vm5 = vcmp.lt.s32.totalorder %v6270_v1, %v6273_v36  ;;  %v6277_v36 = vld [vmem:[#allocation23_spill] sm:$0xff]  ;;  %vm6282_vm9 = vcmp.lt.s32.totalorder %v6270_v1, %v6281_v37 }
 0x499   : > { %vm6278_vm7 = vcmp.lt.s32.totalorder %v6270_v1, %v6277_v36  ;;  %vm6286_vm11 = vcmp.lt.s32.totalorder %v6270_v1, %v6285_v10  ;;  %vm6290_vm0 = vcmp.lt.s32.totalorder %v6270_v1, %v6289_v15  ;;  %vm6293_vm1 = vcmp.lt.s32.totalorder %v6270_v1, %v6292_v35 }
 0x49a   : > { %1926 = vmax.xlane.f32.xlu0 %v1925_v11 }
 0x49c   : > { %v1733_v60 = vpop.f32.mrb[92].mxu1 }
 0x49d   : > { %v5452_v19 = vsel %vm6267_vm2, %v1733_v60, -10000.0  ;;  %v1735_v33 = vpop.f32.mrb[93].mxu1 }
 0x49e   : > { %v1928_v46 = vmax.f32 %v5452_v19, -10000.0  ;;  %v1737_v25 = vpop.f32.mrb[94].mxu1 }
 0x49f   : > { %v5458_v13 = vsel %vm6269_vm3, %v1737_v25, -10000.0  ;;  %v1739_v32 = vpop.f32.mrb[95].mxu1 }
 0x4a0   : > { %v1931_v42 = vmax.f32 %v5458_v13, -10000.0  ;;  %1929 = vmax.xlane.f32.xlu1 %v1928_v46  ;;  %v6275_v32 = vld [vmem:[#allocation22_spill] sm:$0xff] }
 0x4a1   : > { %vm6276_vm6 = vcmp.lt.s32.totalorder %v6270_v1, %v6275_v32  ;;  %v6279_v32 = vld [vmem:[#allocation24_spill] sm:$0xff] }
 0x4a2   : > { %1932 = vmax.xlane.f32.xlu0 %v1931_v42  ;;  %vm6280_vm8 = vcmp.lt.s32.totalorder %v6270_v1, %v6279_v32  ;;  %v6283_v32 = vld [vmem:[#allocation26_spill] sm:$0xff] }
 0x4a3   : > { %vm6284_vm10 = vcmp.lt.s32.totalorder %v6270_v1, %v6283_v32  ;;  %v6287_v32 = vld [vmem:[#allocation28_spill] sm:$0xff] }
 0x4a4   : > { %v5461_v12 = vpop.f32.mrb[96].mxu1  ;;  %vm6288_vm12 = vcmp.lt.s32.totalorder %v6270_v1, %v6287_v32 }
 0x4a5   : > { %v1745_v53 = vpop.f32.mrb[97].mxu1 }
 0x4a6   : > { %v5466_v6 = vsel %vm6272_vm4, %v1745_v53, -10000.0  ;;  %v5468_v11 = vpop.f32.mrb[98].mxu1 }
 0x4a7   : > { %v1934_v58 = vmax.f32 %v5461_v12, %v5466_v6  ;;  %v1749_v60 = vpop.f32.mrb[99].mxu1 }
 0x4a8   : > { %v5475_v33 = vsel %vm6274_vm5, %v1749_v60, -10000.0 }
 0x4a9   : > { %v1937_v46 = vmax.f32 %v5468_v11, %v5475_v33  ;;  %1935 = vmax.xlane.f32.xlu1 %v1934_v58 }
 0x4ab   : > { %1938 = vmax.xlane.f32.xlu0 %v1937_v46 }
 0x4ac   : > { %v5479_v25 = vpop.f32.mrb[100].mxu1 }
 0x4ad   : > { %v1755_v44 = vpop.f32.mrb[101].mxu1 }
 0x4ae   : > { %v5484_v42 = vsel %vm6276_vm6, %v1755_v44, -10000.0  ;;  %v5486_v53 = vpop.f32.mrb[102].mxu1 }
 0x4af   : > { %v1940_v38 = vmax.f32 %v5479_v25, %v5484_v42  ;;  %v1759_v60 = vpop.f32.mrb[103].mxu1 }
 0x4b0   : > { %v5493_v7 = vsel %vm6278_vm7, %v1759_v60, -10000.0 }
 0x4b1   : > { %v1943_v58 = vmax.f32 %v5486_v53, %v5493_v7  ;;  %1941 = vmax.xlane.f32.xlu1 %v1940_v38 }
 0x4b3   : > { %1944 = vmax.xlane.f32.xlu0 %v1943_v58 }
 0x4b4   : > { %v5497_v46 = vpop.f32.mrb[104].mxu1 }
 0x4b5   : > { %v1765_v44 = vpop.f32.mrb[105].mxu1 }
 0x4b6   : > { %v5502_v41 = vsel %vm6280_vm8, %v1765_v44, -10000.0  ;;  %v5504_v27 = vpop.f32.mrb[106].mxu1 }
 0x4b7   : > { %v1946_v36 = vmax.f32 %v5497_v46, %v5502_v41  ;;  %v1769_v60 = vpop.f32.mrb[107].mxu1 }
 0x4b8   : > { %v5511_v48 = vsel %vm6282_vm9, %v1769_v60, -10000.0 }
 0x4b9   : > { %v1949_v38 = vmax.f32 %v5504_v27, %v5511_v48  ;;  %1947 = vmax.xlane.f32.xlu1 %v1946_v36 }
 0x4bb   : > { %1950 = vmax.xlane.f32.xlu0 %v1949_v38 }
 0x4bc   : > { %v5515_v58 = vpop.f32.mrb[108].mxu1 }
 0x4bd   : > { %v1775_v44 = vpop.f32.mrb[109].mxu1 }
 0x4be   : > { %v5520_v26 = vsel %vm6284_vm10, %v1775_v44, -10000.0  ;;  %v5522_v5 = vpop.f32.mrb[110].mxu1 }
 0x4bf   : > { %v1952_v37 = vmax.f32 %v5515_v58, %v5520_v26  ;;  %v1779_v60 = vpop.f32.mrb[111].mxu1 }
 0x4c0   : > { %v5529_v43 = vsel %vm6286_vm11, %v1779_v60, -10000.0 }
 0x4c1   : > { %v1955_v36 = vmax.f32 %v5522_v5, %v5529_v43  ;;  %1953 = vmax.xlane.f32.xlu1 %v1952_v37 }
 0x4c3   : > { %1956 = vmax.xlane.f32.xlu0 %v1955_v36 }
 0x4c4   : > { %v5533_v38 = vpop.f32.mrb[112].mxu1 }
 0x4c5   : > { %v1785_v44 = vpop.f32.mrb[113].mxu1 }
 0x4c6   : > { %v5538_v55 = vsel %vm6288_vm12, %v1785_v44, -10000.0  ;;  %v5540_v8 = vpop.f32.mrb[114].mxu1 }
 0x4c7   : > { %v1958_v10 = vmax.f32 %v5533_v38, %v5538_v55  ;;  %v1789_v60 = vpop.f32.mrb[115].mxu1 }
 0x4c8   : > { %v5547_v59 = vsel %vm6290_vm0, %v1789_v60, -10000.0 }
 0x4c9   : > { %v1961_v37 = vmax.f32 %v5540_v8, %v5547_v59  ;;  %1959 = vmax.xlane.f32.xlu1 %v1958_v10 }
 0x4cb   : > { %1962 = vmax.xlane.f32.xlu0 %v1961_v37 }
 0x4cc   : > { %v5551_v36 = vpop.f32.mrb[116].mxu1 }
 0x4cd   : > { %v5553_v44 = vpop.f32.mrb[117].mxu1 }
 0x4ce   : > { %v5555_v32 = vpop.f32.mrb[118].mxu1 }
 0x4cf   : > { %v5557_v56 = vpop.f32.mrb[119].mxu1 }
 0x4d4   : > { %v5559_v24 = vpop.f32.mrb[120].mxu1 }
 0x4d5   : > { %v1805_v15 = vpop.f32.mrb[121].mxu1 }
 0x4d6   : > { %v5564_v3 = vsel %vm243_vm15, %v1805_v15, -10000.0  ;;  %v5566_v10 = vpop.f32.mrb[122].mxu1 }
 0x4d7   : > { %v1970_v37 = vmax.f32 %v5559_v24, %v5564_v3  ;;  %v1809_v2 = vpop.f32.mrb[123].mxu1 }
 0x4d8   : > { %v5573_v30 = vsel %vm6293_vm1, %v1809_v2, -10000.0  ;;  %v3810_v2 = vld [vmem:[%s4259_s11 + $0x14] ss:$8 sps:$4 sm:$0xff]  }
 0x4d9   : > { %v1973_v23 = vmax.f32 %v5566_v10, %v5573_v30  ;;  %1971 = vmax.xlane.f32.xlu1 %v1970_v37  ;;  %3542 = vmatpush3.bf16.msra.mxu0 %v3810_v2 }
 0x4da   : > { %3660 = vmatpush3.bf16.msra.mxu1 %v3810_v2  ;;  %3543 = vmatprep.subr.bf16.mxu0 %v3811_v29 }
 0x4db   : > { %1974 = vmax.xlane.f32.xlu0 %v1973_v23  ;;  %3653 = vmatprep.subr.bf16.mxu1 %v3811_v29 }
 0x4dc   : > { %v5577_v60 = vpop.f32.mrb[124].mxu1 }
 0x4dd   : > { %v5579_v15 = vpop.f32.mrb[125].mxu1  ;;  %3544 = vmatpush3.bf16.msra.mxu0 %v3812_v9 }
 0x4de   : > { %v5581_v16 = vpop.f32.mrb[126].mxu1  ;;  %3661 = vmatpush3.bf16.msra.mxu1 %v3812_v9  ;;  %3545 = vmatprep.subr.bf16.mxu0 %v3813_v22  ;;  %v6294_v9 = vld [vmem:[#allocation30_spill] sm:$0xff] }
 0x4df   : > { %v5583_v51 = vpop.f32.mrb[127].mxu1  ;;  %3654 = vmatprep.subr.bf16.mxu1 %v3813_v22  ;;  %vm6295_vm15 = vcmp.lt.s32.totalorder %v6270_v1, %v6294_v9 }
 0x4e0   : > { %v5605_v22 = vsel %vm6295_vm15, %v5553_v44, -10000.0 }
 0x4f5   : > { %v1888_v23 = vpop.xlane.xlu0 %1887 }
 0x4f6   : > { %v1982_v35 = vsub.f32 %v5368_v52, %v1888_v23  ;;  %v1983_v37 = vsub.f32 -10000.0, %v1888_v23 }
 0x4f7   : > { %v1891_v0 = vpop.xlane.xlu1 %1890 }
 0x4f8   : > { %v2046_v20 = vmul.f32 1.442695, %v1982_v35  ;;  %v2048_v47 = vmul.f32 1.442695, %v1983_v37  ;;  %v1984_v31 = vsub.f32 %v5374_v18, %v1891_v0  ;;  %v1985_v61 = vsub.f32 -10000.0, %v1891_v0 }
 0x4f9   : > { %v3814_v35 = vld [vmem:[%s4259_s11 + $0x34] ss:$8 sps:$4 sm:$0xff]  }
 0x4fa   : > { %4015 = vpow2.f32 %v2046_v20  ;;  %v2050_v39 = vmul.f32 1.442695, %v1984_v31  ;;  %v2052_v63 = vmul.f32 1.442695, %v1985_v61  ;;  %3546 = vmatpush3.bf16.msra.mxu0 %v3814_v35  ;;  %3662 = vmatpush3.bf16.msra.mxu1 %v3814_v35 }
 0x4fb   : > { %4017 = vpow2.f32 %v2048_v47 }
 0x4fc   : > { %4019 = vpow2.f32 %v2050_v39 }
 0x4fd   : > { %4021 = vpow2.f32 %v2052_v63  ;;  %v1894_v2 = vpop.xlane.xlu0 %1893 }
 0x4fe   : > { %v1986_v52 = vsub.f32 %v5380_v14, %v1894_v2  ;;  %v1987_v23 = vsub.f32 -10000.0, %v1894_v2 }
 0x500   : > { %v2054_v20 = vmul.f32 1.442695, %v1986_v52  ;;  %v2056_v31 = vmul.f32 1.442695, %v1987_v23 }
 0x501   : > { %v1897_v0 = vpop.xlane.xlu0 %1896 }
 0x502   : > { %4023 = vpow2.f32 %v2054_v20  ;;  %v1988_v47 = vsub.f32 %v5386_v57, %v1897_v0  ;;  %v1989_v18 = vsub.f32 -10000.0, %v1897_v0 }
 0x503   : > { %4025 = vpow2.f32 %v2056_v31 }
 0x504   : > { %v5597_v63 = vpop.eup %4015  ;;  %v2058_v37 = vmul.f32 1.442695, %v1988_v47  ;;  %v2060_v14 = vmul.f32 1.442695, %v1989_v18  ;;  %v1964_v47 = vmax.f32 %v5551_v36, %v5605_v22  ;;  %v6296_v18 = vld [vmem:[#allocation31_spill] sm:$0xff] }
 0x505   : > { %v5599_v61 = vpop.eup %4017  ;;  %v1900_v39 = vpop.xlane.xlu1 %1899  ;;  %vm6297_vm2 = vcmp.lt.s32.totalorder %v6270_v1, %v6296_v18 }
 0x506   : > { %v5607_v29 = vpop.eup %4019  ;;  %4027 = vpow2.f32 %v2058_v37  ;;  %v1990_v57 = vsub.f32 %v5392_v21, %v1900_v39  ;;  %v1991_v2 = vsub.f32 -10000.0, %v1900_v39  ;;  %v2174_v52 = vadd.f32 %v5599_v61, %v5597_v63 }
 0x507   : > { %v5612_v23 = vpop.eup %4021  ;;  %4029 = vpow2.f32 %v2060_v14  ;;  %v1903_v35 = vpop.xlane.xlu0 %1902  ;;  %v5623_v37 = vsel %vm6297_vm2, %v5557_v56, -10000.0 }
 0x508   : > { %v2062_v20 = vmul.f32 1.442695, %v1990_v57  ;;  %v2064_v31 = vmul.f32 1.442695, %v1991_v2  ;;  %2175 = vadd.xlane.f32.xlu1 %v2174_v52  ;;  %v1992_v44 = vsub.f32 %v5398_v34, %v1903_v35  ;;  %v1993_v0 = vsub.f32 -10000.0, %v1903_v35 }
 0x509   : > { %v2177_v21 = vadd.f32 %v5612_v23, %v5607_v29  ;;  %v5631_v57 = vsel %vm247_vm14, %v5579_v15, -10000.0  ;;  %v1967_v56 = vmax.f32 %v5555_v32, %v5623_v37 }
 0x50a   : > { %4031 = vpow2.f32 %v2062_v20  ;;  %v2066_v14 = vmul.f32 1.442695, %v1992_v44  ;;  %v2068_v9 = vmul.f32 1.442695, %v1993_v0  ;;  %v1976_v44 = vmax.f32 %v5577_v60, %v5631_v57 }
 0x50b   : > { %4033 = vpow2.f32 %v2064_v31  ;;  %2178 = vadd.xlane.f32.xlu0 %v2177_v21 }
 0x50c   : > { %v5625_v39 = vpop.eup %4023  ;;  %4035 = vpow2.f32 %v2066_v14  ;;  %1965 = vmax.xlane.f32.xlu1 %v1964_v47 }
 0x50d   : > { %v5633_v2 = vpop.eup %4025  ;;  %4037 = vpow2.f32 %v2068_v9  ;;  %v1906_v52 = vpop.xlane.xlu1 %1905 }
 0x50e   : > { %v1994_v35 = vsub.f32 %v5404_v40, %v1906_v52  ;;  %v1995_v20 = vsub.f32 -10000.0, %v1906_v52  ;;  %v2180_v31 = vadd.f32 %v5633_v2, %v5625_v39 }
 0x50f   : > { %1968 = vmax.xlane.f32.xlu0 %v1967_v56  ;;  %v1909_v0 = vpop.xlane.xlu0 %1908 }
 0x510   : > { %v5642_v15 = vpop.eup %4027  ;;  %v2070_v47 = vmul.f32 1.442695, %v1994_v35  ;;  %v2072_v21 = vmul.f32 1.442695, %v1995_v20  ;;  %2181 = vadd.xlane.f32.xlu1 %v2180_v31  ;;  %v1996_v18 = vsub.f32 %v5410_v28, %v1909_v0  ;;  %v1997_v14 = vsub.f32 -10000.0, %v1909_v0 }
 0x511   : > { %v5645_v9 = vpop.eup %4029  ;;  %v5653_v35 = vsel %vm249_vm13, %v5583_v51, -10000.0  ;;  %vm2751_vm13 = vcmask 523264  }
 0x512   : > { %4039 = vpow2.f32 %v2070_v47  ;;  %v2074_v40 = vmul.f32 1.442695, %v1996_v18  ;;  %v2076_v34 = vmul.f32 1.442695, %v1997_v14  ;;  %v2183_v52 = vadd.f32 %v5645_v9, %v5642_v15  ;;  %v3815_v14 = vld [vmem:[%s4259_s11 + $0xc4] ss:$8 sps:$4 sm:$0xff]  }
 0x513   : > { %4041 = vpow2.f32 %v2072_v21  ;;  %v1979_v47 = vmax.f32 %v5581_v16, %v5653_v35  ;;  %3547 = vmatprep.subr.bf16.mxu0 %v3815_v14  ;;  %3655 = vmatprep.subr.bf16.mxu1 %v3815_v14 }
 0x514   : > { %v5655_v20 = vpop.eup %4031  ;;  %4043 = vpow2.f32 %v2074_v40  ;;  %1977 = vmax.xlane.f32.xlu1 %v1976_v44  ;;  %2184 = vadd.xlane.f32.xlu0 %v2183_v52 }
 0x515   : > { %6300 = vst [vmem:[#allocation3_spill] sm:$0xff] %v5655_v20  ;;  %v5657_v28 = vpop.eup %4033  ;;  %4045 = vpow2.f32 %v2076_v34  ;;  %v1912_v31 = vpop.xlane.xlu1 %1911  ;;  %3548 = vmatpush3.bf16.msra.mxu0 %v3816_v54  ;;  %3663 = vmatpush3.bf16.msra.mxu1 %v3816_v54 }
 0x516   : > { %v5659_v0 = vpop.eup %4035  ;;  %v1998_v1 = vsub.f32 %v5416_v17, %v1912_v31  ;;  %v1999_v21 = vsub.f32 -10000.0, %v1912_v31  ;;  %v2186_v51 = vadd.f32 %v5657_v28, %v5655_v20 }
 0x517   : > { %v5666_v18 = vpop.eup %4037  ;;  %v1915_v44 = vpop.xlane.xlu0 %1914 }
 0x518   : > { %v2078_v40 = vmul.f32 1.442695, %v1998_v1  ;;  %v2080_v52 = vmul.f32 1.442695, %v1999_v21  ;;  %2187 = vadd.xlane.f32.xlu1 %v2186_v51  ;;  %1980 = vmax.xlane.f32.xlu0 %v1979_v47  ;;  %v2000_v34 = vsub.f32 %v5422_v62, %v1915_v44  ;;  %v2001_v56 = vsub.f32 -10000.0, %v1915_v44 }
 0x519   : > { %v2189_v20 = vadd.f32 %v5666_v18, %v5659_v0  ;;  %v3817_v47 = vld [vmem:[%s4259_s11 + $0xd4] ss:$8 sps:$4 sm:$0xff]  }
 0x51a   : > { %4047 = vpow2.f32 %v2078_v40  ;;  %v2082_v17 = vmul.f32 1.442695, %v2000_v34  ;;  %v2084_v31 = vmul.f32 1.442695, %v2001_v56  ;;  %v3818_v51 = vld [vmem:[%s4259_s11 + $0x54] ss:$8 sps:$4 sm:$0xff]   ;;  %3549 = vmatprep.subr.bf16.mxu0 %v3817_v47  ;;  %3656 = vmatprep.subr.bf16.mxu1 %v3817_v47 }
 0x51b   : > { %4049 = vpow2.f32 %v2080_v52  ;;  %3550 = vmatpush3.bf16.msra.mxu0 %v3818_v51  ;;  %3664 = vmatpush3.bf16.msra.mxu1 %v3818_v51 }
 0x51c   : > { %v5673_v1 = vpop.eup %4039  ;;  %4051 = vpow2.f32 %v2082_v17  ;;  %2190 = vadd.xlane.f32.xlu0 %v2189_v20 }
 0x51d   : > { %6301 = vst [vmem:[#allocation4_spill] sm:$0xff] %v5673_v1  ;;  %v5676_v62 = vpop.eup %4041  ;;  %4053 = vpow2.f32 %v2084_v31  ;;  %v1918_v21 = vpop.xlane.xlu1 %1917 }
 0x51e   : > { %6302 = vst [vmem:[#allocation5_spill] sm:$0xff] %v5676_v62  ;;  %v5679_v44 = vpop.eup %4043  ;;  %v2002_v14 = vsub.f32 %v5428_v45, %v1918_v21  ;;  %v2003_v40 = vsub.f32 -10000.0, %v1918_v21  ;;  %v2192_v54 = vadd.f32 %v5676_v62, %v5673_v1  ;;  %v3819_v21 = vld [vmem:[%s4259_s11 + $0xe4] ss:$8 sps:$4 sm:$0xff]  }
 0x51f   : > { %6303 = vst [vmem:[#allocation6_spill] sm:$0xff] %v5679_v44  ;;  %v5684_v52 = vpop.eup %4045  ;;  %v1921_v20 = vpop.xlane.xlu0 %1920  ;;  %v3820_v1 = vld [vmem:[%s4259_s11 + $0x64] ss:$8 sps:$4 sm:$0xff]   ;;  %3551 = vmatprep.subr.bf16.mxu0 %v3819_v21  ;;  %3657 = vmatprep.subr.bf16.mxu1 %v3819_v21 }
 0x520   : > { %v2086_v34 = vmul.f32 1.442695, %v2002_v14  ;;  %v2088_v56 = vmul.f32 1.442695, %v2003_v40  ;;  %2193 = vadd.xlane.f32.xlu1 %v2192_v54  ;;  %v2004_v17 = vsub.f32 %v5434_v50, %v1921_v20  ;;  %v2005_v31 = vsub.f32 -10000.0, %v1921_v20  ;;  %3552 = vmatpush3.bf16.msra.mxu0 %v3820_v1 }
 0x521   : > { %v2195_v45 = vadd.f32 %v5684_v52, %v5679_v44  ;;  %v3821_v14 = vld [vmem:[%s4259_s11 + $0xf4] ss:$8 sps:$4 sm:$0xff]   ;;  %3665 = vmatpush3.bf16.msra.mxu1 %v3820_v1 }
 0x522   : > { %4055 = vpow2.f32 %v2086_v34  ;;  %v2090_v47 = vmul.f32 1.442695, %v2004_v17  ;;  %v2092_v62 = vmul.f32 1.442695, %v2005_v31  ;;  %v3822_v54 = vld [vmem:[%s4259_s11 + $0x74] ss:$8 sps:$4 sm:$0xff]   ;;  %3553 = vmatprep.subr.bf16.mxu0 %v3821_v14  ;;  %3658 = vmatprep.subr.bf16.mxu1 %v3821_v14 }
 0x523   : > { %4057 = vpow2.f32 %v2088_v56  ;;  %2196 = vadd.xlane.f32.xlu0 %v2195_v45 }
 0x524   : > { %v5691_v51 = vpop.eup %4047  ;;  %4059 = vpow2.f32 %v2090_v47  ;;  %3554 = vmatpush3.bf16.msra.mxu0 %v3822_v54 }
 0x525   : > { %6304 = vst [vmem:[#allocation7_spill] sm:$0xff] %v5691_v51  ;;  %v5694_v50 = vpop.eup %4049  ;;  %4061 = vpow2.f32 %v2092_v62  ;;  %v1924_v40 = vpop.xlane.xlu1 %1923  ;;  %3666 = vmatpush3.bf16.msra.mxu1 %v3822_v54 }
 0x526   : > { %v5697_v20 = vpop.eup %4051  ;;  %v2006_v34 = vsub.f32 %v5440_v49, %v1924_v40  ;;  %v2007_v17 = vsub.f32 -10000.0, %v1924_v40  ;;  %v2198_v56 = vadd.f32 %v5694_v50, %v5691_v51 }
 0x527   : > { %6305 = vst [vmem:[#allocation8_spill] sm:$0xff] %v5697_v20  ;;  %v5702_v31 = vpop.eup %4053  ;;  %v1927_v45 = vpop.xlane.xlu0 %1926 }
 0x528   : > { %v2094_v21 = vmul.f32 1.442695, %v2006_v34  ;;  %v2096_v47 = vmul.f32 1.442695, %v2007_v17  ;;  %2199 = vadd.xlane.f32.xlu1 %v2198_v56  ;;  %v2008_v62 = vsub.f32 %v5446_v4, %v1927_v45  ;;  %v2009_v44 = vsub.f32 -10000.0, %v1927_v45 }
 0x529   : > { %v2201_v1 = vadd.f32 %v5702_v31, %v5697_v20 }
 0x52a   : > { %4063 = vpow2.f32 %v2094_v21  ;;  %v2098_v49 = vmul.f32 1.442695, %v2008_v62  ;;  %v2100_v40 = vmul.f32 1.442695, %v2009_v44 }
 0x52b   : > { %4065 = vpow2.f32 %v2096_v47  ;;  %2202 = vadd.xlane.f32.xlu0 %v2201_v1 }
 0x52c   : > { %v5707_v14 = vpop.eup %4055  ;;  %4067 = vpow2.f32 %v2098_v49 }
 0x52d   : > { %6306 = vst [vmem:[#allocation9_spill] sm:$0xff] %v5707_v14  ;;  %v5709_v51 = vpop.eup %4057  ;;  %4069 = vpow2.f32 %v2100_v40  ;;  %v1930_v34 = vpop.xlane.xlu1 %1929 }
 0x52e   : > { %v5711_v17 = vpop.eup %4059  ;;  %v2010_v4 = vsub.f32 %v5452_v19, %v1930_v34  ;;  %v2011_v56 = vsub.f32 -10000.0, %v1930_v34  ;;  %v2204_v54 = vadd.f32 %v5709_v51, %v5707_v14 }
 0x52f   : > { %v5716_v45 = vpop.eup %4061  ;;  %v1933_v44 = vpop.xlane.xlu0 %1932 }
 0x530   : > { %v2102_v21 = vmul.f32 1.442695, %v2010_v4  ;;  %v2104_v47 = vmul.f32 1.442695, %v2011_v56  ;;  %2205 = vadd.xlane.f32.xlu1 %v2204_v54  ;;  %v2012_v62 = vsub.f32 %v5458_v13, %v1933_v44  ;;  %v2013_v1 = vsub.f32 -10000.0, %v1933_v44 }
 0x531   : > { %v2207_v49 = vadd.f32 %v5716_v45, %v5711_v17 }
 0x532   : > { %4071 = vpow2.f32 %v2102_v21  ;;  %v2106_v40 = vmul.f32 1.442695, %v2012_v62  ;;  %v2108_v20 = vmul.f32 1.442695, %v2013_v1 }
 0x533   : > { %4073 = vpow2.f32 %v2104_v47  ;;  %2208 = vadd.xlane.f32.xlu0 %v2207_v49 }
 0x534   : > { %v5721_v19 = vpop.eup %4063  ;;  %4075 = vpow2.f32 %v2106_v40 }
 0x535   : > { %6307 = vst [vmem:[#allocation10_spill] sm:$0xff] %v5721_v19  ;;  %v5723_v34 = vpop.eup %4065  ;;  %4077 = vpow2.f32 %v2108_v20 }
 0x536   : > { %6308 = vst [vmem:[#allocation11_spill] sm:$0xff] %v5723_v34  ;;  %v5725_v4 = vpop.eup %4067  ;;  %v1936_v56 = vpop.xlane.xlu1 %1935  ;;  %v2210_v13 = vadd.f32 %v5723_v34, %v5721_v19 }
 0x537   : > { %v5729_v54 = vpop.eup %4069  ;;  %v2014_v44 = vsub.f32 %v5461_v12, %v1936_v56  ;;  %v2015_v21 = vsub.f32 %v5466_v6, %v1936_v56 }
 0x538   : > { %2211 = vadd.xlane.f32.xlu1 %v2210_v13  ;;  %v1939_v47 = vpop.xlane.xlu0 %1938  ;;  %v2213_v62 = vadd.f32 %v5729_v54, %v5725_v4 }
 0x539   : > { %v2110_v1 = vmul.f32 1.442695, %v2014_v44  ;;  %v2112_v49 = vmul.f32 1.442695, %v2015_v21  ;;  %v2016_v20 = vsub.f32 %v5468_v11, %v1939_v47  ;;  %v2017_v40 = vsub.f32 %v5475_v33, %v1939_v47 }
 0x53a   : > { %2214 = vadd.xlane.f32.xlu0 %v2213_v62 }
 0x53b   : > { %4079 = vpow2.f32 %v2110_v1  ;;  %v2114_v19 = vmul.f32 1.442695, %v2016_v20  ;;  %v2116_v34 = vmul.f32 1.442695, %v2017_v40 }
 0x53c   : > { %v5737_v14 = vpop.eup %4071  ;;  %4081 = vpow2.f32 %v2112_v49 }
 0x53d   : > { %v5739_v12 = vpop.eup %4073  ;;  %4083 = vpow2.f32 %v2114_v19 }
 0x53e   : > { %v5741_v6 = vpop.eup %4075  ;;  %4085 = vpow2.f32 %v2116_v34  ;;  %v1942_v56 = vpop.xlane.xlu1 %1941  ;;  %v2216_v13 = vadd.f32 %v5739_v12, %v5737_v14 }
 0x53f   : > { %v5745_v11 = vpop.eup %4077  ;;  %v2018_v33 = vsub.f32 %v5479_v25, %v1942_v56  ;;  %v2019_v44 = vsub.f32 %v5484_v42, %v1942_v56 }
 0x540   : > { %2217 = vadd.xlane.f32.xlu1 %v2216_v13  ;;  %v1945_v21 = vpop.xlane.xlu0 %1944  ;;  %v2219_v47 = vadd.f32 %v5745_v11, %v5741_v6 }
 0x541   : > { %v2118_v62 = vmul.f32 1.442695, %v2018_v33  ;;  %v2120_v19 = vmul.f32 1.442695, %v2019_v44  ;;  %v2020_v1 = vsub.f32 %v5486_v53, %v1945_v21  ;;  %v2021_v34 = vsub.f32 %v5493_v7, %v1945_v21 }
 0x542   : > { %2220 = vadd.xlane.f32.xlu0 %v2219_v47 }
 0x543   : > { %4087 = vpow2.f32 %v2118_v62  ;;  %v2122_v49 = vmul.f32 1.442695, %v2020_v1  ;;  %v2124_v20 = vmul.f32 1.442695, %v2021_v34 }
 0x544   : > { %4089 = vpow2.f32 %v2120_v19 }
 0x545   : > { %v5753_v40 = vpop.eup %4079  ;;  %4091 = vpow2.f32 %v2122_v49 }
 0x546   : > { %v5755_v25 = vpop.eup %4081  ;;  %4093 = vpow2.f32 %v2124_v20  ;;  %v1948_v42 = vpop.xlane.xlu1 %1947 }
 0x547   : > { %v5757_v56 = vpop.eup %4083  ;;  %v2022_v13 = vsub.f32 %v5497_v46, %v1948_v42  ;;  %v2023_v53 = vsub.f32 %v5502_v41, %v1948_v42  ;;  %v2222_v7 = vadd.f32 %v5755_v25, %v5753_v40 }
 0x548   : > { %v5763_v33 = vpop.eup %4085  ;;  %v1951_v44 = vpop.xlane.xlu0 %1950 }
 0x549   : > { %v2126_v21 = vmul.f32 1.442695, %v2022_v13  ;;  %v2128_v47 = vmul.f32 1.442695, %v2023_v53  ;;  %2223 = vadd.xlane.f32.xlu1 %v2222_v7  ;;  %v2024_v62 = vsub.f32 %v5504_v27, %v1951_v44  ;;  %v2025_v19 = vsub.f32 %v5511_v48, %v1951_v44 }
 0x54a   : > { %v2225_v1 = vadd.f32 %v5763_v33, %v5757_v56 }
 0x54b   : > { %4095 = vpow2.f32 %v2126_v21  ;;  %v2130_v46 = vmul.f32 1.442695, %v2024_v62  ;;  %v2132_v34 = vmul.f32 1.442695, %v2025_v19 }
 0x54c   : > { %4097 = vpow2.f32 %v2128_v47  ;;  %2226 = vadd.xlane.f32.xlu0 %v2225_v1 }
 0x54d   : > { %v5769_v41 = vpop.eup %4087  ;;  %4099 = vpow2.f32 %v2130_v46 }
 0x54e   : > { %v5771_v49 = vpop.eup %4089  ;;  %4101 = vpow2.f32 %v2132_v34  ;;  %v1954_v20 = vpop.xlane.xlu1 %1953 }
 0x54f   : > { %v5773_v42 = vpop.eup %4091  ;;  %v2026_v27 = vsub.f32 %v5515_v58, %v1954_v20  ;;  %v2027_v48 = vsub.f32 %v5520_v26, %v1954_v20  ;;  %v2228_v13 = vadd.f32 %v5771_v49, %v5769_v41 }
 0x550   : > { %v5779_v53 = vpop.eup %4093  ;;  %v1957_v7 = vpop.xlane.xlu0 %1956 }
 0x551   : > { %v2134_v44 = vmul.f32 1.442695, %v2026_v27  ;;  %v2136_v21 = vmul.f32 1.442695, %v2027_v48  ;;  %2229 = vadd.xlane.f32.xlu1 %v2228_v13  ;;  %v2028_v47 = vsub.f32 %v5522_v5, %v1957_v7  ;;  %v2029_v62 = vsub.f32 %v5529_v43, %v1957_v7 }
 0x552   : > { %v2231_v19 = vadd.f32 %v5779_v53, %v5773_v42 }
 0x553   : > { %4103 = vpow2.f32 %v2134_v44  ;;  %v2138_v58 = vmul.f32 1.442695, %v2028_v47  ;;  %v2140_v1 = vmul.f32 1.442695, %v2029_v62 }
 0x554   : > { %4105 = vpow2.f32 %v2136_v21  ;;  %2232 = vadd.xlane.f32.xlu0 %v2231_v19 }
 0x555   : > { %v5785_v26 = vpop.eup %4095  ;;  %4107 = vpow2.f32 %v2138_v58 }
 0x556   : > { %v5787_v46 = vpop.eup %4097  ;;  %4109 = vpow2.f32 %v2140_v1  ;;  %v1960_v34 = vpop.xlane.xlu1 %1959 }
 0x557   : > { %v5789_v20 = vpop.eup %4099  ;;  %v2030_v5 = vsub.f32 %v5533_v38, %v1960_v34  ;;  %v2031_v43 = vsub.f32 %v5538_v55, %v1960_v34  ;;  %v2234_v27 = vadd.f32 %v5787_v46, %v5785_v26 }
 0x558   : > { %v5795_v48 = vpop.eup %4101  ;;  %v1963_v13 = vpop.xlane.xlu0 %1962 }
 0x559   : > { %v2142_v7 = vmul.f32 1.442695, %v2030_v5  ;;  %v2144_v44 = vmul.f32 1.442695, %v2031_v43  ;;  %2235 = vadd.xlane.f32.xlu1 %v2234_v27  ;;  %v2032_v21 = vsub.f32 %v5540_v8, %v1963_v13  ;;  %v2033_v47 = vsub.f32 %v5547_v59, %v1963_v13 }
 0x55a   : > { %v2237_v62 = vadd.f32 %v5795_v48, %v5789_v20 }
 0x55b   : > { %4111 = vpow2.f32 %v2142_v7  ;;  %v2146_v38 = vmul.f32 1.442695, %v2032_v21  ;;  %v2148_v19 = vmul.f32 1.442695, %v2033_v47 }
 0x55c   : > { %4113 = vpow2.f32 %v2144_v44  ;;  %2238 = vadd.xlane.f32.xlu0 %v2237_v62 }
 0x55d   : > { %v5801_v55 = vpop.eup %4103  ;;  %4115 = vpow2.f32 %v2146_v38 }
 0x55e   : > { %6309 = vst [vmem:[#allocation12_spill] sm:$0xff] %v5801_v55  ;;  %v5803_v58 = vpop.eup %4105  ;;  %4117 = vpow2.f32 %v2148_v19 }
 0x55f   : > { %v5805_v1 = vpop.eup %4107  ;;  %v2240_v8 = vadd.f32 %v5803_v58, %v5801_v55 }
 0x560   : > { %6310 = vst [vmem:[#allocation13_spill] sm:$0xff] %v5805_v1  ;;  %v5809_v59 = vpop.eup %4109 }
 0x561   : > { %2241 = vadd.xlane.f32.xlu1 %v2240_v8  ;;  %v2243_v34 = vadd.f32 %v5809_v59, %v5805_v1 }
 0x563   : > { %2244 = vadd.xlane.f32.xlu0 %v2243_v34 }
 0x565   : > { %v5813_v5 = vpop.eup %4111 }
 0x566   : > { %v5815_v43 = vpop.eup %4113  ;;  %v1972_v27 = vpop.xlane.xlu1 %1971 }
 0x567   : > { %v5817_v13 = vpop.eup %4115  ;;  %v2038_v7 = vsub.f32 %v5559_v24, %v1972_v27  ;;  %v2039_v44 = vsub.f32 %v5564_v3, %v1972_v27  ;;  %v2246_v21 = vadd.f32 %v5815_v43, %v5813_v5 }
 0x568   : > { %v5823_v47 = vpop.eup %4117  ;;  %v1975_v62 = vpop.xlane.xlu0 %1974 }
 0x569   : > { %v2158_v38 = vmul.f32 1.442695, %v2038_v7  ;;  %v2160_v19 = vmul.f32 1.442695, %v2039_v44  ;;  %2247 = vadd.xlane.f32.xlu1 %v2246_v21  ;;  %v2040_v8 = vsub.f32 %v5566_v10, %v1975_v62  ;;  %v2041_v34 = vsub.f32 %v5573_v30, %v1975_v62 }
 0x56a   : > { %v2249_v55 = vadd.f32 %v5823_v47, %v5817_v13 }
 0x56b   : > { %4119 = vpow2.f32 %v2158_v38  ;;  %v2162_v24 = vmul.f32 1.442695, %v2040_v8  ;;  %v2164_v1 = vmul.f32 1.442695, %v2041_v34 }
 0x56c   : > { %4121 = vpow2.f32 %v2160_v19  ;;  %2250 = vadd.xlane.f32.xlu0 %v2249_v55 }
 0x56d   : > { %4123 = vpow2.f32 %v2162_v24 }
 0x56e   : > { %4125 = vpow2.f32 %v2164_v1 }
 0x575   : > { %v5829_v3 = vpop.eup %4119 }
 0x576   : > { %v5831_v27 = vpop.eup %4121 }
 0x577   : > { %6311 = vst [vmem:[#allocation14_spill] sm:$0xff] %v5831_v27  ;;  %v5833_v7 = vpop.eup %4123  ;;  %v2258_v10 = vadd.f32 %v5831_v27, %v5829_v3 }
 0x578   : > { %6312 = vst [vmem:[#allocation15_spill] sm:$0xff] %v5833_v7  ;;  %v5837_v30 = vpop.eup %4125 }
 0x579   : > { %6313 = vst [vmem:[#allocation16_spill] sm:$0xff] %v5837_v30  ;;  %2259 = vadd.xlane.f32.xlu1 %v2258_v10  ;;  %v2261_v44 = vadd.f32 %v5837_v30, %v5833_v7 }
 0x57b   : > { %2262 = vadd.xlane.f32.xlu0 %v2261_v44 }
 0x595   : > { %v2176_v21 = vpop.xlane.xlu1 %2175 }
 0x596   : > { %4127 = vrcp.f32 %v2176_v21 }
 0x598   : > { %v2179_v55 = vpop.xlane.xlu0 %2178 }
 0x599   : > { %4129 = vrcp.f32 %v2179_v55  ;;  %v1966_v1 = vpop.xlane.xlu1 %1965 }
 0x59a   : > { %v2034_v62 = vsub.f32 %v5551_v36, %v1966_v1  ;;  %v2035_v38 = vsub.f32 %v5605_v22, %v1966_v1 }
 0x59c   : > { %v2150_v19 = vmul.f32 1.442695, %v2034_v62  ;;  %v2152_v8 = vmul.f32 1.442695, %v2035_v38  ;;  %v1969_v34 = vpop.xlane.xlu0 %1968 }
 0x59d   : > { %v2036_v24 = vsub.f32 %v5555_v32, %v1969_v34  ;;  %v2037_v10 = vsub.f32 %v5623_v37, %v1969_v34  ;;  %v2182_v27 = vpop.xlane.xlu1 %2181 }
 0x59e   : > { %4131 = vpow2.f32 %v2150_v19 }
 0x59f   : > { %4133 = vpow2.f32 %v2152_v8  ;;  %v2154_v44 = vmul.f32 1.442695, %v2036_v24  ;;  %v2156_v30 = vmul.f32 1.442695, %v2037_v10 }
 0x5a0   : > { %v4128_v21 = vpop.eup %4127  ;;  %4135 = vrcp.f32 %v2182_v27 }
 0x5a1   : > { %4137 = vpow2.f32 %v2154_v44  ;;  %v1978_v55 = vpop.xlane.xlu1 %1977  ;;  %v2185_v7 = vpop.xlane.xlu0 %2184  ;;  %v2303_v32 = vmul.f32 %v4128_v21, %v5599_v61  ;;  %v2302_v27 = vmul.f32 %v4128_v21, %v5597_v63 }
 0x5a2   : > { %4139 = vpow2.f32 %v2156_v30  ;;  %v2042_v36 = vsub.f32 %v5577_v60, %v1978_v55  ;;  %v2043_v22 = vsub.f32 %v5631_v57, %v1978_v55 }
 0x5a3   : > { %v4130_v1 = vpop.eup %4129  ;;  %4141 = vrcp.f32 %v2185_v7 }
 0x5a4   : > { %v2304_v37 = vmul.f32 %v4130_v1, %v5607_v29  ;;  %v2166_v62 = vmul.f32 1.442695, %v2042_v36  ;;  %v2168_v38 = vmul.f32 1.442695, %v2043_v22  ;;  %v2305_v19 = vmul.f32 %v4130_v1, %v5612_v23 }
 0x5a5   : > { %v1981_v8 = vpop.xlane.xlu0 %1980  ;;  %v2188_v34 = vpop.xlane.xlu1 %2187 }
 0x5a6   : > { %4143 = vpow2.f32 %v2166_v62  ;;  %v2044_v30 = vsub.f32 %v5581_v16, %v1981_v8  ;;  %v2045_v60 = vsub.f32 %v5653_v35, %v1981_v8  ;;  %v2367_v57 = vpack.c.bf16 %v2305_v19, %v2303_v32 }
 0x5a7   : > { %4145 = vpow2.f32 %v2168_v38  ;;  %v2366_v7 = vpack.c.bf16 %v2304_v37, %v2302_v27 }
 0x5a8   : > { %v5853_v24 = vpop.eup %4131  ;;  %v2170_v61 = vmul.f32 1.442695, %v2044_v30  ;;  %v2172_v29 = vmul.f32 1.442695, %v2045_v60  ;;  %2494 = vmatprep.mubr.bf16.mxu0 %v2367_v57  ;;  %4147 = vrcp.f32 %v2188_v34 }
 0x5a9   : > { %v5855_v10 = vpop.eup %4133  ;;  %2495 = vmatmul.mubr.bf16.vlgmr.msra.gmra.mrb[64].mxu0 %v2366_v7  ;;  %v2191_v63 = vpop.xlane.xlu0 %2190 }
 0x5aa   : > { %v4136_v23 = vpop.eup %4135  ;;  %4149 = vpow2.f32 %v2170_v61  ;;  %v2252_v16 = vadd.f32 %v5855_v10, %v5853_v24  ;;  %v6314_v61 = vld [vmem:[#allocation3_spill] sm:$0xff] }
 0x5ab   : > { %v5859_v44 = vpop.eup %4137  ;;  %4151 = vpow2.f32 %v2172_v29  ;;  %v2307_v22 = vmul.f32 %v4136_v23, %v5633_v2  ;;  %v2306_v32 = vmul.f32 %v4136_v23, %v5625_v39 }
 0x5ac   : > { %v5861_v35 = vpop.eup %4139  ;;  %4153 = vrcp.f32 %v2191_v63  ;;  %2253 = vadd.xlane.f32.xlu1 %v2252_v16 }
 0x5ad   : > { %v4142_v21 = vpop.eup %4141  ;;  %v2194_v55 = vpop.xlane.xlu1 %2193  ;;  %v2255_v36 = vadd.f32 %v5861_v35, %v5859_v44 }
 0x5ae   : > { %v2309_v1 = vmul.f32 %v4142_v21, %v5645_v9  ;;  %v2308_v37 = vmul.f32 %v4142_v21, %v5642_v15  ;;  %4155 = vrcp.f32 %v2194_v55 }
 0x5af   : > { %2256 = vadd.xlane.f32.xlu0 %v2255_v36 }
 0x5b0   : > { %v5869_v62 = vpop.eup %4143  ;;  %v2197_v38 = vpop.xlane.xlu0 %2196  ;;  %v2369_v19 = vpack.c.bf16 %v2309_v1, %v2307_v22  ;;  %v2368_v27 = vpack.c.bf16 %v2308_v37, %v2306_v32  ;;  %v6315_v22 = vld [vmem:[#allocation5_spill] sm:$0xff] }
 0x5b1   : > { %v5871_v8 = vpop.eup %4145  ;;  %4157 = vrcp.f32 %v2197_v38 }
 0x5b2   : > { %2502 = vmatprep.mubr.bf16.mxu0 %v2369_v19  ;;  %v2264_v2 = vadd.f32 %v5871_v8, %v5869_v62  ;;  %v4148_v34 = vpop.eup %4147  ;;  %v6317_v19 = vld [vmem:[#allocation4_spill] sm:$0xff] }
 0x5b3   : > { %2503 = vmatmul.mubr.bf16.gmra.mrb[68].mxu0 %v2368_v27  ;;  %v2311_v57 = vmul.f32 %v4148_v34, %v5657_v28  ;;  %v2310_v29 = vmul.f32 %v4148_v34, %v6314_v61 }
 0x5b4   : > { %v5875_v9 = vpop.eup %4149  ;;  %2265 = vadd.xlane.f32.xlu1 %v2264_v2 }
 0x5b5   : > { %v5877_v39 = vpop.eup %4151  ;;  %v2200_v15 = vpop.xlane.xlu1 %2199 }
 0x5b6   : > { %v4154_v30 = vpop.eup %4153  ;;  %v2267_v60 = vadd.f32 %v5877_v39, %v5875_v9  ;;  %4159 = vrcp.f32 %v2200_v15 }
 0x5b7   : > { %v2313_v7 = vmul.f32 %v4154_v30, %v5666_v18  ;;  %v2312_v63 = vmul.f32 %v4154_v30, %v5659_v0  ;;  %v6316_v18 = vld [vmem:[#allocation6_spill] sm:$0xff] }
 0x5b8   : > { %2268 = vadd.xlane.f32.xlu0 %v2267_v60  ;;  %v2203_v23 = vpop.xlane.xlu0 %2202  ;;  %v4156_v16 = vpop.eup %4155 }
 0x5b9   : > { %4161 = vrcp.f32 %v2203_v23  ;;  %v2371_v21 = vpack.c.bf16 %v2313_v7, %v2311_v57  ;;  %v2370_v55 = vpack.c.bf16 %v2312_v63, %v2310_v29  ;;  %v2315_v1 = vmul.f32 %v4156_v16, %v6315_v22  ;;  %v6318_v7 = vld [vmem:[#allocation8_spill] sm:$0xff]  ;;  %v6319_v63 = vld [vmem:[#allocation7_spill] sm:$0xff] }
 0x5ba   : > { %v2314_v27 = vmul.f32 %v4156_v16, %v6317_v19  ;;  %v6321_v19 = vld [vmem:[#allocation11_spill] sm:$0xff] }
 0x5bb   : > { %v4158_v36 = vpop.eup %4157  ;;  %2510 = vmatprep.mubr.bf16.mxu0 %v2371_v21 }
 0x5bc   : > { %2511 = vmatmul.mubr.bf16.gmra.mrb[72].mxu0 %v2370_v55  ;;  %v2317_v28 = vmul.f32 %v4158_v36, %v5684_v52  ;;  %v2316_v38 = vmul.f32 %v4158_v36, %v6316_v18 }
 0x5bd   : > { %v2206_v32 = vpop.xlane.xlu1 %2205 }
 0x5be   : > { %v2373_v37 = vpack.c.bf16 %v2317_v28, %v2315_v1  ;;  %4163 = vrcp.f32 %v2206_v32  ;;  %v2372_v34 = vpack.c.bf16 %v2316_v38, %v2314_v27 }
 0x5c0   : > { %2518 = vmatprep.mubr.bf16.mxu0 %v2373_v37  ;;  %v2209_v0 = vpop.xlane.xlu0 %2208  ;;  %v4160_v2 = vpop.eup %4159  ;;  %v6320_v37 = vld [vmem:[#allocation9_spill] sm:$0xff] }
 0x5c1   : > { %4165 = vrcp.f32 %v2209_v0  ;;  %v2319_v30 = vmul.f32 %v4160_v2, %v5694_v50  ;;  %v2318_v23 = vmul.f32 %v4160_v2, %v6319_v63 }
 0x5c3   : > { %v4162_v15 = vpop.eup %4161 }
 0x5c4   : > { %2519 = vmatmul.mubr.bf16.gmra.mrb[76].mxu0 %v2372_v34  ;;  %v2321_v60 = vmul.f32 %v4162_v15, %v5702_v31  ;;  %v2320_v61 = vmul.f32 %v4162_v15, %v6318_v7 }
 0x5c5   : > { %v2212_v57 = vpop.xlane.xlu1 %2211 }
 0x5c6   : > { %4167 = vrcp.f32 %v2212_v57  ;;  %v2375_v52 = vpack.c.bf16 %v2321_v60, %v2319_v30  ;;  %v2374_v21 = vpack.c.bf16 %v2320_v61, %v2318_v23 }
 0x5c7   : > { %v2215_v29 = vpop.xlane.xlu0 %2214 }
 0x5c8   : > { %2526 = vmatprep.mubr.bf16.mxu0 %v2375_v52  ;;  %4169 = vrcp.f32 %v2215_v29  ;;  %v4164_v16 = vpop.eup %4163 }
 0x5c9   : > { %v2323_v36 = vmul.f32 %v4164_v16, %v5709_v51  ;;  %v2322_v18 = vmul.f32 %v4164_v16, %v6320_v37 }
 0x5cb   : > { %v4166_v55 = vpop.eup %4165 }
 0x5cc   : > { %2527 = vmatmul.mubr.bf16.gmra.mrb[80].mxu0 %v2374_v21  ;;  %v2325_v50 = vmul.f32 %v4166_v55, %v5716_v45  ;;  %v2324_v1 = vmul.f32 %v4166_v55, %v5711_v17  ;;  %v6322_v17 = vld [vmem:[#allocation10_spill] sm:$0xff] }
 0x5cd   : > { %v2218_v22 = vpop.xlane.xlu1 %2217 }
 0x5ce   : > { %4171 = vrcp.f32 %v2218_v22  ;;  %v2377_v31 = vpack.c.bf16 %v2325_v50, %v2323_v36  ;;  %v2376_v0 = vpack.c.bf16 %v2324_v1, %v2322_v18 }
 0x5cf   : > { %v2221_v28 = vpop.xlane.xlu0 %2220 }
 0x5d0   : > { %v4168_v32 = vpop.eup %4167  ;;  %2534 = vmatprep.mubr.bf16.mxu0 %v2377_v31  ;;  %4173 = vrcp.f32 %v2221_v28 }
 0x5d1   : > { %v2327_v27 = vmul.f32 %v4168_v32, %v6321_v19  ;;  %v2326_v30 = vmul.f32 %v4168_v32, %v6322_v17 }
 0x5d2   : > { %v4170_v38 = vpop.eup %4169 }
 0x5d3   : > { %v2329_v2 = vmul.f32 %v4170_v38, %v5729_v54  ;;  %v2328_v34 = vmul.f32 %v4170_v38, %v5725_v4 }
 0x5d4   : > { %2535 = vmatmul.mubr.bf16.gmra.mrb[84].mxu0 %v2376_v0 }
 0x5d5   : > { %v2379_v51 = vpack.c.bf16 %v2329_v2, %v2327_v27  ;;  %v2378_v52 = vpack.c.bf16 %v2328_v34, %v2326_v30 }
 0x5d6   : > { %v2224_v45 = vpop.xlane.xlu1 %2223 }
 0x5d7   : > { %2542 = vmatprep.mubr.bf16.mxu0 %v2379_v51  ;;  %4175 = vrcp.f32 %v2224_v45 }
 0x5d8   : > { %v4172_v15 = vpop.eup %4171 }
 0x5d9   : > { %v2227_v60 = vpop.xlane.xlu0 %2226  ;;  %v2331_v7 = vmul.f32 %v4172_v15, %v5739_v12  ;;  %v2330_v4 = vmul.f32 %v4172_v15, %v5737_v14 }
 0x5da   : > { %v4174_v57 = vpop.eup %4173  ;;  %4177 = vrcp.f32 %v2227_v60 }
 0x5db   : > { %v2333_v61 = vmul.f32 %v4174_v57, %v5745_v11  ;;  %v2332_v63 = vmul.f32 %v4174_v57, %v5741_v6 }
 0x5dc   : > { %2543 = vmatmul.mubr.bf16.gmra.mrb[88].mxu0 %v2378_v52 }
 0x5dd   : > { %v2381_v54 = vpack.c.bf16 %v2333_v61, %v2331_v7  ;;  %v2380_v21 = vpack.c.bf16 %v2332_v63, %v2330_v4 }
 0x5de   : > { %v2230_v29 = vpop.xlane.xlu1 %2229 }
 0x5df   : > { %2550 = vmatprep.mubr.bf16.mxu0 %v2381_v54  ;;  %4179 = vrcp.f32 %v2230_v29 }
 0x5e1   : > { %v2233_v23 = vpop.xlane.xlu0 %2232  ;;  %v4176_v16 = vpop.eup %4175 }
 0x5e2   : > { %4181 = vrcp.f32 %v2233_v23  ;;  %v2335_v36 = vmul.f32 %v4176_v16, %v5755_v25  ;;  %v2334_v6 = vmul.f32 %v4176_v16, %v5753_v40 }
 0x5e4   : > { %v4178_v55 = vpop.eup %4177  ;;  %2551 = vmatmul.mubr.bf16.gmra.mrb[92].mxu0 %v2380_v21 }
 0x5e5   : > { %v2337_v12 = vmul.f32 %v4178_v55, %v5763_v33  ;;  %v2336_v50 = vmul.f32 %v4178_v55, %v5757_v56 }
 0x5e6   : > { %v2236_v11 = vpop.xlane.xlu1 %2235 }
 0x5e7   : > { %v2383_v22 = vpack.c.bf16 %v2337_v12, %v2335_v36  ;;  %4183 = vrcp.f32 %v2236_v11  ;;  %v2382_v1 = vpack.c.bf16 %v2336_v50, %v2334_v6  ;;  %v6325_v36 = vld [vmem:[#allocation15_spill] sm:$0xff]  ;;  %v6326_v12 = vld [vmem:[#allocation14_spill] sm:$0xff]  ;;  %v6327_v11 = vld [vmem:[#allocation16_spill] sm:$0xff] }
 0x5e9   : > { %2558 = vmatprep.mubr.bf16.mxu0 %v2383_v22  ;;  %v2239_v31 = vpop.xlane.xlu0 %2238  ;;  %v4180_v14 = vpop.eup %4179 }
 0x5ea   : > { %4185 = vrcp.f32 %v2239_v31  ;;  %v2339_v32 = vmul.f32 %v4180_v14, %v5771_v49  ;;  %v2338_v38 = vmul.f32 %v4180_v14, %v5769_v41 }
 0x5ec   : > { %v4182_v28 = vpop.eup %4181  ;;  %2559 = vmatmul.mubr.bf16.gmra.mrb[96].mxu0 %v2382_v1 }
 0x5ed   : > { %v2341_v25 = vmul.f32 %v4182_v28, %v5779_v53  ;;  %v2340_v33 = vmul.f32 %v4182_v28, %v5773_v42 }
 0x5ee   : > { %v2242_v37 = vpop.xlane.xlu1 %2241 }
 0x5ef   : > { %4187 = vrcp.f32 %v2242_v37  ;;  %v2385_v56 = vpack.c.bf16 %v2341_v25, %v2339_v32  ;;  %v2384_v0 = vpack.c.bf16 %v2340_v33, %v2338_v38 }
 0x5f0   : > { %v2245_v18 = vpop.xlane.xlu0 %2244 }
 0x5f1   : > { %2566 = vmatprep.mubr.bf16.mxu0 %v2385_v56  ;;  %4189 = vrcp.f32 %v2245_v18  ;;  %v4184_v40 = vpop.eup %4183 }
 0x5f2   : > { %v2343_v27 = vmul.f32 %v4184_v40, %v5787_v46  ;;  %v2342_v42 = vmul.f32 %v4184_v40, %v5785_v26 }
 0x5f4   : > { %v4186_v19 = vpop.eup %4185  ;;  %2567 = vmatmul.mubr.bf16.gmra.mrb[100].mxu0 %v2384_v0 }
 0x5f5   : > { %v2345_v49 = vmul.f32 %v4186_v19, %v5795_v48  ;;  %v2344_v53 = vmul.f32 %v4186_v19, %v5789_v20  ;;  %v6323_v48 = vld [vmem:[#allocation13_spill] sm:$0xff]  ;;  %v6324_v20 = vld [vmem:[#allocation12_spill] sm:$0xff] }
 0x5f6   : > { %v2248_v2 = vpop.xlane.xlu1 %2247 }
 0x5f7   : > { %v2387_v51 = vpack.c.bf16 %v2345_v49, %v2343_v27  ;;  %4191 = vrcp.f32 %v2248_v2  ;;  %v2386_v34 = vpack.c.bf16 %v2344_v53, %v2342_v42 }
 0x5f9   : > { %v4188_v45 = vpop.eup %4187  ;;  %2574 = vmatprep.mubr.bf16.mxu0 %v2387_v51  ;;  %v2251_v41 = vpop.xlane.xlu0 %2250 }
 0x5fa   : > { %4193 = vrcp.f32 %v2251_v41  ;;  %v2347_v17 = vmul.f32 %v4188_v45, %v5803_v58  ;;  %v2346_v57 = vmul.f32 %v4188_v45, %v6324_v20 }
 0x5fb   : > { %v4190_v15 = vpop.eup %4189 }
 0x5fc   : > { %2575 = vmatmul.mubr.bf16.gmra.mrb[104].mxu0 %v2386_v34  ;;  %v2349_v46 = vmul.f32 %v4190_v15, %v5809_v59  ;;  %v2348_v60 = vmul.f32 %v4190_v15, %v6323_v48 }
 0x5fe   : > { %v2389_v30 = vpack.c.bf16 %v2349_v46, %v2347_v17  ;;  %v2388_v7 = vpack.c.bf16 %v2348_v60, %v2346_v57 }
 0x600   : > { %2582 = vmatprep.mubr.bf16.mxu0 %v2389_v30 }
 0x601   : > { %v4192_v52 = vpop.eup %4191 }
 0x602   : > { %v2351_v61 = vmul.f32 %v4192_v52, %v5815_v43  ;;  %v2350_v4 = vmul.f32 %v4192_v52, %v5813_v5 }
 0x604   : > { %v4194_v26 = vpop.eup %4193  ;;  %2583 = vmatmul.mubr.bf16.gmra.mrb[108].mxu0 %v2388_v7 }
 0x605   : > { %v2353_v54 = vmul.f32 %v4194_v26, %v5823_v47  ;;  %v2352_v63 = vmul.f32 %v4194_v26, %v5817_v13 }
 0x606   : > { %v2260_v29 = vpop.xlane.xlu1 %2259 }
 0x607   : > { %4195 = vrcp.f32 %v2260_v29  ;;  %v2391_v58 = vpack.c.bf16 %v2353_v54, %v2351_v61  ;;  %v2390_v23 = vpack.c.bf16 %v2352_v63, %v2350_v4 }
 0x608   : > { %v2263_v59 = vpop.xlane.xlu0 %2262 }
 0x609   : > { %2590 = vmatprep.mubr.bf16.mxu0 %v2391_v58  ;;  %4197 = vrcp.f32 %v2263_v59 }
 0x60c   : > { %2591 = vmatmul.mubr.bf16.gmra.mrb[112].mxu0 %v2390_v23 }
 0x611   : > { %v4196_v16 = vpop.eup %4195 }
 0x612   : > { %v2358_v55 = vmul.f32 %v4196_v16, %v5829_v3  ;;  %v2359_v47 = vmul.f32 %v4196_v16, %v6326_v12 }
 0x613   : > { %v4198_v21 = vpop.eup %4197 }
 0x614   : > { %v2360_v43 = vmul.f32 %v4198_v21, %v6325_v36  ;;  %v2361_v50 = vmul.f32 %v4198_v21, %v6327_v11 }
 0x616   : > { %v2395_v13 = vpack.c.bf16 %v2361_v50, %v2359_v47  ;;  %v2394_v22 = vpack.c.bf16 %v2360_v43, %v2358_v55 }
 0x618   : > { %2606 = vmatprep.mubr.bf16.mxu1 %v2395_v13 }
 0x619   : > { %2607 = vmatmul.mubr.bf16.vlgmr.msra.gmra.mrb[128].mxu1 %v2394_v22 }
 0x639   : > { %v2254_v6 = vpop.xlane.xlu1 %2253 }
 0x63a   : > { %4199 = vrcp.f32 %v2254_v6 }
 0x63c   : > { %v2257_v5 = vpop.xlane.xlu0 %2256 }
 0x63d   : > { %4201 = vrcp.f32 %v2257_v5 }
 0x641   : > { %v2266_v31 = vpop.xlane.xlu1 %2265 }
 0x642   : > { %4203 = vrcp.f32 %v2266_v31 }
 0x644   : > { %v4200_v14 = vpop.eup %4199 }
 0x645   : > { %v2269_v1 = vpop.xlane.xlu0 %2268  ;;  %v2355_v28 = vmul.f32 %v4200_v14, %v5855_v10  ;;  %v2354_v25 = vmul.f32 %v4200_v14, %v5853_v24 }
 0x646   : > { %4205 = vrcp.f32 %v2269_v1 }
 0x647   : > { %v4202_v3 = vpop.eup %4201 }
 0x648   : > { %v2357_v32 = vmul.f32 %v4202_v3, %v5861_v35  ;;  %v2356_v37 = vmul.f32 %v4202_v3, %v5859_v44 }
 0x64a   : > { %v2393_v33 = vpack.c.bf16 %v2357_v32, %v2355_v28  ;;  %v2392_v56 = vpack.c.bf16 %v2356_v37, %v2354_v25 }
 0x64c   : > { %2598 = vmatprep.mubr.bf16.mxu0 %v2393_v33  ;;  %v4204_v18 = vpop.eup %4203 }
 0x64d   : > { %2599 = vmatmul.mubr.bf16.gmra.mrb[116].mxu0 %v2392_v56  ;;  %v2363_v40 = vmul.f32 %v4204_v18, %v5871_v8  ;;  %v2362_v19 = vmul.f32 %v4204_v18, %v5869_v62 }
 0x650   : > { %v4206_v38 = vpop.eup %4205 }
 0x651   : > { %v2365_v0 = vmul.f32 %v4206_v38, %v5877_v39  ;;  %v2364_v10 = vmul.f32 %v4206_v38, %v5875_v9 }
 0x653   : > { %v2397_v27 = vpack.c.bf16 %v2365_v0, %v2363_v40  ;;  %v2396_v35 = vpack.c.bf16 %v2364_v10, %v2362_v19 }
 0x655   : > { %2614 = vmatprep.mubr.bf16.mxu1 %v2397_v27 }
 0x656   : > { %2615 = vmatmul.mubr.bf16.gmra.mrb[132].mxu1 %v2396_v35 }
 0x67c   : > { %v3555_v24 = vpop.f32.mrb[64].mxu0 }
 0x67d   : > { %v3556_v44 = vpop.f32.mrb[65].mxu0 }
 0x67e   : > { %v3557_v49 = vadd.f32 %v3556_v44, %v3555_v24  ;;  %v3558_v2 = vpop.f32.mrb[66].mxu0 }
 0x67f   : > { %v3559_v53 = vpop.f32.mrb[67].mxu0 }
 0x680   : > { %v3560_v51 = vadd.f32 %v3559_v53, %v3558_v2 }
 0x682   : > { %v3695_v42 = vpack.i.bf16 %v3560_v51, %v3557_v49 }
 0x684   : > { %3696 = vrot.lane.b32.xlu1 %v3695_v42, %s4232_s13 }
 0x686   : > { %v3561_v8 = vpop.f32.mrb[68].mxu0 }
 0x687   : > { %v3562_v45 = vpop.f32.mrb[69].mxu0 }
 0x688   : > { %v3563_v39 = vadd.f32 %v3562_v45, %v3561_v8  ;;  %v3564_v41 = vpop.f32.mrb[70].mxu0 }
 0x689   : > { %v3565_v62 = vpop.f32.mrb[71].mxu0 }
 0x68a   : > { %v3566_v34 = vadd.f32 %v3565_v62, %v3564_v41 }
 0x68c   : > { %v3700_v9 = vpack.i.bf16 %v3566_v34, %v3563_v39 }
 0x68e   : > { %3701 = vrot.lane.b32.xlu0 %v3700_v9, %s4232_s13 }
 0x68f   : > { %v3567_v15 = vpop.f32.mrb[72].mxu0 }
 0x690   : > { %v3568_v17 = vpop.f32.mrb[73].mxu0 }
 0x691   : > { %v3569_v46 = vadd.f32 %v3568_v17, %v3567_v15  ;;  %v3570_v30 = vpop.f32.mrb[74].mxu0 }
 0x692   : > { %v3571_v48 = vpop.f32.mrb[75].mxu0 }
 0x693   : > { %v3572_v60 = vadd.f32 %v3571_v48, %v3570_v30 }
 0x695   : > { %v3705_v20 = vpack.i.bf16 %v3572_v60, %v3569_v46 }
 0x697   : > { %3706 = vrot.lane.b32.xlu1 %v3705_v20, %s4232_s13  ;;  %v3573_v57 = vpop.f32.mrb[76].mxu0 }
 0x698   : > { %v3574_v52 = vpop.f32.mrb[77].mxu0 }
 0x699   : > { %v3575_v7 = vadd.f32 %v3574_v52, %v3573_v57  ;;  %v3576_v26 = vpop.f32.mrb[78].mxu0 }
 0x69a   : > { %v3577_v61 = vpop.f32.mrb[79].mxu0 }
 0x69b   : > { %v3578_v54 = vadd.f32 %v3577_v61, %v3576_v26 }
 0x69d   : > { %v3710_v29 = vpack.i.bf16 %v3578_v54, %v3575_v7 }
 0x69f   : > { %3711 = vrot.lane.b32.xlu1 %v3710_v29, %s4232_s13  ;;  %v3579_v63 = vpop.f32.mrb[80].mxu0 }
 0x6a0   : > { %v3580_v58 = vpop.f32.mrb[81].mxu0 }
 0x6a1   : > { %v3581_v59 = vadd.f32 %v3580_v58, %v3579_v63  ;;  %v3582_v4 = vpop.f32.mrb[82].mxu0 }
 0x6a2   : > { %v3583_v23 = vpop.f32.mrb[83].mxu0 }
 0x6a3   : > { %v3584_v16 = vadd.f32 %v3583_v23, %v3582_v4 }
 0x6a5   : > { %v3715_v21 = vpack.i.bf16 %v3584_v16, %v3581_v59 }
 0x6a7   : > { %3716 = vrot.lane.b32.xlu0 %v3715_v21, %s4232_s13  ;;  %v3585_v55 = vpop.f32.mrb[84].mxu0 }
 0x6a8   : > { %v3586_v36 = vpop.f32.mrb[85].mxu0 }
 0x6a9   : > { %v3587_v43 = vadd.f32 %v3586_v36, %v3585_v55  ;;  %v3588_v12 = vpop.f32.mrb[86].mxu0  ;;  %v6328_v55 = vld [vmem:[#allocation2_spill] sm:$0xff] }
 0x6aa   : > { %v3589_v47 = vpop.f32.mrb[87].mxu0  ;;  %vm250_vm14 = vcmp.gt.s32.totalorder %v6328_v55, 0 }
 0x6ab   : > { %v3590_v11 = vadd.f32 %v3589_v47, %v3588_v12  ;;  %v6329_v12 = vld [vmem:[#allocation38_spill] sm:$0xff] }
 0x6ad   : > { %v3720_v50 = vpack.i.bf16 %v3590_v11, %v3587_v43  ;;  %v6330_v11 = vld [vmem:[#allocation37_spill] sm:$0xff] }
 0x6af   : > { %3721 = vrot.lane.b32.xlu1 %v3720_v50, %s4232_s13  ;;  %v3591_v13 = vpop.f32.mrb[88].mxu0 }
 0x6b0   : > { %v3592_v22 = vpop.f32.mrb[89].mxu0 }
 0x6b1   : > { %v3593_v6 = vadd.f32 %v3592_v22, %v3591_v13  ;;  %v3594_v5 = vpop.f32.mrb[90].mxu0 }
 0x6b2   : > { %v3595_v31 = vpop.f32.mrb[91].mxu0 }
 0x6b3   : > { %v3596_v14 = vadd.f32 %v3595_v31, %v3594_v5 }
 0x6b5   : > { %v3725_v1 = vpack.i.bf16 %v3596_v14, %v3593_v6  ;;  %v6331_v14 = vld [vmem:[#allocation40_spill] sm:$0xff] }
 0x6b7   : > { %3726 = vrot.lane.b32.xlu0 %v3725_v1, %s4232_s13  ;;  %v3597_v3 = vpop.f32.mrb[92].mxu0 }
 0x6b8   : > { %v3598_v28 = vpop.f32.mrb[93].mxu0 }
 0x6b9   : > { %v3599_v32 = vadd.f32 %v3598_v28, %v3597_v3  ;;  %v3600_v25 = vpop.f32.mrb[94].mxu0  ;;  %v6332_v3 = vld [vmem:[#allocation36_spill] sm:$0xff] }
 0x6ba   : > { %v3601_v37 = vpop.f32.mrb[95].mxu0 }
 0x6bb   : > { %v3602_v33 = vadd.f32 %v3601_v37, %v3600_v25 }
 0x6bd   : > { %v3730_v56 = vpack.i.bf16 %v3602_v33, %v3599_v32 }
 0x6bf   : > { %3731 = vrot.lane.b32.xlu1 %v3730_v56, %s4232_s13  ;;  %v3603_v18 = vpop.f32.mrb[96].mxu0  ;;  %v6333_v56 = vld [vmem:[#allocation42_spill] sm:$0xff] }
 0x6c0   : > { %v3604_v38 = vpop.f32.mrb[97].mxu0 }
 0x6c1   : > { %v3605_v40 = vadd.f32 %v3604_v38, %v3603_v18  ;;  %v3606_v0 = vpop.f32.mrb[98].mxu0  ;;  %v6334_v38 = vld [vmem:[#allocation39_spill] sm:$0xff] }
 0x6c2   : > { %v3607_v19 = vpop.f32.mrb[99].mxu0 }
 0x6c3   : > { %v3608_v10 = vadd.f32 %v3607_v19, %v3606_v0 }
 0x6c5   : > { %v3735_v27 = vpack.i.bf16 %v3608_v10, %v3605_v40 }
 0x6c7   : > { %3736 = vrot.lane.b32.xlu0 %v3735_v27, %s4232_s13  ;;  %v3609_v35 = vpop.f32.mrb[100].mxu0 }
 0x6c8   : > { %v3610_v24 = vpop.f32.mrb[101].mxu0 }
 0x6c9   : > { %v3611_v44 = vadd.f32 %v3610_v24, %v3609_v35  ;;  %v3612_v49 = vpop.f32.mrb[102].mxu0  ;;  %v6335_v35 = vld [vmem:[#allocation46_spill] sm:$0xff] }
 0x6ca   : > { %v3613_v2 = vpop.f32.mrb[103].mxu0 }
 0x6cb   : > { %v3614_v53 = vadd.f32 %v3613_v2, %v3612_v49 }
 0x6cd   : > { %v3740_v51 = vpack.i.bf16 %v3614_v53, %v3611_v44  ;;  %v6336_v44 = vld [vmem:[#allocation48_spill] sm:$0xff] }
 0x6cf   : > { %3741 = vrot.lane.b32.xlu1 %v3740_v51, %s4232_s13  ;;  %v3615_v42 = vpop.f32.mrb[104].mxu0 }
 0x6d0   : > { %v3616_v8 = vpop.f32.mrb[105].mxu0 }
 0x6d1   : > { %v3617_v45 = vadd.f32 %v3616_v8, %v3615_v42  ;;  %v3618_v39 = vpop.f32.mrb[106].mxu0  ;;  %v6337_v8 = vld [vmem:[#allocation41_spill] sm:$0xff] }
 0x6d2   : > { %v3619_v41 = vpop.f32.mrb[107].mxu0 }
 0x6d3   : > { %v3620_v62 = vadd.f32 %v3619_v41, %v3618_v39  ;;  %v6338_v39 = vld [vmem:[#allocation47_spill] sm:$0xff] }
 0x6d5   : > { %v3745_v34 = vpack.i.bf16 %v3620_v62, %v3617_v45 }
 0x6d7   : > { %3746 = vrot.lane.b32.xlu0 %v3745_v34, %s4232_s13  ;;  %v3621_v9 = vpop.f32.mrb[108].mxu0 }
 0x6d8   : > { %v3622_v15 = vpop.f32.mrb[109].mxu0 }
 0x6d9   : > { %v3623_v17 = vadd.f32 %v3622_v15, %v3621_v9  ;;  %v3624_v46 = vpop.f32.mrb[110].mxu0 }
 0x6da   : > { %v3625_v30 = vpop.f32.mrb[111].mxu0 }
 0x6db   : > { %v3626_v48 = vadd.f32 %v3625_v30, %v3624_v46 }
 0x6dd   : > { %v3750_v60 = vpack.i.bf16 %v3626_v48, %v3623_v17 }
 0x6df   : > { %3751 = vrot.lane.b32.xlu1 %v3750_v60, %s4232_s13  ;;  %v3627_v20 = vpop.f32.mrb[112].mxu0 }
 0x6e0   : > { %v3628_v57 = vpop.f32.mrb[113].mxu0 }
 0x6e1   : > { %v3629_v52 = vadd.f32 %v3628_v57, %v3627_v20  ;;  %v3630_v7 = vpop.f32.mrb[114].mxu0  ;;  %v6339_v20 = vld [vmem:[#allocation50_spill] sm:$0xff] }
 0x6e2   : > { %v3631_v26 = vpop.f32.mrb[115].mxu0 }
 0x6e3   : > { %v3632_v61 = vadd.f32 %v3631_v26, %v3630_v7 }
 0x6e5   : > { %v3755_v54 = vpack.i.bf16 %v3632_v61, %v3629_v52  ;;  %v6340_v52 = vld [vmem:[#allocation44_spill] sm:$0xff] }
 0x6e7   : > { %3756 = vrot.lane.b32.xlu0 %v3755_v54, %s4232_s13 }
 0x6ec   : > { %v3639_v29 = vpop.f32.mrb[128].mxu1 }
 0x6ed   : > { %v3640_v63 = vpop.f32.mrb[129].mxu1 }
 0x6ee   : > { %v3641_v58 = vadd.f32 %v3640_v63, %v3639_v29  ;;  %v3642_v59 = vpop.f32.mrb[130].mxu1 }
 0x6ef   : > { %v3643_v4 = vpop.f32.mrb[131].mxu1 }
 0x6f0   : > { %v3644_v23 = vadd.f32 %v3643_v4, %v3642_v59 }
 0x6f2   : > { %v3765_v16 = vpack.i.bf16 %v3644_v23, %v3641_v58 }
 0x6f4   : > { %3766 = vrot.lane.b32.xlu0 %v3765_v16, %s4232_s13 }
 0x6f6   : > { %v3697_v21 = vpop.permute.xlu1 %3696 }
 0x6f7   : > { %v3699_v36 = vunpack.i.h.bf16 %v3697_v21  ;;  %v3698_v43 = vunpack.i.l.bf16 %v3697_v21  ;;  %v6341_v21 = vld [vmem:[#allocation49_spill] sm:$0xff] }
 0x6f9   : > { %v2753_v47 = vsel %vm2751_vm13, %v6329_v12, %v3699_v36  ;;  %v2752_v50 = vsel %vm2751_vm13, %v6330_v11, %v3698_v43  ;;  %v6342_v36 = vld [vmem:[#allocation52_spill] sm:$0xff] }
 0x6fa   : > { %v2848_v13 = vsel %vm250_vm14, %v2752_v50, 0.0 }
 0x6fb   : > { %v3239_v22 = vpack.c.bf16 %v2753_v47, %v2848_v13 }
 0x6fd   : > { %3240 = vst [vmem:[%s5960_s19] sm:$0xff] %v3239_v22  }
 0x700   : > { %v3702_v6 = vpop.permute.xlu0 %3701 }
 0x701   : > { %v3704_v5 = vunpack.i.h.bf16 %v3702_v6  ;;  %v3703_v31 = vunpack.i.l.bf16 %v3702_v6 }
 0x703   : > { %v2755_v1 = vsel %vm2751_vm13, %v6331_v14, %v3704_v5  ;;  %v2754_v28 = vsel %vm2751_vm13, %v6332_v3, %v3703_v31  ;;  %v6343_v5 = vld [vmem:[#allocation43_spill] sm:$0xff] }
 0x704   : > { %v3244_v32 = vpack.c.bf16 %v2755_v1, %v2754_v28  ;;  %v6344_v14 = vld [vmem:[#allocation51_spill] sm:$0xff] }
 0x706   : > { %3316 = vst [vmem:[%s5960_s19 + $0x8] sm:$0xff] %v3244_v32  }
 0x709   : > { %v3707_v25 = vpop.permute.xlu1 %3706 }
 0x70a   : > { %v3709_v37 = vunpack.i.h.bf16 %v3707_v25  ;;  %v3708_v33 = vunpack.i.l.bf16 %v3707_v25 }
 0x70c   : > { %v2757_v18 = vsel %vm2751_vm13, %v6333_v56, %v3709_v37  ;;  %v2756_v40 = vsel %vm2751_vm13, %v6334_v38, %v3708_v33  ;;  %v6345_v37 = vld [vmem:[#allocation57_spill] sm:$0xff] }
 0x70d   : > { %v3249_v0 = vpack.c.bf16 %v2757_v18, %v2756_v40  ;;  %v6346_v56 = vld [vmem:[#allocation45_spill] sm:$0xff] }
 0x70f   : > { %3317 = vst [vmem:[%s5960_s19 + $0x10] sm:$0xff] %v3249_v0  }
 0x711   : > { %v3712_v19 = vpop.permute.xlu1 %3711 }
 0x712   : > { %v3714_v10 = vunpack.i.h.bf16 %v3712_v19  ;;  %v3713_v27 = vunpack.i.l.bf16 %v3712_v19 }
 0x714   : > { %v2759_v24 = vsel %vm2751_vm13, %v6335_v35, %v3714_v10  ;;  %v2758_v49 = vsel %vm2751_vm13, %v6336_v44, %v3713_v27  ;;  %v6347_v10 = vld [vmem:[#allocation55_spill] sm:$0xff]  ;;  %v6348_v35 = vld [vmem:[#allocation53_spill] sm:$0xff] }
 0x715   : > { %v3254_v2 = vpack.c.bf16 %v2759_v24, %v2758_v49 }
 0x717   : > { %3318 = vst [vmem:[%s5960_s19 + $0x18] sm:$0xff] %v3254_v2  }
 0x719   : > { %v3717_v53 = vpop.permute.xlu0 %3716 }
 0x71a   : > { %v3719_v51 = vunpack.i.h.bf16 %v3717_v53  ;;  %v3718_v42 = vunpack.i.l.bf16 %v3717_v53 }
 0x71c   : > { %v2761_v45 = vsel %vm2751_vm13, %v6337_v8, %v3719_v51  ;;  %v2760_v41 = vsel %vm2751_vm13, %v6338_v39, %v3718_v42  ;;  %v6349_v51 = vld [vmem:[#allocation61_spill] sm:$0xff]  ;;  %v6350_v8 = vld [vmem:[#allocation56_spill] sm:$0xff] }
 0x71d   : > { %v3259_v62 = vpack.c.bf16 %v2761_v45, %v2760_v41 }
 0x71f   : > { %3319 = vst [vmem:[%s5960_s19 + $0x20] sm:$0xff] %v3259_v62  }
 0x720   : > { %v3633_v34 = vpop.f32.mrb[116].mxu0 }
 0x721   : > { %v3722_v9 = vpop.permute.xlu1 %3721  ;;  %v3634_v15 = vpop.f32.mrb[117].mxu0 }
 0x722   : > { %v3724_v17 = vunpack.i.h.bf16 %v3722_v9  ;;  %v3723_v46 = vunpack.i.l.bf16 %v3722_v9  ;;  %v3635_v30 = vadd.f32 %v3634_v15, %v3633_v34  ;;  %v3636_v48 = vpop.f32.mrb[118].mxu0  ;;  %v6351_v9 = vld [vmem:[#allocation59_spill] sm:$0xff] }
 0x723   : > { %v3637_v60 = vpop.f32.mrb[119].mxu0 }
 0x724   : > { %v2763_v57 = vsel %vm2751_vm13, %v6339_v20, %v3724_v17  ;;  %v2762_v7 = vsel %vm2751_vm13, %v6340_v52, %v3723_v46  ;;  %v3638_v26 = vadd.f32 %v3637_v60, %v3636_v48  ;;  %v6352_v17 = vld [vmem:[#allocation54_spill] sm:$0xff] }
 0x725   : > { %v3264_v61 = vpack.c.bf16 %v2763_v57, %v2762_v7  ;;  %v6353_v57 = vld [vmem:[#allocation58_spill] sm:$0xff]  ;;  %v6354_v7 = vld [vmem:[#allocation60_spill] sm:$0xff] }
 0x726   : > { %v3760_v54 = vpack.i.bf16 %v3638_v26, %v3635_v30 }
 0x727   : > { %3320 = vst [vmem:[%s5960_s19 + $0x28] sm:$0xff] %v3264_v61  }
 0x728   : > { %3761 = vrot.lane.b32.xlu1 %v3760_v54, %s4232_s13 }
 0x729   : > { %v3727_v29 = vpop.permute.xlu0 %3726  ;;  %v3645_v63 = vpop.f32.mrb[132].mxu1 }
 0x72a   : > { %v3729_v58 = vunpack.i.h.bf16 %v3727_v29  ;;  %v3728_v59 = vunpack.i.l.bf16 %v3727_v29  ;;  %v3646_v4 = vpop.f32.mrb[133].mxu1 }
 0x72b   : > { %v3647_v23 = vadd.f32 %v3646_v4, %v3645_v63  ;;  %v3648_v16 = vpop.f32.mrb[134].mxu1  ;;  %v6356_v4 = vld [vmem:[#allocation64_spill] sm:$0xff] }
 0x72c   : > { %v2765_v55 = vsel %vm2751_vm13, %v6341_v21, %v3729_v58  ;;  %v2764_v43 = vsel %vm2751_vm13, %v6342_v36, %v3728_v59  ;;  %v3649_v12 = vpop.f32.mrb[135].mxu1  ;;  %v6355_v58 = vld [vmem:[#allocation65_spill] sm:$0xff] }
 0x72d   : > { %v3269_v47 = vpack.c.bf16 %v2765_v55, %v2764_v43  ;;  %v3650_v11 = vadd.f32 %v3649_v12, %v3648_v16  ;;  %v6357_v43 = vld [vmem:[#allocation63_spill] sm:$0xff] }
 0x72f   : > { %3321 = vst [vmem:[%s5960_s19 + $0x30] sm:$0xff] %v3269_v47   ;;  %v3770_v50 = vpack.i.bf16 %v3650_v11, %v3647_v23  ;;  %v6358_v47 = vld [vmem:[#allocation62_spill] sm:$0xff] }
 0x731   : > { %v3732_v13 = vpop.permute.xlu1 %3731  ;;  %3771 = vrot.lane.b32.xlu1 %v3770_v50, %s4232_s13 }
 0x732   : > { %v3734_v22 = vunpack.i.h.bf16 %v3732_v13  ;;  %v3733_v6 = vunpack.i.l.bf16 %v3732_v13 }
 0x734   : > { %v2767_v31 = vsel %vm2751_vm13, %v6343_v5, %v3734_v22  ;;  %v2766_v1 = vsel %vm2751_vm13, %v6344_v14, %v3733_v6  ;;  %v6359_v5 = vld [vmem:[#allocation67_spill] sm:$0xff]  ;;  %v6360_v14 = vld [vmem:[#allocation66_spill] sm:$0xff] }
 0x735   : > { %v3274_v3 = vpack.c.bf16 %v2767_v31, %v2766_v1 }
 0x737   : > { %3322 = vst [vmem:[%s5960_s19 + $0x38] sm:$0xff] %v3274_v3  }
 0x739   : > { %v3737_v28 = vpop.permute.xlu0 %3736 }
 0x73a   : > { %v3739_v32 = vunpack.i.h.bf16 %v3737_v28  ;;  %v3738_v25 = vunpack.i.l.bf16 %v3737_v28 }
 0x73c   : > { %v2769_v33 = vsel %vm2751_vm13, %v6345_v37, %v3739_v32  ;;  %v2768_v18 = vsel %vm2751_vm13, %v6346_v56, %v3738_v25 }
 0x73d   : > { %v3279_v38 = vpack.c.bf16 %v2769_v33, %v2768_v18 }
 0x73f   : > { %3323 = vst [vmem:[%s5960_s19 + $0x40] sm:$0xff] %v3279_v38  }
 0x741   : > { %v3742_v40 = vpop.permute.xlu1 %3741 }
 0x742   : > { %v3744_v0 = vunpack.i.h.bf16 %v3742_v40  ;;  %v3743_v19 = vunpack.i.l.bf16 %v3742_v40 }
 0x744   : > { %v2771_v27 = vsel %vm2751_vm13, %v6347_v10, %v3744_v0  ;;  %v2770_v24 = vsel %vm2751_vm13, %v6348_v35, %v3743_v19 }
 0x745   : > { %v3284_v44 = vpack.c.bf16 %v2771_v27, %v2770_v24 }
 0x747   : > { %3324 = vst [vmem:[%s5960_s19 + $0x48] sm:$0xff] %v3284_v44  }
 0x749   : > { %v3747_v49 = vpop.permute.xlu0 %3746 }
 0x74a   : > { %v3749_v2 = vunpack.i.h.bf16 %v3747_v49  ;;  %v3748_v53 = vunpack.i.l.bf16 %v3747_v49 }
 0x74c   : > { %v2773_v42 = vsel %vm2751_vm13, %v6349_v51, %v3749_v2  ;;  %v2772_v45 = vsel %vm2751_vm13, %v6350_v8, %v3748_v53 }
 0x74d   : > { %v3289_v39 = vpack.c.bf16 %v2773_v42, %v2772_v45 }
 0x74f   : > { %3325 = vst [vmem:[%s5960_s19 + $0x50] sm:$0xff] %v3289_v39  }
 0x751   : > { %v3752_v41 = vpop.permute.xlu1 %3751 }
 0x752   : > { %v3754_v62 = vunpack.i.h.bf16 %v3752_v41  ;;  %v3753_v34 = vunpack.i.l.bf16 %v3752_v41 }
 0x754   : > { %v2775_v15 = vsel %vm2751_vm13, %v6351_v9, %v3754_v62  ;;  %v2774_v46 = vsel %vm2751_vm13, %v6352_v17, %v3753_v34 }
 0x755   : > { %v3294_v30 = vpack.c.bf16 %v2775_v15, %v2774_v46 }
 0x757   : > { %3326 = vst [vmem:[%s5960_s19 + $0x58] sm:$0xff] %v3294_v30  }
 0x759   : > { %v3757_v48 = vpop.permute.xlu0 %3756 }
 0x75a   : > { %v3759_v60 = vunpack.i.h.bf16 %v3757_v48  ;;  %v3758_v20 = vunpack.i.l.bf16 %v3757_v48 }
 0x75c   : > { %v2777_v52 = vsel %vm2751_vm13, %v6353_v57, %v3759_v60  ;;  %v2776_v26 = vsel %vm2751_vm13, %v6354_v7, %v3758_v20 }
 0x75d   : > { %v3299_v61 = vpack.c.bf16 %v2777_v52, %v2776_v26 }
 0x75f   : > { %3327 = vst [vmem:[%s5960_s19 + $0x60] sm:$0xff] %v3299_v61  }
 0x766   : > { %v3767_v54 = vpop.permute.xlu0 %3766 }
 0x767   : > { %v3769_v29 = vunpack.i.h.bf16 %v3767_v54  ;;  %v3768_v63 = vunpack.i.l.bf16 %v3767_v54 }
 0x769   : > { %v2781_v59 = vsel %vm2751_vm13, %v6355_v58, %v3769_v29  ;;  %v2780_v23 = vsel %vm2751_vm13, %v6356_v4, %v3768_v63 }
 0x76a   : > { %v3309_v16 = vpack.c.bf16 %v2781_v59, %v2780_v23 }
 0x76c   : > { %3329 = vst [vmem:[%s5960_s19 + $0x70] sm:$0xff] %v3309_v16  }
 0x79a   : > { %v3762_v21 = vpop.permute.xlu1 %3761 }
 0x79b   : > { %v3764_v55 = vunpack.i.h.bf16 %v3762_v21  ;;  %v3763_v36 = vunpack.i.l.bf16 %v3762_v21 }
 0x79d   : > { %v2779_v12 = vsel %vm2751_vm13, %v6357_v43, %v3764_v55  ;;  %v2778_v11 = vsel %vm2751_vm13, %v6358_v47, %v3763_v36 }
 0x79e   : > { %v3304_v50 = vpack.c.bf16 %v2779_v12, %v2778_v11 }
 0x7a0   : > { %3328 = vst [vmem:[%s5960_s19 + $0x68] sm:$0xff] %v3304_v50  }
 0x7a3   : > { %v3772_v13 = vpop.permute.xlu1 %3771 }
 0x7a4   : > { %v3774_v22 = vunpack.i.h.bf16 %v3772_v13  ;;  %v3773_v6 = vunpack.i.l.bf16 %v3772_v13 }
 0x7a6   : > { %v2783_v31 = vsel %vm2751_vm13, %v6359_v5, %v3774_v22  ;;  %v2782_v1 = vsel %vm2751_vm13, %v6360_v14, %v3773_v6 }
 0x7a7   : > { %v3314_v3 = vpack.c.bf16 %v2783_v31, %v2782_v1 }
 0x7a9   : > { %3330 = vst [vmem:[%s5960_s19 + $0x78] sm:$0xff] %v3314_v3  }
 0x7aa PF: > { %s11_s6 = sadd.s32 1, %s4229_s6  }
 0x7ab   : > { %p8_p4 = scmp.ge.s32.totalorder %s11_s6, 4  }
 0x7ad   :  { %10 = sbr.rel (!%p8_p4) target bundleno = 1 (0x1), region = 54 }

</bundles_post_ra>
